<compile_context>
chip_gen: v7x
topology: tpu7x:2x2x1
jax: 0.10.0
libtpu: 0.0.40
codegen_flags: <defaults>
</compile_context>

<pallas_src>
import functools

import jax
import jax.numpy as jnp
from jax import lax
from jax.experimental import pallas as pl
from jax.experimental.pallas import tpu as pltpu

LANES = 128            # TPU lane width: outputs padded to this for lane-dense stores
EPS = 1e-5             # torch.nn.InstanceNorm2d default
N_RESIDUAL = 6         # the shared ResidualBlock is applied 6 times
COMPUTE_DTYPE = jnp.float32   # set to jnp.bfloat16 for max MXU throughput


# ------------------------------ Pallas kernels ------------------------------
def _conv_in_relu_kernel(x_ref, w_ref, b_ref, o_ref, *, eps, relu):
    """One conv layer for one batch element, fully fused in VMEM:
       (M, K) patches @ (K, CP) weight + bias -> InstanceNorm over M -> ReLU."""
    a = x_ref[...]                                             # (M, K)
    acc = jnp.dot(a, w_ref[...], preferred_element_type=jnp.float32)
    acc = acc + b_ref[...]                                     # (M, CP)
    mean = jnp.mean(acc, axis=0, keepdims=True)                # per-channel over HW
    cen = acc - mean
    var = jnp.mean(cen * cen, axis=0, keepdims=True)           # biased, as torch
    y = cen * lax.rsqrt(var + eps)
    if relu:
        y = jnp.maximum(y, 0.0)
    o_ref[...] = y                                             # lane-dense (M, 128k)


def _residual_stack_kernel(x_ref, w1_ref, b1_ref, w2_ref, b2_ref, o_ref, *,
                           eps, iters):
    """`iters` applications of the weight-shared ResidualBlock
       x <- x + IN(relu(IN(x @ W1 + b1)) @ W2 + b2), kept resident in VMEM."""
    x = x_ref[...]                                             # (M, CP)
    w1 = w1_ref[...]
    b1 = b1_ref[...]
    w2 = w2_ref[...]
    b2 = b2_ref[...]

    def inorm(v):
        m = jnp.mean(v, axis=0, keepdims=True)
        c = v - m
        var = jnp.mean(c * c, axis=0, keepdims=True)
        return c * lax.rsqrt(var + eps)

    for _ in range(iters):                                     # static unroll (6)
        h = jnp.maximum(
            inorm(jnp.dot(x, w1, preferred_element_type=jnp.float32) + b1), 0.0)
        x = x + inorm(jnp.dot(h, w2, preferred_element_type=jnp.float32) + b2)
    o_ref[...] = x


# ------------------------------ kernel wrappers ------------------------------
def _pad_lanes(m, cp):
    """Zero-pad the last dim up to `cp`.  Zero weight/bias lanes stay exactly
    zero through matmul / InstanceNorm / ReLU, so padding is semantically inert."""
    return jnp.pad(m, [(0, 0)] * (m.ndim - 1) + [(0, cp - m.shape[-1])])


def fused_conv_in_relu(patches, w2, b, *, relu=True, eps=EPS):
    """patches: (N, M, K); w2: (K, Cout); b: (Cout,)
       -> (N, M, CP) float32, CP = Cout rounded up to 128 (lane-dense output)."""
    N, M, K = patches.shape
    cout = w2.shape[1]
    cp = ((cout + LANES - 1) // LANES) * LANES
    w_p = _pad_lanes(w2.astype(COMPUTE_DTYPE), cp)                      # (K, CP)
    b_p = _pad_lanes(b.astype(jnp.float32).reshape(1, cout), cp)        # (1, CP)
    return pl.pallas_call(
        functools.partial(_conv_in_relu_kernel, eps=eps, relu=relu),
        out_shape=jax.ShapeDtypeStruct((N, M, cp), jnp.float32),
        grid=(N,),                                # >= 2 programs -> both v7x cores busy
        in_specs=[
            pl.BlockSpec((None, M, K), lambda n: (n, 0, 0)),
            pl.BlockSpec((K, cp), lambda n: (0, 0)),     # weight stays VMEM-resident
            pl.BlockSpec((1, cp), lambda n: (0, 0)),
        ],
        out_specs=pl.BlockSpec((None, M, cp), lambda n: (n, 0, 0)),
        compiler_params=pltpu.CompilerParams(dimension_semantics=("parallel",)),
    )(patches.astype(COMPUTE_DTYPE), w_p, b_p)


def residual_stack(x_pad, w1_2d, b1, w2_2d, b2, *, iters=N_RESIDUAL, eps=EPS):
    """x_pad: (N, M, CP) lane-padded activations; w*_2d: (C, C) 1x1-conv weights."""
    N, M, cp = x_pad.shape
    c = w1_2d.shape[0]

    def pad_w(w):     # (C, C) -> (CP, CP): zero rows (padded in-ch) / cols (out-ch)
        return jnp.pad(w.astype(COMPUTE_DTYPE), ((0, cp - c), (0, cp - c)))

    def pad_b(bias):
        return _pad_lanes(bias.astype(jnp.float32).reshape(1, c), cp)

    return pl.pallas_call(
        functools.partial(_residual_stack_kernel, eps=eps, iters=iters),
        out_shape=jax.ShapeDtypeStruct((N, M, cp), jnp.float32),
        grid=(N,),
        in_specs=[
            pl.BlockSpec((None, M, cp), lambda n: (n, 0, 0)),
            pl.BlockSpec((cp, cp), lambda n: (0, 0)),
            pl.BlockSpec((1, cp), lambda n: (0, 0)),
            pl.BlockSpec((cp, cp), lambda n: (0, 0)),
            pl.BlockSpec((1, cp), lambda n: (0, 0)),
        ],
        out_specs=pl.BlockSpec((None, M, cp), lambda n: (n, 0, 0)),
        compiler_params=pltpu.CompilerParams(dimension_semantics=("parallel",)),
    )(x_pad.astype(COMPUTE_DTYPE), pad_w(w1_2d), pad_b(b1), pad_w(w2_2d), pad_b(b2))


# --------------------------------- JAX glue ----------------------------------
# TODO(synk): patch extraction (im2col / transposed-conv zero-dilation) remains
# thin XLA glue; fusing it into the kernel would need manual strided DMAs.
def _im2col(x, k, s):
    """x: (N, H, W, C) -> patches (N, Ho*Wo, k*k*C) with (kh, kw, c) row order."""
    N, H, W, C = x.shape
    Ho = (H - k) // s + 1
    Wo = (W - k) // s + 1
    cols = []
    for i in range(k):
        for j in range(k):
            cols.append(x[:, i:i + s * (Ho - 1) + 1:s, j:j + s * (Wo - 1) + 1:s, :])
    patches = jnp.stack(cols, axis=3)                          # (N, Ho, Wo, k*k, C)
    return patches.reshape(N, Ho * Wo, k * k * C), Ho, Wo


def _weight_matrix(w_oihw):
    """(Cout, Cin, kh, kw) -> (kh*kw*Cin, Cout), matching _im2col row order."""
    cout, cin, kh, kw = w_oihw.shape
    return jnp.transpose(w_oihw, (2, 3, 1, 0)).reshape(kh * kw * cin, cout)


def generator_forward(params, x_nchw):
    x = jnp.transpose(x_nchw, (0, 2, 3, 1)).astype(jnp.float32)        # NHWC
    N = x.shape[0]

    def conv_block(x_nhwc, w_oihw, b, *, k, s):
        patches, Ho, Wo = _im2col(x_nhwc, k, s)
        y_pad = fused_conv_in_relu(patches, _weight_matrix(w_oihw), b)
        cout = w_oihw.shape[0]
        return y_pad[:, :, :cout].reshape(N, Ho, Wo, cout), y_pad

    def tconv_block(x_nhwc, w_iohw, b, *, k, s):
        # ConvTranspose2d(k, stride=s, pad=0) == zero-dilate by s, edge-pad by
        # k-1, then a stride-1 conv with the flipped, (in,out)-swapped kernel.
        cout = w_iohw.shape[1]
        x_dp = lax.pad(x_nhwc, jnp.array(0.0, x_nhwc.dtype),
                       ((0, 0, 0), (k - 1, k - 1, s - 1),
                        (k - 1, k - 1, s - 1), (0, 0, 0)))
        patches, Ho, Wo = _im2col(x_dp, k, 1)
        w_conv = jnp.flip(jnp.transpose(w_iohw, (1, 0, 2, 3)), axis=(2, 3))
        y_pad = fused_conv_in_relu(patches, _weight_matrix(w_conv), b)
        return y_pad[:, :, :cout].reshape(N, Ho, Wo, cout)

    # ---- down path: Conv2d(3, stride 2) + InstanceNorm + ReLU, one kernel each
    x, _ = conv_block(x, params["w1"], params["b1"], k=3, s=2)
    x, _ = conv_block(x, params["w2"], params["b2"], k=3, s=2)
    x, x_pad = conv_block(x, params["w3"], params["b3"], k=3, s=2)
    _, H3, W3, C3 = x.shape

    # ---- 6 applications of the shared ResidualBlock in one fused kernel
    x_pad = residual_stack(x_pad,
                           _weight_matrix(params["rw1"]), params["rb1"],
                           _weight_matrix(params["rw2"]), params["rb2"])
    x = x_pad[:, :, :C3].reshape(N, H3, W3, C3)

    # ---- up path: ConvTranspose2d + InstanceNorm + ReLU, one kernel each
    x = tconv_block(x, params["tw1"], params["tb1"], k=4, s=2)
    x = tconv_block(x, params["tw2"], params["tb2"], k=4, s=2)
    x = tconv_block(x, params["tw3"], params["tb3"], k=2, s=2)
    return jnp.transpose(x, (0, 3, 1, 2))                               # NCHW


# ------------------------------ parameter init -------------------------------
def init_params(key, out_ch):
    def pair(k, w_shape, n_bias, fan_in):
        kw, kb = jax.random.split(k)
        bound = 1.0 / (fan_in ** 0.5)
        w = jax.random.uniform(kw, w_shape, jnp.float32, -bound, bound)
        b = jax.random.uniform(kb, (n_bias,), jnp.float32, -bound, bound)
        return w, b

    oc = out_ch
    ks = jax.random.split(key, 8)
    p = {}
    p["w1"], p["b1"] = pair(ks[0], (oc, 3, 3, 3), oc, 3 * 9)
    p["w2"], p["b2"] = pair(ks[1], (2 * oc, oc, 3, 3), 2 * oc, oc * 9)
    p["w3"], p["b3"] = pair(ks[2], (4 * oc, 2 * oc, 3, 3), 4 * oc, 2 * oc * 9)
    p["rw1"], p["rb1"] = pair(ks[3], (4 * oc, 4 * oc, 1, 1), 4 * oc, 4 * oc)
    p["rw2"], p["rb2"] = pair(ks[4], (4 * oc, 4 * oc, 1, 1), 4 * oc, 4 * oc)
    # ConvTranspose2d weights use PyTorch layout (Cin, Cout, kH, kW)
    p["tw1"], p["tb1"] = pair(ks[5], (4 * oc, 2 * oc, 4, 4), 2 * oc, 2 * oc * 16)
    p["tw2"], p["tb2"] = pair(ks[6], (2 * oc, oc, 4, 4), oc, oc * 16)
    p["tw3"], p["tb3"] = pair(ks[7], (oc, 3, 2, 2), 3, 3 * 4)
    return p


# --------------------------- pure-JAX reference check -------------------------
def reference_forward(params, x):
    def conv(x, w, b, s):
        y = lax.conv_general_dilated(x, w, (s, s), "VALID",
                                     dimension_numbers=("NCHW", "OIHW", "NCHW"))
        return y + b.reshape(1, -1, 1, 1)

    def tconv(x, w, b, k, s):
        w_flip = jnp.flip(jnp.transpose(w, (1, 0, 2, 3)), axis=(2, 3))
        y = lax.conv_general_dilated(x, w_flip, (1, 1),
                                     ((k - 1, k - 1), (k - 1, k - 1)),
                                     lhs_dilation=(s, s),
                                     dimension_numbers=("NCHW", "OIHW", "NCHW"))
        return y + b.reshape(1, -1, 1, 1)

    def inorm(x, eps=EPS):
        m = jnp.mean(x, axis=(2, 3), keepdims=True)
        v = jnp.mean((x - m) ** 2, axis=(2, 3), keepdims=True)
        return (x - m) * lax.rsqrt(v + eps)

    def relu(x):
        return jnp.maximum(x, 0.0)

    x = relu(inorm(conv(x, params["w1"], params["b1"], 2)))
    x = relu(inorm(conv(x, params["w2"], params["b2"], 2)))
    x = relu(inorm(conv(x, params["w3"], params["b3"], 2)))
    for _ in range(N_RESIDUAL):   # same weights every iteration, as in the module
        h = relu(inorm(conv(x, params["rw1"], params["rb1"], 1)))
        x = x + inorm(conv(h, params["rw2"], params["rb2"], 1))
    x = relu(inorm(tconv(x, params["tw1"], params["tb1"], 4, 2)))
    x = relu(inorm(tconv(x, params["tw2"], params["tb2"], 4, 2)))
    x = relu(inorm(tconv(x, params["tw3"], params["tb3"], 2, 2)))
    return x


if __name__ == "__main__":
    key = jax.random.PRNGKey(0)
    k_param, k_data = jax.random.split(key)

    out_ch = 8
    x = jax.random.normal(k_data, (2, 3, 32, 32), jnp.float32)   # NCHW input
    params = init_params(k_param, out_ch)

    y = jax.block_until_ready(jax.jit(generator_forward)(params, x))
    y_ref = jax.block_until_ready(jax.jit(reference_forward)(params, x))

    assert y.shape == y_ref.shape == (2, 3, 36, 36), (y.shape, y_ref.shape)
    err = float(jnp.max(jnp.abs(y - y_ref)))
    assert err < 2e-2, err

    print("KERNEL_OK")
</pallas_src>

<mosaic_0001>
module attributes {stable_mosaic.version = 11 : i64} {
  func.func @_conv_in_relu_kernel(%arg0: i32, %arg1: memref<1x225x27xf32, #tpu.memory_space<vmem>>, %arg2: memref<27x128xf32, #tpu.memory_space<vmem>>, %arg3: memref<1x128xf32, #tpu.memory_space<vmem>>, %arg4: memref<1x225x128xf32, #tpu.memory_space<vmem>>) attributes {dimension_semantics = [#tpu.dimension_semantics<parallel>], iteration_bounds = array<i64: 2>, scalar_prefetch = 0 : i64, scratch_operands = 0 : i64, tpu.core_type = #tpu.core_type<tc>, window_params = [{transform_indices = @transform_0, window_bounds = array<i64: 1, 225, 27>}, {pipeline_mode = #tpu.pipeline_mode<synchronous>, transform_indices = @transform_1, window_bounds = array<i64: 27, 128>}, {pipeline_mode = #tpu.pipeline_mode<synchronous>, transform_indices = @transform_2, window_bounds = array<i64: 1, 128>}, {transform_indices = @transform_3, window_bounds = array<i64: 1, 225, 128>}]} {
    %c0 = arith.constant 0 : index
    %c0_0 = arith.constant 0 : index
    %c0_1 = arith.constant 0 : index
    %0 = vector.load %arg1[%c0, %c0_0, %c0_1] : memref<1x225x27xf32, #tpu.memory_space<vmem>>, vector<1x225x27xf32>
    %1 = vector.shape_cast %0 : vector<1x225x27xf32> to vector<225x27xf32>
    %c0_2 = arith.constant 0 : index
    %c0_3 = arith.constant 0 : index
    %2 = vector.load %arg2[%c0_2, %c0_3] : memref<27x128xf32, #tpu.memory_space<vmem>>, vector<27x128xf32>
    %cst = arith.constant dense<0.000000e+00> : vector<225x128xf32>
    %3 = tpu.matmul %1, %2, %cst {dimension_numbers = #tpu.dot_dimension_numbers<[1], [0], [0], [1], [0, 0, 1, 1], [], []>} : vector<225x27xf32>, vector<27x128xf32>, vector<225x128xf32> -> vector<225x128xf32>
    %c0_4 = arith.constant 0 : index
    %c0_5 = arith.constant 0 : index
    %4 = vector.load %arg3[%c0_4, %c0_5] : memref<1x128xf32, #tpu.memory_space<vmem>>, vector<1x128xf32>
    %5 = vector.broadcast %4 : vector<1x128xf32> to vector<225x128xf32>
    %6 = arith.addf %3, %5 : vector<225x128xf32>
    %cst_6 = arith.constant dense<0.000000e+00> : vector<128xf32>
    %7 = vector.multi_reduction <add>, %6, %cst_6 [0] : vector<225x128xf32> to vector<128xf32>
    %8 = vector.shape_cast %7 : vector<128xf32> to vector<1x128xf32>
    %cst_7 = arith.constant 2.250000e+02 : f32
    %9 = vector.broadcast %cst_7 : f32 to vector<1x128xf32>
    %10 = arith.divf %8, %9 : vector<1x128xf32>
    %11 = vector.broadcast %10 : vector<1x128xf32> to vector<225x128xf32>
    %12 = arith.subf %6, %11 : vector<225x128xf32>
    %13 = arith.mulf %12, %12 : vector<225x128xf32>
    %cst_8 = arith.constant dense<0.000000e+00> : vector<128xf32>
    %14 = vector.multi_reduction <add>, %13, %cst_8 [0] : vector<225x128xf32> to vector<128xf32>
    %15 = vector.shape_cast %14 : vector<128xf32> to vector<1x128xf32>
    %cst_9 = arith.constant 2.250000e+02 : f32
    %16 = vector.broadcast %cst_9 : f32 to vector<1x128xf32>
    %17 = arith.divf %15, %16 : vector<1x128xf32>
    %cst_10 = arith.constant 9.99999974E-6 : f32
    %18 = vector.broadcast %cst_10 : f32 to vector<1x128xf32>
    %19 = arith.addf %17, %18 : vector<1x128xf32>
    %20 = math.rsqrt %19 : vector<1x128xf32>
    %21 = vector.broadcast %20 : vector<1x128xf32> to vector<225x128xf32>
    %22 = arith.mulf %12, %21 : vector<225x128xf32>
    %cst_11 = arith.constant 0.000000e+00 : f32
    %23 = vector.broadcast %cst_11 : f32 to vector<225x128xf32>
    %24 = arith.maximumf %22, %23 : vector<225x128xf32>
    %c0_12 = arith.constant 0 : index
    %c0_13 = arith.constant 0 : index
    %c0_14 = arith.constant 0 : index
    %25 = vector.load %arg4[%c0_12, %c0_13, %c0_14] : memref<1x225x128xf32, #tpu.memory_space<vmem>>, vector<1x225x128xf32>
    %26 = vector.shape_cast %25 : vector<1x225x128xf32> to vector<225x128xf32>
    %27 = vector.shape_cast %24 : vector<225x128xf32> to vector<1x225x128xf32>
    tpu.vector_store %arg4[%c0_12, %c0_13, %c0_14], %27 {strides = array<i32>} : memref<1x225x128xf32, #tpu.memory_space<vmem>>, vector<1x225x128xf32>,
    return
  }
  func.func @transform_0(%arg0: i32) -> (i32, i32, i32) {
    %c0_i32 = arith.constant 0 : i32
    %c0_i32_0 = arith.constant 0 : i32
    %c0_i32_1 = arith.constant 0 : i32
    return %arg0, %c0_i32, %c0_i32_0 : i32, i32, i32
  }
  func.func @transform_1(%arg0: i32) -> (i32, i32) {
    %c0_i32 = arith.constant 0 : i32
    %c0_i32_0 = arith.constant 0 : i32
    %c0_i32_1 = arith.constant 0 : i32
    return %c0_i32, %c0_i32_0 : i32, i32
  }
  func.func @transform_2(%arg0: i32) -> (i32, i32) {
    %c0_i32 = arith.constant 0 : i32
    %c0_i32_0 = arith.constant 0 : i32
    %c0_i32_1 = arith.constant 0 : i32
    return %c0_i32, %c0_i32_0 : i32, i32
  }
  func.func @transform_3(%arg0: i32) -> (i32, i32, i32) {
    %c0_i32 = arith.constant 0 : i32
    %c0_i32_0 = arith.constant 0 : i32
    %c0_i32_1 = arith.constant 0 : i32
    return %arg0, %c0_i32, %c0_i32_0 : i32, i32, i32
  }
}

module attributes {stable_mosaic.version = 11 : i64} {
  func.func @_conv_in_relu_kernel(%arg0: i32, %arg1: memref<1x49x72xf32, #tpu.memory_space<vmem>>, %arg2: memref<72x128xf32, #tpu.memory_space<vmem>>, %arg3: memref<1x128xf32, #tpu.memory_space<vmem>>, %arg4: memref<1x49x128xf32, #tpu.memory_space<vmem>>) attributes {dimension_semantics = [#tpu.dimension_semantics<parallel>], iteration_bounds = array<i64: 2>, scalar_prefetch = 0 : i64, scratch_operands = 0 : i64, tpu.core_type = #tpu.core_type<tc>, window_params = [{transform_indices = @transform_0, window_bounds = array<i64: 1, 49, 72>}, {pipeline_mode = #tpu.pipeline_mode<synchronous>, transform_indices = @transform_1, window_bounds = array<i64: 72, 128>}, {pipeline_mode = #tpu.pipeline_mode<synchronous>, transform_indices = @transform_2, window_bounds = array<i64: 1, 128>}, {transform_indices = @transform_3, window_bounds = array<i64: 1, 49, 128>}]} {
    %c0 = arith.constant 0 : index
    %c0_0 = arith.constant 0 : index
    %c0_1 = arith.constant 0 : index
    %0 = vector.load %arg1[%c0, %c0_0, %c0_1] : memref<1x49x72xf32, #tpu.memory_space<vmem>>, vector<1x49x72xf32>
    %1 = vector.shape_cast %0 : vector<1x49x72xf32> to vector<49x72xf32>
    %c0_2 = arith.constant 0 : index
    %c0_3 = arith.constant 0 : index
    %2 = vector.load %arg2[%c0_2, %c0_3] : memref<72x128xf32, #tpu.memory_space<vmem>>, vector<72x128xf32>
    %cst = arith.constant dense<0.000000e+00> : vector<49x128xf32>
    %3 = tpu.matmul %1, %2, %cst {dimension_numbers = #tpu.dot_dimension_numbers<[1], [0], [0], [1], [0, 0, 1, 1], [], []>} : vector<49x72xf32>, vector<72x128xf32>, vector<49x128xf32> -> vector<49x128xf32>
    %c0_4 = arith.constant 0 : index
    %c0_5 = arith.constant 0 : index
    %4 = vector.load %arg3[%c0_4, %c0_5] : memref<1x128xf32, #tpu.memory_space<vmem>>, vector<1x128xf32>
    %5 = vector.broadcast %4 : vector<1x128xf32> to vector<49x128xf32>
    %6 = arith.addf %3, %5 : vector<49x128xf32>
    %cst_6 = arith.constant dense<0.000000e+00> : vector<128xf32>
    %7 = vector.multi_reduction <add>, %6, %cst_6 [0] : vector<49x128xf32> to vector<128xf32>
    %8 = vector.shape_cast %7 : vector<128xf32> to vector<1x128xf32>
    %cst_7 = arith.constant 4.900000e+01 : f32
    %9 = vector.broadcast %cst_7 : f32 to vector<1x128xf32>
    %10 = arith.divf %8, %9 : vector<1x128xf32>
    %11 = vector.broadcast %10 : vector<1x128xf32> to vector<49x128xf32>
    %12 = arith.subf %6, %11 : vector<49x128xf32>
    %13 = arith.mulf %12, %12 : vector<49x128xf32>
    %cst_8 = arith.constant dense<0.000000e+00> : vector<128xf32>
    %14 = vector.multi_reduction <add>, %13, %cst_8 [0] : vector<49x128xf32> to vector<128xf32>
    %15 = vector.shape_cast %14 : vector<128xf32> to vector<1x128xf32>
    %cst_9 = arith.constant 4.900000e+01 : f32
    %16 = vector.broadcast %cst_9 : f32 to vector<1x128xf32>
    %17 = arith.divf %15, %16 : vector<1x128xf32>
    %cst_10 = arith.constant 9.99999974E-6 : f32
    %18 = vector.broadcast %cst_10 : f32 to vector<1x128xf32>
    %19 = arith.addf %17, %18 : vector<1x128xf32>
    %20 = math.rsqrt %19 : vector<1x128xf32>
    %21 = vector.broadcast %20 : vector<1x128xf32> to vector<49x128xf32>
    %22 = arith.mulf %12, %21 : vector<49x128xf32>
    %cst_11 = arith.constant 0.000000e+00 : f32
    %23 = vector.broadcast %cst_11 : f32 to vector<49x128xf32>
    %24 = arith.maximumf %22, %23 : vector<49x128xf32>
    %c0_12 = arith.constant 0 : index
    %c0_13 = arith.constant 0 : index
    %c0_14 = arith.constant 0 : index
    %25 = vector.load %arg4[%c0_12, %c0_13, %c0_14] : memref<1x49x128xf32, #tpu.memory_space<vmem>>, vector<1x49x128xf32>
    %26 = vector.shape_cast %25 : vector<1x49x128xf32> to vector<49x128xf32>
    %27 = vector.shape_cast %24 : vector<49x128xf32> to vector<1x49x128xf32>
    tpu.vector_store %arg4[%c0_12, %c0_13, %c0_14], %27 {strides = array<i32>} : memref<1x49x128xf32, #tpu.memory_space<vmem>>, vector<1x49x128xf32>,
    return
  }
  func.func @transform_0(%arg0: i32) -> (i32, i32, i32) {
    %c0_i32 = arith.constant 0 : i32
    %c0_i32_0 = arith.constant 0 : i32
    %c0_i32_1 = arith.constant 0 : i32
    return %arg0, %c0_i32, %c0_i32_0 : i32, i32, i32
  }
  func.func @transform_1(%arg0: i32) -> (i32, i32) {
    %c0_i32 = arith.constant 0 : i32
    %c0_i32_0 = arith.constant 0 : i32
    %c0_i32_1 = arith.constant 0 : i32
    return %c0_i32, %c0_i32_0 : i32, i32
  }
  func.func @transform_2(%arg0: i32) -> (i32, i32) {
    %c0_i32 = arith.constant 0 : i32
    %c0_i32_0 = arith.constant 0 : i32
    %c0_i32_1 = arith.constant 0 : i32
    return %c0_i32, %c0_i32_0 : i32, i32
  }
  func.func @transform_3(%arg0: i32) -> (i32, i32, i32) {
    %c0_i32 = arith.constant 0 : i32
    %c0_i32_0 = arith.constant 0 : i32
    %c0_i32_1 = arith.constant 0 : i32
    return %arg0, %c0_i32, %c0_i32_0 : i32, i32, i32
  }
}

module attributes {stable_mosaic.version = 11 : i64} {
  func.func @_conv_in_relu_kernel(%arg0: i32, %arg1: memref<1x9x144xf32, #tpu.memory_space<vmem>>, %arg2: memref<144x128xf32, #tpu.memory_space<vmem>>, %arg3: memref<1x128xf32, #tpu.memory_space<vmem>>, %arg4: memref<1x9x128xf32, #tpu.memory_space<vmem>>) attributes {dimension_semantics = [#tpu.dimension_semantics<parallel>], iteration_bounds = array<i64: 2>, scalar_prefetch = 0 : i64, scratch_operands = 0 : i64, tpu.core_type = #tpu.core_type<tc>, window_params = [{transform_indices = @transform_0, window_bounds = array<i64: 1, 9, 144>}, {pipeline_mode = #tpu.pipeline_mode<synchronous>, transform_indices = @transform_1, window_bounds = array<i64: 144, 128>}, {pipeline_mode = #tpu.pipeline_mode<synchronous>, transform_indices = @transform_2, window_bounds = array<i64: 1, 128>}, {transform_indices = @transform_3, window_bounds = array<i64: 1, 9, 128>}]} {
    %c0 = arith.constant 0 : index
    %c0_0 = arith.constant 0 : index
    %c0_1 = arith.constant 0 : index
    %0 = vector.load %arg1[%c0, %c0_0, %c0_1] : memref<1x9x144xf32, #tpu.memory_space<vmem>>, vector<1x9x144xf32>
    %1 = vector.shape_cast %0 : vector<1x9x144xf32> to vector<9x144xf32>
    %c0_2 = arith.constant 0 : index
    %c0_3 = arith.constant 0 : index
    %2 = vector.load %arg2[%c0_2, %c0_3] : memref<144x128xf32, #tpu.memory_space<vmem>>, vector<144x128xf32>
    %cst = arith.constant dense<0.000000e+00> : vector<9x128xf32>
    %3 = tpu.matmul %1, %2, %cst {dimension_numbers = #tpu.dot_dimension_numbers<[1], [0], [0], [1], [0, 0, 1, 1], [], []>} : vector<9x144xf32>, vector<144x128xf32>, vector<9x128xf32> -> vector<9x128xf32>
    %c0_4 = arith.constant 0 : index
    %c0_5 = arith.constant 0 : index
    %4 = vector.load %arg3[%c0_4, %c0_5] : memref<1x128xf32, #tpu.memory_space<vmem>>, vector<1x128xf32>
    %5 = vector.broadcast %4 : vector<1x128xf32> to vector<9x128xf32>
    %6 = arith.addf %3, %5 : vector<9x128xf32>
    %cst_6 = arith.constant dense<0.000000e+00> : vector<128xf32>
    %7 = vector.multi_reduction <add>, %6, %cst_6 [0] : vector<9x128xf32> to vector<128xf32>
    %8 = vector.shape_cast %7 : vector<128xf32> to vector<1x128xf32>
    %cst_7 = arith.constant 9.000000e+00 : f32
    %9 = vector.broadcast %cst_7 : f32 to vector<1x128xf32>
    %10 = arith.divf %8, %9 : vector<1x128xf32>
    %11 = vector.broadcast %10 : vector<1x128xf32> to vector<9x128xf32>
    %12 = arith.subf %6, %11 : vector<9x128xf32>
    %13 = arith.mulf %12, %12 : vector<9x128xf32>
    %cst_8 = arith.constant dense<0.000000e+00> : vector<128xf32>
    %14 = vector.multi_reduction <add>, %13, %cst_8 [0] : vector<9x128xf32> to vector<128xf32>
    %15 = vector.shape_cast %14 : vector<128xf32> to vector<1x128xf32>
    %cst_9 = arith.constant 9.000000e+00 : f32
    %16 = vector.broadcast %cst_9 : f32 to vector<1x128xf32>
    %17 = arith.divf %15, %16 : vector<1x128xf32>
    %cst_10 = arith.constant 9.99999974E-6 : f32
    %18 = vector.broadcast %cst_10 : f32 to vector<1x128xf32>
    %19 = arith.addf %17, %18 : vector<1x128xf32>
    %20 = math.rsqrt %19 : vector<1x128xf32>
    %21 = vector.broadcast %20 : vector<1x128xf32> to vector<9x128xf32>
    %22 = arith.mulf %12, %21 : vector<9x128xf32>
    %cst_11 = arith.constant 0.000000e+00 : f32
    %23 = vector.broadcast %cst_11 : f32 to vector<9x128xf32>
    %24 = arith.maximumf %22, %23 : vector<9x128xf32>
    %c0_12 = arith.constant 0 : index
    %c0_13 = arith.constant 0 : index
    %c0_14 = arith.constant 0 : index
    %25 = vector.load %arg4[%c0_12, %c0_13, %c0_14] : memref<1x9x128xf32, #tpu.memory_space<vmem>>, vector<1x9x128xf32>
    %26 = vector.shape_cast %25 : vector<1x9x128xf32> to vector<9x128xf32>
    %27 = vector.shape_cast %24 : vector<9x128xf32> to vector<1x9x128xf32>
    tpu.vector_store %arg4[%c0_12, %c0_13, %c0_14], %27 {strides = array<i32>} : memref<1x9x128xf32, #tpu.memory_space<vmem>>, vector<1x9x128xf32>,
    return
  }
  func.func @transform_0(%arg0: i32) -> (i32, i32, i32) {
    %c0_i32 = arith.constant 0 : i32
    %c0_i32_0 = arith.constant 0 : i32
    %c0_i32_1 = arith.constant 0 : i32
    return %arg0, %c0_i32, %c0_i32_0 : i32, i32, i32
  }
  func.func @transform_1(%arg0: i32) -> (i32, i32) {
    %c0_i32 = arith.constant 0 : i32
    %c0_i32_0 = arith.constant 0 : i32
    %c0_i32_1 = arith.constant 0 : i32
    return %c0_i32, %c0_i32_0 : i32, i32
  }
  func.func @transform_2(%arg0: i32) -> (i32, i32) {
    %c0_i32 = arith.constant 0 : i32
    %c0_i32_0 = arith.constant 0 : i32
    %c0_i32_1 = arith.constant 0 : i32
    return %c0_i32, %c0_i32_0 : i32, i32
  }
  func.func @transform_3(%arg0: i32) -> (i32, i32, i32) {
    %c0_i32 = arith.constant 0 : i32
    %c0_i32_0 = arith.constant 0 : i32
    %c0_i32_1 = arith.constant 0 : i32
    return %arg0, %c0_i32, %c0_i32_0 : i32, i32, i32
  }
}

module attributes {stable_mosaic.version = 11 : i64} {
  func.func @_residual_stack_kernel(%arg0: i32, %arg1: memref<1x9x128xf32, #tpu.memory_space<vmem>>, %arg2: memref<128x128xf32, #tpu.memory_space<vmem>>, %arg3: memref<1x128xf32, #tpu.memory_space<vmem>>, %arg4: memref<128x128xf32, #tpu.memory_space<vmem>>, %arg5: memref<1x128xf32, #tpu.memory_space<vmem>>, %arg6: memref<1x9x128xf32, #tpu.memory_space<vmem>>) attributes {dimension_semantics = [#tpu.dimension_semantics<parallel>], iteration_bounds = array<i64: 2>, scalar_prefetch = 0 : i64, scratch_operands = 0 : i64, tpu.core_type = #tpu.core_type<tc>, window_params = [{transform_indices = @transform_0, window_bounds = array<i64: 1, 9, 128>}, {pipeline_mode = #tpu.pipeline_mode<synchronous>, transform_indices = @transform_1, window_bounds = array<i64: 128, 128>}, {pipeline_mode = #tpu.pipeline_mode<synchronous>, transform_indices = @transform_2, window_bounds = array<i64: 1, 128>}, {pipeline_mode = #tpu.pipeline_mode<synchronous>, transform_indices = @transform_3, window_bounds = array<i64: 128, 128>}, {pipeline_mode = #tpu.pipeline_mode<synchronous>, transform_indices = @transform_4, window_bounds = array<i64: 1, 128>}, {transform_indices = @transform_5, window_bounds = array<i64: 1, 9, 128>}]} {
    %c0 = arith.constant 0 : index
    %c0_0 = arith.constant 0 : index
    %c0_1 = arith.constant 0 : index
    %0 = vector.load %arg1[%c0, %c0_0, %c0_1] : memref<1x9x128xf32, #tpu.memory_space<vmem>>, vector<1x9x128xf32>
    %1 = vector.shape_cast %0 : vector<1x9x128xf32> to vector<9x128xf32>
    %c0_2 = arith.constant 0 : index
    %c0_3 = arith.constant 0 : index
    %2 = vector.load %arg2[%c0_2, %c0_3] : memref<128x128xf32, #tpu.memory_space<vmem>>, vector<128x128xf32>
    %c0_4 = arith.constant 0 : index
    %c0_5 = arith.constant 0 : index
    %3 = vector.load %arg3[%c0_4, %c0_5] : memref<1x128xf32, #tpu.memory_space<vmem>>, vector<1x128xf32>
    %c0_6 = arith.constant 0 : index
    %c0_7 = arith.constant 0 : index
    %4 = vector.load %arg4[%c0_6, %c0_7] : memref<128x128xf32, #tpu.memory_space<vmem>>, vector<128x128xf32>
    %c0_8 = arith.constant 0 : index
    %c0_9 = arith.constant 0 : index
    %5 = vector.load %arg5[%c0_8, %c0_9] : memref<1x128xf32, #tpu.memory_space<vmem>>, vector<1x128xf32>
    %cst = arith.constant dense<0.000000e+00> : vector<9x128xf32>
    %6 = tpu.matmul %1, %2, %cst {dimension_numbers = #tpu.dot_dimension_numbers<[1], [0], [0], [1], [0, 0, 1, 1], [], []>} : vector<9x128xf32>, vector<128x128xf32>, vector<9x128xf32> -> vector<9x128xf32>
    %7 = vector.broadcast %3 : vector<1x128xf32> to vector<9x128xf32>
    %8 = arith.addf %6, %7 : vector<9x128xf32>
    %cst_10 = arith.constant dense<0.000000e+00> : vector<128xf32>
    %9 = vector.multi_reduction <add>, %8, %cst_10 [0] : vector<9x128xf32> to vector<128xf32>
    %10 = vector.shape_cast %9 : vector<128xf32> to vector<1x128xf32>
    %cst_11 = arith.constant 9.000000e+00 : f32
    %11 = vector.broadcast %cst_11 : f32 to vector<1x128xf32>
    %12 = arith.divf %10, %11 : vector<1x128xf32>
    %13 = vector.broadcast %12 : vector<1x128xf32> to vector<9x128xf32>
    %14 = arith.subf %8, %13 : vector<9x128xf32>
    %15 = arith.mulf %14, %14 : vector<9x128xf32>
    %cst_12 = arith.constant dense<0.000000e+00> : vector<128xf32>
    %16 = vector.multi_reduction <add>, %15, %cst_12 [0] : vector<9x128xf32> to vector<128xf32>
    %17 = vector.shape_cast %16 : vector<128xf32> to vector<1x128xf32>
    %cst_13 = arith.constant 9.000000e+00 : f32
    %18 = vector.broadcast %cst_13 : f32 to vector<1x128xf32>
    %19 = arith.divf %17, %18 : vector<1x128xf32>
    %cst_14 = arith.constant 9.99999974E-6 : f32
    %20 = vector.broadcast %cst_14 : f32 to vector<1x128xf32>
    %21 = arith.addf %19, %20 : vector<1x128xf32>
    %22 = math.rsqrt %21 : vector<1x128xf32>
    %23 = vector.broadcast %22 : vector<1x128xf32> to vector<9x128xf32>
    %24 = arith.mulf %14, %23 : vector<9x128xf32>
    %cst_15 = arith.constant 0.000000e+00 : f32
    %25 = vector.broadcast %cst_15 : f32 to vector<9x128xf32>
    %26 = arith.maximumf %24, %25 : vector<9x128xf32>
    %cst_16 = arith.constant dense<0.000000e+00> : vector<9x128xf32>
    %27 = tpu.matmul %26, %4, %cst_16 {dimension_numbers = #tpu.dot_dimension_numbers<[1], [0], [0], [1], [0, 0, 1, 1], [], []>} : vector<9x128xf32>, vector<128x128xf32>, vector<9x128xf32> -> vector<9x128xf32>
    %28 = vector.broadcast %5 : vector<1x128xf32> to vector<9x128xf32>
    %29 = arith.addf %27, %28 : vector<9x128xf32>
    %cst_17 = arith.constant dense<0.000000e+00> : vector<128xf32>
    %30 = vector.multi_reduction <add>, %29, %cst_17 [0] : vector<9x128xf32> to vector<128xf32>
    %31 = vector.shape_cast %30 : vector<128xf32> to vector<1x128xf32>
    %cst_18 = arith.constant 9.000000e+00 : f32
    %32 = vector.broadcast %cst_18 : f32 to vector<1x128xf32>
    %33 = arith.divf %31, %32 : vector<1x128xf32>
    %34 = vector.broadcast %33 : vector<1x128xf32> to vector<9x128xf32>
    %35 = arith.subf %29, %34 : vector<9x128xf32>
    %36 = arith.mulf %35, %35 : vector<9x128xf32>
    %cst_19 = arith.constant dense<0.000000e+00> : vector<128xf32>
    %37 = vector.multi_reduction <add>, %36, %cst_19 [0] : vector<9x128xf32> to vector<128xf32>
    %38 = vector.shape_cast %37 : vector<128xf32> to vector<1x128xf32>
    %cst_20 = arith.constant 9.000000e+00 : f32
    %39 = vector.broadcast %cst_20 : f32 to vector<1x128xf32>
    %40 = arith.divf %38, %39 : vector<1x128xf32>
    %cst_21 = arith.constant 9.99999974E-6 : f32
    %41 = vector.broadcast %cst_21 : f32 to vector<1x128xf32>
    %42 = arith.addf %40, %41 : vector<1x128xf32>
    %43 = math.rsqrt %42 : vector<1x128xf32>
    %44 = vector.broadcast %43 : vector<1x128xf32> to vector<9x128xf32>
    %45 = arith.mulf %35, %44 : vector<9x128xf32>
    %46 = arith.addf %1, %45 : vector<9x128xf32>
    %cst_22 = arith.constant dense<0.000000e+00> : vector<9x128xf32>
    %47 = tpu.matmul %46, %2, %cst_22 {dimension_numbers = #tpu.dot_dimension_numbers<[1], [0], [0], [1], [0, 0, 1, 1], [], []>} : vector<9x128xf32>, vector<128x128xf32>, vector<9x128xf32> -> vector<9x128xf32>
    %48 = vector.broadcast %3 : vector<1x128xf32> to vector<9x128xf32>
    %49 = arith.addf %47, %48 : vector<9x128xf32>
    %cst_23 = arith.constant dense<0.000000e+00> : vector<128xf32>
    %50 = vector.multi_reduction <add>, %49, %cst_23 [0] : vector<9x128xf32> to vector<128xf32>
    %51 = vector.shape_cast %50 : vector<128xf32> to vector<1x128xf32>
    %cst_24 = arith.constant 9.000000e+00 : f32
    %52 = vector.broadcast %cst_24 : f32 to vector<1x128xf32>
    %53 = arith.divf %51, %52 : vector<1x128xf32>
    %54 = vector.broadcast %53 : vector<1x128xf32> to vector<9x128xf32>
    %55 = arith.subf %49, %54 : vector<9x128xf32>
    %56 = arith.mulf %55, %55 : vector<9x128xf32>
    %cst_25 = arith.constant dense<0.000000e+00> : vector<128xf32>
    %57 = vector.multi_reduction <add>, %56, %cst_25 [0] : vector<9x128xf32> to vector<128xf32>
    %58 = vector.shape_cast %57 : vector<128xf32> to vector<1x128xf32>
    %cst_26 = arith.constant 9.000000e+00 : f32
    %59 = vector.broadcast %cst_26 : f32 to vector<1x128xf32>
    %60 = arith.divf %58, %59 : vector<1x128xf32>
    %cst_27 = arith.constant 9.99999974E-6 : f32
    %61 = vector.broadcast %cst_27 : f32 to vector<1x128xf32>
    %62 = arith.addf %60, %61 : vector<1x128xf32>
    %63 = math.rsqrt %62 : vector<1x128xf32>
    %64 = vector.broadcast %63 : vector<1x128xf32> to vector<9x128xf32>
    %65 = arith.mulf %55, %64 : vector<9x128xf32>
    %cst_28 = arith.constant 0.000000e+00 : f32
    %66 = vector.broadcast %cst_28 : f32 to vector<9x128xf32>
    %67 = arith.maximumf %65, %66 : vector<9x128xf32>
    %cst_29 = arith.constant dense<0.000000e+00> : vector<9x128xf32>
    %68 = tpu.matmul %67, %4, %cst_29 {dimension_numbers = #tpu.dot_dimension_numbers<[1], [0], [0], [1], [0, 0, 1, 1], [], []>} : vector<9x128xf32>, vector<128x128xf32>, vector<9x128xf32> -> vector<9x128xf32>
    %69 = vector.broadcast %5 : vector<1x128xf32> to vector<9x128xf32>
    %70 = arith.addf %68, %69 : vector<9x128xf32>
    %cst_30 = arith.constant dense<0.000000e+00> : vector<128xf32>
    %71 = vector.multi_reduction <add>, %70, %cst_30 [0] : vector<9x128xf32> to vector<128xf32>
    %72 = vector.shape_cast %71 : vector<128xf32> to vector<1x128xf32>
    %cst_31 = arith.constant 9.000000e+00 : f32
    %73 = vector.broadcast %cst_31 : f32 to vector<1x128xf32>
    %74 = arith.divf %72, %73 : vector<1x128xf32>
    %75 = vector.broadcast %74 : vector<1x128xf32> to vector<9x128xf32>
    %76 = arith.subf %70, %75 : vector<9x128xf32>
    %77 = arith.mulf %76, %76 : vector<9x128xf32>
    %cst_32 = arith.constant dense<0.000000e+00> : vector<128xf32>
    %78 = vector.multi_reduction <add>, %77, %cst_32 [0] : vector<9x128xf32> to vector<128xf32>
    %79 = vector.shape_cast %78 : vector<128xf32> to vector<1x128xf32>
    %cst_33 = arith.constant 9.000000e+00 : f32
    %80 = vector.broadcast %cst_33 : f32 to vector<1x128xf32>
    %81 = arith.divf %79, %80 : vector<1x128xf32>
    %cst_34 = arith.constant 9.99999974E-6 : f32
    %82 = vector.broadcast %cst_34 : f32 to vector<1x128xf32>
    %83 = arith.addf %81, %82 : vector<1x128xf32>
    %84 = math.rsqrt %83 : vector<1x128xf32>
    %85 = vector.broadcast %84 : vector<1x128xf32> to vector<9x128xf32>
    %86 = arith.mulf %76, %85 : vector<9x128xf32>
    %87 = arith.addf %46, %86 : vector<9x128xf32>
    %cst_35 = arith.constant dense<0.000000e+00> : vector<9x128xf32>
    %88 = tpu.matmul %87, %2, %cst_35 {dimension_numbers = #tpu.dot_dimension_numbers<[1], [0], [0], [1], [0, 0, 1, 1], [], []>} : vector<9x128xf32>, vector<128x128xf32>, vector<9x128xf32> -> vector<9x128xf32>
    %89 = vector.broadcast %3 : vector<1x128xf32> to vector<9x128xf32>
    %90 = arith.addf %88, %89 : vector<9x128xf32>
    %cst_36 = arith.constant dense<0.000000e+00> : vector<128xf32>
    %91 = vector.multi_reduction <add>, %90, %cst_36 [0] : vector<9x128xf32> to vector<128xf32>
    %92 = vector.shape_cast %91 : vector<128xf32> to vector<1x128xf32>
    %cst_37 = arith.constant 9.000000e+00 : f32
    %93 = vector.broadcast %cst_37 : f32 to vector<1x128xf32>
    %94 = arith.divf %92, %93 : vector<1x128xf32>
    %95 = vector.broadcast %94 : vector<1x128xf32> to vector<9x128xf32>
    %96 = arith.subf %90, %95 : vector<9x128xf32>
    %97 = arith.mulf %96, %96 : vector<9x128xf32>
    %cst_38 = arith.constant dense<0.000000e+00> : vector<128xf32>
    %98 = vector.multi_reduction <add>, %97, %cst_38 [0] : vector<9x128xf32> to vector<128xf32>
    %99 = vector.shape_cast %98 : vector<128xf32> to vector<1x128xf32>
    %cst_39 = arith.constant 9.000000e+00 : f32
    %100 = vector.broadcast %cst_39 : f32 to vector<1x128xf32>
    %101 = arith.divf %99, %100 : vector<1x128xf32>
    %cst_40 = arith.constant 9.99999974E-6 : f32
    %102 = vector.broadcast %cst_40 : f32 to vector<1x128xf32>
    %103 = arith.addf %101, %102 : vector<1x128xf32>
    %104 = math.rsqrt %103 : vector<1x128xf32>
    %105 = vector.broadcast %104 : vector<1x128xf32> to vector<9x128xf32>
    %106 = arith.mulf %96, %105 : vector<9x128xf32>
    %cst_41 = arith.constant 0.000000e+00 : f32
    %107 = vector.broadcast %cst_41 : f32 to vector<9x128xf32>
    %108 = arith.maximumf %106, %107 : vector<9x128xf32>
    %cst_42 = arith.constant dense<0.000000e+00> : vector<9x128xf32>
    %109 = tpu.matmul %108, %4, %cst_42 {dimension_numbers = #tpu.dot_dimension_numbers<[1], [0], [0], [1], [0, 0, 1, 1], [], []>} : vector<9x128xf32>, vector<128x128xf32>, vector<9x128xf32> -> vector<9x128xf32>
    %110 = vector.broadcast %5 : vector<1x128xf32> to vector<9x128xf32>
    %111 = arith.addf %109, %110 : vector<9x128xf32>
    %cst_43 = arith.constant dense<0.000000e+00> : vector<128xf32>
    %112 = vector.multi_reduction <add>, %111, %cst_43 [0] : vector<9x128xf32> to vector<128xf32>
    %113 = vector.shape_cast %112 : vector<128xf32> to vector<1x128xf32>
    %cst_44 = arith.constant 9.000000e+00 : f32
    %114 = vector.broadcast %cst_44 : f32 to vector<1x128xf32>
    %115 = arith.divf %113, %114 : vector<1x128xf32>
    %116 = vector.broadcast %115 : vector<1x128xf32> to vector<9x128xf32>
    %117 = arith.subf %111, %116 : vector<9x128xf32>
    %118 = arith.mulf %117, %117 : vector<9x128xf32>
    %cst_45 = arith.constant dense<0.000000e+00> : vector<128xf32>
    %119 = vector.multi_reduction <add>, %118, %cst_45 [0] : vector<9x128xf32> to vector<128xf32>
    %120 = vector.shape_cast %119 : vector<128xf32> to vector<1x128xf32>
    %cst_46 = arith.constant 9.000000e+00 : f32
    %121 = vector.broadcast %cst_46 : f32 to vector<1x128xf32>
    %122 = arith.divf %120, %121 : vector<1x128xf32>
    %cst_47 = arith.constant 9.99999974E-6 : f32
    %123 = vector.broadcast %cst_47 : f32 to vector<1x128xf32>
    %124 = arith.addf %122, %123 : vector<1x128xf32>
    %125 = math.rsqrt %124 : vector<1x128xf32>
    %126 = vector.broadcast %125 : vector<1x128xf32> to vector<9x128xf32>
    %127 = arith.mulf %117, %126 : vector<9x128xf32>
    %128 = arith.addf %87, %127 : vector<9x128xf32>
    %cst_48 = arith.constant dense<0.000000e+00> : vector<9x128xf32>
    %129 = tpu.matmul %128, %2, %cst_48 {dimension_numbers = #tpu.dot_dimension_numbers<[1], [0], [0], [1], [0, 0, 1, 1], [], []>} : vector<9x128xf32>, vector<128x128xf32>, vector<9x128xf32> -> vector<9x128xf32>
    %130 = vector.broadcast %3 : vector<1x128xf32> to vector<9x128xf32>
    %131 = arith.addf %129, %130 : vector<9x128xf32>
    %cst_49 = arith.constant dense<0.000000e+00> : vector<128xf32>
    %132 = vector.multi_reduction <add>, %131, %cst_49 [0] : vector<9x128xf32> to vector<128xf32>
    %133 = vector.shape_cast %132 : vector<128xf32> to vector<1x128xf32>
    %cst_50 = arith.constant 9.000000e+00 : f32
    %134 = vector.broadcast %cst_50 : f32 to vector<1x128xf32>
    %135 = arith.divf %133, %134 : vector<1x128xf32>
    %136 = vector.broadcast %135 : vector<1x128xf32> to vector<9x128xf32>
    %137 = arith.subf %131, %136 : vector<9x128xf32>
    %138 = arith.mulf %137, %137 : vector<9x128xf32>
    %cst_51 = arith.constant dense<0.000000e+00> : vector<128xf32>
    %139 = vector.multi_reduction <add>, %138, %cst_51 [0] : vector<9x128xf32> to vector<128xf32>
    %140 = vector.shape_cast %139 : vector<128xf32> to vector<1x128xf32>
    %cst_52 = arith.constant 9.000000e+00 : f32
    %141 = vector.broadcast %cst_52 : f32 to vector<1x128xf32>
    %142 = arith.divf %140, %141 : vector<1x128xf32>
    %cst_53 = arith.constant 9.99999974E-6 : f32
    %143 = vector.broadcast %cst_53 : f32 to vector<1x128xf32>
    %144 = arith.addf %142, %143 : vector<1x128xf32>
    %145 = math.rsqrt %144 : vector<1x128xf32>
    %146 = vector.broadcast %145 : vector<1x128xf32> to vector<9x128xf32>
    %147 = arith.mulf %137, %146 : vector<9x128xf32>
    %cst_54 = arith.constant 0.000000e+00 : f32
    %148 = vector.broadcast %cst_54 : f32 to vector<9x128xf32>
    %149 = arith.maximumf %147, %148 : vector<9x128xf32>
    %cst_55 = arith.constant dense<0.000000e+00> : vector<9x128xf32>
    %150 = tpu.matmul %149, %4, %cst_55 {dimension_numbers = #tpu.dot_dimension_numbers<[1], [0], [0], [1], [0, 0, 1, 1], [], []>} : vector<9x128xf32>, vector<128x128xf32>, vector<9x128xf32> -> vector<9x128xf32>
    %151 = vector.broadcast %5 : vector<1x128xf32> to vector<9x128xf32>
    %152 = arith.addf %150, %151 : vector<9x128xf32>
    %cst_56 = arith.constant dense<0.000000e+00> : vector<128xf32>
    %153 = vector.multi_reduction <add>, %152, %cst_56 [0] : vector<9x128xf32> to vector<128xf32>
    %154 = vector.shape_cast %153 : vector<128xf32> to vector<1x128xf32>
    %cst_57 = arith.constant 9.000000e+00 : f32
    %155 = vector.broadcast %cst_57 : f32 to vector<1x128xf32>
    %156 = arith.divf %154, %155 : vector<1x128xf32>
    %157 = vector.broadcast %156 : vector<1x128xf32> to vector<9x128xf32>
    %158 = arith.subf %152, %157 : vector<9x128xf32>
    %159 = arith.mulf %158, %158 : vector<9x128xf32>
    %cst_58 = arith.constant dense<0.000000e+00> : vector<128xf32>
    %160 = vector.multi_reduction <add>, %159, %cst_58 [0] : vector<9x128xf32> to vector<128xf32>
    %161 = vector.shape_cast %160 : vector<128xf32> to vector<1x128xf32>
    %cst_59 = arith.constant 9.000000e+00 : f32
    %162 = vector.broadcast %cst_59 : f32 to vector<1x128xf32>
    %163 = arith.divf %161, %162 : vector<1x128xf32>
    %cst_60 = arith.constant 9.99999974E-6 : f32
    %164 = vector.broadcast %cst_60 : f32 to vector<1x128xf32>
    %165 = arith.addf %163, %164 : vector<1x128xf32>
    %166 = math.rsqrt %165 : vector<1x128xf32>
    %167 = vector.broadcast %166 : vector<1x128xf32> to vector<9x128xf32>
    %168 = arith.mulf %158, %167 : vector<9x128xf32>
    %169 = arith.addf %128, %168 : vector<9x128xf32>
    %cst_61 = arith.constant dense<0.000000e+00> : vector<9x128xf32>
    %170 = tpu.matmul %169, %2, %cst_61 {dimension_numbers = #tpu.dot_dimension_numbers<[1], [0], [0], [1], [0, 0, 1, 1], [], []>} : vector<9x128xf32>, vector<128x128xf32>, vector<9x128xf32> -> vector<9x128xf32>
    %171 = vector.broadcast %3 : vector<1x128xf32> to vector<9x128xf32>
    %172 = arith.addf %170, %171 : vector<9x128xf32>
    %cst_62 = arith.constant dense<0.000000e+00> : vector<128xf32>
    %173 = vector.multi_reduction <add>, %172, %cst_62 [0] : vector<9x128xf32> to vector<128xf32>
    %174 = vector.shape_cast %173 : vector<128xf32> to vector<1x128xf32>
    %cst_63 = arith.constant 9.000000e+00 : f32
    %175 = vector.broadcast %cst_63 : f32 to vector<1x128xf32>
    %176 = arith.divf %174, %175 : vector<1x128xf32>
    %177 = vector.broadcast %176 : vector<1x128xf32> to vector<9x128xf32>
    %178 = arith.subf %172, %177 : vector<9x128xf32>
    %179 = arith.mulf %178, %178 : vector<9x128xf32>
    %cst_64 = arith.constant dense<0.000000e+00> : vector<128xf32>
    %180 = vector.multi_reduction <add>, %179, %cst_64 [0] : vector<9x128xf32> to vector<128xf32>
    %181 = vector.shape_cast %180 : vector<128xf32> to vector<1x128xf32>
    %cst_65 = arith.constant 9.000000e+00 : f32
    %182 = vector.broadcast %cst_65 : f32 to vector<1x128xf32>
    %183 = arith.divf %181, %182 : vector<1x128xf32>
    %cst_66 = arith.constant 9.99999974E-6 : f32
    %184 = vector.broadcast %cst_66 : f32 to vector<1x128xf32>
    %185 = arith.addf %183, %184 : vector<1x128xf32>
    %186 = math.rsqrt %185 : vector<1x128xf32>
    %187 = vector.broadcast %186 : vector<1x128xf32> to vector<9x128xf32>
    %188 = arith.mulf %178, %187 : vector<9x128xf32>
    %cst_67 = arith.constant 0.000000e+00 : f32
    %189 = vector.broadcast %cst_67 : f32 to vector<9x128xf32>
    %190 = arith.maximumf %188, %189 : vector<9x128xf32>
    %cst_68 = arith.constant dense<0.000000e+00> : vector<9x128xf32>
    %191 = tpu.matmul %190, %4, %cst_68 {dimension_numbers = #tpu.dot_dimension_numbers<[1], [0], [0], [1], [0, 0, 1, 1], [], []>} : vector<9x128xf32>, vector<128x128xf32>, vector<9x128xf32> -> vector<9x128xf32>
    %192 = vector.broadcast %5 : vector<1x128xf32> to vector<9x128xf32>
    %193 = arith.addf %191, %192 : vector<9x128xf32>
    %cst_69 = arith.constant dense<0.000000e+00> : vector<128xf32>
    %194 = vector.multi_reduction <add>, %193, %cst_69 [0] : vector<9x128xf32> to vector<128xf32>
    %195 = vector.shape_cast %194 : vector<128xf32> to vector<1x128xf32>
    %cst_70 = arith.constant 9.000000e+00 : f32
    %196 = vector.broadcast %cst_70 : f32 to vector<1x128xf32>
    %197 = arith.divf %195, %196 : vector<1x128xf32>
    %198 = vector.broadcast %197 : vector<1x128xf32> to vector<9x128xf32>
    %199 = arith.subf %193, %198 : vector<9x128xf32>
    %200 = arith.mulf %199, %199 : vector<9x128xf32>
    %cst_71 = arith.constant dense<0.000000e+00> : vector<128xf32>
    %201 = vector.multi_reduction <add>, %200, %cst_71 [0] : vector<9x128xf32> to vector<128xf32>
    %202 = vector.shape_cast %201 : vector<128xf32> to vector<1x128xf32>
    %cst_72 = arith.constant 9.000000e+00 : f32
    %203 = vector.broadcast %cst_72 : f32 to vector<1x128xf32>
    %204 = arith.divf %202, %203 : vector<1x128xf32>
    %cst_73 = arith.constant 9.99999974E-6 : f32
    %205 = vector.broadcast %cst_73 : f32 to vector<1x128xf32>
    %206 = arith.addf %204, %205 : vector<1x128xf32>
    %207 = math.rsqrt %206 : vector<1x128xf32>
    %208 = vector.broadcast %207 : vector<1x128xf32> to vector<9x128xf32>
    %209 = arith.mulf %199, %208 : vector<9x128xf32>
    %210 = arith.addf %169, %209 : vector<9x128xf32>
    %cst_74 = arith.constant dense<0.000000e+00> : vector<9x128xf32>
    %211 = tpu.matmul %210, %2, %cst_74 {dimension_numbers = #tpu.dot_dimension_numbers<[1], [0], [0], [1], [0, 0, 1, 1], [], []>} : vector<9x128xf32>, vector<128x128xf32>, vector<9x128xf32> -> vector<9x128xf32>
    %212 = vector.broadcast %3 : vector<1x128xf32> to vector<9x128xf32>
    %213 = arith.addf %211, %212 : vector<9x128xf32>
    %cst_75 = arith.constant dense<0.000000e+00> : vector<128xf32>
    %214 = vector.multi_reduction <add>, %213, %cst_75 [0] : vector<9x128xf32> to vector<128xf32>
    %215 = vector.shape_cast %214 : vector<128xf32> to vector<1x128xf32>
    %cst_76 = arith.constant 9.000000e+00 : f32
    %216 = vector.broadcast %cst_76 : f32 to vector<1x128xf32>
    %217 = arith.divf %215, %216 : vector<1x128xf32>
    %218 = vector.broadcast %217 : vector<1x128xf32> to vector<9x128xf32>
    %219 = arith.subf %213, %218 : vector<9x128xf32>
    %220 = arith.mulf %219, %219 : vector<9x128xf32>
    %cst_77 = arith.constant dense<0.000000e+00> : vector<128xf32>
    %221 = vector.multi_reduction <add>, %220, %cst_77 [0] : vector<9x128xf32> to vector<128xf32>
    %222 = vector.shape_cast %221 : vector<128xf32> to vector<1x128xf32>
    %cst_78 = arith.constant 9.000000e+00 : f32
    %223 = vector.broadcast %cst_78 : f32 to vector<1x128xf32>
    %224 = arith.divf %222, %223 : vector<1x128xf32>
    %cst_79 = arith.constant 9.99999974E-6 : f32
    %225 = vector.broadcast %cst_79 : f32 to vector<1x128xf32>
    %226 = arith.addf %224, %225 : vector<1x128xf32>
    %227 = math.rsqrt %226 : vector<1x128xf32>
    %228 = vector.broadcast %227 : vector<1x128xf32> to vector<9x128xf32>
    %229 = arith.mulf %219, %228 : vector<9x128xf32>
    %cst_80 = arith.constant 0.000000e+00 : f32
    %230 = vector.broadcast %cst_80 : f32 to vector<9x128xf32>
    %231 = arith.maximumf %229, %230 : vector<9x128xf32>
    %cst_81 = arith.constant dense<0.000000e+00> : vector<9x128xf32>
    %232 = tpu.matmul %231, %4, %cst_81 {dimension_numbers = #tpu.dot_dimension_numbers<[1], [0], [0], [1], [0, 0, 1, 1], [], []>} : vector<9x128xf32>, vector<128x128xf32>, vector<9x128xf32> -> vector<9x128xf32>
    %233 = vector.broadcast %5 : vector<1x128xf32> to vector<9x128xf32>
    %234 = arith.addf %232, %233 : vector<9x128xf32>
    %cst_82 = arith.constant dense<0.000000e+00> : vector<128xf32>
    %235 = vector.multi_reduction <add>, %234, %cst_82 [0] : vector<9x128xf32> to vector<128xf32>
    %236 = vector.shape_cast %235 : vector<128xf32> to vector<1x128xf32>
    %cst_83 = arith.constant 9.000000e+00 : f32
    %237 = vector.broadcast %cst_83 : f32 to vector<1x128xf32>
    %238 = arith.divf %236, %237 : vector<1x128xf32>
    %239 = vector.broadcast %238 : vector<1x128xf32> to vector<9x128xf32>
    %240 = arith.subf %234, %239 : vector<9x128xf32>
    %241 = arith.mulf %240, %240 : vector<9x128xf32>
    %cst_84 = arith.constant dense<0.000000e+00> : vector<128xf32>
    %242 = vector.multi_reduction <add>, %241, %cst_84 [0] : vector<9x128xf32> to vector<128xf32>
    %243 = vector.shape_cast %242 : vector<128xf32> to vector<1x128xf32>
    %cst_85 = arith.constant 9.000000e+00 : f32
    %244 = vector.broadcast %cst_85 : f32 to vector<1x128xf32>
    %245 = arith.divf %243, %244 : vector<1x128xf32>
    %cst_86 = arith.constant 9.99999974E-6 : f32
    %246 = vector.broadcast %cst_86 : f32 to vector<1x128xf32>
    %247 = arith.addf %245, %246 : vector<1x128xf32>
    %248 = math.rsqrt %247 : vector<1x128xf32>
    %249 = vector.broadcast %248 : vector<1x128xf32> to vector<9x128xf32>
    %250 = arith.mulf %240, %249 : vector<9x128xf32>
    %251 = arith.addf %210, %250 : vector<9x128xf32>
    %c0_87 = arith.constant 0 : index
    %c0_88 = arith.constant 0 : index
    %c0_89 = arith.constant 0 : index
    %252 = vector.load %arg6[%c0_87, %c0_88, %c0_89] : memref<1x9x128xf32, #tpu.memory_space<vmem>>, vector<1x9x128xf32>
    %253 = vector.shape_cast %252 : vector<1x9x128xf32> to vector<9x128xf32>
    %254 = vector.shape_cast %251 : vector<9x128xf32> to vector<1x9x128xf32>
    tpu.vector_store %arg6[%c0_87, %c0_88, %c0_89], %254 {strides = array<i32>} : memref<1x9x128xf32, #tpu.memory_space<vmem>>, vector<1x9x128xf32>,
    return
  }
  func.func @transform_0(%arg0: i32) -> (i32, i32, i32) {
    %c0_i32 = arith.constant 0 : i32
    %c0_i32_0 = arith.constant 0 : i32
    %c0_i32_1 = arith.constant 0 : i32
    return %arg0, %c0_i32, %c0_i32_0 : i32, i32, i32
  }
  func.func @transform_1(%arg0: i32) -> (i32, i32) {
    %c0_i32 = arith.constant 0 : i32
    %c0_i32_0 = arith.constant 0 : i32
    %c0_i32_1 = arith.constant 0 : i32
    return %c0_i32, %c0_i32_0 : i32, i32
  }
  func.func @transform_2(%arg0: i32) -> (i32, i32) {
    %c0_i32 = arith.constant 0 : i32
    %c0_i32_0 = arith.constant 0 : i32
    %c0_i32_1 = arith.constant 0 : i32
    return %c0_i32, %c0_i32_0 : i32, i32
  }
  func.func @transform_3(%arg0: i32) -> (i32, i32) {
    %c0_i32 = arith.constant 0 : i32
    %c0_i32_0 = arith.constant 0 : i32
    %c0_i32_1 = arith.constant 0 : i32
    return %c0_i32, %c0_i32_0 : i32, i32
  }
  func.func @transform_4(%arg0: i32) -> (i32, i32) {
    %c0_i32 = arith.constant 0 : i32
    %c0_i32_0 = arith.constant 0 : i32
    %c0_i32_1 = arith.constant 0 : i32
    return %c0_i32, %c0_i32_0 : i32, i32
  }
  func.func @transform_5(%arg0: i32) -> (i32, i32, i32) {
    %c0_i32 = arith.constant 0 : i32
    %c0_i32_0 = arith.constant 0 : i32
    %c0_i32_1 = arith.constant 0 : i32
    return %arg0, %c0_i32, %c0_i32_0 : i32, i32, i32
  }
}

module attributes {stable_mosaic.version = 11 : i64} {
  func.func @_conv_in_relu_kernel(%arg0: i32, %arg1: memref<1x64x512xf32, #tpu.memory_space<vmem>>, %arg2: memref<512x128xf32, #tpu.memory_space<vmem>>, %arg3: memref<1x128xf32, #tpu.memory_space<vmem>>, %arg4: memref<1x64x128xf32, #tpu.memory_space<vmem>>) attributes {dimension_semantics = [#tpu.dimension_semantics<parallel>], iteration_bounds = array<i64: 2>, scalar_prefetch = 0 : i64, scratch_operands = 0 : i64, tpu.core_type = #tpu.core_type<tc>, window_params = [{transform_indices = @transform_0, window_bounds = array<i64: 1, 64, 512>}, {pipeline_mode = #tpu.pipeline_mode<synchronous>, transform_indices = @transform_1, window_bounds = array<i64: 512, 128>}, {pipeline_mode = #tpu.pipeline_mode<synchronous>, transform_indices = @transform_2, window_bounds = array<i64: 1, 128>}, {transform_indices = @transform_3, window_bounds = array<i64: 1, 64, 128>}]} {
    %c0 = arith.constant 0 : index
    %c0_0 = arith.constant 0 : index
    %c0_1 = arith.constant 0 : index
    %0 = vector.load %arg1[%c0, %c0_0, %c0_1] : memref<1x64x512xf32, #tpu.memory_space<vmem>>, vector<1x64x512xf32>
    %1 = vector.shape_cast %0 : vector<1x64x512xf32> to vector<64x512xf32>
    %c0_2 = arith.constant 0 : index
    %c0_3 = arith.constant 0 : index
    %2 = vector.load %arg2[%c0_2, %c0_3] : memref<512x128xf32, #tpu.memory_space<vmem>>, vector<512x128xf32>
    %cst = arith.constant dense<0.000000e+00> : vector<64x128xf32>
    %3 = tpu.matmul %1, %2, %cst {dimension_numbers = #tpu.dot_dimension_numbers<[1], [0], [0], [1], [0, 0, 1, 1], [], []>} : vector<64x512xf32>, vector<512x128xf32>, vector<64x128xf32> -> vector<64x128xf32>
    %c0_4 = arith.constant 0 : index
    %c0_5 = arith.constant 0 : index
    %4 = vector.load %arg3[%c0_4, %c0_5] : memref<1x128xf32, #tpu.memory_space<vmem>>, vector<1x128xf32>
    %5 = vector.broadcast %4 : vector<1x128xf32> to vector<64x128xf32>
    %6 = arith.addf %3, %5 : vector<64x128xf32>
    %cst_6 = arith.constant dense<0.000000e+00> : vector<128xf32>
    %7 = vector.multi_reduction <add>, %6, %cst_6 [0] : vector<64x128xf32> to vector<128xf32>
    %8 = vector.shape_cast %7 : vector<128xf32> to vector<1x128xf32>
    %cst_7 = arith.constant 6.400000e+01 : f32
    %9 = vector.broadcast %cst_7 : f32 to vector<1x128xf32>
    %10 = arith.divf %8, %9 : vector<1x128xf32>
    %11 = vector.broadcast %10 : vector<1x128xf32> to vector<64x128xf32>
    %12 = arith.subf %6, %11 : vector<64x128xf32>
    %13 = arith.mulf %12, %12 : vector<64x128xf32>
    %cst_8 = arith.constant dense<0.000000e+00> : vector<128xf32>
    %14 = vector.multi_reduction <add>, %13, %cst_8 [0] : vector<64x128xf32> to vector<128xf32>
    %15 = vector.shape_cast %14 : vector<128xf32> to vector<1x128xf32>
    %cst_9 = arith.constant 6.400000e+01 : f32
    %16 = vector.broadcast %cst_9 : f32 to vector<1x128xf32>
    %17 = arith.divf %15, %16 : vector<1x128xf32>
    %cst_10 = arith.constant 9.99999974E-6 : f32
    %18 = vector.broadcast %cst_10 : f32 to vector<1x128xf32>
    %19 = arith.addf %17, %18 : vector<1x128xf32>
    %20 = math.rsqrt %19 : vector<1x128xf32>
    %21 = vector.broadcast %20 : vector<1x128xf32> to vector<64x128xf32>
    %22 = arith.mulf %12, %21 : vector<64x128xf32>
    %cst_11 = arith.constant 0.000000e+00 : f32
    %23 = vector.broadcast %cst_11 : f32 to vector<64x128xf32>
    %24 = arith.maximumf %22, %23 : vector<64x128xf32>
    %c0_12 = arith.constant 0 : index
    %c0_13 = arith.constant 0 : index
    %c0_14 = arith.constant 0 : index
    %25 = vector.load %arg4[%c0_12, %c0_13, %c0_14] : memref<1x64x128xf32, #tpu.memory_space<vmem>>, vector<1x64x128xf32>
    %26 = vector.shape_cast %25 : vector<1x64x128xf32> to vector<64x128xf32>
    %27 = vector.shape_cast %24 : vector<64x128xf32> to vector<1x64x128xf32>
    tpu.vector_store %arg4[%c0_12, %c0_13, %c0_14], %27 {strides = array<i32>} : memref<1x64x128xf32, #tpu.memory_space<vmem>>, vector<1x64x128xf32>,
    return
  }
  func.func @transform_0(%arg0: i32) -> (i32, i32, i32) {
    %c0_i32 = arith.constant 0 : i32
    %c0_i32_0 = arith.constant 0 : i32
    %c0_i32_1 = arith.constant 0 : i32
    return %arg0, %c0_i32, %c0_i32_0 : i32, i32, i32
  }
  func.func @transform_1(%arg0: i32) -> (i32, i32) {
    %c0_i32 = arith.constant 0 : i32
    %c0_i32_0 = arith.constant 0 : i32
    %c0_i32_1 = arith.constant 0 : i32
    return %c0_i32, %c0_i32_0 : i32, i32
  }
  func.func @transform_2(%arg0: i32) -> (i32, i32) {
    %c0_i32 = arith.constant 0 : i32
    %c0_i32_0 = arith.constant 0 : i32
    %c0_i32_1 = arith.constant 0 : i32
    return %c0_i32, %c0_i32_0 : i32, i32
  }
  func.func @transform_3(%arg0: i32) -> (i32, i32, i32) {
    %c0_i32 = arith.constant 0 : i32
    %c0_i32_0 = arith.constant 0 : i32
    %c0_i32_1 = arith.constant 0 : i32
    return %arg0, %c0_i32, %c0_i32_0 : i32, i32, i32
  }
}

module attributes {stable_mosaic.version = 11 : i64} {
  func.func @_conv_in_relu_kernel(%arg0: i32, %arg1: memref<1x324x256xf32, #tpu.memory_space<vmem>>, %arg2: memref<256x128xf32, #tpu.memory_space<vmem>>, %arg3: memref<1x128xf32, #tpu.memory_space<vmem>>, %arg4: memref<1x324x128xf32, #tpu.memory_space<vmem>>) attributes {dimension_semantics = [#tpu.dimension_semantics<parallel>], iteration_bounds = array<i64: 2>, scalar_prefetch = 0 : i64, scratch_operands = 0 : i64, tpu.core_type = #tpu.core_type<tc>, window_params = [{transform_indices = @transform_0, window_bounds = array<i64: 1, 324, 256>}, {pipeline_mode = #tpu.pipeline_mode<synchronous>, transform_indices = @transform_1, window_bounds = array<i64: 256, 128>}, {pipeline_mode = #tpu.pipeline_mode<synchronous>, transform_indices = @transform_2, window_bounds = array<i64: 1, 128>}, {transform_indices = @transform_3, window_bounds = array<i64: 1, 324, 128>}]} {
    %c0 = arith.constant 0 : index
    %c0_0 = arith.constant 0 : index
    %c0_1 = arith.constant 0 : index
    %0 = vector.load %arg1[%c0, %c0_0, %c0_1] : memref<1x324x256xf32, #tpu.memory_space<vmem>>, vector<1x324x256xf32>
    %1 = vector.shape_cast %0 : vector<1x324x256xf32> to vector<324x256xf32>
    %c0_2 = arith.constant 0 : index
    %c0_3 = arith.constant 0 : index
    %2 = vector.load %arg2[%c0_2, %c0_3] : memref<256x128xf32, #tpu.memory_space<vmem>>, vector<256x128xf32>
    %cst = arith.constant dense<0.000000e+00> : vector<324x128xf32>
    %3 = tpu.matmul %1, %2, %cst {dimension_numbers = #tpu.dot_dimension_numbers<[1], [0], [0], [1], [0, 0, 1, 1], [], []>} : vector<324x256xf32>, vector<256x128xf32>, vector<324x128xf32> -> vector<324x128xf32>
    %c0_4 = arith.constant 0 : index
    %c0_5 = arith.constant 0 : index
    %4 = vector.load %arg3[%c0_4, %c0_5] : memref<1x128xf32, #tpu.memory_space<vmem>>, vector<1x128xf32>
    %5 = vector.broadcast %4 : vector<1x128xf32> to vector<324x128xf32>
    %6 = arith.addf %3, %5 : vector<324x128xf32>
    %cst_6 = arith.constant dense<0.000000e+00> : vector<128xf32>
    %7 = vector.multi_reduction <add>, %6, %cst_6 [0] : vector<324x128xf32> to vector<128xf32>
    %8 = vector.shape_cast %7 : vector<128xf32> to vector<1x128xf32>
    %cst_7 = arith.constant 3.240000e+02 : f32
    %9 = vector.broadcast %cst_7 : f32 to vector<1x128xf32>
    %10 = arith.divf %8, %9 : vector<1x128xf32>
    %11 = vector.broadcast %10 : vector<1x128xf32> to vector<324x128xf32>
    %12 = arith.subf %6, %11 : vector<324x128xf32>
    %13 = arith.mulf %12, %12 : vector<324x128xf32>
    %cst_8 = arith.constant dense<0.000000e+00> : vector<128xf32>
    %14 = vector.multi_reduction <add>, %13, %cst_8 [0] : vector<324x128xf32> to vector<128xf32>
    %15 = vector.shape_cast %14 : vector<128xf32> to vector<1x128xf32>
    %cst_9 = arith.constant 3.240000e+02 : f32
    %16 = vector.broadcast %cst_9 : f32 to vector<1x128xf32>
    %17 = arith.divf %15, %16 : vector<1x128xf32>
    %cst_10 = arith.constant 9.99999974E-6 : f32
    %18 = vector.broadcast %cst_10 : f32 to vector<1x128xf32>
    %19 = arith.addf %17, %18 : vector<1x128xf32>
    %20 = math.rsqrt %19 : vector<1x128xf32>
    %21 = vector.broadcast %20 : vector<1x128xf32> to vector<324x128xf32>
    %22 = arith.mulf %12, %21 : vector<324x128xf32>
    %cst_11 = arith.constant 0.000000e+00 : f32
    %23 = vector.broadcast %cst_11 : f32 to vector<324x128xf32>
    %24 = arith.maximumf %22, %23 : vector<324x128xf32>
    %c0_12 = arith.constant 0 : index
    %c0_13 = arith.constant 0 : index
    %c0_14 = arith.constant 0 : index
    %25 = vector.load %arg4[%c0_12, %c0_13, %c0_14] : memref<1x324x128xf32, #tpu.memory_space<vmem>>, vector<1x324x128xf32>
    %26 = vector.shape_cast %25 : vector<1x324x128xf32> to vector<324x128xf32>
    %27 = vector.shape_cast %24 : vector<324x128xf32> to vector<1x324x128xf32>
    tpu.vector_store %arg4[%c0_12, %c0_13, %c0_14], %27 {strides = array<i32>} : memref<1x324x128xf32, #tpu.memory_space<vmem>>, vector<1x324x128xf32>,
    return
  }
  func.func @transform_0(%arg0: i32) -> (i32, i32, i32) {
    %c0_i32 = arith.constant 0 : i32
    %c0_i32_0 = arith.constant 0 : i32
    %c0_i32_1 = arith.constant 0 : i32
    return %arg0, %c0_i32, %c0_i32_0 : i32, i32, i32
  }
  func.func @transform_1(%arg0: i32) -> (i32, i32) {
    %c0_i32 = arith.constant 0 : i32
    %c0_i32_0 = arith.constant 0 : i32
    %c0_i32_1 = arith.constant 0 : i32
    return %c0_i32, %c0_i32_0 : i32, i32
  }
  func.func @transform_2(%arg0: i32) -> (i32, i32) {
    %c0_i32 = arith.constant 0 : i32
    %c0_i32_0 = arith.constant 0 : i32
    %c0_i32_1 = arith.constant 0 : i32
    return %c0_i32, %c0_i32_0 : i32, i32
  }
  func.func @transform_3(%arg0: i32) -> (i32, i32, i32) {
    %c0_i32 = arith.constant 0 : i32
    %c0_i32_0 = arith.constant 0 : i32
    %c0_i32_1 = arith.constant 0 : i32
    return %arg0, %c0_i32, %c0_i32_0 : i32, i32, i32
  }
}

module attributes {stable_mosaic.version = 11 : i64} {
  func.func @_conv_in_relu_kernel(%arg0: i32, %arg1: memref<1x1296x32xf32, #tpu.memory_space<vmem>>, %arg2: memref<32x128xf32, #tpu.memory_space<vmem>>, %arg3: memref<1x128xf32, #tpu.memory_space<vmem>>, %arg4: memref<1x1296x128xf32, #tpu.memory_space<vmem>>) attributes {dimension_semantics = [#tpu.dimension_semantics<parallel>], iteration_bounds = array<i64: 2>, scalar_prefetch = 0 : i64, scratch_operands = 0 : i64, tpu.core_type = #tpu.core_type<tc>, window_params = [{transform_indices = @transform_0, window_bounds = array<i64: 1, 1296, 32>}, {pipeline_mode = #tpu.pipeline_mode<synchronous>, transform_indices = @transform_1, window_bounds = array<i64: 32, 128>}, {pipeline_mode = #tpu.pipeline_mode<synchronous>, transform_indices = @transform_2, window_bounds = array<i64: 1, 128>}, {transform_indices = @transform_3, window_bounds = array<i64: 1, 1296, 128>}]} {
    %c0 = arith.constant 0 : index
    %c0_0 = arith.constant 0 : index
    %c0_1 = arith.constant 0 : index
    %0 = vector.load %arg1[%c0, %c0_0, %c0_1] : memref<1x1296x32xf32, #tpu.memory_space<vmem>>, vector<1x1296x32xf32>
    %1 = vector.shape_cast %0 : vector<1x1296x32xf32> to vector<1296x32xf32>
    %c0_2 = arith.constant 0 : index
    %c0_3 = arith.constant 0 : index
    %2 = vector.load %arg2[%c0_2, %c0_3] : memref<32x128xf32, #tpu.memory_space<vmem>>, vector<32x128xf32>
    %cst = arith.constant dense<0.000000e+00> : vector<1296x128xf32>
    %3 = tpu.matmul %1, %2, %cst {dimension_numbers = #tpu.dot_dimension_numbers<[1], [0], [0], [1], [0, 0, 1, 1], [], []>} : vector<1296x32xf32>, vector<32x128xf32>, vector<1296x128xf32> -> vector<1296x128xf32>
    %c0_4 = arith.constant 0 : index
    %c0_5 = arith.constant 0 : index
    %4 = vector.load %arg3[%c0_4, %c0_5] : memref<1x128xf32, #tpu.memory_space<vmem>>, vector<1x128xf32>
    %5 = vector.broadcast %4 : vector<1x128xf32> to vector<1296x128xf32>
    %6 = arith.addf %3, %5 : vector<1296x128xf32>
    %cst_6 = arith.constant dense<0.000000e+00> : vector<128xf32>
    %7 = vector.multi_reduction <add>, %6, %cst_6 [0] : vector<1296x128xf32> to vector<128xf32>
    %8 = vector.shape_cast %7 : vector<128xf32> to vector<1x128xf32>
    %cst_7 = arith.constant 1.296000e+03 : f32
    %9 = vector.broadcast %cst_7 : f32 to vector<1x128xf32>
    %10 = arith.divf %8, %9 : vector<1x128xf32>
    %11 = vector.broadcast %10 : vector<1x128xf32> to vector<1296x128xf32>
    %12 = arith.subf %6, %11 : vector<1296x128xf32>
    %13 = arith.mulf %12, %12 : vector<1296x128xf32>
    %cst_8 = arith.constant dense<0.000000e+00> : vector<128xf32>
    %14 = vector.multi_reduction <add>, %13, %cst_8 [0] : vector<1296x128xf32> to vector<128xf32>
    %15 = vector.shape_cast %14 : vector<128xf32> to vector<1x128xf32>
    %cst_9 = arith.constant 1.296000e+03 : f32
    %16 = vector.broadcast %cst_9 : f32 to vector<1x128xf32>
    %17 = arith.divf %15, %16 : vector<1x128xf32>
    %cst_10 = arith.constant 9.99999974E-6 : f32
    %18 = vector.broadcast %cst_10 : f32 to vector<1x128xf32>
    %19 = arith.addf %17, %18 : vector<1x128xf32>
    %20 = math.rsqrt %19 : vector<1x128xf32>
    %21 = vector.broadcast %20 : vector<1x128xf32> to vector<1296x128xf32>
    %22 = arith.mulf %12, %21 : vector<1296x128xf32>
    %cst_11 = arith.constant 0.000000e+00 : f32
    %23 = vector.broadcast %cst_11 : f32 to vector<1296x128xf32>
    %24 = arith.maximumf %22, %23 : vector<1296x128xf32>
    %c0_12 = arith.constant 0 : index
    %c0_13 = arith.constant 0 : index
    %c0_14 = arith.constant 0 : index
    %25 = vector.load %arg4[%c0_12, %c0_13, %c0_14] : memref<1x1296x128xf32, #tpu.memory_space<vmem>>, vector<1x1296x128xf32>
    %26 = vector.shape_cast %25 : vector<1x1296x128xf32> to vector<1296x128xf32>
    %27 = vector.shape_cast %24 : vector<1296x128xf32> to vector<1x1296x128xf32>
    tpu.vector_store %arg4[%c0_12, %c0_13, %c0_14], %27 {strides = array<i32>} : memref<1x1296x128xf32, #tpu.memory_space<vmem>>, vector<1x1296x128xf32>,
    return
  }
  func.func @transform_0(%arg0: i32) -> (i32, i32, i32) {
    %c0_i32 = arith.constant 0 : i32
    %c0_i32_0 = arith.constant 0 : i32
    %c0_i32_1 = arith.constant 0 : i32
    return %arg0, %c0_i32, %c0_i32_0 : i32, i32, i32
  }
  func.func @transform_1(%arg0: i32) -> (i32, i32) {
    %c0_i32 = arith.constant 0 : i32
    %c0_i32_0 = arith.constant 0 : i32
    %c0_i32_1 = arith.constant 0 : i32
    return %c0_i32, %c0_i32_0 : i32, i32
  }
  func.func @transform_2(%arg0: i32) -> (i32, i32) {
    %c0_i32 = arith.constant 0 : i32
    %c0_i32_0 = arith.constant 0 : i32
    %c0_i32_1 = arith.constant 0 : i32
    return %c0_i32, %c0_i32_0 : i32, i32
  }
  func.func @transform_3(%arg0: i32) -> (i32, i32, i32) {
    %c0_i32 = arith.constant 0 : i32
    %c0_i32_0 = arith.constant 0 : i32
    %c0_i32_1 = arith.constant 0 : i32
    return %arg0, %c0_i32, %c0_i32_0 : i32, i32, i32
  }
}

</mosaic_0001>

<bundles_post_ra>
// kernel: generator_forward.7
= control target key start
LH: loop header
LB: loop body
LE: loop exit
PB: predicated region body
PF: predicated region fallthrough
CT: control target
= control target key end

     0   :  { %s1015_s12 = smov 0   ;;  %s1450_s0 = inlined_call_operand.vmem [shape: f32[2,225,27], index: 0, kind: input, shape index: {}]   ;;  %s1451_s1 = inlined_call_operand.vmem [shape: f32[27,128], index: 1, kind: input, shape index: {}]   ;;  %s1452_s2 = inlined_call_operand.vmem [shape: f32[1,128], index: 2, kind: input, shape index: {}]   ;;  %s1453_s3 = inlined_call_operand.vmem [shape: f32[2,225,128], index: 3, kind: output, shape index: {}]  }
   0x1 LB: > { %s789_s13 = sadd.s32 4294967295, %s989_s12   ;;  %p793_p0 = scmp.ge.s32.totalorder %s989_s12, 1  ;;  %s989_s12 = sphi %s1015_s12, %s13_s12  }
   0x2   : > { %p137_p1 = scmp.lt.s32.totalorder %s989_s12, 3 }
   0x4   : > { %p138_p2 = pnand %p793_p0, %p137_p1 }
   0x5   : > { %v200_v0 = vld [vmem:[%s1451_s1] sm:$0xff] (!%p138_p2)  ;;  %v201_v1 = vld [vmem:[%s1451_s1 + $0x8] sm:$0xff] (!%p138_p2)  ;;  %v202_v2 = vld [vmem:[%s1451_s1 + $0x10] sm:$0xff] (!%p138_p2)  ;;  %vm299_vm0 = vcmask (!%p138_p2), 1042432   ;;  %v991_v3 = vmov (!%p138_p2), 0.0|0.0   ;;  %p161_p3 = scmp.lt.s32.totalorder (!%p138_p2), %s789_s13, 1 }
   0x6   : > { %141 = sbr.rel (%p138_p2) target bundleno = 446 (0x1be), region = 32  ;;  %957 = vmatprep.subr.bf16.mxu0 (!%p138_p2), %v991_v3  ;;  %v958_v4 = vpack.c.bf16 (!%p138_p2), %v201_v1, %v200_v0  ;;  %v203_v5 = vld [vmem:[%s1451_s1 + $0x18] sm:$0x7] (!%p138_p2)  ;;  %964 = vmatprep.subr.bf16.mxu1 (!%p138_p2), %v991_v3  ;;  %vm992_vm1 = vmmov (!%p138_p2), 0   ;;  %v993_v6 = vmov (!%p138_p2), 0.0   ;;  %vm994_vm2 = vmmov (!%p138_p2), 1  }
   0x7   : > { %870 = vmatprep.mubr.msk.f32.mxu0 (!%p138_p2), %vm992_vm1, %v993_v6  ;;  %915 = vmatprep.mubr.msk.f32.mxu1 (!%p138_p2), %vm992_vm1, %v993_v6  ;;  %v961_v7 = vpack.c.bf16 (!%p138_p2), %v203_v5, %v202_v2  ;;  %vm962_vm3 = vmpackc.low (!%p138_p2), %vm299_vm0, %vm994_vm2  ;;  %vm211_vm4 = vcmask (!%p138_p2), 220160   ;;  %v1177_v60 = vld [vmem:[%s1452_s2] ss:$0 sm:$0xff] (!%p138_p2)  ;;  %vm540_vm5 = vcmask (!%p138_p2), 1040384  }
   0x8   : > { %959 = vmatpush3.bf16.msra.mxu0 (!%p138_p2), %v958_v4  ;;  %966 = vmatpush3.bf16.msra.mxu1 (!%p138_p2), %v958_v4 }
   0x9   : > { %960 = vmatprep.subr.bf16.mxu0 (!%p138_p2), %v991_v3  ;;  %965 = vmatprep.subr.bf16.mxu1 (!%p138_p2), %v991_v3 }
   0xc   : > { %963 = vmatpush3.bf16.msk.msra.mxu0 (!%p138_p2), %vm962_vm3, %v961_v7  ;;  %967 = vmatpush3.bf16.msk.msra.mxu1 (!%p138_p2), %vm962_vm3, %v961_v7 }
   0xd   : > { %s1455_s13 = smov (!%p161_p3, %s789_s13), 1 }
   0xe   : > { %s968_s22 = smul.u32 232, %s1455_s13 }
  0x10   : > { %s1048_s25 = scalar_lea.vmem %s1450_s0, %s968_s22  ;;  %s1411_s30 = scalar_lea.vmem %s1453_s3, %s968_s22 }
  0x11   : > { %v171_v8 = vld [vmem:[%s1048_s25] sm:$0xff]  ;;  %v186_v9 = vld [vmem:[%s1048_s25 + $0x78] sm:$0xff]  ;;  %v172_v10 = vld [vmem:[%s1048_s25 + $0x8] sm:$0xff] }
  0x12   : > { %871 = vmatmul.mubr.msk.f32.vlgmr.msra.gmra.mrb[0].mxu0 %vm211_vm4, %v171_v8  ;;  %916 = vmatmul.mubr.msk.f32.vlgmr.msra.gmra.mrb[0].mxu1 %vm211_vm4, %v186_v9  ;;  %v187_v11 = vld [vmem:[%s1048_s25 + $0x80] sm:$0xff]  ;;  %v173_v12 = vld [vmem:[%s1048_s25 + $0x10] sm:$0xff]  ;;  %v188_v13 = vld [vmem:[%s1048_s25 + $0x88] sm:$0xff] }
  0x13   : > { %873 = vmatprep.mubr.msk.f32.mxu0 %vm992_vm1, %v993_v6  ;;  %918 = vmatprep.mubr.msk.f32.mxu1 %vm992_vm1, %v993_v6  ;;  %v174_v14 = vld [vmem:[%s1048_s25 + $0x18] sm:$0xff]  ;;  %v189_v15 = vld [vmem:[%s1048_s25 + $0x90] sm:$0xff]  ;;  %v175_v16 = vld [vmem:[%s1048_s25 + $0x20] sm:$0xff] }
  0x14   : > { %v190_v17 = vld [vmem:[%s1048_s25 + $0x98] sm:$0xff]  ;;  %v176_v18 = vld [vmem:[%s1048_s25 + $0x28] sm:$0xff]  ;;  %v191_v19 = vld [vmem:[%s1048_s25 + $0xa0] sm:$0xff] }
  0x15   : > { %v177_v20 = vld [vmem:[%s1048_s25 + $0x30] sm:$0xff]  ;;  %v192_v21 = vld [vmem:[%s1048_s25 + $0xa8] sm:$0xff]  ;;  %v178_v22 = vld [vmem:[%s1048_s25 + $0x38] sm:$0xff] }
  0x16   : > { %874 = vmatmul.mubr.msk.f32.gmra.mrb[2].mxu0 %vm211_vm4, %v172_v10  ;;  %919 = vmatmul.mubr.msk.f32.gmra.mrb[2].mxu1 %vm211_vm4, %v187_v11  ;;  %v193_v23 = vld [vmem:[%s1048_s25 + $0xb0] sm:$0xff]  ;;  %v179_v24 = vld [vmem:[%s1048_s25 + $0x40] sm:$0xff]  ;;  %v194_v25 = vld [vmem:[%s1048_s25 + $0xb8] sm:$0xff] }
  0x17   : > { %876 = vmatprep.mubr.msk.f32.mxu0 %vm992_vm1, %v993_v6  ;;  %921 = vmatprep.mubr.msk.f32.mxu1 %vm992_vm1, %v993_v6  ;;  %v180_v26 = vld [vmem:[%s1048_s25 + $0x48] sm:$0xff]  ;;  %v195_v27 = vld [vmem:[%s1048_s25 + $0xc0] sm:$0xff]  ;;  %v181_v28 = vld [vmem:[%s1048_s25 + $0x50] sm:$0xff] }
  0x18   : > { %v196_v29 = vld [vmem:[%s1048_s25 + $0xc8] sm:$0xff]  ;;  %v182_v30 = vld [vmem:[%s1048_s25 + $0x58] sm:$0xff]  ;;  %v197_v31 = vld [vmem:[%s1048_s25 + $0xd0] sm:$0xff] }
  0x19   : > { %v183_v32 = vld [vmem:[%s1048_s25 + $0x60] sm:$0xff]  ;;  %v198_v33 = vld [vmem:[%s1048_s25 + $0xd8] sm:$0xff]  ;;  %v184_v34 = vld [vmem:[%s1048_s25 + $0x68] sm:$0xff] }
  0x1a   : > { %877 = vmatmul.mubr.msk.f32.gmra.mrb[4].mxu0 %vm211_vm4, %v173_v12  ;;  %922 = vmatmul.mubr.msk.f32.gmra.mrb[4].mxu1 %vm211_vm4, %v188_v13  ;;  %v199_v35 = vld [vmem:[%s1048_s25 + $0xe0] sm:$0x1]  ;;  %v185_v36 = vld [vmem:[%s1048_s25 + $0x70] sm:$0xff] }
  0x1b   : > { %879 = vmatprep.mubr.msk.f32.mxu0 %vm992_vm1, %v993_v6  ;;  %924 = vmatprep.mubr.msk.f32.mxu1 %vm992_vm1, %v993_v6 }
  0x1e   : > { %880 = vmatmul.mubr.msk.f32.gmra.mrb[6].mxu0 %vm211_vm4, %v174_v14  ;;  %925 = vmatmul.mubr.msk.f32.gmra.mrb[6].mxu1 %vm211_vm4, %v189_v15 }
  0x1f   : > { %882 = vmatprep.mubr.msk.f32.mxu0 %vm992_vm1, %v993_v6  ;;  %927 = vmatprep.mubr.msk.f32.mxu1 %vm992_vm1, %v993_v6 }
  0x22   : > { %883 = vmatmul.mubr.msk.f32.gmra.mrb[8].mxu0 %vm211_vm4, %v175_v16  ;;  %928 = vmatmul.mubr.msk.f32.gmra.mrb[8].mxu1 %vm211_vm4, %v190_v17 }
  0x23   : > { %885 = vmatprep.mubr.msk.f32.mxu0 %vm992_vm1, %v993_v6  ;;  %930 = vmatprep.mubr.msk.f32.mxu1 %vm992_vm1, %v993_v6 }
  0x26   : > { %886 = vmatmul.mubr.msk.f32.gmra.mrb[10].mxu0 %vm211_vm4, %v176_v18  ;;  %931 = vmatmul.mubr.msk.f32.gmra.mrb[10].mxu1 %vm211_vm4, %v191_v19 }
  0x27   : > { %888 = vmatprep.mubr.msk.f32.mxu0 %vm992_vm1, %v993_v6  ;;  %933 = vmatprep.mubr.msk.f32.mxu1 %vm992_vm1, %v993_v6 }
  0x2a   : > { %889 = vmatmul.mubr.msk.f32.gmra.mrb[12].mxu0 %vm211_vm4, %v177_v20  ;;  %934 = vmatmul.mubr.msk.f32.gmra.mrb[12].mxu1 %vm211_vm4, %v192_v21 }
  0x2b   : > { %891 = vmatprep.mubr.msk.f32.mxu0 %vm992_vm1, %v993_v6  ;;  %936 = vmatprep.mubr.msk.f32.mxu1 %vm992_vm1, %v993_v6 }
  0x2e   : > { %892 = vmatmul.mubr.msk.f32.gmra.mrb[14].mxu0 %vm211_vm4, %v178_v22  ;;  %937 = vmatmul.mubr.msk.f32.gmra.mrb[14].mxu1 %vm211_vm4, %v193_v23 }
  0x2f   : > { %894 = vmatprep.mubr.msk.f32.mxu0 %vm992_vm1, %v993_v6  ;;  %939 = vmatprep.mubr.msk.f32.mxu1 %vm992_vm1, %v993_v6 }
  0x32   : > { %895 = vmatmul.mubr.msk.f32.gmra.mrb[16].mxu0 %vm211_vm4, %v179_v24  ;;  %940 = vmatmul.mubr.msk.f32.gmra.mrb[16].mxu1 %vm211_vm4, %v194_v25 }
  0x33   : > { %897 = vmatprep.mubr.msk.f32.mxu0 %vm992_vm1, %v993_v6  ;;  %942 = vmatprep.mubr.msk.f32.mxu1 %vm992_vm1, %v993_v6 }
  0x36   : > { %898 = vmatmul.mubr.msk.f32.gmra.mrb[18].mxu0 %vm211_vm4, %v180_v26  ;;  %943 = vmatmul.mubr.msk.f32.gmra.mrb[18].mxu1 %vm211_vm4, %v195_v27 }
  0x37   : > { %900 = vmatprep.mubr.msk.f32.mxu0 %vm992_vm1, %v993_v6  ;;  %945 = vmatprep.mubr.msk.f32.mxu1 %vm992_vm1, %v993_v6 }
  0x3a   : > { %901 = vmatmul.mubr.msk.f32.gmra.mrb[20].mxu0 %vm211_vm4, %v181_v28  ;;  %946 = vmatmul.mubr.msk.f32.gmra.mrb[20].mxu1 %vm211_vm4, %v196_v29 }
  0x3b   : > { %903 = vmatprep.mubr.msk.f32.mxu0 %vm992_vm1, %v993_v6  ;;  %948 = vmatprep.mubr.msk.f32.mxu1 %vm992_vm1, %v993_v6 }
  0x3e   : > { %904 = vmatmul.mubr.msk.f32.gmra.mrb[22].mxu0 %vm211_vm4, %v182_v30  ;;  %949 = vmatmul.mubr.msk.f32.gmra.mrb[22].mxu1 %vm211_vm4, %v197_v31 }
  0x3f   : > { %906 = vmatprep.mubr.msk.f32.mxu0 %vm992_vm1, %v993_v6  ;;  %951 = vmatprep.mubr.msk.f32.mxu1 %vm992_vm1, %v993_v6 }
  0x42   : > { %907 = vmatmul.mubr.msk.f32.gmra.mrb[24].mxu0 %vm211_vm4, %v183_v32  ;;  %952 = vmatmul.mubr.msk.f32.gmra.mrb[24].mxu1 %vm211_vm4, %v198_v33 }
  0x43   : > { %909 = vmatprep.mubr.msk.f32.mxu0 %vm992_vm1, %v993_v6  ;;  %954 = vmatprep.mubr.msk.f32.mxu1 %vm992_vm1, %v993_v6 }
  0x46   : > { %910 = vmatmul.mubr.msk.f32.gmra.mrb[26].mxu0 %vm211_vm4, %v184_v34  ;;  %955 = vmatmul.mubr.msk.f32.gmra.mrb[26].mxu1 %vm211_vm4, %v199_v35 }
  0x47   : > { %912 = vmatprep.mubr.msk.f32.mxu0 %vm992_vm1, %v993_v6 }
  0x4a   : > { %913 = vmatmul.mubr.msk.f32.gmra.mrb[28].mxu0 %vm211_vm4, %v185_v36 }
  0xe5   : > { %v369_v37 = vpop.f32.mrb[0].mxu0  ;;  %v1162_v39 = vpop.f32.mrb[0].mxu1 }
  0xe6   : > { %v872_v38 = vpop.f32.mrb[1].mxu0  ;;  %v917_v40 = vpop.f32.mrb[1].mxu1  ;;  %v1183_v0 = vadd.f32 %v1177_v60, %v369_v37 }
  0xe9   : > { %v374_v41 = vpop.f32.mrb[2].mxu0  ;;  %v1164_v43 = vpop.f32.mrb[2].mxu1 }
  0xea   : > { %v875_v42 = vpop.f32.mrb[3].mxu0  ;;  %v920_v44 = vpop.f32.mrb[3].mxu1  ;;  %v1180_v62 = vadd.f32 %v1177_v60, %v374_v41 }
  0xec   : > { %v513_v5 = vadd.f32 %v1180_v62, %v1183_v0 }
  0xed   : > { %v379_v45 = vpop.f32.mrb[4].mxu0  ;;  %v1166_v47 = vpop.f32.mrb[4].mxu1 }
  0xee   : > { %v878_v46 = vpop.f32.mrb[5].mxu0  ;;  %v923_v48 = vpop.f32.mrb[5].mxu1  ;;  %v1186_v1 = vadd.f32 %v1177_v60, %v379_v45 }
  0xf0   : > { %v514_v8 = vadd.f32 %v513_v5, %v1186_v1 }
  0xf1   : > { %v384_v49 = vpop.f32.mrb[6].mxu0  ;;  %v1168_v51 = vpop.f32.mrb[6].mxu1 }
  0xf2   : > { %v881_v50 = vpop.f32.mrb[7].mxu0  ;;  %v926_v52 = vpop.f32.mrb[7].mxu1  ;;  %v1193_v6 = vadd.f32 %v1177_v60, %v384_v49 }
  0xf4   : > { %v515_v13 = vadd.f32 %v514_v8, %v1193_v6  ;;  %v445_v8 = vadd.f32 %v1177_v60, %v1162_v39 }
  0xf5   : > { %v389_v53 = vpop.f32.mrb[8].mxu0  ;;  %v1170_v55 = vpop.f32.mrb[8].mxu1 }
  0xf6   : > { %v884_v54 = vpop.f32.mrb[9].mxu0  ;;  %v929_v56 = vpop.f32.mrb[9].mxu1  ;;  %v1197_v9 = vadd.f32 %v1177_v60, %v389_v53 }
  0xf8   : > { %v516_v16 = vadd.f32 %v515_v13, %v1197_v9 }
  0xf9   : > { %v394_v57 = vpop.f32.mrb[10].mxu0  ;;  %v1172_v59 = vpop.f32.mrb[10].mxu1 }
  0xfa   : > { %v887_v58 = vpop.f32.mrb[11].mxu0  ;;  %v932_v61 = vpop.f32.mrb[11].mxu1  ;;  %v1203_v14 = vadd.f32 %v1177_v60, %v394_v57  ;;  %v470_v39 = vadd.f32 %v1177_v60, %v1172_v59 }
  0xfc   : > { %v517_v21 = vadd.f32 %v516_v16, %v1203_v14 }
  0xfd   : > { %v399_v63 = vpop.f32.mrb[12].mxu0  ;;  %v1188_v3 = vpop.f32.mrb[12].mxu1 }
  0xfe   : > { %v890_v2 = vpop.f32.mrb[13].mxu0  ;;  %v935_v4 = vpop.f32.mrb[13].mxu1  ;;  %v1207_v17 = vadd.f32 %v1177_v60, %v399_v63 }
 0x100   : > { %v518_v24 = vadd.f32 %v517_v21, %v1207_v17  ;;  %v465_v21 = vadd.f32 %v1177_v60, %v1170_v55 }
 0x101   : > { %v404_v7 = vpop.f32.mrb[14].mxu0  ;;  %v1199_v11 = vpop.f32.mrb[14].mxu1 }
 0x102   : > { %v893_v10 = vpop.f32.mrb[15].mxu0  ;;  %v938_v12 = vpop.f32.mrb[15].mxu1  ;;  %v1211_v22 = vadd.f32 %v1177_v60, %v404_v7 }
 0x103   : > { %v450_v12 = vadd.f32 %v1177_v60, %v1164_v43  ;;  %v475_v43 = vadd.f32 %v1177_v60, %v1188_v3 }
 0x104   : > { %v519_v29 = vadd.f32 %v518_v24, %v1211_v22 }
 0x105   : > { %v409_v15 = vpop.f32.mrb[16].mxu0  ;;  %v484_v19 = vpop.f32.mrb[16].mxu1 }
 0x106   : > { %v896_v18 = vpop.f32.mrb[17].mxu0  ;;  %v941_v20 = vpop.f32.mrb[17].mxu1  ;;  %v1215_v25 = vadd.f32 %v1177_v60, %v409_v15  ;;  %v455_v15 = vadd.f32 %v1177_v60, %v1166_v47  ;;  %v480_v47 = vadd.f32 %v1177_v60, %v1199_v11 }
 0x107   : > { %v460_v18 = vadd.f32 %v1177_v60, %v1168_v51  ;;  %v485_v51 = vadd.f32 %v1177_v60, %v484_v19 }
 0x108   : > { %v520_v32 = vadd.f32 %v519_v29, %v1215_v25 }
 0x109   : > { %v414_v23 = vpop.f32.mrb[18].mxu0  ;;  %v489_v27 = vpop.f32.mrb[18].mxu1 }
 0x10a   : > { %v899_v26 = vpop.f32.mrb[19].mxu0  ;;  %v944_v28 = vpop.f32.mrb[19].mxu1  ;;  %v1219_v30 = vadd.f32 %v1177_v60, %v414_v23 }
 0x10c   : > { %v521_v37 = vadd.f32 %v520_v32, %v1219_v30  ;;  %v490_v32 = vadd.f32 %v1177_v60, %v489_v27 }
 0x10d   : > { %v419_v31 = vpop.f32.mrb[20].mxu0  ;;  %v494_v35 = vpop.f32.mrb[20].mxu1 }
 0x10e   : > { %v1223_v33 = vadd.f32 %v1177_v60, %v419_v31  ;;  %v902_v34 = vpop.f32.mrb[21].mxu0  ;;  %v947_v36 = vpop.f32.mrb[21].mxu1 }
 0x10f   : > { %v495_v34 = vadd.f32 %v1177_v60, %v494_v35 }
 0x110   : > { %v522_v40 = vadd.f32 %v521_v37, %v1223_v33 }
 0x111   : > { %v424_v38 = vpop.f32.mrb[22].mxu0  ;;  %v499_v44 = vpop.f32.mrb[22].mxu1 }
 0x112   : > { %v425_v41 = vadd.f32 %v1177_v60, %v424_v38  ;;  %v905_v42 = vpop.f32.mrb[23].mxu0  ;;  %v950_v45 = vpop.f32.mrb[23].mxu1  ;;  %v500_v37 = vadd.f32 %v1177_v60, %v499_v44 }
 0x114   : > { %v523_v46 = vadd.f32 %v522_v40, %v425_v41 }
 0x115   : > { %v429_v48 = vpop.f32.mrb[24].mxu0  ;;  %v504_v52 = vpop.f32.mrb[24].mxu1 }
 0x116   : > { %v430_v49 = vadd.f32 %v1177_v60, %v429_v48  ;;  %v908_v50 = vpop.f32.mrb[25].mxu0  ;;  %v953_v53 = vpop.f32.mrb[25].mxu1  ;;  %v505_v38 = vadd.f32 %v1177_v60, %v504_v52 }
 0x118   : > { %v524_v54 = vadd.f32 %v523_v46, %v430_v49 }
 0x119   : > { %v434_v56 = vpop.f32.mrb[26].mxu0  ;;  %v509_v61 = vpop.f32.mrb[26].mxu1 }
 0x11a   : > { %v435_v57 = vadd.f32 %v1177_v60, %v434_v56  ;;  %v911_v58 = vpop.f32.mrb[27].mxu0  ;;  %v956_v63 = vpop.f32.mrb[27].mxu1  ;;  %v510_v59 = vadd.f32 %v1177_v60, %v509_v61 }
 0x11c   : > { %v525_v2 = vadd.f32 %v524_v54, %v435_v57  ;;  %v541_v11 = vsel %vm540_vm5, %v510_v59, 0.0 }
 0x11d   : > { %v439_v4 = vpop.f32.mrb[28].mxu0 }
 0x11e   : > { %v440_v5 = vadd.f32 %v1177_v60, %v439_v4  ;;  %v914_v7 = vpop.f32.mrb[29].mxu0 }
 0x120   : > { %v526_v10 = vadd.f32 %v525_v2, %v440_v5 }
 0x122   : > { %v527_v13 = vadd.f32 %v526_v10, %v445_v8 }
 0x124   : > { %v528_v16 = vadd.f32 %v527_v13, %v450_v12 }
 0x126   : > { %v529_v20 = vadd.f32 %v528_v16, %v455_v15 }
 0x128   : > { %v530_v23 = vadd.f32 %v529_v20, %v460_v18 }
 0x12a   : > { %v531_v24 = vadd.f32 %v530_v23, %v465_v21 }
 0x12c   : > { %v532_v26 = vadd.f32 %v531_v24, %v470_v39 }
 0x12e   : > { %v533_v28 = vadd.f32 %v532_v26, %v475_v43 }
 0x130   : > { %v534_v29 = vadd.f32 %v533_v28, %v480_v47 }
 0x132   : > { %v535_v31 = vadd.f32 %v534_v29, %v485_v51 }
 0x134   : > { %v536_v55 = vadd.f32 %v535_v31, %v490_v32 }
 0x136   : > { %v537_v36 = vadd.f32 %v536_v55, %v495_v34 }
 0x138   : > { %v538_v3 = vadd.f32 %v537_v36, %v500_v37 }
 0x13a   : > { %v539_v40 = vadd.f32 %v538_v3, %v505_v38 }
 0x13c   : > { %v542_v42 = vadd.f32 %v541_v11, %v539_v40 }
 0x13e   : > { %v543_v19 = vrot.slane %v542_v42, 4 }
 0x140   : > { %v544_v45 = vadd.f32 %v543_v19, %v542_v42 }
 0x142   : > { %v545_v46 = vrot.slane %v544_v45, 2 }
 0x144   : > { %v546_v27 = vadd.f32 %v545_v46, %v544_v45 }
 0x146   : > { %v547_v48 = vrot.slane %v546_v27, 1 }
 0x148   : > { %v548_v50 = vadd.f32 %v547_v48, %v546_v27 }
 0x14a   : > { %v550_v35 = vmul.f32 0.0044444446, %v548_v50 }
 0x14c   : > { %v1255_v53 = vsub.f32 %v1183_v0, %v550_v35  ;;  %v1258_v44 = vsub.f32 %v1180_v62, %v550_v35  ;;  %v1261_v54 = vsub.f32 %v1223_v33, %v550_v35  ;;  %v1263_v60 = vsub.f32 %v425_v41, %v550_v35 }
 0x14d   : > { %v1265_v52 = vsub.f32 %v430_v49, %v550_v35  ;;  %v1267_v56 = vsub.f32 %v435_v57, %v550_v35  ;;  %v1269_v58 = vsub.f32 %v440_v5, %v550_v35  ;;  %v1271_v61 = vsub.f32 %v445_v8, %v550_v35 }
 0x14e   : > { %v1273_v63 = vsub.f32 %v450_v12, %v550_v35  ;;  %v1275_v0 = vsub.f32 %v455_v15, %v550_v35  ;;  %v1277_v2 = vsub.f32 %v460_v18, %v550_v35  ;;  %v1279_v62 = vsub.f32 %v465_v21, %v550_v35 }
 0x14f   : > { %v1281_v33 = vsub.f32 %v470_v39, %v550_v35  ;;  %v1283_v41 = vsub.f32 %v475_v43, %v550_v35  ;;  %v1285_v49 = vsub.f32 %v480_v47, %v550_v35  ;;  %v1287_v57 = vsub.f32 %v485_v51, %v550_v35 }
 0x150   : > { %v1289_v4 = vsub.f32 %v490_v32, %v550_v35  ;;  %v1291_v5 = vsub.f32 %v495_v34, %v550_v35  ;;  %v1293_v7 = vsub.f32 %v500_v37, %v550_v35  ;;  %v1295_v8 = vsub.f32 %v505_v38, %v550_v35 }
 0x151   : > { %v1297_v10 = vsub.f32 %v510_v59, %v550_v35  ;;  %v1300_v12 = vsub.f32 %v1186_v1, %v550_v35  ;;  %v580_v13 = vmul.f32 %v1255_v53, %v1255_v53  ;;  %v581_v15 = vmul.f32 %v1258_v44, %v1258_v44 }
 0x152   : > { %v1307_v16 = vsub.f32 %v1193_v6, %v550_v35  ;;  %v1310_v18 = vsub.f32 %v1197_v9, %v550_v35  ;;  %v1317_v23 = vsub.f32 %v1203_v14, %v550_v35  ;;  %v1323_v43 = vsub.f32 %v1207_v17, %v550_v35 }
 0x153   : > { %v582_v20 = vmul.f32 %v1300_v12, %v1300_v12  ;;  %v608_v21 = vmul.f32 %v1297_v10, %v1297_v10  ;;  %v609_v1 = vadd.f32 %v581_v15, %v580_v13  ;;  %v1328_v47 = vsub.f32 %v1211_v22, %v550_v35 }
 0x154   : > { %v583_v39 = vmul.f32 %v1307_v16, %v1307_v16  ;;  %v584_v9 = vmul.f32 %v1310_v18, %v1310_v18  ;;  %v585_v14 = vmul.f32 %v1317_v23, %v1317_v23  ;;  %v1333_v29 = vsub.f32 %v1215_v25, %v550_v35 }
 0x155   : > { %v610_v24 = vadd.f32 %v609_v1, %v582_v20  ;;  %v636_v6 = vsel %vm540_vm5, %v608_v21, 0.0  ;;  %v586_v51 = vmul.f32 %v1323_v43, %v1323_v43  ;;  %v1338_v17 = vsub.f32 %v1219_v30, %v550_v35 }
 0x156   : > { %v587_v32 = vmul.f32 %v1328_v47, %v1328_v47  ;;  %v588_v22 = vmul.f32 %v1333_v29, %v1333_v29  ;;  %v590_v36 = vmul.f32 %v1261_v54, %v1261_v54  ;;  %v591_v30 = vmul.f32 %v1263_v60, %v1263_v60 }
 0x157   : > { %v611_v26 = vadd.f32 %v610_v24, %v583_v39  ;;  %v589_v59 = vmul.f32 %v1338_v17, %v1338_v17  ;;  %v592_v38 = vmul.f32 %v1265_v52, %v1265_v52  ;;  %v593_v40 = vmul.f32 %v1267_v56, %v1267_v56 }
 0x158   : > { %v594_v19 = vmul.f32 %v1269_v58, %v1269_v58  ;;  %v595_v46 = vmul.f32 %v1271_v61, %v1271_v61  ;;  %v596_v48 = vmul.f32 %v1273_v63, %v1273_v63  ;;  %v597_v35 = vmul.f32 %v1275_v0, %v1275_v0 }
 0x159   : > { %v612_v28 = vadd.f32 %v611_v26, %v584_v9  ;;  %v598_v15 = vmul.f32 %v1277_v2, %v1277_v2  ;;  %v599_v21 = vmul.f32 %v1279_v62, %v1279_v62  ;;  %v600_v39 = vmul.f32 %v1281_v33, %v1281_v33 }
 0x15a   : > { %v601_v9 = vmul.f32 %v1283_v41, %v1283_v41 }
 0x15b   : > { %v613_v31 = vadd.f32 %v612_v28, %v585_v14  ;;  %v602_v14 = vmul.f32 %v1285_v49, %v1285_v49 }
 0x15d   : > { %v614_v55 = vadd.f32 %v613_v31, %v586_v51  ;;  %v603_v51 = vmul.f32 %v1287_v57, %v1287_v57 }
 0x15f   : > { %v615_v34 = vadd.f32 %v614_v55, %v587_v32  ;;  %v604_v32 = vmul.f32 %v1289_v4, %v1289_v4 }
 0x161   : > { %v616_v25 = vadd.f32 %v615_v34, %v588_v22  ;;  %v605_v22 = vmul.f32 %v1291_v5, %v1291_v5 }
 0x163   : > { %v617_v37 = vadd.f32 %v616_v25, %v589_v59  ;;  %v606_v59 = vmul.f32 %v1293_v7, %v1293_v7 }
 0x165   : > { %v618_v3 = vadd.f32 %v617_v37, %v590_v36  ;;  %v607_v36 = vmul.f32 %v1295_v8, %v1295_v8 }
 0x167   : > { %v619_v11 = vadd.f32 %v618_v3, %v591_v30 }
 0x169   : > { %v620_v42 = vadd.f32 %v619_v11, %v592_v38 }
 0x16b   : > { %v621_v45 = vadd.f32 %v620_v42, %v593_v40 }
 0x16d   : > { %v622_v27 = vadd.f32 %v621_v45, %v594_v19 }
 0x16f   : > { %v623_v50 = vadd.f32 %v622_v27, %v595_v46 }
 0x171   : > { %v624_v13 = vadd.f32 %v623_v50, %v596_v48 }
 0x173   : > { %v625_v20 = vadd.f32 %v624_v13, %v597_v35 }
 0x175   : > { %v626_v1 = vadd.f32 %v625_v20, %v598_v15 }
 0x177   : > { %v627_v24 = vadd.f32 %v626_v1, %v599_v21 }
 0x179   : > { %v628_v26 = vadd.f32 %v627_v24, %v600_v39 }
 0x17b   : > { %v629_v28 = vadd.f32 %v628_v26, %v601_v9 }
 0x17d   : > { %v630_v31 = vadd.f32 %v629_v28, %v602_v14 }
 0x17f   : > { %v631_v55 = vadd.f32 %v630_v31, %v603_v51 }
 0x181   : > { %v632_v34 = vadd.f32 %v631_v55, %v604_v32 }
 0x183   : > { %v633_v25 = vadd.f32 %v632_v34, %v605_v22 }
 0x185   : > { %v634_v37 = vadd.f32 %v633_v25, %v606_v59 }
 0x187   : > { %v635_v30 = vadd.f32 %v634_v37, %v607_v36 }
 0x189   : > { %v637_v3 = vadd.f32 %v636_v6, %v635_v30 }
 0x18b   : > { %v638_v38 = vrot.slane %v637_v3, 4 }
 0x18d   : > { %v639_v11 = vadd.f32 %v638_v38, %v637_v3 }
 0x18f   : > { %v640_v40 = vrot.slane %v639_v11, 2 }
 0x191   : > { %v641_v42 = vadd.f32 %v640_v40, %v639_v11 }
 0x193   : > { %v642_v19 = vrot.slane %v641_v42, 1 }
 0x195   : > { %v643_v45 = vadd.f32 %v642_v19, %v641_v42 }
 0x197   : > { %v644_v46 = vmul.f32 0.0044444446, %v643_v45 }
 0x199   : > { %v645_v27 = vadd.f32 1e-05, %v644_v46 }
 0x19b   : > { %981 = vrsqrt.f32 %v645_v27 }
 0x1a5   : > { %v982_v48 = vpop.eup %981 }
 0x1a6   : > { %v647_v50 = vmul.f32 %v982_v48, %v1255_v53  ;;  %v648_v35 = vmul.f32 %v982_v48, %v1258_v44  ;;  %v649_v13 = vmul.f32 %v982_v48, %v1300_v12  ;;  %v650_v15 = vmul.f32 %v982_v48, %v1307_v16 }
 0x1a7   : > { %v651_v6 = vmul.f32 %v982_v48, %v1310_v18  ;;  %v652_v20 = vmul.f32 %v982_v48, %v1317_v23  ;;  %v653_v21 = vmul.f32 %v982_v48, %v1323_v43  ;;  %v654_v1 = vmul.f32 %v982_v48, %v1328_v47 }
 0x1a8   : > { %v655_v39 = vmul.f32 %v982_v48, %v1333_v29  ;;  %v656_v24 = vmul.f32 %v982_v48, %v1338_v17  ;;  %v657_v53 = vmul.f32 %v982_v48, %v1261_v54  ;;  %v658_v44 = vmul.f32 %v982_v48, %v1263_v60 }
 0x1a9   : > { %v659_v12 = vmul.f32 %v982_v48, %v1265_v52  ;;  %v660_v16 = vmul.f32 %v982_v48, %v1267_v56  ;;  %v661_v18 = vmul.f32 %v982_v48, %v1269_v58  ;;  %v662_v23 = vmul.f32 %v982_v48, %v1271_v61 }
 0x1aa   : > { %v663_v43 = vmul.f32 %v982_v48, %v1273_v63  ;;  %v664_v47 = vmul.f32 %v982_v48, %v1275_v0  ;;  %v665_v29 = vmul.f32 %v982_v48, %v1277_v2  ;;  %v666_v17 = vmul.f32 %v982_v48, %v1279_v62 }
 0x1ab   : > { %v667_v54 = vmul.f32 %v982_v48, %v1281_v33  ;;  %v668_v60 = vmul.f32 %v982_v48, %v1283_v41  ;;  %v669_v52 = vmul.f32 %v982_v48, %v1285_v49  ;;  %v670_v56 = vmul.f32 %v982_v48, %v1287_v57 }
 0x1ac   : > { %v671_v58 = vmul.f32 %v982_v48, %v1289_v4  ;;  %v672_v61 = vmul.f32 %v982_v48, %v1291_v5  ;;  %v673_v63 = vmul.f32 %v982_v48, %v1293_v7  ;;  %v674_v0 = vmul.f32 %v982_v48, %v1295_v8 }
 0x1ad   : > { %v675_v2 = vmul.f32 %v982_v48, %v1297_v10  ;;  %v676_v62 = vmax.f32 %v647_v50, 0.0  ;;  %v677_v33 = vmax.f32 %v648_v35, 0.0  ;;  %v678_v41 = vmax.f32 %v649_v13, 0.0 }
 0x1ae   : > { %v679_v49 = vmax.f32 %v650_v15, 0.0  ;;  %v680_v57 = vmax.f32 %v651_v6, 0.0  ;;  %v681_v4 = vmax.f32 %v652_v20, 0.0  ;;  %v682_v9 = vmax.f32 %v653_v21, 0.0 }
 0x1af   : > { %v683_v5 = vmax.f32 %v654_v1, 0.0  ;;  %v684_v26 = vmax.f32 %v655_v39, 0.0  ;;  %v685_v14 = vmax.f32 %v656_v24, 0.0  ;;  %v686_v7 = vmax.f32 %v657_v53, 0.0  ;;  %705 = vst [vmem:[%s1411_s30] sm:$0xff] %v676_v62  ;;  %706 = vst [vmem:[%s1411_s30 + $0x8] sm:$0xff] %v677_v33 }
 0x1b0   : > { %707 = vst [vmem:[%s1411_s30 + $0x10] sm:$0xff] %v678_v41  ;;  %v687_v8 = vmax.f32 %v658_v44, 0.0  ;;  %v688_v10 = vmax.f32 %v659_v12, 0.0  ;;  %v689_v28 = vmax.f32 %v660_v16, 0.0  ;;  %v690_v51 = vmax.f32 %v661_v18, 0.0  ;;  %708 = vst [vmem:[%s1411_s30 + $0x18] sm:$0xff] %v679_v49 }
 0x1b1   : > { %709 = vst [vmem:[%s1411_s30 + $0x20] sm:$0xff] %v680_v57  ;;  %710 = vst [vmem:[%s1411_s30 + $0x28] sm:$0xff] %v681_v4  ;;  %v691_v31 = vmax.f32 %v662_v23, 0.0  ;;  %v692_v32 = vmax.f32 %v663_v43, 0.0  ;;  %v693_v55 = vmax.f32 %v664_v47, 0.0  ;;  %v694_v22 = vmax.f32 %v665_v29, 0.0 }
 0x1b2   : > { %711 = vst [vmem:[%s1411_s30 + $0x30] sm:$0xff] %v682_v9  ;;  %712 = vst [vmem:[%s1411_s30 + $0x38] sm:$0xff] %v683_v5  ;;  %v695_v34 = vmax.f32 %v666_v17, 0.0  ;;  %v696_v59 = vmax.f32 %v667_v54, 0.0  ;;  %v697_v25 = vmax.f32 %v668_v60, 0.0  ;;  %v698_v36 = vmax.f32 %v669_v52, 0.0 }
 0x1b3   : > { %713 = vst [vmem:[%s1411_s30 + $0x40] sm:$0xff] %v684_v26  ;;  %714 = vst [vmem:[%s1411_s30 + $0x48] sm:$0xff] %v685_v14  ;;  %v699_v37 = vmax.f32 %v670_v56, 0.0  ;;  %v700_v30 = vmax.f32 %v671_v58, 0.0  ;;  %v701_v3 = vmax.f32 %v672_v61, 0.0  ;;  %v702_v38 = vmax.f32 %v673_v63, 0.0 }
 0x1b4   : > { %715 = vst [vmem:[%s1411_s30 + $0x50] sm:$0xff] %v686_v7  ;;  %716 = vst [vmem:[%s1411_s30 + $0x58] sm:$0xff] %v687_v8  ;;  %v703_v11 = vmax.f32 %v674_v0, 0.0  ;;  %v704_v40 = vmax.f32 %v675_v2, 0.0 }
 0x1b5   : > { %717 = vst [vmem:[%s1411_s30 + $0x60] sm:$0xff] %v688_v10  ;;  %718 = vst [vmem:[%s1411_s30 + $0x68] sm:$0xff] %v689_v28 }
 0x1b6   : > { %719 = vst [vmem:[%s1411_s30 + $0x70] sm:$0xff] %v690_v51  ;;  %720 = vst [vmem:[%s1411_s30 + $0x78] sm:$0xff] %v691_v31 }
 0x1b7   : > { %721 = vst [vmem:[%s1411_s30 + $0x80] sm:$0xff] %v692_v32  ;;  %722 = vst [vmem:[%s1411_s30 + $0x88] sm:$0xff] %v693_v55 }
 0x1b8   : > { %723 = vst [vmem:[%s1411_s30 + $0x90] sm:$0xff] %v694_v22  ;;  %724 = vst [vmem:[%s1411_s30 + $0x98] sm:$0xff] %v695_v34 }
 0x1b9   : > { %725 = vst [vmem:[%s1411_s30 + $0xa0] sm:$0xff] %v696_v59  ;;  %726 = vst [vmem:[%s1411_s30 + $0xa8] sm:$0xff] %v697_v25 }
 0x1ba   : > { %727 = vst [vmem:[%s1411_s30 + $0xb0] sm:$0xff] %v698_v36  ;;  %728 = vst [vmem:[%s1411_s30 + $0xb8] sm:$0xff] %v699_v37 }
 0x1bb   : > { %729 = vst [vmem:[%s1411_s30 + $0xc0] sm:$0xff] %v700_v30  ;;  %730 = vst [vmem:[%s1411_s30 + $0xc8] sm:$0xff] %v701_v3 }
 0x1bc   : > { %731 = vst [vmem:[%s1411_s30 + $0xd0] sm:$0xff] %v702_v38  ;;  %732 = vst [vmem:[%s1411_s30 + $0xd8] sm:$0xff] %v703_v11 }
 0x1bd   : > { %733 = vst [vmem:[%s1411_s30 + $0xe0] sm:$0x1] %v704_v40 }
 0x1be PF: > { %s13_s12 = sadd.s32 1, %s989_s12  }
 0x1bf   : > { %p10_p4 = scmp.ge.s32.totalorder %s13_s12, 4  }
 0x1c1   :  { %12 = sbr.rel (!%p10_p4) target bundleno = 1 (0x1), region = 62 }

// kernel: generator_forward.8
= control target key start
LH: loop header
LB: loop body
LE: loop exit
PB: predicated region body
PF: predicated region fallthrough
CT: control target
= control target key end

     0   :  { %s577_s12 = smov 0   ;;  %s647_s0 = inlined_call_operand.vmem [shape: f32[2,49,72], index: 0, kind: input, shape index: {}]   ;;  %s648_s1 = inlined_call_operand.vmem [shape: f32[72,128], index: 1, kind: input, shape index: {}]   ;;  %s649_s2 = inlined_call_operand.vmem [shape: f32[1,128], index: 2, kind: input, shape index: {}]   ;;  %s650_s3 = inlined_call_operand.vmem [shape: f32[2,49,128], index: 3, kind: output, shape index: {}]  }
   0x1 LB: > { %s438_s13 = sadd.s32 4294967295, %s552_s12   ;;  %p442_p0 = scmp.ge.s32.totalorder %s552_s12, 1  ;;  %s552_s12 = sphi %s577_s12, %s13_s12  }
   0x2   : > { %p137_p1 = scmp.lt.s32.totalorder %s552_s12, 3 }
   0x4   : > { %p138_p2 = pnand %p442_p0, %p137_p1 }
   0x5   : > { %v178_v0 = vld [vmem:[%s648_s1] sm:$0xff] (!%p138_p2)  ;;  %v179_v1 = vld [vmem:[%s648_s1 + $0x8] sm:$0xff] (!%p138_p2)  ;;  %v180_v2 = vld [vmem:[%s648_s1 + $0x10] sm:$0xff] (!%p138_p2)  ;;  %v554_v3 = vmov (!%p138_p2), 0.0|0.0   ;;  %vm555_vm0 = vmmov (!%p138_p2), 0   ;;  %v556_v6 = vmov (!%p138_p2), 0.0  }
   0x6   : > { %141 = sbr.rel (%p138_p2) target bundleno = 324 (0x144), region = 32  ;;  %510 = vmatprep.subr.bf16.mxu0 (!%p138_p2), %v554_v3  ;;  %v511_v4 = vpack.c.bf16 (!%p138_p2), %v179_v1, %v178_v0  ;;  %v181_v5 = vld [vmem:[%s648_s1 + $0x18] sm:$0xff] (!%p138_p2)  ;;  %522 = vmatprep.subr.bf16.mxu1 (!%p138_p2), %v554_v3  ;;  %p161_p3 = scmp.lt.s32.totalorder (!%p138_p2), %s438_s13, 1  ;;  %v182_v8 = vld [vmem:[%s648_s1 + $0x20] sm:$0xff] (!%p138_p2)  ;;  %v183_v9 = vld [vmem:[%s648_s1 + $0x28] sm:$0xff] (!%p138_p2)  ;;  %vm194_vm1 = vcmask (!%p138_p2), 588800  }
   0x7   : > { %489 = vmatprep.mubr.msk.f32.mxu0 (!%p138_p2), %vm555_vm0, %v556_v6  ;;  %501 = vmatprep.mubr.msk.f32.mxu1 (!%p138_p2), %vm555_vm0, %v556_v6  ;;  %v514_v7 = vpack.c.bf16 (!%p138_p2), %v181_v5, %v180_v2  ;;  %v517_v10 = vpack.c.bf16 (!%p138_p2), %v183_v9, %v182_v8  ;;  %v184_v11 = vld [vmem:[%s648_s1 + $0x30] sm:$0xff] (!%p138_p2)  ;;  %v185_v12 = vld [vmem:[%s648_s1 + $0x38] sm:$0xff] (!%p138_p2)  ;;  %v186_v14 = vld [vmem:[%s648_s1 + $0x40] sm:$0xff] (!%p138_p2)  ;;  %vm321_vm2 = vcmask (!%p138_p2), 1040384  }
   0x8   : > { %512 = vmatpush3.bf16.msra.mxu0 (!%p138_p2), %v511_v4  ;;  %527 = vmatpush3.bf16.msra.mxu1 (!%p138_p2), %v511_v4  ;;  %v520_v13 = vpack.c.bf16 (!%p138_p2), %v185_v12, %v184_v11  ;;  %v445_v26 = vld [vmem:[%s649_s2] ss:$0 sm:$0xff] (!%p138_p2) }
   0x9   : > { %513 = vmatprep.subr.bf16.mxu0 (!%p138_p2), %v554_v3  ;;  %523 = vmatprep.subr.bf16.mxu1 (!%p138_p2), %v554_v3 }
   0xc   : > { %515 = vmatpush3.bf16.msra.mxu0 (!%p138_p2), %v514_v7  ;;  %528 = vmatpush3.bf16.msra.mxu1 (!%p138_p2), %v514_v7 }
   0xd   : > { %s652_s13 = smov (!%p161_p3, %s438_s13), 1  ;;  %516 = vmatprep.subr.bf16.mxu0 %v554_v3  ;;  %524 = vmatprep.subr.bf16.mxu1 %v554_v3 }
   0xe   : > { %s532_s30 = smul.u32 56, %s652_s13 }
  0x10   : > { %518 = vmatpush3.bf16.msra.mxu0 %v517_v10  ;;  %529 = vmatpush3.bf16.msra.mxu1 %v517_v10  ;;  %s165_s6 = scalar_lea.vmem %s647_s0, %s532_s30  ;;  %s170_s15 = scalar_lea.vmem %s650_s3, %s532_s30 }
  0x11   : > { %519 = vmatprep.subr.bf16.mxu0 %v554_v3  ;;  %525 = vmatprep.subr.bf16.mxu1 %v554_v3  ;;  %v171_v15 = vld [vmem:[%s165_s6] sm:$0xff]  ;;  %v172_v17 = vld [vmem:[%s165_s6 + $0x8] sm:$0xff]  ;;  %v173_v19 = vld [vmem:[%s165_s6 + $0x10] sm:$0xff] }
  0x12   : > { %v175_v16 = vld [vmem:[%s165_s6 + $0x20] sm:$0xff]  ;;  %v176_v18 = vld [vmem:[%s165_s6 + $0x28] sm:$0xff]  ;;  %v177_v20 = vld [vmem:[%s165_s6 + $0x30] sm:$0x1] }
  0x13   : > { %v174_v21 = vld [vmem:[%s165_s6 + $0x18] sm:$0xff] }
  0x14   : > { %521 = vmatpush3.bf16.msra.mxu0 %v520_v13  ;;  %530 = vmatpush3.bf16.msra.mxu1 %v520_v13 }
  0x15   : > { %487 = vmatprep.subr.mxu0 %v556_v6  ;;  %526 = vmatprep.subr.mxu1 %v556_v6 }
  0x18   : > { %488 = vmatpush3.msra.mxu0 %v186_v14  ;;  %531 = vmatpush3.msra.mxu1 %v186_v14 }
  0x19   : > { %490 = vmatmul.mubr.msk.f32.vlgmr.msra.gmra.mrb[0].mxu0 %vm194_vm1, %v171_v15  ;;  %502 = vmatmul.mubr.msk.f32.vlgmr.msra.gmra.mrb[0].mxu1 %vm194_vm1, %v175_v16 }
  0x1a   : > { %492 = vmatprep.mubr.msk.f32.mxu0 %vm555_vm0, %v556_v6  ;;  %504 = vmatprep.mubr.msk.f32.mxu1 %vm555_vm0, %v556_v6 }
  0x1d   : > { %493 = vmatmul.mubr.msk.f32.gmra.mrb[2].mxu0 %vm194_vm1, %v172_v17  ;;  %505 = vmatmul.mubr.msk.f32.gmra.mrb[2].mxu1 %vm194_vm1, %v176_v18 }
  0x1e   : > { %495 = vmatprep.mubr.msk.f32.mxu0 %vm555_vm0, %v556_v6  ;;  %507 = vmatprep.mubr.msk.f32.mxu1 %vm555_vm0, %v556_v6 }
  0x21   : > { %496 = vmatmul.mubr.msk.f32.gmra.mrb[4].mxu0 %vm194_vm1, %v173_v19  ;;  %508 = vmatmul.mubr.msk.f32.gmra.mrb[4].mxu1 %vm194_vm1, %v177_v20 }
  0x22   : > { %498 = vmatprep.mubr.msk.f32.mxu0 %vm555_vm0, %v556_v6 }
  0x25   : > { %499 = vmatmul.mubr.msk.f32.gmra.mrb[6].mxu0 %vm194_vm1, %v174_v21 }
  0xec   : > { %v282_v22 = vpop.f32.mrb[0].mxu0  ;;  %v302_v23 = vpop.f32.mrb[0].mxu1 }
  0xed   : > { %v491_v24 = vpop.f32.mrb[1].mxu0  ;;  %v503_v25 = vpop.f32.mrb[1].mxu1  ;;  %v283_v29 = vadd.f32 %v445_v26, %v282_v22  ;;  %v303_v44 = vadd.f32 %v445_v26, %v302_v23 }
  0xf0   : > { %v287_v27 = vpop.f32.mrb[2].mxu0  ;;  %v307_v28 = vpop.f32.mrb[2].mxu1 }
  0xf1   : > { %v288_v30 = vadd.f32 %v445_v26, %v287_v27  ;;  %v494_v31 = vpop.f32.mrb[3].mxu0  ;;  %v506_v32 = vpop.f32.mrb[3].mxu1  ;;  %v308_v46 = vadd.f32 %v445_v26, %v307_v28 }
  0xf3   : > { %v316_v33 = vadd.f32 %v288_v30, %v283_v29 }
  0xf4   : > { %v292_v34 = vpop.f32.mrb[4].mxu0  ;;  %v312_v35 = vpop.f32.mrb[4].mxu1 }
  0xf5   : > { %v293_v36 = vadd.f32 %v445_v26, %v292_v34  ;;  %v497_v37 = vpop.f32.mrb[5].mxu0  ;;  %v509_v38 = vpop.f32.mrb[5].mxu1  ;;  %v313_v43 = vadd.f32 %v445_v26, %v312_v35 }
  0xf7   : > { %v317_v39 = vadd.f32 %v316_v33, %v293_v36  ;;  %v322_v48 = vsel %vm321_vm2, %v313_v43, 0.0 }
  0xf8   : > { %v297_v40 = vpop.f32.mrb[6].mxu0 }
  0xf9   : > { %v298_v41 = vadd.f32 %v445_v26, %v297_v40  ;;  %v500_v42 = vpop.f32.mrb[7].mxu0 }
  0xfb   : > { %v318_v45 = vadd.f32 %v317_v39, %v298_v41 }
  0xfd   : > { %v319_v47 = vadd.f32 %v318_v45, %v303_v44 }
  0xff   : > { %v320_v49 = vadd.f32 %v319_v47, %v308_v46 }
 0x101   : > { %v323_v50 = vadd.f32 %v322_v48, %v320_v49 }
 0x103   : > { %v324_v51 = vrot.slane %v323_v50, 4 }
 0x105   : > { %v325_v52 = vadd.f32 %v324_v51, %v323_v50 }
 0x107   : > { %v326_v53 = vrot.slane %v325_v52, 2 }
 0x109   : > { %v327_v54 = vadd.f32 %v326_v53, %v325_v52 }
 0x10b   : > { %v328_v55 = vrot.slane %v327_v54, 1 }
 0x10d   : > { %v329_v56 = vadd.f32 %v328_v55, %v327_v54 }
 0x10f   : > { %v331_v57 = vmul.f32 0.020408163, %v329_v56 }
 0x111   : > { %v332_v58 = vsub.f32 %v283_v29, %v331_v57  ;;  %v333_v59 = vsub.f32 %v288_v30, %v331_v57  ;;  %v334_v60 = vsub.f32 %v293_v36, %v331_v57  ;;  %v335_v61 = vsub.f32 %v298_v41, %v331_v57 }
 0x112   : > { %v336_v62 = vsub.f32 %v303_v44, %v331_v57  ;;  %v337_v63 = vsub.f32 %v308_v46, %v331_v57  ;;  %v338_v0 = vsub.f32 %v313_v43, %v331_v57 }
 0x113   : > { %v339_v1 = vmul.f32 %v332_v58, %v332_v58  ;;  %v340_v2 = vmul.f32 %v333_v59, %v333_v59  ;;  %v341_v3 = vmul.f32 %v334_v60, %v334_v60  ;;  %v342_v5 = vmul.f32 %v335_v61, %v335_v61 }
 0x114   : > { %v343_v7 = vmul.f32 %v336_v62, %v336_v62  ;;  %v345_v9 = vmul.f32 %v338_v0, %v338_v0  ;;  %v344_v10 = vmul.f32 %v337_v63, %v337_v63 }
 0x115   : > { %v346_v4 = vadd.f32 %v340_v2, %v339_v1 }
 0x116   : > { %v351_v13 = vsel %vm321_vm2, %v345_v9, 0.0 }
 0x117   : > { %v347_v6 = vadd.f32 %v346_v4, %v341_v3 }
 0x119   : > { %v348_v8 = vadd.f32 %v347_v6, %v342_v5 }
 0x11b   : > { %v349_v11 = vadd.f32 %v348_v8, %v343_v7 }
 0x11d   : > { %v350_v12 = vadd.f32 %v349_v11, %v344_v10 }
 0x11f   : > { %v352_v14 = vadd.f32 %v351_v13, %v350_v12 }
 0x121   : > { %v353_v15 = vrot.slane %v352_v14, 4 }
 0x123   : > { %v354_v16 = vadd.f32 %v353_v15, %v352_v14 }
 0x125   : > { %v355_v17 = vrot.slane %v354_v16, 2 }
 0x127   : > { %v356_v18 = vadd.f32 %v355_v17, %v354_v16 }
 0x129   : > { %v357_v19 = vrot.slane %v356_v18, 1 }
 0x12b   : > { %v358_v20 = vadd.f32 %v357_v19, %v356_v18 }
 0x12d   : > { %v359_v21 = vmul.f32 0.020408163, %v358_v20 }
 0x12f   : > { %v360_v22 = vadd.f32 1e-05, %v359_v21 }
 0x131   : > { %544 = vrsqrt.f32 %v360_v22 }
 0x13b   : > { %v545_v23 = vpop.eup %544 }
 0x13c   : > { %v362_v24 = vmul.f32 %v545_v23, %v332_v58  ;;  %v363_v25 = vmul.f32 %v545_v23, %v333_v59  ;;  %v364_v26 = vmul.f32 %v545_v23, %v334_v60  ;;  %v365_v27 = vmul.f32 %v545_v23, %v335_v61 }
 0x13d   : > { %v366_v28 = vmul.f32 %v545_v23, %v336_v62  ;;  %v367_v29 = vmul.f32 %v545_v23, %v337_v63  ;;  %v368_v30 = vmul.f32 %v545_v23, %v338_v0 }
 0x13e   : > { %v369_v31 = vmax.f32 %v362_v24, 0.0  ;;  %v370_v32 = vmax.f32 %v363_v25, 0.0  ;;  %v371_v33 = vmax.f32 %v364_v26, 0.0  ;;  %v372_v34 = vmax.f32 %v365_v27, 0.0 }
 0x13f   : > { %v373_v35 = vmax.f32 %v366_v28, 0.0  ;;  %v374_v36 = vmax.f32 %v367_v29, 0.0  ;;  %v375_v37 = vmax.f32 %v368_v30, 0.0 }
 0x140   : > { %376 = vst [vmem:[%s170_s15] sm:$0xff] %v369_v31  ;;  %377 = vst [vmem:[%s170_s15 + $0x8] sm:$0xff] %v370_v32 }
 0x141   : > { %378 = vst [vmem:[%s170_s15 + $0x10] sm:$0xff] %v371_v33  ;;  %379 = vst [vmem:[%s170_s15 + $0x18] sm:$0xff] %v372_v34 }
 0x142   : > { %380 = vst [vmem:[%s170_s15 + $0x20] sm:$0xff] %v373_v35  ;;  %381 = vst [vmem:[%s170_s15 + $0x28] sm:$0xff] %v374_v36 }
 0x143   : > { %382 = vst [vmem:[%s170_s15 + $0x30] sm:$0x1] %v375_v37 }
 0x144 PF: > { %s13_s12 = sadd.s32 1, %s552_s12  }
 0x145   : > { %p10_p4 = scmp.ge.s32.totalorder %s13_s12, 4  }
 0x147   :  { %12 = sbr.rel (!%p10_p4) target bundleno = 1 (0x1), region = 62 }

// kernel: generator_forward.9
= control target key start
LH: loop header
LB: loop body
LE: loop exit
PB: predicated region body
PF: predicated region fallthrough
CT: control target
= control target key end

     0   :  { %s470_s12 = smov 0   ;;  %s574_s0 = inlined_call_operand.vmem [shape: f32[2,9,144], index: 0, kind: input, shape index: {}]   ;;  %s575_s1 = inlined_call_operand.vmem [shape: f32[144,128], index: 1, kind: input, shape index: {}]   ;;  %s576_s2 = inlined_call_operand.vmem [shape: f32[1,128], index: 2, kind: input, shape index: {}]   ;;  %s577_s3 = inlined_call_operand.vmem [shape: f32[2,9,128], index: 3, kind: output, shape index: {}]  }
   0x1 LB: > { %s369_s13 = sadd.s32 4294967295, %s447_s12   ;;  %p373_p0 = scmp.ge.s32.totalorder %s447_s12, 1  ;;  %s447_s12 = sphi %s470_s12, %s13_s12  }
   0x2   : > { %p137_p1 = scmp.lt.s32.totalorder %s447_s12, 3 }
   0x4   : > { %p138_p2 = pnand %p373_p0, %p137_p1 }
   0x5   : > { %v175_v0 = vld [vmem:[%s575_s1] sm:$0xff] (!%p138_p2)  ;;  %v176_v1 = vld [vmem:[%s575_s1 + $0x8] sm:$0xff] (!%p138_p2)  ;;  %v177_v2 = vld [vmem:[%s575_s1 + $0x10] sm:$0xff] (!%p138_p2)  ;;  %p161_p3 = scmp.lt.s32.totalorder (!%p138_p2), %s369_s13, 1  ;;  %v449_v3 = vmov (!%p138_p2), 0.0|0.0   ;;  %vm200_vm0 = vcmask (!%p138_p2), 130048  }
   0x6   : > { %141 = sbr.rel (%p138_p2) target bundleno = 313 (0x139), region = 32  ;;  %385 = vmatprep.subr.bf16.mxu0 (!%p138_p2), %v449_v3  ;;  %412 = vmatprep.subr.bf16.mxu1 (!%p138_p2), %v449_v3  ;;  %v386_v4 = vpack.c.bf16 (!%p138_p2), %v176_v1, %v175_v0  ;;  %v178_v5 = vld [vmem:[%s575_s1 + $0x18] sm:$0xff] (!%p138_p2)  ;;  %v179_v7 = vld [vmem:[%s575_s1 + $0x20] sm:$0xff] (!%p138_p2)  ;;  %v180_v8 = vld [vmem:[%s575_s1 + $0x28] sm:$0xff] (!%p138_p2)  ;;  %vm282_vm1 = vcmask (!%p138_p2), 1040384  }
   0x7   : > { %v389_v6 = vpack.c.bf16 (!%p138_p2), %v178_v5, %v177_v2  ;;  %v392_v11 = vpack.c.bf16 (!%p138_p2), %v180_v8, %v179_v7  ;;  %v181_v12 = vld [vmem:[%s575_s1 + $0x30] sm:$0xff] (!%p138_p2)  ;;  %v182_v13 = vld [vmem:[%s575_s1 + $0x38] sm:$0xff] (!%p138_p2)  ;;  %v183_v15 = vld [vmem:[%s575_s1 + $0x40] sm:$0xff] (!%p138_p2) }
   0x8   : > { %387 = vmatpush1.bf16.msra.mxu0 (!%p138_p2), %v386_v4  ;;  %421 = vmatpush1.bf16.msra.mxu1 (!%p138_p2), %v386_v4  ;;  %v395_v14 = vpack.c.bf16 (!%p138_p2), %v182_v13, %v181_v12  ;;  %v184_v16 = vld [vmem:[%s575_s1 + $0x48] sm:$0xff] (!%p138_p2)  ;;  %v185_v18 = vld [vmem:[%s575_s1 + $0x50] sm:$0xff] (!%p138_p2)  ;;  %v186_v19 = vld [vmem:[%s575_s1 + $0x58] sm:$0xff] (!%p138_p2) }
   0x9   : > { %388 = vmatprep.subr.bf16.mxu0 (!%p138_p2), %v449_v3  ;;  %413 = vmatprep.subr.bf16.mxu1 (!%p138_p2), %v449_v3  ;;  %v398_v17 = vpack.c.bf16 (!%p138_p2), %v184_v16, %v183_v15  ;;  %v401_v20 = vpack.c.bf16 (!%p138_p2), %v186_v19, %v185_v18  ;;  %v187_v21 = vld [vmem:[%s575_s1 + $0x60] sm:$0xff] (!%p138_p2)  ;;  %v188_v22 = vld [vmem:[%s575_s1 + $0x68] sm:$0xff] (!%p138_p2)  ;;  %v189_v24 = vld [vmem:[%s575_s1 + $0x70] sm:$0xff] (!%p138_p2) }
   0xa   : > { %v404_v23 = vpack.c.bf16 (!%p138_p2), %v188_v22, %v187_v21  ;;  %v190_v25 = vld [vmem:[%s575_s1 + $0x78] sm:$0xff] (!%p138_p2)  ;;  %v191_v27 = vld [vmem:[%s575_s1 + $0x80] sm:$0xff] (!%p138_p2)  ;;  %v192_v28 = vld [vmem:[%s575_s1 + $0x88] sm:$0xff] (!%p138_p2) }
   0xb   : > { %v407_v26 = vpack.c.bf16 (!%p138_p2), %v190_v25, %v189_v24  ;;  %v410_v29 = vpack.c.bf16 (!%p138_p2), %v192_v28, %v191_v27  ;;  %v378_v32 = vld [vmem:[%s576_s2] ss:$0 sm:$0xff] (!%p138_p2) }
   0xc   : > { %390 = vmatpush1.bf16.msra.mxu0 (!%p138_p2), %v389_v6  ;;  %422 = vmatpush1.bf16.msra.mxu1 (!%p138_p2), %v389_v6 }
   0xd   : > { %s579_s13 = smov (!%p161_p3, %s369_s13), 1  ;;  %391 = vmatprep.subr.bf16.mxu0 %v449_v3  ;;  %414 = vmatprep.subr.bf16.mxu1 %v449_v3 }
   0xe   : > { %s383_s26 = sshll.u32 %s579_s13, 5 }
   0xf   : > { %s506_s29 = scalar_lea.vmem %s574_s0, %s383_s26 }
  0x10   : > { %v172_v9 = vld [vmem:[%s506_s29 + $0x8] sm:$0xff]  ;;  %v174_v10 = vld [vmem:[%s506_s29 + $0x18] sm:$0x1]  ;;  %393 = vmatpush1.bf16.msra.mxu0 %v392_v11  ;;  %423 = vmatpush1.bf16.msra.mxu1 %v392_v11  ;;  %v171_v30 = vld [vmem:[%s506_s29] sm:$0xff] }
  0x11   : > { %379 = vmatprep.mubr.msk.f32.mxu0 %vm200_vm0, %v172_v9  ;;  %380 = vmatprep.mubr.msk.f32.mxu1 %vm200_vm0, %v174_v10  ;;  %v173_v31 = vld [vmem:[%s506_s29 + $0x10] sm:$0x1]  ;;  %s384_s29 = sshll.u32 %s579_s13, 4 }
  0x12   : > { %394 = vmatprep.subr.bf16.mxu0 %v449_v3  ;;  %415 = vmatprep.subr.bf16.mxu1 %v449_v3  ;;  %s170_s7 = scalar_lea.vmem %s577_s3, %s384_s29 }
  0x14   : > { %396 = vmatpush1.bf16.msra.mxu0 %v395_v14  ;;  %424 = vmatpush1.bf16.msra.mxu1 %v395_v14 }
  0x15   : > { %397 = vmatprep.subr.bf16.mxu0 %v449_v3  ;;  %416 = vmatprep.subr.bf16.mxu1 %v449_v3 }
  0x18   : > { %399 = vmatpush1.bf16.msra.mxu0 %v398_v17  ;;  %425 = vmatpush1.bf16.msra.mxu1 %v398_v17 }
  0x19   : > { %400 = vmatprep.subr.bf16.mxu0 %v449_v3  ;;  %417 = vmatprep.subr.bf16.mxu1 %v449_v3 }
  0x1c   : > { %402 = vmatpush1.bf16.msra.mxu0 %v401_v20  ;;  %426 = vmatpush1.bf16.msra.mxu1 %v401_v20 }
  0x1d   : > { %403 = vmatprep.subr.bf16.mxu0 %v449_v3  ;;  %418 = vmatprep.subr.bf16.mxu1 %v449_v3 }
  0x20   : > { %405 = vmatpush1.bf16.msra.mxu0 %v404_v23  ;;  %427 = vmatpush1.bf16.msra.mxu1 %v404_v23 }
  0x21   : > { %406 = vmatprep.subr.bf16.mxu0 %v449_v3  ;;  %419 = vmatprep.subr.bf16.mxu1 %v449_v3 }
  0x24   : > { %408 = vmatpush1.bf16.msra.mxu0 %v407_v26  ;;  %428 = vmatpush1.bf16.msra.mxu1 %v407_v26 }
  0x25   : > { %409 = vmatprep.subr.bf16.mxu0 %v449_v3  ;;  %420 = vmatprep.subr.bf16.mxu1 %v449_v3 }
  0x28   : > { %411 = vmatpush1.bf16.msra.mxu0 %v410_v29  ;;  %429 = vmatpush1.bf16.msra.mxu1 %v410_v29 }
  0x2b   : > { %272 = vmatmul.mubr.f32.vlgmr.msra.gmra.mrb[0].mxu0 %v171_v30  ;;  %277 = vmatmul.mubr.f32.vlgmr.msra.gmra.mrb[0].mxu1 %v173_v31 }
  0xfe   : > { %v273_v33 = vpop.f32.mrb[0].mxu0  ;;  %v278_v34 = vpop.f32.mrb[0].mxu1 }
  0xff   : > { %v274_v35 = vadd.f32 %v378_v32, %v273_v33  ;;  %v279_v36 = vadd.f32 %v378_v32, %v278_v34  ;;  %v275_v37 = vpop.f32.mrb[1].mxu0  ;;  %v280_v38 = vpop.f32.mrb[1].mxu1 }
 0x101   : > { %v283_v39 = vsel %vm282_vm1, %v279_v36, 0.0 }
 0x102   : > { %v284_v40 = vadd.f32 %v283_v39, %v274_v35 }
 0x104   : > { %v285_v41 = vrot.slane %v284_v40, 4 }
 0x106   : > { %v286_v42 = vadd.f32 %v285_v41, %v284_v40 }
 0x108   : > { %v287_v43 = vrot.slane %v286_v42, 2 }
 0x10a   : > { %v288_v44 = vadd.f32 %v287_v43, %v286_v42 }
 0x10c   : > { %v289_v45 = vrot.slane %v288_v44, 1 }
 0x10e   : > { %v290_v46 = vadd.f32 %v289_v45, %v288_v44 }
 0x110   : > { %v292_v47 = vmul.f32 0.11111111, %v290_v46 }
 0x112   : > { %v293_v48 = vsub.f32 %v274_v35, %v292_v47  ;;  %v294_v49 = vsub.f32 %v279_v36, %v292_v47 }
 0x114   : > { %v295_v50 = vmul.f32 %v293_v48, %v293_v48  ;;  %v296_v51 = vmul.f32 %v294_v49, %v294_v49 }
 0x116   : > { %v297_v52 = vsel %vm282_vm1, %v296_v51, 0.0 }
 0x117   : > { %v298_v53 = vadd.f32 %v297_v52, %v295_v50 }
 0x119   : > { %v299_v54 = vrot.slane %v298_v53, 4 }
 0x11b   : > { %v300_v55 = vadd.f32 %v299_v54, %v298_v53 }
 0x11d   : > { %v301_v56 = vrot.slane %v300_v55, 2 }
 0x11f   : > { %v302_v57 = vadd.f32 %v301_v56, %v300_v55 }
 0x121   : > { %v303_v58 = vrot.slane %v302_v57, 1 }
 0x123   : > { %v304_v59 = vadd.f32 %v303_v58, %v302_v57 }
 0x125   : > { %v305_v60 = vmul.f32 0.11111111, %v304_v59 }
 0x127   : > { %v306_v61 = vadd.f32 1e-05, %v305_v60 }
 0x129   : > { %439 = vrsqrt.f32 %v306_v61 }
 0x133   : > { %v440_v62 = vpop.eup %439 }
 0x134   : > { %v308_v63 = vmul.f32 %v440_v62, %v293_v48  ;;  %v309_v0 = vmul.f32 %v440_v62, %v294_v49 }
 0x136   : > { %v310_v1 = vmax.f32 %v308_v63, 0.0  ;;  %v311_v2 = vmax.f32 %v309_v0, 0.0 }
 0x138   : > { %312 = vst [vmem:[%s170_s7] sm:$0xff] %v310_v1  ;;  %313 = vst [vmem:[%s170_s7 + $0x8] sm:$0x1] %v311_v2 }
 0x139 PF: > { %s13_s12 = sadd.s32 1, %s447_s12  }
 0x13a   : > { %p10_p4 = scmp.ge.s32.totalorder %s13_s12, 4  }
 0x13c   :  { %12 = sbr.rel (!%p10_p4) target bundleno = 1 (0x1), region = 62 }

// kernel: generator_forward.10
= control target key start
LH: loop header
LB: loop body
LE: loop exit
PB: predicated region body
PF: predicated region fallthrough
CT: control target
= control target key end

     0   :  { %s2673_s18 = smov 0   ;;  %s3127_s0 = inlined_call_operand.vmem [shape: f32[2,9,128], index: 0, kind: input, shape index: {}]   ;;  %s3128_s1 = inlined_call_operand.vmem [shape: f32[128,128], index: 1, kind: input, shape index: {}]   ;;  %s3129_s2 = inlined_call_operand.vmem [shape: f32[1,128], index: 2, kind: input, shape index: {}]   ;;  %s3130_s3 = inlined_call_operand.vmem [shape: f32[128,128], index: 3, kind: input, shape index: {}]   ;;  %s3131_s4 = inlined_call_operand.vmem [shape: f32[1,128], index: 4, kind: input, shape index: {}]   ;;  %s3132_s5 = inlined_call_operand.vmem [shape: f32[2,9,128], index: 5, kind: output, shape index: {}]  }
   0x1 LB: > { %s1568_s19 = sadd.s32 4294967295, %s2641_s18   ;;  %p1572_p0 = scmp.ge.s32.totalorder %s2641_s18, 1  ;;  %s2641_s18 = sphi %s2673_s18, %s15_s18  }
   0x2   : > { %p187_p1 = scmp.lt.s32.totalorder %s2641_s18, 3 }
   0x4   : > { %p188_p2 = pnand %p1572_p0, %p187_p1 }
   0x5   : > { %v227_v0 = vld [vmem:[%s3128_s1] sm:$0xff] (!%p188_p2)  ;;  %v228_v1 = vld [vmem:[%s3128_s1 + $0x8] sm:$0xff] (!%p188_p2)  ;;  %v229_v2 = vld [vmem:[%s3128_s1 + $0x10] sm:$0xff] (!%p188_p2)  ;;  %p215_p3 = scmp.lt.s32.totalorder (!%p188_p2), %s1568_s19, 1  ;;  %vm342_vm0 = vcmask (!%p188_p2), 1040384  }
   0x6   : > { %191 = sbr.rel (%p188_p2) target bundleno = 3280 (0xcd0), region = 40  ;;  %v2690_v3 = vpack.c.bf16 (!%p188_p2), %v228_v1, %v227_v0  ;;  %v230_v4 = vld [vmem:[%s3128_s1 + $0x18] sm:$0xff] (!%p188_p2)  ;;  %v231_v6 = vld [vmem:[%s3128_s1 + $0x20] sm:$0xff] (!%p188_p2)  ;;  %v232_v7 = vld [vmem:[%s3128_s1 + $0x28] sm:$0xff] (!%p188_p2) }
   0x7   : > { %v2695_v5 = vpack.c.bf16 (!%p188_p2), %v230_v4, %v229_v2  ;;  %v2709_v8 = vpack.c.bf16 (!%p188_p2), %v232_v7, %v231_v6  ;;  %v233_v9 = vld [vmem:[%s3128_s1 + $0x30] sm:$0xff] (!%p188_p2)  ;;  %v234_v10 = vld [vmem:[%s3128_s1 + $0x38] sm:$0xff] (!%p188_p2)  ;;  %v235_v13 = vld [vmem:[%s3128_s1 + $0x40] sm:$0xff] (!%p188_p2) }
   0x8   : > { %2220 = vmatprep.subr.bf16.mxu0 (!%p188_p2), %v2690_v3  ;;  %v2730_v12 = vpack.c.bf16 (!%p188_p2), %v234_v10, %v233_v9  ;;  %v236_v14 = vld [vmem:[%s3128_s1 + $0x48] sm:$0xff] (!%p188_p2)  ;;  %v237_v16 = vld [vmem:[%s3128_s1 + $0x50] sm:$0xff] (!%p188_p2)  ;;  %v238_v17 = vld [vmem:[%s3128_s1 + $0x58] sm:$0xff] (!%p188_p2) }
   0x9   : > { %2222 = vmatpush3.bf16.msra.mxu0 (!%p188_p2), %v2690_v3  ;;  %v2740_v15 = vpack.c.bf16 (!%p188_p2), %v236_v14, %v235_v13  ;;  %v2750_v18 = vpack.c.bf16 (!%p188_p2), %v238_v17, %v237_v16  ;;  %v239_v19 = vld [vmem:[%s3128_s1 + $0x60] sm:$0xff] (!%p188_p2)  ;;  %v240_v20 = vld [vmem:[%s3128_s1 + $0x68] sm:$0xff] (!%p188_p2)  ;;  %v241_v22 = vld [vmem:[%s3128_s1 + $0x70] sm:$0xff] (!%p188_p2) }
   0xa   : > { %2224 = vmatprep.subr.bf16.mxu0 (!%p188_p2), %v2695_v5  ;;  %v2760_v21 = vpack.c.bf16 (!%p188_p2), %v240_v20, %v239_v19  ;;  %v242_v23 = vld [vmem:[%s3128_s1 + $0x78] sm:$0xff] (!%p188_p2)  ;;  %v244_v26 = vld [vmem:[%s3130_s3] sm:$0xff] (!%p188_p2)  ;;  %v245_v27 = vld [vmem:[%s3130_s3 + $0x8] sm:$0xff] (!%p188_p2) }
   0xb   : > { %v2770_v24 = vpack.c.bf16 (!%p188_p2), %v242_v23, %v241_v22  ;;  %v246_v28 = vld [vmem:[%s3130_s3 + $0x10] sm:$0xff] (!%p188_p2)  ;;  %v2805_v29 = vpack.c.bf16 (!%p188_p2), %v245_v27, %v244_v26  ;;  %v247_v30 = vld [vmem:[%s3130_s3 + $0x18] sm:$0xff] (!%p188_p2)  ;;  %v248_v32 = vld [vmem:[%s3130_s3 + $0x20] sm:$0xff] (!%p188_p2) }
   0xc   : > { %v2810_v31 = vpack.c.bf16 (!%p188_p2), %v247_v30, %v246_v28  ;;  %v249_v33 = vld [vmem:[%s3130_s3 + $0x28] sm:$0xff] (!%p188_p2)  ;;  %v250_v35 = vld [vmem:[%s3130_s3 + $0x30] sm:$0xff] (!%p188_p2)  ;;  %v251_v36 = vld [vmem:[%s3130_s3 + $0x38] sm:$0xff] (!%p188_p2) }
   0xd   : > { %s3134_s19 = smov (!%p215_p3, %s1568_s19), 1  ;;  %2226 = vmatpush3.bf16.msra.mxu0 %v2695_v5  ;;  %2252 = vmatprep.subr.bf16.mxu1 %v2805_v29  ;;  %v2821_v34 = vpack.c.bf16 %v249_v33, %v248_v32  ;;  %v2831_v37 = vpack.c.bf16 %v251_v36, %v250_v35  ;;  %v252_v38 = vld [vmem:[%s3130_s3 + $0x40] sm:$0xff]  ;;  %v253_v39 = vld [vmem:[%s3130_s3 + $0x48] sm:$0xff]  ;;  %v254_v41 = vld [vmem:[%s3130_s3 + $0x50] sm:$0xff] }
   0xe   : > { %s1581_s7 = sshll.u32 %s3134_s19, 4  ;;  %2228 = vmatprep.subr.bf16.mxu0 %v2709_v8  ;;  %2254 = vmatpush3.bf16.msra.mxu1 %v2805_v29  ;;  %v2841_v40 = vpack.c.bf16 %v253_v39, %v252_v38  ;;  %v255_v42 = vld [vmem:[%s3130_s3 + $0x58] sm:$0xff]  ;;  %v256_v44 = vld [vmem:[%s3130_s3 + $0x60] sm:$0xff]  ;;  %v257_v45 = vld [vmem:[%s3130_s3 + $0x68] sm:$0xff] }
   0xf   : > { %s2716_s10 = scalar_lea.vmem %s3127_s0, %s1581_s7  ;;  %2256 = vmatprep.subr.bf16.mxu1 %v2810_v31  ;;  %v2851_v43 = vpack.c.bf16 %v255_v42, %v254_v41  ;;  %v2861_v46 = vpack.c.bf16 %v257_v45, %v256_v44  ;;  %v258_v47 = vld [vmem:[%s3130_s3 + $0x70] sm:$0xff]  ;;  %v259_v48 = vld [vmem:[%s3130_s3 + $0x78] sm:$0xff]  ;;  %v2880_v50 = vld [vmem:[%s3129_s2] ss:$0 sm:$0xff]  ;;  %s224_s27 = scalar_lea.vmem %s3132_s5, %s1581_s7 }
  0x10   : > { %v2725_v11 = vld [vmem:[%s2716_s10] sm:$0xff]  ;;  %v2776_v25 = vld [vmem:[%s2716_s10 + $0x8] sm:$0x1]  ;;  %v2871_v49 = vpack.c.bf16 %v259_v48, %v258_v47 }
  0x11   : > { %1831 = vmatprep.mubr.f32.mxu0 %v2725_v11  ;;  %2230 = vmatpush3.bf16.msra.mxu0 %v2709_v8  ;;  %v2905_v30 = vld [vmem:[%s3131_s4] ss:$0 sm:$0xff] }
  0x12   : > { %2232 = vmatprep.subr.bf16.mxu0 %v2730_v12  ;;  %2258 = vmatpush3.bf16.msra.mxu1 %v2810_v31 }
  0x13   : > { %2260 = vmatprep.subr.bf16.mxu1 %v2821_v34 }
  0x15   : > { %2234 = vmatpush3.bf16.msra.mxu0 %v2730_v12 }
  0x16   : > { %2236 = vmatprep.subr.bf16.mxu0 %v2740_v15  ;;  %2262 = vmatpush3.bf16.msra.mxu1 %v2821_v34 }
  0x17   : > { %2264 = vmatprep.subr.bf16.mxu1 %v2831_v37 }
  0x19   : > { %2238 = vmatpush3.bf16.msra.mxu0 %v2740_v15 }
  0x1a   : > { %2240 = vmatprep.subr.bf16.mxu0 %v2750_v18  ;;  %2266 = vmatpush3.bf16.msra.mxu1 %v2831_v37 }
  0x1b   : > { %2268 = vmatprep.subr.bf16.mxu1 %v2841_v40 }
  0x1d   : > { %2242 = vmatpush3.bf16.msra.mxu0 %v2750_v18 }
  0x1e   : > { %2244 = vmatprep.subr.bf16.mxu0 %v2760_v21  ;;  %2270 = vmatpush3.bf16.msra.mxu1 %v2841_v40 }
  0x1f   : > { %2272 = vmatprep.subr.bf16.mxu1 %v2851_v43 }
  0x21   : > { %2246 = vmatpush3.bf16.msra.mxu0 %v2760_v21 }
  0x22   : > { %2248 = vmatprep.subr.bf16.mxu0 %v2770_v24  ;;  %2274 = vmatpush3.bf16.msra.mxu1 %v2851_v43 }
  0x23   : > { %2276 = vmatprep.subr.bf16.mxu1 %v2861_v46 }
  0x25   : > { %2250 = vmatpush3.bf16.msra.mxu0 %v2770_v24 }
  0x26   : > { %2284 = vmatprep.subr.bf16.mxu0 %v2690_v3  ;;  %2278 = vmatpush3.bf16.msra.mxu1 %v2861_v46 }
  0x27   : > { %2280 = vmatprep.subr.bf16.mxu1 %v2871_v49 }
  0x28   : > { %1832 = vmatmul.mubr.f32.vlgmr.msra.gmra.mrb[0].mxu0 %v2776_v25 }
  0x29   : > { %2286 = vmatpush3.bf16.msra.mxu0 %v2690_v3 }
  0x2a   : > { %2288 = vmatprep.subr.bf16.mxu0 %v2695_v5  ;;  %2282 = vmatpush3.bf16.msra.mxu1 %v2871_v49 }
  0x2b   : > { %2316 = vmatprep.subr.bf16.mxu1 %v2805_v29 }
  0x2d   : > { %2290 = vmatpush3.bf16.msra.mxu0 %v2695_v5 }
  0x2e   : > { %2292 = vmatprep.subr.bf16.mxu0 %v2709_v8 }
  0x31   : > { %2294 = vmatpush3.bf16.msra.mxu0 %v2709_v8 }
  0x32   : > { %2296 = vmatprep.subr.bf16.mxu0 %v2730_v12 }
  0x35   : > { %2298 = vmatpush3.bf16.msra.mxu0 %v2730_v12 }
  0x36   : > { %2300 = vmatprep.subr.bf16.mxu0 %v2740_v15 }
  0x39   : > { %2302 = vmatpush3.bf16.msra.mxu0 %v2740_v15 }
  0x3a   : > { %2304 = vmatprep.subr.bf16.mxu0 %v2750_v18 }
  0x3d   : > { %2306 = vmatpush3.bf16.msra.mxu0 %v2750_v18 }
  0x3e   : > { %2308 = vmatprep.subr.bf16.mxu0 %v2760_v21 }
  0x41   : > { %2310 = vmatpush3.bf16.msra.mxu0 %v2760_v21 }
  0x42   : > { %2312 = vmatprep.subr.bf16.mxu0 %v2770_v24 }
  0x45   : > { %2314 = vmatpush3.bf16.msra.mxu0 %v2770_v24 }
  0x46   : > { %2348 = vmatprep.subr.bf16.mxu0 %v2690_v3 }
  0xfb   : > { %v1833_v51 = vpop.f32.mrb[0].mxu0 }
  0xfc   : > { %v339_v52 = vadd.f32 %v1833_v51, %v2880_v50  ;;  %v333_v53 = vpop.f32.mrb[1].mxu0 }
  0xfd   : > { %v334_v54 = vadd.f32 %v2880_v50, %v333_v53 }
  0xfe   : > { %v343_v55 = vsel %vm342_vm0, %v339_v52, 0.0 }
  0xff   : > { %v344_v56 = vadd.f32 %v343_v55, %v334_v54 }
 0x101   : > { %v345_v57 = vrot.slane %v344_v56, 4 }
 0x103   : > { %v346_v58 = vadd.f32 %v345_v57, %v344_v56 }
 0x105   : > { %v347_v59 = vrot.slane %v346_v58, 2 }
 0x107   : > { %v348_v60 = vadd.f32 %v347_v59, %v346_v58 }
 0x109   : > { %v349_v61 = vrot.slane %v348_v60, 1 }
 0x10b   : > { %v350_v62 = vadd.f32 %v349_v61, %v348_v60 }
 0x10d   : > { %v352_v63 = vmul.f32 0.11111111, %v350_v62 }
 0x10f   : > { %v353_v0 = vsub.f32 %v334_v54, %v352_v63  ;;  %v354_v1 = vsub.f32 %v339_v52, %v352_v63 }
 0x111   : > { %v355_v2 = vmul.f32 %v353_v0, %v353_v0  ;;  %v356_v4 = vmul.f32 %v354_v1, %v354_v1 }
 0x113   : > { %v357_v6 = vsel %vm342_vm0, %v356_v4, 0.0 }
 0x114   : > { %v358_v7 = vadd.f32 %v357_v6, %v355_v2 }
 0x116   : > { %v359_v9 = vrot.slane %v358_v7, 4 }
 0x118   : > { %v360_v10 = vadd.f32 %v359_v9, %v358_v7 }
 0x11a   : > { %v361_v13 = vrot.slane %v360_v10, 2 }
 0x11c   : > { %v362_v14 = vadd.f32 %v361_v13, %v360_v10 }
 0x11e   : > { %v363_v16 = vrot.slane %v362_v14, 1 }
 0x120   : > { %v364_v17 = vadd.f32 %v363_v16, %v362_v14 }
 0x122   : > { %v365_v19 = vmul.f32 0.11111111, %v364_v17 }
 0x124   : > { %v366_v20 = vadd.f32 1e-05, %v365_v19 }
 0x126   : > { %2611 = vrsqrt.f32 %v366_v20 }
 0x130   : > { %v2612_v22 = vpop.eup %2611 }
 0x131   : > { %v368_v23 = vmul.f32 %v2612_v22, %v353_v0  ;;  %v369_v26 = vmul.f32 %v2612_v22, %v354_v1 }
 0x133   : > { %v370_v27 = vmax.f32 %v368_v23, 0.0  ;;  %v371_v28 = vmax.f32 %v369_v26, 0.0 }
 0x135   : > { %1866 = vmatprep.mubr.f32.mxu1 %v370_v27 }
 0x136   : > { %1867 = vmatmul.mubr.f32.vlgmr.msra.gmra.mrb[0].mxu1 %v371_v28 }
 0x137   : > { %2318 = vmatpush3.bf16.msra.mxu1 %v2805_v29 }
 0x138   : > { %2320 = vmatprep.subr.bf16.mxu1 %v2810_v31 }
 0x13b   : > { %2322 = vmatpush3.bf16.msra.mxu1 %v2810_v31 }
 0x13c   : > { %2324 = vmatprep.subr.bf16.mxu1 %v2821_v34 }
 0x13f   : > { %2326 = vmatpush3.bf16.msra.mxu1 %v2821_v34 }
 0x140   : > { %2328 = vmatprep.subr.bf16.mxu1 %v2831_v37 }
 0x143   : > { %2330 = vmatpush3.bf16.msra.mxu1 %v2831_v37 }
 0x144   : > { %2332 = vmatprep.subr.bf16.mxu1 %v2841_v40 }
 0x147   : > { %2334 = vmatpush3.bf16.msra.mxu1 %v2841_v40 }
 0x148   : > { %2336 = vmatprep.subr.bf16.mxu1 %v2851_v43 }
 0x14b   : > { %2338 = vmatpush3.bf16.msra.mxu1 %v2851_v43 }
 0x14c   : > { %2340 = vmatprep.subr.bf16.mxu1 %v2861_v46 }
 0x14f   : > { %2342 = vmatpush3.bf16.msra.mxu1 %v2861_v46 }
 0x150   : > { %2344 = vmatprep.subr.bf16.mxu1 %v2871_v49 }
 0x153   : > { %2346 = vmatpush3.bf16.msra.mxu1 %v2871_v49 }
 0x154   : > { %2380 = vmatprep.subr.bf16.mxu1 %v2805_v29 }
 0x209   : > { %v1868_v32 = vpop.f32.mrb[0].mxu1 }
 0x20a   : > { %v450_v33 = vadd.f32 %v1868_v32, %v2905_v30  ;;  %v444_v35 = vpop.f32.mrb[1].mxu1 }
 0x20b   : > { %v445_v36 = vadd.f32 %v2905_v30, %v444_v35 }
 0x20c   : > { %v453_v38 = vsel %vm342_vm0, %v450_v33, 0.0 }
 0x20d   : > { %v454_v39 = vadd.f32 %v453_v38, %v445_v36 }
 0x20f   : > { %v455_v41 = vrot.slane %v454_v39, 4 }
 0x211   : > { %v456_v42 = vadd.f32 %v455_v41, %v454_v39 }
 0x213   : > { %v457_v44 = vrot.slane %v456_v42, 2 }
 0x215   : > { %v458_v45 = vadd.f32 %v457_v44, %v456_v42 }
 0x217   : > { %v459_v47 = vrot.slane %v458_v45, 1 }
 0x219   : > { %v460_v48 = vadd.f32 %v459_v47, %v458_v45 }
 0x21b   : > { %v461_v51 = vmul.f32 0.11111111, %v460_v48 }
 0x21d   : > { %v462_v52 = vsub.f32 %v445_v36, %v461_v51  ;;  %v463_v53 = vsub.f32 %v450_v33, %v461_v51 }
 0x21f   : > { %v464_v54 = vmul.f32 %v462_v52, %v462_v52  ;;  %v465_v55 = vmul.f32 %v463_v53, %v463_v53 }
 0x221   : > { %v466_v56 = vsel %vm342_vm0, %v465_v55, 0.0 }
 0x222   : > { %v467_v57 = vadd.f32 %v466_v56, %v464_v54 }
 0x224   : > { %v468_v58 = vrot.slane %v467_v57, 4 }
 0x226   : > { %v469_v59 = vadd.f32 %v468_v58, %v467_v57 }
 0x228   : > { %v470_v60 = vrot.slane %v469_v59, 2 }
 0x22a   : > { %v471_v61 = vadd.f32 %v470_v60, %v469_v59 }
 0x22c   : > { %v472_v62 = vrot.slane %v471_v61, 1 }
 0x22e   : > { %v473_v63 = vadd.f32 %v472_v62, %v471_v61 }
 0x230   : > { %v474_v0 = vmul.f32 0.11111111, %v473_v63 }
 0x232   : > { %v475_v1 = vadd.f32 1e-05, %v474_v0 }
 0x234   : > { %2613 = vrsqrt.f32 %v475_v1 }
 0x23e   : > { %v2614_v2 = vpop.eup %2613 }
 0x23f   : > { %v477_v4 = vmul.f32 %v2614_v2, %v462_v52  ;;  %v478_v6 = vmul.f32 %v2614_v2, %v463_v53 }
 0x241   : > { %v2912_v7 = vadd.f32 %v477_v4, %v2725_v11  ;;  %v2915_v9 = vadd.f32 %v478_v6, %v2776_v25 }
 0x243   : > { %1901 = vmatprep.mubr.f32.mxu0 %v2912_v7 }
 0x244   : > { %1902 = vmatmul.mubr.f32.vlgmr.msra.gmra.mrb[2].mxu0 %v2915_v9 }
 0x245   : > { %2350 = vmatpush3.bf16.msra.mxu0 %v2690_v3 }
 0x246   : > { %2352 = vmatprep.subr.bf16.mxu0 %v2695_v5 }
 0x249   : > { %2354 = vmatpush3.bf16.msra.mxu0 %v2695_v5 }
 0x24a   : > { %2356 = vmatprep.subr.bf16.mxu0 %v2709_v8 }
 0x24d   : > { %2358 = vmatpush3.bf16.msra.mxu0 %v2709_v8 }
 0x24e   : > { %2360 = vmatprep.subr.bf16.mxu0 %v2730_v12 }
 0x251   : > { %2362 = vmatpush3.bf16.msra.mxu0 %v2730_v12 }
 0x252   : > { %2364 = vmatprep.subr.bf16.mxu0 %v2740_v15 }
 0x255   : > { %2366 = vmatpush3.bf16.msra.mxu0 %v2740_v15 }
 0x256   : > { %2368 = vmatprep.subr.bf16.mxu0 %v2750_v18 }
 0x259   : > { %2370 = vmatpush3.bf16.msra.mxu0 %v2750_v18 }
 0x25a   : > { %2372 = vmatprep.subr.bf16.mxu0 %v2760_v21 }
 0x25d   : > { %2374 = vmatpush3.bf16.msra.mxu0 %v2760_v21 }
 0x25e   : > { %2376 = vmatprep.subr.bf16.mxu0 %v2770_v24 }
 0x261   : > { %2378 = vmatpush3.bf16.msra.mxu0 %v2770_v24 }
 0x262   : > { %2412 = vmatprep.subr.bf16.mxu0 %v2690_v3 }
 0x317   : > { %v1903_v11 = vpop.f32.mrb[2].mxu0 }
 0x318   : > { %v553_v25 = vadd.f32 %v1903_v11, %v2880_v50  ;;  %v547_v10 = vpop.f32.mrb[3].mxu0 }
 0x319   : > { %v548_v13 = vadd.f32 %v2880_v50, %v547_v10 }
 0x31a   : > { %v556_v14 = vsel %vm342_vm0, %v553_v25, 0.0 }
 0x31b   : > { %v557_v16 = vadd.f32 %v556_v14, %v548_v13 }
 0x31d   : > { %v558_v17 = vrot.slane %v557_v16, 4 }
 0x31f   : > { %v559_v19 = vadd.f32 %v558_v17, %v557_v16 }
 0x321   : > { %v560_v20 = vrot.slane %v559_v19, 2 }
 0x323   : > { %v561_v22 = vadd.f32 %v560_v20, %v559_v19 }
 0x325   : > { %v562_v23 = vrot.slane %v561_v22, 1 }
 0x327   : > { %v563_v26 = vadd.f32 %v562_v23, %v561_v22 }
 0x329   : > { %v564_v27 = vmul.f32 0.11111111, %v563_v26 }
 0x32b   : > { %v565_v28 = vsub.f32 %v548_v13, %v564_v27  ;;  %v566_v32 = vsub.f32 %v553_v25, %v564_v27 }
 0x32d   : > { %v567_v33 = vmul.f32 %v565_v28, %v565_v28  ;;  %v568_v35 = vmul.f32 %v566_v32, %v566_v32 }
 0x32f   : > { %v569_v36 = vsel %vm342_vm0, %v568_v35, 0.0 }
 0x330   : > { %v570_v38 = vadd.f32 %v569_v36, %v567_v33 }
 0x332   : > { %v571_v39 = vrot.slane %v570_v38, 4 }
 0x334   : > { %v572_v41 = vadd.f32 %v571_v39, %v570_v38 }
 0x336   : > { %v573_v42 = vrot.slane %v572_v41, 2 }
 0x338   : > { %v574_v44 = vadd.f32 %v573_v42, %v572_v41 }
 0x33a   : > { %v575_v45 = vrot.slane %v574_v44, 1 }
 0x33c   : > { %v576_v47 = vadd.f32 %v575_v45, %v574_v44 }
 0x33e   : > { %v577_v48 = vmul.f32 0.11111111, %v576_v47 }
 0x340   : > { %v578_v51 = vadd.f32 1e-05, %v577_v48 }
 0x342   : > { %2615 = vrsqrt.f32 %v578_v51 }
 0x34c   : > { %v2616_v52 = vpop.eup %2615 }
 0x34d   : > { %v580_v53 = vmul.f32 %v2616_v52, %v565_v28  ;;  %v581_v54 = vmul.f32 %v2616_v52, %v566_v32 }
 0x34f   : > { %v582_v55 = vmax.f32 %v580_v53, 0.0  ;;  %v583_v56 = vmax.f32 %v581_v54, 0.0 }
 0x351   : > { %1936 = vmatprep.mubr.f32.mxu1 %v582_v55 }
 0x352   : > { %1937 = vmatmul.mubr.f32.vlgmr.msra.gmra.mrb[2].mxu1 %v583_v56 }
 0x353   : > { %2382 = vmatpush3.bf16.msra.mxu1 %v2805_v29 }
 0x354   : > { %2384 = vmatprep.subr.bf16.mxu1 %v2810_v31 }
 0x357   : > { %2386 = vmatpush3.bf16.msra.mxu1 %v2810_v31 }
 0x358   : > { %2388 = vmatprep.subr.bf16.mxu1 %v2821_v34 }
 0x35b   : > { %2390 = vmatpush3.bf16.msra.mxu1 %v2821_v34 }
 0x35c   : > { %2392 = vmatprep.subr.bf16.mxu1 %v2831_v37 }
 0x35f   : > { %2394 = vmatpush3.bf16.msra.mxu1 %v2831_v37 }
 0x360   : > { %2396 = vmatprep.subr.bf16.mxu1 %v2841_v40 }
 0x363   : > { %2398 = vmatpush3.bf16.msra.mxu1 %v2841_v40 }
 0x364   : > { %2400 = vmatprep.subr.bf16.mxu1 %v2851_v43 }
 0x367   : > { %2402 = vmatpush3.bf16.msra.mxu1 %v2851_v43 }
 0x368   : > { %2404 = vmatprep.subr.bf16.mxu1 %v2861_v46 }
 0x36b   : > { %2406 = vmatpush3.bf16.msra.mxu1 %v2861_v46 }
 0x36c   : > { %2408 = vmatprep.subr.bf16.mxu1 %v2871_v49 }
 0x36f   : > { %2410 = vmatpush3.bf16.msra.mxu1 %v2871_v49 }
 0x370   : > { %2444 = vmatprep.subr.bf16.mxu1 %v2805_v29 }
 0x425   : > { %v1938_v57 = vpop.f32.mrb[2].mxu1 }
 0x426   : > { %v656_v58 = vadd.f32 %v1938_v57, %v2905_v30  ;;  %v650_v59 = vpop.f32.mrb[3].mxu1 }
 0x427   : > { %v651_v60 = vadd.f32 %v2905_v30, %v650_v59 }
 0x428   : > { %v659_v61 = vsel %vm342_vm0, %v656_v58, 0.0 }
 0x429   : > { %v660_v62 = vadd.f32 %v659_v61, %v651_v60 }
 0x42b   : > { %v661_v63 = vrot.slane %v660_v62, 4 }
 0x42d   : > { %v662_v0 = vadd.f32 %v661_v63, %v660_v62 }
 0x42f   : > { %v663_v1 = vrot.slane %v662_v0, 2 }
 0x431   : > { %v664_v2 = vadd.f32 %v663_v1, %v662_v0 }
 0x433   : > { %v665_v4 = vrot.slane %v664_v2, 1 }
 0x435   : > { %v666_v6 = vadd.f32 %v665_v4, %v664_v2 }
 0x437   : > { %v667_v11 = vmul.f32 0.11111111, %v666_v6 }
 0x439   : > { %v668_v25 = vsub.f32 %v651_v60, %v667_v11  ;;  %v669_v10 = vsub.f32 %v656_v58, %v667_v11 }
 0x43b   : > { %v670_v13 = vmul.f32 %v668_v25, %v668_v25  ;;  %v671_v14 = vmul.f32 %v669_v10, %v669_v10 }
 0x43d   : > { %v672_v16 = vsel %vm342_vm0, %v671_v14, 0.0 }
 0x43e   : > { %v673_v17 = vadd.f32 %v672_v16, %v670_v13 }
 0x440   : > { %v674_v19 = vrot.slane %v673_v17, 4 }
 0x442   : > { %v675_v20 = vadd.f32 %v674_v19, %v673_v17 }
 0x444   : > { %v676_v22 = vrot.slane %v675_v20, 2 }
 0x446   : > { %v677_v23 = vadd.f32 %v676_v22, %v675_v20 }
 0x448   : > { %v678_v26 = vrot.slane %v677_v23, 1 }
 0x44a   : > { %v679_v27 = vadd.f32 %v678_v26, %v677_v23 }
 0x44c   : > { %v680_v28 = vmul.f32 0.11111111, %v679_v27 }
 0x44e   : > { %v681_v32 = vadd.f32 1e-05, %v680_v28 }
 0x450   : > { %2617 = vrsqrt.f32 %v681_v32 }
 0x45a   : > { %v2618_v33 = vpop.eup %2617 }
 0x45b   : > { %v683_v35 = vmul.f32 %v2618_v33, %v668_v25  ;;  %v684_v36 = vmul.f32 %v2618_v33, %v669_v10 }
 0x45d   : > { %v2960_v38 = vadd.f32 %v683_v35, %v2912_v7  ;;  %v2963_v39 = vadd.f32 %v684_v36, %v2915_v9 }
 0x45f   : > { %1971 = vmatprep.mubr.f32.mxu0 %v2960_v38 }
 0x460   : > { %1972 = vmatmul.mubr.f32.vlgmr.msra.gmra.mrb[4].mxu0 %v2963_v39 }
 0x461   : > { %2414 = vmatpush3.bf16.msra.mxu0 %v2690_v3 }
 0x462   : > { %2416 = vmatprep.subr.bf16.mxu0 %v2695_v5 }
 0x465   : > { %2418 = vmatpush3.bf16.msra.mxu0 %v2695_v5 }
 0x466   : > { %2420 = vmatprep.subr.bf16.mxu0 %v2709_v8 }
 0x469   : > { %2422 = vmatpush3.bf16.msra.mxu0 %v2709_v8 }
 0x46a   : > { %2424 = vmatprep.subr.bf16.mxu0 %v2730_v12 }
 0x46d   : > { %2426 = vmatpush3.bf16.msra.mxu0 %v2730_v12 }
 0x46e   : > { %2428 = vmatprep.subr.bf16.mxu0 %v2740_v15 }
 0x471   : > { %2430 = vmatpush3.bf16.msra.mxu0 %v2740_v15 }
 0x472   : > { %2432 = vmatprep.subr.bf16.mxu0 %v2750_v18 }
 0x475   : > { %2434 = vmatpush3.bf16.msra.mxu0 %v2750_v18 }
 0x476   : > { %2436 = vmatprep.subr.bf16.mxu0 %v2760_v21 }
 0x479   : > { %2438 = vmatpush3.bf16.msra.mxu0 %v2760_v21 }
 0x47a   : > { %2440 = vmatprep.subr.bf16.mxu0 %v2770_v24 }
 0x47d   : > { %2442 = vmatpush3.bf16.msra.mxu0 %v2770_v24 }
 0x47e   : > { %2476 = vmatprep.subr.bf16.mxu0 %v2690_v3 }
 0x533   : > { %v1973_v7 = vpop.f32.mrb[4].mxu0 }
 0x534   : > { %v759_v9 = vadd.f32 %v1973_v7, %v2880_v50  ;;  %v753_v41 = vpop.f32.mrb[5].mxu0 }
 0x535   : > { %v754_v42 = vadd.f32 %v2880_v50, %v753_v41 }
 0x536   : > { %v762_v44 = vsel %vm342_vm0, %v759_v9, 0.0 }
 0x537   : > { %v763_v45 = vadd.f32 %v762_v44, %v754_v42 }
 0x539   : > { %v764_v47 = vrot.slane %v763_v45, 4 }
 0x53b   : > { %v765_v48 = vadd.f32 %v764_v47, %v763_v45 }
 0x53d   : > { %v766_v51 = vrot.slane %v765_v48, 2 }
 0x53f   : > { %v767_v52 = vadd.f32 %v766_v51, %v765_v48 }
 0x541   : > { %v768_v53 = vrot.slane %v767_v52, 1 }
 0x543   : > { %v769_v54 = vadd.f32 %v768_v53, %v767_v52 }
 0x545   : > { %v770_v55 = vmul.f32 0.11111111, %v769_v54 }
 0x547   : > { %v771_v56 = vsub.f32 %v754_v42, %v770_v55  ;;  %v772_v57 = vsub.f32 %v759_v9, %v770_v55 }
 0x549   : > { %v773_v58 = vmul.f32 %v771_v56, %v771_v56  ;;  %v774_v59 = vmul.f32 %v772_v57, %v772_v57 }
 0x54b   : > { %v775_v60 = vsel %vm342_vm0, %v774_v59, 0.0 }
 0x54c   : > { %v776_v61 = vadd.f32 %v775_v60, %v773_v58 }
 0x54e   : > { %v777_v62 = vrot.slane %v776_v61, 4 }
 0x550   : > { %v778_v63 = vadd.f32 %v777_v62, %v776_v61 }
 0x552   : > { %v779_v0 = vrot.slane %v778_v63, 2 }
 0x554   : > { %v780_v1 = vadd.f32 %v779_v0, %v778_v63 }
 0x556   : > { %v781_v2 = vrot.slane %v780_v1, 1 }
 0x558   : > { %v782_v4 = vadd.f32 %v781_v2, %v780_v1 }
 0x55a   : > { %v783_v6 = vmul.f32 0.11111111, %v782_v4 }
 0x55c   : > { %v784_v11 = vadd.f32 1e-05, %v783_v6 }
 0x55e   : > { %2619 = vrsqrt.f32 %v784_v11 }
 0x568   : > { %v2620_v25 = vpop.eup %2619 }
 0x569   : > { %v786_v10 = vmul.f32 %v2620_v25, %v771_v56  ;;  %v787_v13 = vmul.f32 %v2620_v25, %v772_v57 }
 0x56b   : > { %v788_v14 = vmax.f32 %v786_v10, 0.0  ;;  %v789_v16 = vmax.f32 %v787_v13, 0.0 }
 0x56d   : > { %2006 = vmatprep.mubr.f32.mxu1 %v788_v14 }
 0x56e   : > { %2007 = vmatmul.mubr.f32.vlgmr.msra.gmra.mrb[4].mxu1 %v789_v16 }
 0x56f   : > { %2446 = vmatpush3.bf16.msra.mxu1 %v2805_v29 }
 0x570   : > { %2448 = vmatprep.subr.bf16.mxu1 %v2810_v31 }
 0x573   : > { %2450 = vmatpush3.bf16.msra.mxu1 %v2810_v31 }
 0x574   : > { %2452 = vmatprep.subr.bf16.mxu1 %v2821_v34 }
 0x577   : > { %2454 = vmatpush3.bf16.msra.mxu1 %v2821_v34 }
 0x578   : > { %2456 = vmatprep.subr.bf16.mxu1 %v2831_v37 }
 0x57b   : > { %2458 = vmatpush3.bf16.msra.mxu1 %v2831_v37 }
 0x57c   : > { %2460 = vmatprep.subr.bf16.mxu1 %v2841_v40 }
 0x57f   : > { %2462 = vmatpush3.bf16.msra.mxu1 %v2841_v40 }
 0x580   : > { %2464 = vmatprep.subr.bf16.mxu1 %v2851_v43 }
 0x583   : > { %2466 = vmatpush3.bf16.msra.mxu1 %v2851_v43 }
 0x584   : > { %2468 = vmatprep.subr.bf16.mxu1 %v2861_v46 }
 0x587   : > { %2470 = vmatpush3.bf16.msra.mxu1 %v2861_v46 }
 0x588   : > { %2472 = vmatprep.subr.bf16.mxu1 %v2871_v49 }
 0x58b   : > { %2474 = vmatpush3.bf16.msra.mxu1 %v2871_v49 }
 0x58c   : > { %2508 = vmatprep.subr.bf16.mxu1 %v2805_v29 }
 0x641   : > { %v2008_v17 = vpop.f32.mrb[4].mxu1 }
 0x642   : > { %v862_v19 = vadd.f32 %v2008_v17, %v2905_v30  ;;  %v856_v20 = vpop.f32.mrb[5].mxu1 }
 0x643   : > { %v857_v22 = vadd.f32 %v2905_v30, %v856_v20 }
 0x644   : > { %v865_v23 = vsel %vm342_vm0, %v862_v19, 0.0 }
 0x645   : > { %v866_v26 = vadd.f32 %v865_v23, %v857_v22 }
 0x647   : > { %v867_v27 = vrot.slane %v866_v26, 4 }
 0x649   : > { %v868_v28 = vadd.f32 %v867_v27, %v866_v26 }
 0x64b   : > { %v869_v32 = vrot.slane %v868_v28, 2 }
 0x64d   : > { %v870_v33 = vadd.f32 %v869_v32, %v868_v28 }
 0x64f   : > { %v871_v35 = vrot.slane %v870_v33, 1 }
 0x651   : > { %v872_v36 = vadd.f32 %v871_v35, %v870_v33 }
 0x653   : > { %v873_v7 = vmul.f32 0.11111111, %v872_v36 }
 0x655   : > { %v874_v9 = vsub.f32 %v857_v22, %v873_v7  ;;  %v875_v41 = vsub.f32 %v862_v19, %v873_v7 }
 0x657   : > { %v876_v42 = vmul.f32 %v874_v9, %v874_v9  ;;  %v877_v44 = vmul.f32 %v875_v41, %v875_v41 }
 0x659   : > { %v878_v45 = vsel %vm342_vm0, %v877_v44, 0.0 }
 0x65a   : > { %v879_v47 = vadd.f32 %v878_v45, %v876_v42 }
 0x65c   : > { %v880_v48 = vrot.slane %v879_v47, 4 }
 0x65e   : > { %v881_v51 = vadd.f32 %v880_v48, %v879_v47 }
 0x660   : > { %v882_v52 = vrot.slane %v881_v51, 2 }
 0x662   : > { %v883_v53 = vadd.f32 %v882_v52, %v881_v51 }
 0x664   : > { %v884_v54 = vrot.slane %v883_v53, 1 }
 0x666   : > { %v885_v55 = vadd.f32 %v884_v54, %v883_v53 }
 0x668   : > { %v886_v56 = vmul.f32 0.11111111, %v885_v55 }
 0x66a   : > { %v887_v57 = vadd.f32 1e-05, %v886_v56 }
 0x66c   : > { %2621 = vrsqrt.f32 %v887_v57 }
 0x676   : > { %v2622_v58 = vpop.eup %2621 }
 0x677   : > { %v889_v59 = vmul.f32 %v2622_v58, %v874_v9  ;;  %v890_v60 = vmul.f32 %v2622_v58, %v875_v41 }
 0x679   : > { %v3008_v61 = vadd.f32 %v889_v59, %v2960_v38  ;;  %v3011_v62 = vadd.f32 %v890_v60, %v2963_v39 }
 0x67b   : > { %2041 = vmatprep.mubr.f32.mxu0 %v3008_v61 }
 0x67c   : > { %2042 = vmatmul.mubr.f32.vlgmr.msra.gmra.mrb[6].mxu0 %v3011_v62 }
 0x67d   : > { %2478 = vmatpush3.bf16.msra.mxu0 %v2690_v3 }
 0x67e   : > { %2480 = vmatprep.subr.bf16.mxu0 %v2695_v5 }
 0x681   : > { %2482 = vmatpush3.bf16.msra.mxu0 %v2695_v5 }
 0x682   : > { %2484 = vmatprep.subr.bf16.mxu0 %v2709_v8 }
 0x685   : > { %2486 = vmatpush3.bf16.msra.mxu0 %v2709_v8 }
 0x686   : > { %2488 = vmatprep.subr.bf16.mxu0 %v2730_v12 }
 0x689   : > { %2490 = vmatpush3.bf16.msra.mxu0 %v2730_v12 }
 0x68a   : > { %2492 = vmatprep.subr.bf16.mxu0 %v2740_v15 }
 0x68d   : > { %2494 = vmatpush3.bf16.msra.mxu0 %v2740_v15 }
 0x68e   : > { %2496 = vmatprep.subr.bf16.mxu0 %v2750_v18 }
 0x691   : > { %2498 = vmatpush3.bf16.msra.mxu0 %v2750_v18 }
 0x692   : > { %2500 = vmatprep.subr.bf16.mxu0 %v2760_v21 }
 0x695   : > { %2502 = vmatpush3.bf16.msra.mxu0 %v2760_v21 }
 0x696   : > { %2504 = vmatprep.subr.bf16.mxu0 %v2770_v24 }
 0x699   : > { %2506 = vmatpush3.bf16.msra.mxu0 %v2770_v24 }
 0x69a   : > { %2540 = vmatprep.subr.bf16.mxu0 %v2690_v3 }
 0x74f   : > { %v2043_v38 = vpop.f32.mrb[6].mxu0 }
 0x750   : > { %v965_v39 = vadd.f32 %v2043_v38, %v2880_v50  ;;  %v959_v63 = vpop.f32.mrb[7].mxu0 }
 0x751   : > { %v960_v0 = vadd.f32 %v2880_v50, %v959_v63 }
 0x752   : > { %v968_v1 = vsel %vm342_vm0, %v965_v39, 0.0 }
 0x753   : > { %v969_v2 = vadd.f32 %v968_v1, %v960_v0 }
 0x755   : > { %v970_v4 = vrot.slane %v969_v2, 4 }
 0x757   : > { %v971_v6 = vadd.f32 %v970_v4, %v969_v2 }
 0x759   : > { %v972_v11 = vrot.slane %v971_v6, 2 }
 0x75b   : > { %v973_v25 = vadd.f32 %v972_v11, %v971_v6 }
 0x75d   : > { %v974_v10 = vrot.slane %v973_v25, 1 }
 0x75f   : > { %v975_v13 = vadd.f32 %v974_v10, %v973_v25 }
 0x761   : > { %v976_v14 = vmul.f32 0.11111111, %v975_v13 }
 0x763   : > { %v977_v16 = vsub.f32 %v960_v0, %v976_v14  ;;  %v978_v17 = vsub.f32 %v965_v39, %v976_v14 }
 0x765   : > { %v979_v19 = vmul.f32 %v977_v16, %v977_v16  ;;  %v980_v20 = vmul.f32 %v978_v17, %v978_v17 }
 0x767   : > { %v981_v22 = vsel %vm342_vm0, %v980_v20, 0.0 }
 0x768   : > { %v982_v23 = vadd.f32 %v981_v22, %v979_v19 }
 0x76a   : > { %v983_v26 = vrot.slane %v982_v23, 4 }
 0x76c   : > { %v984_v27 = vadd.f32 %v983_v26, %v982_v23 }
 0x76e   : > { %v985_v28 = vrot.slane %v984_v27, 2 }
 0x770   : > { %v986_v32 = vadd.f32 %v985_v28, %v984_v27 }
 0x772   : > { %v987_v33 = vrot.slane %v986_v32, 1 }
 0x774   : > { %v988_v35 = vadd.f32 %v987_v33, %v986_v32 }
 0x776   : > { %v989_v36 = vmul.f32 0.11111111, %v988_v35 }
 0x778   : > { %v990_v7 = vadd.f32 1e-05, %v989_v36 }
 0x77a   : > { %2623 = vrsqrt.f32 %v990_v7 }
 0x784   : > { %v2624_v9 = vpop.eup %2623 }
 0x785   : > { %v992_v41 = vmul.f32 %v2624_v9, %v977_v16  ;;  %v993_v42 = vmul.f32 %v2624_v9, %v978_v17 }
 0x787   : > { %v994_v44 = vmax.f32 %v992_v41, 0.0  ;;  %v995_v45 = vmax.f32 %v993_v42, 0.0 }
 0x789   : > { %2076 = vmatprep.mubr.f32.mxu1 %v994_v44 }
 0x78a   : > { %2077 = vmatmul.mubr.f32.vlgmr.msra.gmra.mrb[6].mxu1 %v995_v45 }
 0x78b   : > { %2510 = vmatpush3.bf16.msra.mxu1 %v2805_v29 }
 0x78c   : > { %2512 = vmatprep.subr.bf16.mxu1 %v2810_v31 }
 0x78f   : > { %2514 = vmatpush3.bf16.msra.mxu1 %v2810_v31 }
 0x790   : > { %2516 = vmatprep.subr.bf16.mxu1 %v2821_v34 }
 0x793   : > { %2518 = vmatpush3.bf16.msra.mxu1 %v2821_v34 }
 0x794   : > { %2520 = vmatprep.subr.bf16.mxu1 %v2831_v37 }
 0x797   : > { %2522 = vmatpush3.bf16.msra.mxu1 %v2831_v37 }
 0x798   : > { %2524 = vmatprep.subr.bf16.mxu1 %v2841_v40 }
 0x79b   : > { %2526 = vmatpush3.bf16.msra.mxu1 %v2841_v40 }
 0x79c   : > { %2528 = vmatprep.subr.bf16.mxu1 %v2851_v43 }
 0x79f   : > { %2530 = vmatpush3.bf16.msra.mxu1 %v2851_v43 }
 0x7a0   : > { %2532 = vmatprep.subr.bf16.mxu1 %v2861_v46 }
 0x7a3   : > { %2534 = vmatpush3.bf16.msra.mxu1 %v2861_v46 }
 0x7a4   : > { %2536 = vmatprep.subr.bf16.mxu1 %v2871_v49 }
 0x7a7   : > { %2538 = vmatpush3.bf16.msra.mxu1 %v2871_v49 }
 0x7a8   : > { %2572 = vmatprep.subr.bf16.mxu1 %v2805_v29 }
 0x85d   : > { %v2078_v47 = vpop.f32.mrb[6].mxu1 }
 0x85e   : > { %v1068_v48 = vadd.f32 %v2078_v47, %v2905_v30  ;;  %v1062_v51 = vpop.f32.mrb[7].mxu1 }
 0x85f   : > { %v1063_v52 = vadd.f32 %v2905_v30, %v1062_v51 }
 0x860   : > { %v1071_v53 = vsel %vm342_vm0, %v1068_v48, 0.0 }
 0x861   : > { %v1072_v54 = vadd.f32 %v1071_v53, %v1063_v52 }
 0x863   : > { %v1073_v55 = vrot.slane %v1072_v54, 4 }
 0x865   : > { %v1074_v56 = vadd.f32 %v1073_v55, %v1072_v54 }
 0x867   : > { %v1075_v57 = vrot.slane %v1074_v56, 2 }
 0x869   : > { %v1076_v58 = vadd.f32 %v1075_v57, %v1074_v56 }
 0x86b   : > { %v1077_v59 = vrot.slane %v1076_v58, 1 }
 0x86d   : > { %v1078_v60 = vadd.f32 %v1077_v59, %v1076_v58 }
 0x86f   : > { %v1079_v38 = vmul.f32 0.11111111, %v1078_v60 }
 0x871   : > { %v1080_v39 = vsub.f32 %v1063_v52, %v1079_v38  ;;  %v1081_v63 = vsub.f32 %v1068_v48, %v1079_v38 }
 0x873   : > { %v1082_v0 = vmul.f32 %v1080_v39, %v1080_v39  ;;  %v1083_v1 = vmul.f32 %v1081_v63, %v1081_v63 }
 0x875   : > { %v1084_v2 = vsel %vm342_vm0, %v1083_v1, 0.0 }
 0x876   : > { %v1085_v4 = vadd.f32 %v1084_v2, %v1082_v0 }
 0x878   : > { %v1086_v6 = vrot.slane %v1085_v4, 4 }
 0x87a   : > { %v1087_v11 = vadd.f32 %v1086_v6, %v1085_v4 }
 0x87c   : > { %v1088_v25 = vrot.slane %v1087_v11, 2 }
 0x87e   : > { %v1089_v10 = vadd.f32 %v1088_v25, %v1087_v11 }
 0x880   : > { %v1090_v13 = vrot.slane %v1089_v10, 1 }
 0x882   : > { %v1091_v14 = vadd.f32 %v1090_v13, %v1089_v10 }
 0x884   : > { %v1092_v16 = vmul.f32 0.11111111, %v1091_v14 }
 0x886   : > { %v1093_v17 = vadd.f32 1e-05, %v1092_v16 }
 0x888   : > { %2625 = vrsqrt.f32 %v1093_v17 }
 0x892   : > { %v2626_v19 = vpop.eup %2625 }
 0x893   : > { %v1095_v20 = vmul.f32 %v2626_v19, %v1080_v39  ;;  %v1096_v22 = vmul.f32 %v2626_v19, %v1081_v63 }
 0x895   : > { %v3056_v23 = vadd.f32 %v1095_v20, %v3008_v61  ;;  %v3059_v26 = vadd.f32 %v1096_v22, %v3011_v62 }
 0x897   : > { %2111 = vmatprep.mubr.f32.mxu0 %v3056_v23 }
 0x898   : > { %2112 = vmatmul.mubr.f32.vlgmr.msra.gmra.mrb[8].mxu0 %v3059_v26 }
 0x899   : > { %2542 = vmatpush3.bf16.msra.mxu0 %v2690_v3 }
 0x89a   : > { %2544 = vmatprep.subr.bf16.mxu0 %v2695_v5 }
 0x89d   : > { %2546 = vmatpush3.bf16.msra.mxu0 %v2695_v5 }
 0x89e   : > { %2548 = vmatprep.subr.bf16.mxu0 %v2709_v8 }
 0x8a1   : > { %2550 = vmatpush3.bf16.msra.mxu0 %v2709_v8 }
 0x8a2   : > { %2552 = vmatprep.subr.bf16.mxu0 %v2730_v12 }
 0x8a5   : > { %2554 = vmatpush3.bf16.msra.mxu0 %v2730_v12 }
 0x8a6   : > { %2556 = vmatprep.subr.bf16.mxu0 %v2740_v15 }
 0x8a9   : > { %2558 = vmatpush3.bf16.msra.mxu0 %v2740_v15 }
 0x8aa   : > { %2560 = vmatprep.subr.bf16.mxu0 %v2750_v18 }
 0x8ad   : > { %2562 = vmatpush3.bf16.msra.mxu0 %v2750_v18 }
 0x8ae   : > { %2564 = vmatprep.subr.bf16.mxu0 %v2760_v21 }
 0x8b1   : > { %2566 = vmatpush3.bf16.msra.mxu0 %v2760_v21 }
 0x8b2   : > { %2568 = vmatprep.subr.bf16.mxu0 %v2770_v24 }
 0x8b5   : > { %2570 = vmatpush3.bf16.msra.mxu0 %v2770_v24 }
 0x96b   : > { %v2113_v3 = vpop.f32.mrb[8].mxu0 }
 0x96c   : > { %v1171_v5 = vadd.f32 %v2113_v3, %v2880_v50  ;;  %v1165_v8 = vpop.f32.mrb[9].mxu0 }
 0x96d   : > { %v1166_v12 = vadd.f32 %v2880_v50, %v1165_v8 }
 0x96e   : > { %v1174_v15 = vsel %vm342_vm0, %v1171_v5, 0.0 }
 0x96f   : > { %v1175_v61 = vadd.f32 %v1174_v15, %v1166_v12 }
 0x971   : > { %v1176_v62 = vrot.slane %v1175_v61, 4 }
 0x973   : > { %v1177_v27 = vadd.f32 %v1176_v62, %v1175_v61 }
 0x975   : > { %v1178_v18 = vrot.slane %v1177_v27, 2 }
 0x977   : > { %v1179_v28 = vadd.f32 %v1178_v18, %v1177_v27 }
 0x979   : > { %v1180_v32 = vrot.slane %v1179_v28, 1 }
 0x97b   : > { %v1181_v33 = vadd.f32 %v1180_v32, %v1179_v28 }
 0x97d   : > { %v1182_v21 = vmul.f32 0.11111111, %v1181_v33 }
 0x97f   : > { %v1183_v35 = vsub.f32 %v1166_v12, %v1182_v21  ;;  %v1184_v36 = vsub.f32 %v1171_v5, %v1182_v21 }
 0x981   : > { %v1185_v7 = vmul.f32 %v1183_v35, %v1183_v35  ;;  %v1186_v24 = vmul.f32 %v1184_v36, %v1184_v36 }
 0x983   : > { %v1187_v9 = vsel %vm342_vm0, %v1186_v24, 0.0 }
 0x984   : > { %v1188_v41 = vadd.f32 %v1187_v9, %v1185_v7 }
 0x986   : > { %v1189_v42 = vrot.slane %v1188_v41, 4 }
 0x988   : > { %v1190_v44 = vadd.f32 %v1189_v42, %v1188_v41 }
 0x98a   : > { %v1191_v45 = vrot.slane %v1190_v44, 2 }
 0x98c   : > { %v1192_v47 = vadd.f32 %v1191_v45, %v1190_v44 }
 0x98e   : > { %v1193_v48 = vrot.slane %v1192_v47, 1 }
 0x990   : > { %v1194_v51 = vadd.f32 %v1193_v48, %v1192_v47 }
 0x992   : > { %v1195_v52 = vmul.f32 0.11111111, %v1194_v51 }
 0x994   : > { %v1196_v53 = vadd.f32 1e-05, %v1195_v52 }
 0x996   : > { %2627 = vrsqrt.f32 %v1196_v53 }
 0x9a0   : > { %v2628_v54 = vpop.eup %2627 }
 0x9a1   : > { %v1198_v55 = vmul.f32 %v2628_v54, %v1183_v35  ;;  %v1199_v56 = vmul.f32 %v2628_v54, %v1184_v36 }
 0x9a3   : > { %v1200_v57 = vmax.f32 %v1198_v55, 0.0  ;;  %v1201_v58 = vmax.f32 %v1199_v56, 0.0 }
 0x9a5   : > { %2146 = vmatprep.mubr.f32.mxu1 %v1200_v57 }
 0x9a6   : > { %2147 = vmatmul.mubr.f32.vlgmr.msra.gmra.mrb[8].mxu1 %v1201_v58 }
 0x9a7   : > { %2574 = vmatpush3.bf16.msra.mxu1 %v2805_v29 }
 0x9a8   : > { %2576 = vmatprep.subr.bf16.mxu1 %v2810_v31 }
 0x9ab   : > { %2578 = vmatpush3.bf16.msra.mxu1 %v2810_v31 }
 0x9ac   : > { %2580 = vmatprep.subr.bf16.mxu1 %v2821_v34 }
 0x9af   : > { %2582 = vmatpush3.bf16.msra.mxu1 %v2821_v34 }
 0x9b0   : > { %2584 = vmatprep.subr.bf16.mxu1 %v2831_v37 }
 0x9b3   : > { %2586 = vmatpush3.bf16.msra.mxu1 %v2831_v37 }
 0x9b4   : > { %2588 = vmatprep.subr.bf16.mxu1 %v2841_v40 }
 0x9b7   : > { %2590 = vmatpush3.bf16.msra.mxu1 %v2841_v40 }
 0x9b8   : > { %2592 = vmatprep.subr.bf16.mxu1 %v2851_v43 }
 0x9bb   : > { %2594 = vmatpush3.bf16.msra.mxu1 %v2851_v43 }
 0x9bc   : > { %2596 = vmatprep.subr.bf16.mxu1 %v2861_v46 }
 0x9bf   : > { %2598 = vmatpush3.bf16.msra.mxu1 %v2861_v46 }
 0x9c0   : > { %2600 = vmatprep.subr.bf16.mxu1 %v2871_v49 }
 0x9c3   : > { %2602 = vmatpush3.bf16.msra.mxu1 %v2871_v49 }
 0xa79   : > { %v2148_v29 = vpop.f32.mrb[8].mxu1 }
 0xa7a   : > { %v1274_v31 = vadd.f32 %v2148_v29, %v2905_v30  ;;  %v1268_v34 = vpop.f32.mrb[9].mxu1 }
 0xa7b   : > { %v1269_v37 = vadd.f32 %v2905_v30, %v1268_v34 }
 0xa7c   : > { %v1277_v40 = vsel %vm342_vm0, %v1274_v31, 0.0 }
 0xa7d   : > { %v1278_v59 = vadd.f32 %v1277_v40, %v1269_v37 }
 0xa7f   : > { %v1279_v60 = vrot.slane %v1278_v59, 4 }
 0xa81   : > { %v1280_v38 = vadd.f32 %v1279_v60, %v1278_v59 }
 0xa83   : > { %v1281_v43 = vrot.slane %v1280_v38, 2 }
 0xa85   : > { %v1282_v39 = vadd.f32 %v1281_v43, %v1280_v38 }
 0xa87   : > { %v1283_v63 = vrot.slane %v1282_v39, 1 }
 0xa89   : > { %v1284_v0 = vadd.f32 %v1283_v63, %v1282_v39 }
 0xa8b   : > { %v1285_v46 = vmul.f32 0.11111111, %v1284_v0 }
 0xa8d   : > { %v1286_v1 = vsub.f32 %v1269_v37, %v1285_v46  ;;  %v1287_v2 = vsub.f32 %v1274_v31, %v1285_v46 }
 0xa8f   : > { %v1288_v4 = vmul.f32 %v1286_v1, %v1286_v1  ;;  %v1289_v49 = vmul.f32 %v1287_v2, %v1287_v2 }
 0xa91   : > { %v1290_v6 = vsel %vm342_vm0, %v1289_v49, 0.0 }
 0xa92   : > { %v1291_v11 = vadd.f32 %v1290_v6, %v1288_v4 }
 0xa94   : > { %v1292_v25 = vrot.slane %v1291_v11, 4 }
 0xa96   : > { %v1293_v10 = vadd.f32 %v1292_v25, %v1291_v11 }
 0xa98   : > { %v1294_v13 = vrot.slane %v1293_v10, 2 }
 0xa9a   : > { %v1295_v14 = vadd.f32 %v1294_v13, %v1293_v10 }
 0xa9c   : > { %v1296_v16 = vrot.slane %v1295_v14, 1 }
 0xa9e   : > { %v1297_v17 = vadd.f32 %v1296_v16, %v1295_v14 }
 0xaa0   : > { %v1298_v19 = vmul.f32 0.11111111, %v1297_v17 }
 0xaa2   : > { %v1299_v20 = vadd.f32 1e-05, %v1298_v19 }
 0xaa4   : > { %2629 = vrsqrt.f32 %v1299_v20 }
 0xaae   : > { %v2630_v22 = vpop.eup %2629 }
 0xaaf   : > { %v1301_v3 = vmul.f32 %v2630_v22, %v1286_v1  ;;  %v1302_v5 = vmul.f32 %v2630_v22, %v1287_v2 }
 0xab1   : > { %v3102_v8 = vadd.f32 %v1301_v3, %v3056_v23  ;;  %v3105_v12 = vadd.f32 %v1302_v5, %v3059_v26 }
 0xab3   : > { %2181 = vmatprep.mubr.f32.mxu0 %v3102_v8 }
 0xab4   : > { %2182 = vmatmul.mubr.f32.vlgmr.msra.gmra.mrb[10].mxu0 %v3105_v12 }
 0xb87   : > { %v2183_v15 = vpop.f32.mrb[10].mxu0 }
 0xb88   : > { %v1377_v61 = vadd.f32 %v2183_v15, %v2880_v50  ;;  %v1371_v62 = vpop.f32.mrb[11].mxu0 }
 0xb89   : > { %v1372_v27 = vadd.f32 %v2880_v50, %v1371_v62 }
 0xb8a   : > { %v1380_v18 = vsel %vm342_vm0, %v1377_v61, 0.0 }
 0xb8b   : > { %v1381_v28 = vadd.f32 %v1380_v18, %v1372_v27 }
 0xb8d   : > { %v1382_v32 = vrot.slane %v1381_v28, 4 }
 0xb8f   : > { %v1383_v33 = vadd.f32 %v1382_v32, %v1381_v28 }
 0xb91   : > { %v1384_v23 = vrot.slane %v1383_v33, 2 }
 0xb93   : > { %v1385_v21 = vadd.f32 %v1384_v23, %v1383_v33 }
 0xb95   : > { %v1386_v35 = vrot.slane %v1385_v21, 1 }
 0xb97   : > { %v1387_v26 = vadd.f32 %v1386_v35, %v1385_v21 }
 0xb99   : > { %v1388_v36 = vmul.f32 0.11111111, %v1387_v26 }
 0xb9b   : > { %v1389_v7 = vsub.f32 %v1372_v27, %v1388_v36  ;;  %v1390_v24 = vsub.f32 %v1377_v61, %v1388_v36 }
 0xb9d   : > { %v1391_v9 = vmul.f32 %v1389_v7, %v1389_v7  ;;  %v1392_v41 = vmul.f32 %v1390_v24, %v1390_v24 }
 0xb9f   : > { %v1393_v42 = vsel %vm342_vm0, %v1392_v41, 0.0 }
 0xba0   : > { %v1394_v44 = vadd.f32 %v1393_v42, %v1391_v9 }
 0xba2   : > { %v1395_v45 = vrot.slane %v1394_v44, 4 }
 0xba4   : > { %v1396_v47 = vadd.f32 %v1395_v45, %v1394_v44 }
 0xba6   : > { %v1397_v50 = vrot.slane %v1396_v47, 2 }
 0xba8   : > { %v1398_v48 = vadd.f32 %v1397_v50, %v1396_v47 }
 0xbaa   : > { %v1399_v51 = vrot.slane %v1398_v48, 1 }
 0xbac   : > { %v1400_v52 = vadd.f32 %v1399_v51, %v1398_v48 }
 0xbae   : > { %v1401_v53 = vmul.f32 0.11111111, %v1400_v52 }
 0xbb0   : > { %v1402_v54 = vadd.f32 1e-05, %v1401_v53 }
 0xbb2   : > { %2631 = vrsqrt.f32 %v1402_v54 }
 0xbbc   : > { %v2632_v55 = vpop.eup %2631 }
 0xbbd   : > { %v1404_v56 = vmul.f32 %v2632_v55, %v1389_v7  ;;  %v1405_v57 = vmul.f32 %v2632_v55, %v1390_v24 }
 0xbbf   : > { %v1406_v58 = vmax.f32 %v1404_v56, 0.0  ;;  %v1407_v29 = vmax.f32 %v1405_v57, 0.0 }
 0xbc1   : > { %2216 = vmatprep.mubr.f32.mxu1 %v1406_v58 }
 0xbc2   : > { %2217 = vmatmul.mubr.f32.vlgmr.msra.gmra.mrb[10].mxu1 %v1407_v29 }
 0xc95   : > { %v2218_v31 = vpop.f32.mrb[10].mxu1 }
 0xc96   : > { %v1480_v34 = vadd.f32 %v2218_v31, %v2905_v30  ;;  %v1474_v37 = vpop.f32.mrb[11].mxu1 }
 0xc97   : > { %v1475_v40 = vadd.f32 %v2905_v30, %v1474_v37 }
 0xc98   : > { %v1483_v59 = vsel %vm342_vm0, %v1480_v34, 0.0 }
 0xc99   : > { %v1484_v60 = vadd.f32 %v1483_v59, %v1475_v40 }
 0xc9b   : > { %v1485_v38 = vrot.slane %v1484_v60, 4 }
 0xc9d   : > { %v1486_v43 = vadd.f32 %v1485_v38, %v1484_v60 }
 0xc9f   : > { %v1487_v39 = vrot.slane %v1486_v43, 2 }
 0xca1   : > { %v1488_v63 = vadd.f32 %v1487_v39, %v1486_v43 }
 0xca3   : > { %v1489_v0 = vrot.slane %v1488_v63, 1 }
 0xca5   : > { %v1490_v46 = vadd.f32 %v1489_v0, %v1488_v63 }
 0xca7   : > { %v1491_v1 = vmul.f32 0.11111111, %v1490_v46 }
 0xca9   : > { %v1492_v2 = vsub.f32 %v1475_v40, %v1491_v1  ;;  %v1493_v4 = vsub.f32 %v1480_v34, %v1491_v1 }
 0xcab   : > { %v1494_v49 = vmul.f32 %v1492_v2, %v1492_v2  ;;  %v1495_v6 = vmul.f32 %v1493_v4, %v1493_v4 }
 0xcad   : > { %v1496_v11 = vsel %vm342_vm0, %v1495_v6, 0.0 }
 0xcae   : > { %v1497_v25 = vadd.f32 %v1496_v11, %v1494_v49 }
 0xcb0   : > { %v1498_v10 = vrot.slane %v1497_v25, 4 }
 0xcb2   : > { %v1499_v30 = vadd.f32 %v1498_v10, %v1497_v25 }
 0xcb4   : > { %v1500_v13 = vrot.slane %v1499_v30, 2 }
 0xcb6   : > { %v1501_v14 = vadd.f32 %v1500_v13, %v1499_v30 }
 0xcb8   : > { %v1502_v16 = vrot.slane %v1501_v14, 1 }
 0xcba   : > { %v1503_v17 = vadd.f32 %v1502_v16, %v1501_v14 }
 0xcbc   : > { %v1504_v19 = vmul.f32 0.11111111, %v1503_v17 }
 0xcbe   : > { %v1505_v20 = vadd.f32 1e-05, %v1504_v19 }
 0xcc0   : > { %2633 = vrsqrt.f32 %v1505_v20 }
 0xcca   : > { %v2634_v22 = vpop.eup %2633 }
 0xccb   : > { %v1507_v3 = vmul.f32 %v2634_v22, %v1492_v2  ;;  %v1508_v5 = vmul.f32 %v2634_v22, %v1493_v4 }
 0xccd   : > { %v1509_v15 = vadd.f32 %v1507_v3, %v3102_v8  ;;  %v1510_v61 = vadd.f32 %v1508_v5, %v3105_v12 }
 0xccf   : > { %1511 = vst [vmem:[%s224_s27] sm:$0xff] %v1509_v15  ;;  %1512 = vst [vmem:[%s224_s27 + $0x8] sm:$0x1] %v1510_v61 }
 0xcd0 PF: > { %s15_s18 = sadd.s32 1, %s2641_s18  }
 0xcd1   : > { %p12_p4 = scmp.ge.s32.totalorder %s15_s18, 4  }
 0xcd3   :  { %14 = sbr.rel (!%p12_p4) target bundleno = 1 (0x1), region = 70 }

// kernel: generator_forward.11
= control target key start
LH: loop header
LB: loop body
LE: loop exit
PB: predicated region body
PF: predicated region fallthrough
CT: control target
= control target key end

     0   :  { %s838_s12 = smov 0   ;;  %s1112_s0 = inlined_call_operand.vmem [shape: f32[2,64,512], index: 0, kind: input, shape index: {}]   ;;  %s1113_s1 = inlined_call_operand.vmem [shape: f32[512,128], index: 1, kind: input, shape index: {}]   ;;  %s1114_s2 = inlined_call_operand.vmem [shape: f32[1,128], index: 2, kind: input, shape index: {}]   ;;  %s1115_s3 = inlined_call_operand.vmem [shape: f32[2,64,128], index: 3, kind: output, shape index: {}]  }
   0x1 LB: > { %s610_s13 = sadd.s32 4294967295, %s816_s12   ;;  %p614_p0 = scmp.ge.s32.totalorder %s816_s12, 1  ;;  %s816_s12 = sphi %s838_s12, %s13_s12  }
   0x2   : > { %p137_p1 = scmp.lt.s32.totalorder %s816_s12, 3 }
   0x4   : > { %p138_p2 = pnand %p614_p0, %p137_p1 }
   0x5   : > { %v219_v0 = vld [vmem:[%s1113_s1 + $0x80] sm:$0xff] (!%p138_p2)  ;;  %v220_v1 = vld [vmem:[%s1113_s1 + $0x88] sm:$0xff] (!%p138_p2)  ;;  %v221_v11 = vld [vmem:[%s1113_s1 + $0x90] sm:$0xff] (!%p138_p2)  ;;  %p920_p3 = scmp.lt.s32.totalorder (!%p138_p2), %s610_s13, 1 }
   0x6   : > { %141 = sbr.rel (%p138_p2) target bundleno = 356 (0x164), region = 32  ;;  %v203_v2 = vld [vmem:[%s1113_s1] sm:$0xff] (!%p138_p2)  ;;  %v736_v3 = vpack.c.bf16 (!%p138_p2), %v220_v1, %v219_v0  ;;  %v204_v4 = vld [vmem:[%s1113_s1 + $0x8] sm:$0xff] (!%p138_p2)  ;;  %v222_v13 = vld [vmem:[%s1113_s1 + $0x98] sm:$0xff] (!%p138_p2) }
   0x7   : > { %v251_v5 = vld [vmem:[%s1113_s1 + $0x180] sm:$0xff] (!%p138_p2)  ;;  %v252_v6 = vld [vmem:[%s1113_s1 + $0x188] sm:$0xff] (!%p138_p2)  ;;  %v738_v7 = vpack.c.bf16 (!%p138_p2), %v204_v4, %v203_v2  ;;  %v205_v14 = vld [vmem:[%s1113_s1 + $0x10] sm:$0xff] (!%p138_p2)  ;;  %v740_v16 = vpack.c.bf16 (!%p138_p2), %v222_v13, %v221_v11 }
   0x8   : > { %v768_v8 = vpack.c.bf16 (!%p138_p2), %v252_v6, %v251_v5  ;;  %v235_v9 = vld [vmem:[%s1113_s1 + $0x100] sm:$0xff] (!%p138_p2)  ;;  %v236_v10 = vld [vmem:[%s1113_s1 + $0x108] sm:$0xff] (!%p138_p2)  ;;  %737 = vmatprep.subr.bf16.mxu0 (!%p138_p2), %v736_v3  ;;  %v206_v15 = vld [vmem:[%s1113_s1 + $0x18] sm:$0xff] (!%p138_p2) }
   0x9   : > { %v770_v12 = vpack.c.bf16 (!%p138_p2), %v236_v10, %v235_v9  ;;  %739 = vmatpush3.bf16.msra.mxu0 (!%p138_p2), %v738_v7  ;;  %v742_v17 = vpack.c.bf16 (!%p138_p2), %v206_v15, %v205_v14  ;;  %v253_v18 = vld [vmem:[%s1113_s1 + $0x190] sm:$0xff] (!%p138_p2)  ;;  %v254_v19 = vld [vmem:[%s1113_s1 + $0x198] sm:$0xff] (!%p138_p2)  ;;  %v223_v23 = vld [vmem:[%s1113_s1 + $0xa0] sm:$0xff] (!%p138_p2) }
   0xa   : > { %769 = vmatprep.subr.bf16.mxu1 (!%p138_p2), %v768_v8  ;;  %v237_v20 = vld [vmem:[%s1113_s1 + $0x110] sm:$0xff] (!%p138_p2)  ;;  %v772_v21 = vpack.c.bf16 (!%p138_p2), %v254_v19, %v253_v18  ;;  %v238_v22 = vld [vmem:[%s1113_s1 + $0x118] sm:$0xff] (!%p138_p2)  ;;  %v224_v24 = vld [vmem:[%s1113_s1 + $0xa8] sm:$0xff] (!%p138_p2)  ;;  %741 = vmatprep.subr.bf16.mxu0 (!%p138_p2), %v740_v16 }
   0xb   : > { %771 = vmatpush3.bf16.msra.mxu1 (!%p138_p2), %v770_v12  ;;  %v774_v25 = vpack.c.bf16 (!%p138_p2), %v238_v22, %v237_v20  ;;  %v744_v26 = vpack.c.bf16 (!%p138_p2), %v224_v24, %v223_v23  ;;  %v207_v27 = vld [vmem:[%s1113_s1 + $0x20] sm:$0xff] (!%p138_p2)  ;;  %v208_v28 = vld [vmem:[%s1113_s1 + $0x28] sm:$0xff] (!%p138_p2)  ;;  %v225_v35 = vld [vmem:[%s1113_s1 + $0xb0] sm:$0xff] (!%p138_p2) }
   0xc   : > { %v255_v29 = vld [vmem:[%s1113_s1 + $0x1a0] sm:$0xff] (!%p138_p2)  ;;  %773 = vmatprep.subr.bf16.mxu1 (!%p138_p2), %v772_v21  ;;  %v256_v30 = vld [vmem:[%s1113_s1 + $0x1a8] sm:$0xff] (!%p138_p2)  ;;  %v746_v33 = vpack.c.bf16 (!%p138_p2), %v208_v28, %v207_v27  ;;  %v226_v36 = vld [vmem:[%s1113_s1 + $0xb8] sm:$0xff] (!%p138_p2) }
   0xd   : > { %v239_v31 = vld [vmem:[%s1113_s1 + $0x120] sm:$0xff]  ;;  %v240_v32 = vld [vmem:[%s1113_s1 + $0x128] sm:$0xff]  ;;  %743 = vmatpush3.bf16.msra.mxu0 %v742_v17  ;;  %v776_v34 = vpack.c.bf16 %v256_v30, %v255_v29  ;;  %v209_v37 = vld [vmem:[%s1113_s1 + $0x30] sm:$0xff]  ;;  %v748_v39 = vpack.c.bf16 %v226_v36, %v225_v35  ;;  %s1118_s13 = smov (!%p920_p3, %s610_s13), 1 }
   0xe   : > { %745 = vmatprep.subr.bf16.mxu0 %v744_v26  ;;  %v778_v38 = vpack.c.bf16 %v240_v32, %v239_v31  ;;  %v210_v40 = vld [vmem:[%s1113_s1 + $0x38] sm:$0xff]  ;;  %v257_v41 = vld [vmem:[%s1113_s1 + $0x1b0] sm:$0xff]  ;;  %v227_v46 = vld [vmem:[%s1113_s1 + $0xc0] sm:$0xff]  ;;  %s622_s28 = sshll.u32 %s1118_s13, 8 }
   0xf   : > { %775 = vmatpush3.bf16.msra.mxu1 %v774_v25  ;;  %v258_v42 = vld [vmem:[%s1113_s1 + $0x1b8] sm:$0xff]  ;;  %v241_v44 = vld [vmem:[%s1113_s1 + $0x130] sm:$0xff]  ;;  %v228_v47 = vld [vmem:[%s1113_s1 + $0xc8] sm:$0xff]  ;;  %v750_v48 = vpack.c.bf16 %v210_v40, %v209_v37  ;;  %s1012_s18 = scalar_lea.vmem %s1112_s0, %s622_s28 }
  0x10   : > { %777 = vmatprep.subr.bf16.mxu1 %v776_v34  ;;  %v780_v43 = vpack.c.bf16 %v258_v42, %v257_v41  ;;  %v242_v45 = vld [vmem:[%s1113_s1 + $0x138] sm:$0xff]  ;;  %v259_v49 = vld [vmem:[%s1113_s1 + $0x1c0] sm:$0xff]  ;;  %v260_v50 = vld [vmem:[%s1113_s1 + $0x1c8] sm:$0xff]  ;;  %v752_v52 = vpack.c.bf16 %v228_v47, %v227_v46 }
  0x11   : > { %747 = vmatpush3.bf16.msra.mxu0 %v746_v33  ;;  %v782_v51 = vpack.c.bf16 %v242_v45, %v241_v44  ;;  %v211_v53 = vld [vmem:[%s1113_s1 + $0x40] sm:$0xff]  ;;  %v212_v54 = vld [vmem:[%s1113_s1 + $0x48] sm:$0xff]  ;;  %v784_v56 = vpack.c.bf16 %v260_v50, %v259_v49  ;;  %v229_v58 = vld [vmem:[%s1113_s1 + $0xd0] sm:$0xff] }
  0x12   : > { %749 = vmatprep.subr.bf16.mxu0 %v748_v39  ;;  %v243_v55 = vld [vmem:[%s1113_s1 + $0x140] sm:$0xff]  ;;  %v244_v57 = vld [vmem:[%s1113_s1 + $0x148] sm:$0xff]  ;;  %v230_v59 = vld [vmem:[%s1113_s1 + $0xd8] sm:$0xff]  ;;  %v754_v62 = vpack.c.bf16 %v212_v54, %v211_v53 }
  0x13   : > { %779 = vmatpush3.bf16.msra.mxu1 %v778_v38  ;;  %v261_v60 = vld [vmem:[%s1113_s1 + $0x1d0] sm:$0xff]  ;;  %v262_v61 = vld [vmem:[%s1113_s1 + $0x1d8] sm:$0xff]  ;;  %v786_v63 = vpack.c.bf16 %v244_v57, %v243_v55  ;;  %v756_v0 = vpack.c.bf16 %v230_v59, %v229_v58  ;;  %v231_v6 = vld [vmem:[%s1113_s1 + $0xe0] sm:$0xff] }
  0x14   : > { %781 = vmatprep.subr.bf16.mxu1 %v780_v43  ;;  %v213_v1 = vld [vmem:[%s1113_s1 + $0x50] sm:$0xff]  ;;  %v214_v2 = vld [vmem:[%s1113_s1 + $0x58] sm:$0xff]  ;;  %v788_v4 = vpack.c.bf16 %v262_v61, %v261_v60  ;;  %v232_v7 = vld [vmem:[%s1113_s1 + $0xe8] sm:$0xff] }
  0x15   : > { %751 = vmatpush3.bf16.msra.mxu0 %v750_v48  ;;  %v245_v3 = vld [vmem:[%s1113_s1 + $0x150] sm:$0xff]  ;;  %v246_v5 = vld [vmem:[%s1113_s1 + $0x158] sm:$0xff]  ;;  %v263_v8 = vld [vmem:[%s1113_s1 + $0x1e0] sm:$0xff]  ;;  %v758_v10 = vpack.c.bf16 %v214_v2, %v213_v1  ;;  %v760_v14 = vpack.c.bf16 %v232_v7, %v231_v6 }
  0x16   : > { %753 = vmatprep.subr.bf16.mxu0 %v752_v52  ;;  %v264_v9 = vld [vmem:[%s1113_s1 + $0x1e8] sm:$0xff]  ;;  %v215_v11 = vld [vmem:[%s1113_s1 + $0x60] sm:$0xff]  ;;  %v790_v13 = vpack.c.bf16 %v246_v5, %v245_v3  ;;  %v233_v19 = vld [vmem:[%s1113_s1 + $0xf0] sm:$0xff] }
  0x17   : > { %783 = vmatpush3.bf16.msra.mxu1 %v782_v51  ;;  %v216_v12 = vld [vmem:[%s1113_s1 + $0x68] sm:$0xff]  ;;  %v247_v15 = vld [vmem:[%s1113_s1 + $0x160] sm:$0xff]  ;;  %v792_v18 = vpack.c.bf16 %v264_v9, %v263_v8  ;;  %v234_v20 = vld [vmem:[%s1113_s1 + $0xf8] sm:$0xff] }
  0x18   : > { %785 = vmatprep.subr.bf16.mxu1 %v784_v56  ;;  %v248_v16 = vld [vmem:[%s1113_s1 + $0x168] sm:$0xff]  ;;  %v174_v21 = vld [vmem:[%s1012_s18 + $0x18] sm:$0xff]  ;;  %v265_v22 = vld [vmem:[%s1113_s1 + $0x1f0] sm:$0xff]  ;;  %v762_v24 = vpack.c.bf16 %v216_v12, %v215_v11  ;;  %v764_v26 = vpack.c.bf16 %v234_v20, %v233_v19 }
  0x19   : > { %755 = vmatpush3.bf16.msra.mxu0 %v754_v62  ;;  %v172_v17 = vld [vmem:[%s1012_s18 + $0x8] sm:$0xff]  ;;  %v266_v23 = vld [vmem:[%s1113_s1 + $0x1f8] sm:$0xff]  ;;  %443 = vmatprep.mubr.f32.mxu1 %v174_v21  ;;  %v794_v25 = vpack.c.bf16 %v248_v16, %v247_v15  ;;  %v217_v27 = vld [vmem:[%s1113_s1 + $0x70] sm:$0xff] }
  0x1a   : > { %757 = vmatprep.subr.bf16.mxu0 %v756_v0  ;;  %338 = vmatprep.mubr.f32.mxu0 %v172_v17  ;;  %v218_v28 = vld [vmem:[%s1113_s1 + $0x78] sm:$0xff]  ;;  %v796_v29 = vpack.c.bf16 %v266_v23, %v265_v22  ;;  %v249_v30 = vld [vmem:[%s1113_s1 + $0x170] sm:$0xff]  ;;  %v171_v34 = vld [vmem:[%s1012_s18] sm:$0xff] }
  0x1b   : > { %787 = vmatpush3.bf16.msra.mxu1 %v786_v63  ;;  %v250_v31 = vld [vmem:[%s1113_s1 + $0x178] sm:$0xff]  ;;  %v766_v32 = vpack.c.bf16 %v218_v28, %v217_v27  ;;  %v173_v35 = vld [vmem:[%s1012_s18 + $0x10] sm:$0xff]  ;;  %v176_v36 = vld [vmem:[%s1012_s18 + $0x28] sm:$0xff] }
  0x1c   : > { %789 = vmatprep.subr.bf16.mxu1 %v788_v4  ;;  %v798_v33 = vpack.c.bf16 %v250_v31, %v249_v30  ;;  %v178_v37 = vld [vmem:[%s1012_s18 + $0x38] sm:$0xff]  ;;  %v175_v38 = vld [vmem:[%s1012_s18 + $0x20] sm:$0xff]  ;;  %v177_v39 = vld [vmem:[%s1012_s18 + $0x30] sm:$0xff] }
  0x1d   : > { %759 = vmatpush3.bf16.msra.mxu0 %v758_v10  ;;  %v180_v40 = vld [vmem:[%s1012_s18 + $0x48] sm:$0xff]  ;;  %v182_v41 = vld [vmem:[%s1012_s18 + $0x58] sm:$0xff]  ;;  %v179_v42 = vld [vmem:[%s1012_s18 + $0x40] sm:$0xff] }
  0x1e   : > { %761 = vmatprep.subr.bf16.mxu0 %v760_v14  ;;  %v181_v43 = vld [vmem:[%s1012_s18 + $0x50] sm:$0xff]  ;;  %v184_v44 = vld [vmem:[%s1012_s18 + $0x68] sm:$0xff]  ;;  %v186_v45 = vld [vmem:[%s1012_s18 + $0x78] sm:$0xff] }
  0x1f   : > { %791 = vmatpush3.bf16.msra.mxu1 %v790_v13  ;;  %v183_v46 = vld [vmem:[%s1012_s18 + $0x60] sm:$0xff]  ;;  %v185_v47 = vld [vmem:[%s1012_s18 + $0x70] sm:$0xff]  ;;  %v188_v48 = vld [vmem:[%s1012_s18 + $0x88] sm:$0xff] }
  0x20   : > { %793 = vmatprep.subr.bf16.mxu1 %v792_v18  ;;  %v190_v49 = vld [vmem:[%s1012_s18 + $0x98] sm:$0xff]  ;;  %v187_v50 = vld [vmem:[%s1012_s18 + $0x80] sm:$0xff]  ;;  %v189_v51 = vld [vmem:[%s1012_s18 + $0x90] sm:$0xff] }
  0x21   : > { %763 = vmatpush3.bf16.msra.mxu0 %v762_v24  ;;  %v192_v52 = vld [vmem:[%s1012_s18 + $0xa8] sm:$0xff]  ;;  %v194_v53 = vld [vmem:[%s1012_s18 + $0xb8] sm:$0xff]  ;;  %v191_v54 = vld [vmem:[%s1012_s18 + $0xa0] sm:$0xff] }
  0x22   : > { %765 = vmatprep.subr.bf16.mxu0 %v764_v26  ;;  %v193_v55 = vld [vmem:[%s1012_s18 + $0xb0] sm:$0xff]  ;;  %v196_v56 = vld [vmem:[%s1012_s18 + $0xc8] sm:$0xff]  ;;  %v198_v57 = vld [vmem:[%s1012_s18 + $0xd8] sm:$0xff] }
  0x23   : > { %795 = vmatpush3.bf16.msra.mxu1 %v794_v25  ;;  %v195_v58 = vld [vmem:[%s1012_s18 + $0xc0] sm:$0xff]  ;;  %v197_v59 = vld [vmem:[%s1012_s18 + $0xd0] sm:$0xff]  ;;  %v200_v60 = vld [vmem:[%s1012_s18 + $0xe8] sm:$0xff] }
  0x24   : > { %797 = vmatprep.subr.bf16.mxu1 %v796_v29  ;;  %v202_v61 = vld [vmem:[%s1012_s18 + $0xf8] sm:$0xff]  ;;  %v199_v62 = vld [vmem:[%s1012_s18 + $0xe0] sm:$0xff]  ;;  %v201_v63 = vld [vmem:[%s1012_s18 + $0xf0] sm:$0xff]  ;;  %s623_s18 = sshll.u32 %s1118_s13, 6 }
  0x25   : > { %767 = vmatpush3.bf16.msra.mxu0 %v766_v32  ;;  %v1091_v1 = vld [vmem:[%s1114_s2] ss:$0 sm:$0xff]  ;;  %s170_s27 = scalar_lea.vmem %s1115_s3, %s623_s18 }
  0x27   : > { %799 = vmatpush3.bf16.msra.mxu1 %v798_v33 }
  0x28   : > { %339 = vmatmul.mubr.f32.vlgmr.msra.gmra.mrb[0].mxu0 %v171_v34 }
  0x29   : > { %343 = vmatprep.mubr.f32.mxu0 %v176_v36 }
  0x2a   : > { %444 = vmatmul.mubr.f32.vlgmr.msra.gmra.mrb[0].mxu1 %v173_v35 }
  0x2b   : > { %448 = vmatprep.mubr.f32.mxu1 %v178_v37 }
  0x2c   : > { %344 = vmatmul.mubr.f32.gmra.mrb[2].mxu0 %v175_v38 }
  0x2d   : > { %348 = vmatprep.mubr.f32.mxu0 %v180_v40 }
  0x2e   : > { %449 = vmatmul.mubr.f32.gmra.mrb[2].mxu1 %v177_v39 }
  0x2f   : > { %453 = vmatprep.mubr.f32.mxu1 %v182_v41 }
  0x30   : > { %349 = vmatmul.mubr.f32.gmra.mrb[4].mxu0 %v179_v42 }
  0x31   : > { %353 = vmatprep.mubr.f32.mxu0 %v184_v44 }
  0x32   : > { %454 = vmatmul.mubr.f32.gmra.mrb[4].mxu1 %v181_v43 }
  0x33   : > { %458 = vmatprep.mubr.f32.mxu1 %v186_v45 }
  0x34   : > { %354 = vmatmul.mubr.f32.gmra.mrb[6].mxu0 %v183_v46 }
  0x35   : > { %358 = vmatprep.mubr.f32.mxu0 %v188_v48 }
  0x36   : > { %459 = vmatmul.mubr.f32.gmra.mrb[6].mxu1 %v185_v47 }
  0x37   : > { %463 = vmatprep.mubr.f32.mxu1 %v190_v49 }
  0x38   : > { %359 = vmatmul.mubr.f32.gmra.mrb[8].mxu0 %v187_v50 }
  0x39   : > { %363 = vmatprep.mubr.f32.mxu0 %v192_v52 }
  0x3a   : > { %464 = vmatmul.mubr.f32.gmra.mrb[8].mxu1 %v189_v51 }
  0x3b   : > { %468 = vmatprep.mubr.f32.mxu1 %v194_v53 }
  0x3c   : > { %364 = vmatmul.mubr.f32.gmra.mrb[10].mxu0 %v191_v54 }
  0x3d   : > { %368 = vmatprep.mubr.f32.mxu0 %v196_v56 }
  0x3e   : > { %469 = vmatmul.mubr.f32.gmra.mrb[10].mxu1 %v193_v55 }
  0x3f   : > { %473 = vmatprep.mubr.f32.mxu1 %v198_v57 }
  0x40   : > { %369 = vmatmul.mubr.f32.gmra.mrb[12].mxu0 %v195_v58 }
  0x41   : > { %373 = vmatprep.mubr.f32.mxu0 %v200_v60 }
  0x42   : > { %474 = vmatmul.mubr.f32.gmra.mrb[12].mxu1 %v197_v59 }
  0x43   : > { %478 = vmatprep.mubr.f32.mxu1 %v202_v61 }
  0x44   : > { %374 = vmatmul.mubr.f32.gmra.mrb[14].mxu0 %v199_v62 }
  0x46   : > { %479 = vmatmul.mubr.f32.gmra.mrb[14].mxu1 %v201_v63 }
  0xfb   : > { %v656_v0 = vpop.f32.mrb[0].mxu0 }
  0xfc   : > { %v657_v2 = vpop.f32.mrb[1].mxu0 }
  0xfd   : > { %v712_v3 = vpop.f32.mrb[0].mxu1  ;;  %v658_v4 = vadd.f32 %v657_v2, %v656_v0 }
  0xfe   : > { %v713_v5 = vpop.f32.mrb[1].mxu1 }
  0xff   : > { %v714_v6 = vadd.f32 %v713_v5, %v712_v3  ;;  %v341_v7 = vadd.f32 %v658_v4, %v1091_v1  ;;  %v659_v8 = vpop.f32.mrb[2].mxu0 }
 0x100   : > { %v660_v9 = vpop.f32.mrb[3].mxu0 }
 0x101   : > { %v715_v10 = vpop.f32.mrb[2].mxu1  ;;  %v1094_v11 = vadd.f32 %v714_v6, %v341_v7  ;;  %v661_v12 = vadd.f32 %v660_v9, %v659_v8 }
 0x102   : > { %v716_v13 = vpop.f32.mrb[3].mxu1 }
 0x103   : > { %v717_v14 = vadd.f32 %v716_v13, %v715_v10  ;;  %v346_v15 = vadd.f32 %v661_v12, %v1091_v1  ;;  %v662_v16 = vpop.f32.mrb[4].mxu0 }
 0x104   : > { %v663_v17 = vpop.f32.mrb[5].mxu0 }
 0x105   : > { %v718_v18 = vpop.f32.mrb[4].mxu1  ;;  %v451_v19 = vadd.f32 %v717_v14, %v346_v15  ;;  %v664_v20 = vadd.f32 %v663_v17, %v662_v16 }
 0x106   : > { %v719_v21 = vpop.f32.mrb[5].mxu1 }
 0x107   : > { %v720_v22 = vadd.f32 %v719_v21, %v718_v18  ;;  %v484_v23 = vadd.f32 %v451_v19, %v1094_v11  ;;  %v351_v24 = vadd.f32 %v664_v20, %v1091_v1  ;;  %v665_v25 = vpop.f32.mrb[6].mxu0 }
 0x108   : > { %v666_v26 = vpop.f32.mrb[7].mxu0 }
 0x109   : > { %v721_v27 = vpop.f32.mrb[6].mxu1  ;;  %v456_v28 = vadd.f32 %v720_v22, %v351_v24  ;;  %v667_v29 = vadd.f32 %v666_v26, %v665_v25 }
 0x10a   : > { %v722_v30 = vpop.f32.mrb[7].mxu1 }
 0x10b   : > { %v723_v31 = vadd.f32 %v722_v30, %v721_v27  ;;  %v485_v32 = vadd.f32 %v484_v23, %v456_v28  ;;  %v356_v33 = vadd.f32 %v667_v29, %v1091_v1  ;;  %v668_v34 = vpop.f32.mrb[8].mxu0 }
 0x10c   : > { %v669_v35 = vpop.f32.mrb[9].mxu0 }
 0x10d   : > { %v724_v36 = vpop.f32.mrb[8].mxu1  ;;  %v461_v37 = vadd.f32 %v723_v31, %v356_v33  ;;  %v670_v38 = vadd.f32 %v669_v35, %v668_v34 }
 0x10e   : > { %v725_v39 = vpop.f32.mrb[9].mxu1 }
 0x10f   : > { %v726_v40 = vadd.f32 %v725_v39, %v724_v36  ;;  %v486_v41 = vadd.f32 %v485_v32, %v461_v37  ;;  %v361_v42 = vadd.f32 %v670_v38, %v1091_v1  ;;  %v671_v43 = vpop.f32.mrb[10].mxu0 }
 0x110   : > { %v672_v44 = vpop.f32.mrb[11].mxu0 }
 0x111   : > { %v727_v45 = vpop.f32.mrb[10].mxu1  ;;  %v466_v46 = vadd.f32 %v726_v40, %v361_v42  ;;  %v673_v47 = vadd.f32 %v672_v44, %v671_v43 }
 0x112   : > { %v728_v48 = vpop.f32.mrb[11].mxu1 }
 0x113   : > { %v729_v49 = vadd.f32 %v728_v48, %v727_v45  ;;  %v487_v50 = vadd.f32 %v486_v41, %v466_v46  ;;  %v366_v51 = vadd.f32 %v673_v47, %v1091_v1  ;;  %v674_v52 = vpop.f32.mrb[12].mxu0 }
 0x114   : > { %v675_v53 = vpop.f32.mrb[13].mxu0 }
 0x115   : > { %v730_v54 = vpop.f32.mrb[12].mxu1  ;;  %v471_v55 = vadd.f32 %v729_v49, %v366_v51  ;;  %v676_v56 = vadd.f32 %v675_v53, %v674_v52 }
 0x116   : > { %v731_v57 = vpop.f32.mrb[13].mxu1 }
 0x117   : > { %v732_v58 = vadd.f32 %v731_v57, %v730_v54  ;;  %v488_v59 = vadd.f32 %v487_v50, %v471_v55  ;;  %v371_v60 = vadd.f32 %v676_v56, %v1091_v1  ;;  %v677_v61 = vpop.f32.mrb[14].mxu0 }
 0x118   : > { %v678_v62 = vpop.f32.mrb[15].mxu0 }
 0x119   : > { %v733_v63 = vpop.f32.mrb[14].mxu1  ;;  %v476_v0 = vadd.f32 %v732_v58, %v371_v60  ;;  %v679_v2 = vadd.f32 %v678_v62, %v677_v61 }
 0x11a   : > { %v734_v3 = vpop.f32.mrb[15].mxu1 }
 0x11b   : > { %v735_v4 = vadd.f32 %v734_v3, %v733_v63  ;;  %v489_v5 = vadd.f32 %v488_v59, %v476_v0  ;;  %v376_v6 = vadd.f32 %v679_v2, %v1091_v1 }
 0x11d   : > { %v481_v7 = vadd.f32 %v735_v4, %v376_v6 }
 0x11f   : > { %v490_v8 = vadd.f32 %v489_v5, %v481_v7 }
 0x121   : > { %v491_v9 = vrot.slane %v490_v8, 4 }
 0x123   : > { %v492_v10 = vadd.f32 %v491_v9, %v490_v8 }
 0x125   : > { %v493_v12 = vrot.slane %v492_v10, 2 }
 0x127   : > { %v494_v13 = vadd.f32 %v493_v12, %v492_v10 }
 0x129   : > { %v495_v14 = vrot.slane %v494_v13, 1 }
 0x12b   : > { %v496_v15 = vadd.f32 %v495_v14, %v494_v13 }
 0x12d   : > { %v498_v16 = vmul.f32 0.015625, %v496_v15 }
 0x12f   : > { %v499_v17 = vsub.f32 %v1094_v11, %v498_v16  ;;  %v500_v18 = vsub.f32 %v451_v19, %v498_v16  ;;  %v501_v20 = vsub.f32 %v456_v28, %v498_v16  ;;  %v502_v21 = vsub.f32 %v461_v37, %v498_v16 }
 0x130   : > { %v503_v22 = vsub.f32 %v466_v46, %v498_v16  ;;  %v504_v23 = vsub.f32 %v471_v55, %v498_v16  ;;  %v505_v24 = vsub.f32 %v476_v0, %v498_v16  ;;  %v506_v25 = vsub.f32 %v481_v7, %v498_v16 }
 0x131   : > { %v507_v26 = vmul.f32 %v499_v17, %v499_v17  ;;  %v508_v1 = vmul.f32 %v500_v18, %v500_v18  ;;  %v509_v27 = vmul.f32 %v501_v20, %v501_v20  ;;  %v510_v30 = vmul.f32 %v502_v21, %v502_v21 }
 0x132   : > { %v511_v32 = vmul.f32 %v503_v22, %v503_v22  ;;  %v512_v34 = vmul.f32 %v504_v23, %v504_v23  ;;  %v513_v36 = vmul.f32 %v505_v24, %v505_v24  ;;  %v514_v19 = vmul.f32 %v506_v25, %v506_v25 }
 0x133   : > { %v515_v29 = vadd.f32 %v508_v1, %v507_v26 }
 0x135   : > { %v516_v31 = vadd.f32 %v515_v29, %v509_v27 }
 0x137   : > { %v517_v33 = vadd.f32 %v516_v31, %v510_v30 }
 0x139   : > { %v518_v35 = vadd.f32 %v517_v33, %v511_v32 }
 0x13b   : > { %v519_v11 = vadd.f32 %v518_v35, %v512_v34 }
 0x13d   : > { %v520_v28 = vadd.f32 %v519_v11, %v513_v36 }
 0x13f   : > { %v521_v37 = vadd.f32 %v520_v28, %v514_v19 }
 0x141   : > { %v522_v38 = vrot.slane %v521_v37, 4 }
 0x143   : > { %v523_v39 = vadd.f32 %v522_v38, %v521_v37 }
 0x145   : > { %v524_v40 = vrot.slane %v523_v39, 2 }
 0x147   : > { %v525_v41 = vadd.f32 %v524_v40, %v523_v39 }
 0x149   : > { %v526_v42 = vrot.slane %v525_v41, 1 }
 0x14b   : > { %v527_v43 = vadd.f32 %v526_v42, %v525_v41 }
 0x14d   : > { %v528_v44 = vmul.f32 0.015625, %v527_v43 }
 0x14f   : > { %v529_v45 = vadd.f32 1e-05, %v528_v44 }
 0x151   : > { %808 = vrsqrt.f32 %v529_v45 }
 0x15b   : > { %v809_v46 = vpop.eup %808 }
 0x15c   : > { %v531_v47 = vmul.f32 %v809_v46, %v499_v17  ;;  %v532_v48 = vmul.f32 %v809_v46, %v500_v18  ;;  %v533_v49 = vmul.f32 %v809_v46, %v501_v20  ;;  %v534_v50 = vmul.f32 %v809_v46, %v502_v21 }
 0x15d   : > { %v535_v51 = vmul.f32 %v809_v46, %v503_v22  ;;  %v536_v52 = vmul.f32 %v809_v46, %v504_v23  ;;  %v537_v53 = vmul.f32 %v809_v46, %v505_v24  ;;  %v538_v54 = vmul.f32 %v809_v46, %v506_v25 }
 0x15e   : > { %v539_v55 = vmax.f32 %v531_v47, 0.0  ;;  %v540_v56 = vmax.f32 %v532_v48, 0.0  ;;  %v541_v57 = vmax.f32 %v533_v49, 0.0  ;;  %v542_v58 = vmax.f32 %v534_v50, 0.0 }
 0x15f   : > { %v543_v59 = vmax.f32 %v535_v51, 0.0  ;;  %v544_v60 = vmax.f32 %v536_v52, 0.0  ;;  %v545_v61 = vmax.f32 %v537_v53, 0.0  ;;  %v546_v62 = vmax.f32 %v538_v54, 0.0 }
 0x160   : > { %547 = vst [vmem:[%s170_s27] sm:$0xff] %v539_v55  ;;  %548 = vst [vmem:[%s170_s27 + $0x8] sm:$0xff] %v540_v56 }
 0x161   : > { %549 = vst [vmem:[%s170_s27 + $0x10] sm:$0xff] %v541_v57  ;;  %550 = vst [vmem:[%s170_s27 + $0x18] sm:$0xff] %v542_v58 }
 0x162   : > { %551 = vst [vmem:[%s170_s27 + $0x20] sm:$0xff] %v543_v59  ;;  %552 = vst [vmem:[%s170_s27 + $0x28] sm:$0xff] %v544_v60 }
 0x163   : > { %553 = vst [vmem:[%s170_s27 + $0x30] sm:$0xff] %v545_v61  ;;  %554 = vst [vmem:[%s170_s27 + $0x38] sm:$0xff] %v546_v62 }
 0x164 PF: > { %s13_s12 = sadd.s32 1, %s816_s12  }
 0x165   : > { %p10_p4 = scmp.ge.s32.totalorder %s13_s12, 4  }
 0x167   :  { %12 = sbr.rel (!%p10_p4) target bundleno = 1 (0x1), region = 62 }

// kernel: generator_forward.12
= control target key start
LH: loop header
LB: loop body
LE: loop exit
PB: predicated region body
PF: predicated region fallthrough
CT: control target
= control target key end

     0   :  { %s1054_s12 = smov 0   ;;  %s1847_s0 = inlined_call_operand.vmem [shape: f32[2,324,256], index: 0, kind: input, shape index: {}]   ;;  %s1848_s1 = inlined_call_operand.vmem [shape: f32[256,128], index: 1, kind: input, shape index: {}]   ;;  %s1849_s2 = inlined_call_operand.vmem [shape: f32[1,128], index: 2, kind: input, shape index: {}]   ;;  %s1850_s3 = inlined_call_operand.vmem [shape: f32[2,324,128], index: 3, kind: output, shape index: {}]  }
   0x1 LB: > { %s922_s13 = sadd.s32 4294967295, %s1031_s12   ;;  %p926_p0 = scmp.ge.s32.totalorder %s1031_s12, 1  ;;  %s1031_s12 = sphi %s1054_s12, %s13_s12  }
   0x2   : > { %p137_p1 = scmp.lt.s32.totalorder %s1031_s12, 3 }
   0x4   : > { %p138_p2 = pnand %p926_p0, %p137_p1 }
   0x5   : > { %v253_v0 = vld [vmem:[%s1848_s1] sm:$0xff] (!%p138_p2)  ;;  %v254_v1 = vld [vmem:[%s1848_s1 + $0x8] sm:$0xff] (!%p138_p2)  ;;  %v255_v2 = vld [vmem:[%s1848_s1 + $0x10] sm:$0xff] (!%p138_p2)  ;;  %p161_p3 = scmp.lt.s32.totalorder (!%p138_p2), %s922_s13, 1  ;;  %v1033_v3 = vmov (!%p138_p2), 0.0|0.0   ;;  %vm601_vm0 = vcmask (!%p138_p2), 1043456  }
   0x6   : > { %141 = sbr.rel (%p138_p2) target bundleno = 570 (0x23a), region = 32  ;;  %932 = vmatprep.subr.bf16.mxu0 (!%p138_p2), %v1033_v3  ;;  %v933_v4 = vpack.c.bf16 (!%p138_p2), %v254_v1, %v253_v0  ;;  %v256_v5 = vld [vmem:[%s1848_s1 + $0x18] sm:$0xff] (!%p138_p2)  ;;  %980 = vmatprep.subr.bf16.mxu1 (!%p138_p2), %v1033_v3  ;;  %v257_v7 = vld [vmem:[%s1848_s1 + $0x20] sm:$0xff] (!%p138_p2)  ;;  %v258_v8 = vld [vmem:[%s1848_s1 + $0x28] sm:$0xff] (!%p138_p2) }
   0x7   : > { %v936_v6 = vpack.c.bf16 (!%p138_p2), %v256_v5, %v255_v2  ;;  %v939_v9 = vpack.c.bf16 (!%p138_p2), %v258_v8, %v257_v7  ;;  %v259_v10 = vld [vmem:[%s1848_s1 + $0x30] sm:$0xff] (!%p138_p2)  ;;  %v260_v11 = vld [vmem:[%s1848_s1 + $0x38] sm:$0xff] (!%p138_p2)  ;;  %v261_v14 = vld [vmem:[%s1848_s1 + $0x40] sm:$0xff] (!%p138_p2) }
   0x8   : > { %934 = vmatpush1.bf16.msra.mxu0 (!%p138_p2), %v933_v4  ;;  %996 = vmatpush1.bf16.msra.mxu1 (!%p138_p2), %v933_v4  ;;  %v942_v13 = vpack.c.bf16 (!%p138_p2), %v260_v11, %v259_v10  ;;  %v262_v15 = vld [vmem:[%s1848_s1 + $0x48] sm:$0xff] (!%p138_p2)  ;;  %v263_v17 = vld [vmem:[%s1848_s1 + $0x50] sm:$0xff] (!%p138_p2)  ;;  %v264_v18 = vld [vmem:[%s1848_s1 + $0x58] sm:$0xff] (!%p138_p2) }
   0x9   : > { %935 = vmatprep.subr.bf16.mxu0 (!%p138_p2), %v1033_v3  ;;  %981 = vmatprep.subr.bf16.mxu1 (!%p138_p2), %v1033_v3  ;;  %v945_v16 = vpack.c.bf16 (!%p138_p2), %v262_v15, %v261_v14  ;;  %v948_v20 = vpack.c.bf16 (!%p138_p2), %v264_v18, %v263_v17  ;;  %v265_v21 = vld [vmem:[%s1848_s1 + $0x60] sm:$0xff] (!%p138_p2)  ;;  %v266_v22 = vld [vmem:[%s1848_s1 + $0x68] sm:$0xff] (!%p138_p2)  ;;  %v267_v24 = vld [vmem:[%s1848_s1 + $0x70] sm:$0xff] (!%p138_p2) }
   0xa   : > { %v951_v23 = vpack.c.bf16 (!%p138_p2), %v266_v22, %v265_v21  ;;  %v268_v25 = vld [vmem:[%s1848_s1 + $0x78] sm:$0xff] (!%p138_p2)  ;;  %v269_v27 = vld [vmem:[%s1848_s1 + $0x80] sm:$0xff] (!%p138_p2)  ;;  %v270_v28 = vld [vmem:[%s1848_s1 + $0x88] sm:$0xff] (!%p138_p2) }
   0xb   : > { %v954_v26 = vpack.c.bf16 (!%p138_p2), %v268_v25, %v267_v24  ;;  %v957_v29 = vpack.c.bf16 (!%p138_p2), %v270_v28, %v269_v27  ;;  %v271_v30 = vld [vmem:[%s1848_s1 + $0x90] sm:$0xff] (!%p138_p2)  ;;  %v272_v31 = vld [vmem:[%s1848_s1 + $0x98] sm:$0xff] (!%p138_p2)  ;;  %v273_v33 = vld [vmem:[%s1848_s1 + $0xa0] sm:$0xff] (!%p138_p2) }
   0xc   : > { %937 = vmatpush1.bf16.msra.mxu0 (!%p138_p2), %v936_v6  ;;  %997 = vmatpush1.bf16.msra.mxu1 (!%p138_p2), %v936_v6  ;;  %v960_v32 = vpack.c.bf16 (!%p138_p2), %v272_v31, %v271_v30  ;;  %v274_v34 = vld [vmem:[%s1848_s1 + $0xa8] sm:$0xff] (!%p138_p2)  ;;  %v275_v36 = vld [vmem:[%s1848_s1 + $0xb0] sm:$0xff] (!%p138_p2)  ;;  %v276_v37 = vld [vmem:[%s1848_s1 + $0xb8] sm:$0xff] (!%p138_p2) }
   0xd   : > { %s1852_s13 = smov (!%p161_p3, %s922_s13), 1  ;;  %938 = vmatprep.subr.bf16.mxu0 %v1033_v3  ;;  %982 = vmatprep.subr.bf16.mxu1 %v1033_v3  ;;  %v963_v35 = vpack.c.bf16 %v274_v34, %v273_v33  ;;  %v966_v38 = vpack.c.bf16 %v276_v37, %v275_v36  ;;  %v277_v39 = vld [vmem:[%s1848_s1 + $0xc0] sm:$0xff]  ;;  %v278_v40 = vld [vmem:[%s1848_s1 + $0xc8] sm:$0xff]  ;;  %v279_v42 = vld [vmem:[%s1848_s1 + $0xd0] sm:$0xff] }
   0xe   : > { %s1012_s26 = smul.u32 656, %s1852_s13  ;;  %v969_v41 = vpack.c.bf16 %v278_v40, %v277_v39  ;;  %v280_v43 = vld [vmem:[%s1848_s1 + $0xd8] sm:$0xff]  ;;  %v281_v45 = vld [vmem:[%s1848_s1 + $0xe0] sm:$0xff]  ;;  %v282_v46 = vld [vmem:[%s1848_s1 + $0xe8] sm:$0xff] }
   0xf   : > { %v972_v44 = vpack.c.bf16 %v280_v43, %v279_v42  ;;  %v975_v47 = vpack.c.bf16 %v282_v46, %v281_v45  ;;  %v283_v48 = vld [vmem:[%s1848_s1 + $0xf0] sm:$0xff]  ;;  %v284_v49 = vld [vmem:[%s1848_s1 + $0xf8] sm:$0xff]  ;;  %s1013_s8 = smul.u32 328, %s1852_s13 }
  0x10   : > { %s1090_s29 = scalar_lea.vmem %s1847_s0, %s1012_s26  ;;  %940 = vmatpush1.bf16.msra.mxu0 %v939_v9  ;;  %998 = vmatpush1.bf16.msra.mxu1 %v939_v9  ;;  %v978_v50 = vpack.c.bf16 %v284_v49, %v283_v48 }
  0x11   : > { %v172_v12 = vld [vmem:[%s1090_s29 + $0x8] sm:$0xff]  ;;  %941 = vmatprep.subr.bf16.mxu0 %v1033_v3  ;;  %983 = vmatprep.subr.bf16.mxu1 %v1033_v3  ;;  %v214_v19 = vld [vmem:[%s1090_s29 + $0x158] sm:$0xff]  ;;  %v171_v51 = vld [vmem:[%s1090_s29] sm:$0xff]  ;;  %s1756_s10 = scalar_lea.vmem %s1850_s3, %s1013_s8 }
  0x12   : > { %356 = vmatprep.mubr.f32.mxu0 %v172_v12  ;;  %461 = vmatprep.mubr.f32.mxu1 %v214_v19  ;;  %v213_v52 = vld [vmem:[%s1090_s29 + $0x150] sm:$0xff]  ;;  %v174_v53 = vld [vmem:[%s1090_s29 + $0x18] sm:$0xff]  ;;  %v216_v54 = vld [vmem:[%s1090_s29 + $0x168] sm:$0xff] }
  0x13   : > { %v173_v55 = vld [vmem:[%s1090_s29 + $0x10] sm:$0xff]  ;;  %v215_v56 = vld [vmem:[%s1090_s29 + $0x160] sm:$0xff]  ;;  %v176_v57 = vld [vmem:[%s1090_s29 + $0x28] sm:$0xff] }
  0x14   : > { %943 = vmatpush1.bf16.msra.mxu0 %v942_v13  ;;  %999 = vmatpush1.bf16.msra.mxu1 %v942_v13  ;;  %v218_v58 = vld [vmem:[%s1090_s29 + $0x178] sm:$0xff]  ;;  %v175_v59 = vld [vmem:[%s1090_s29 + $0x20] sm:$0xff]  ;;  %v217_v60 = vld [vmem:[%s1090_s29 + $0x170] sm:$0xff] }
  0x15   : > { %944 = vmatprep.subr.bf16.mxu0 %v1033_v3  ;;  %984 = vmatprep.subr.bf16.mxu1 %v1033_v3  ;;  %v178_v61 = vld [vmem:[%s1090_s29 + $0x38] sm:$0xff]  ;;  %v220_v62 = vld [vmem:[%s1090_s29 + $0x188] sm:$0xff]  ;;  %v177_v63 = vld [vmem:[%s1090_s29 + $0x30] sm:$0xff] }
  0x16   : > { %v219_v0 = vld [vmem:[%s1090_s29 + $0x180] sm:$0xff]  ;;  %v180_v1 = vld [vmem:[%s1090_s29 + $0x48] sm:$0xff]  ;;  %v222_v2 = vld [vmem:[%s1090_s29 + $0x198] sm:$0xff] }
  0x17   : > { %v221_v4 = vld [vmem:[%s1090_s29 + $0x190] sm:$0xff]  ;;  %v182_v5 = vld [vmem:[%s1090_s29 + $0x58] sm:$0xff]  ;;  %v224_v6 = vld [vmem:[%s1090_s29 + $0x1a8] sm:$0xff] }
  0x18   : > { %946 = vmatpush1.bf16.msra.mxu0 %v945_v16  ;;  %1000 = vmatpush1.bf16.msra.mxu1 %v945_v16  ;;  %v181_v7 = vld [vmem:[%s1090_s29 + $0x50] sm:$0xff]  ;;  %v223_v8 = vld [vmem:[%s1090_s29 + $0x1a0] sm:$0xff]  ;;  %v184_v9 = vld [vmem:[%s1090_s29 + $0x68] sm:$0xff] }
  0x19   : > { %947 = vmatprep.subr.bf16.mxu0 %v1033_v3  ;;  %985 = vmatprep.subr.bf16.mxu1 %v1033_v3  ;;  %v226_v10 = vld [vmem:[%s1090_s29 + $0x1b8] sm:$0xff]  ;;  %v183_v11 = vld [vmem:[%s1090_s29 + $0x60] sm:$0xff]  ;;  %v225_v12 = vld [vmem:[%s1090_s29 + $0x1b0] sm:$0xff] }
  0x1a   : > { %v186_v13 = vld [vmem:[%s1090_s29 + $0x78] sm:$0xff]  ;;  %v228_v14 = vld [vmem:[%s1090_s29 + $0x1c8] sm:$0xff]  ;;  %v185_v15 = vld [vmem:[%s1090_s29 + $0x70] sm:$0xff] }
  0x1b   : > { %v227_v16 = vld [vmem:[%s1090_s29 + $0x1c0] sm:$0xff]  ;;  %v188_v17 = vld [vmem:[%s1090_s29 + $0x88] sm:$0xff]  ;;  %v230_v18 = vld [vmem:[%s1090_s29 + $0x1d8] sm:$0xff] }
  0x1c   : > { %949 = vmatpush1.bf16.msra.mxu0 %v948_v20  ;;  %1001 = vmatpush1.bf16.msra.mxu1 %v948_v20  ;;  %v187_v19 = vld [vmem:[%s1090_s29 + $0x80] sm:$0xff]  ;;  %v229_v20 = vld [vmem:[%s1090_s29 + $0x1d0] sm:$0xff]  ;;  %v190_v21 = vld [vmem:[%s1090_s29 + $0x98] sm:$0xff] }
  0x1d   : > { %950 = vmatprep.subr.bf16.mxu0 %v1033_v3  ;;  %986 = vmatprep.subr.bf16.mxu1 %v1033_v3  ;;  %v232_v22 = vld [vmem:[%s1090_s29 + $0x1e8] sm:$0xff]  ;;  %v231_v24 = vld [vmem:[%s1090_s29 + $0x1e0] sm:$0xff]  ;;  %v233_v28 = vld [vmem:[%s1090_s29 + $0x1f0] sm:$0xff] }
  0x1e   : > { %v192_v25 = vld [vmem:[%s1090_s29 + $0xa8] sm:$0xff]  ;;  %v191_v27 = vld [vmem:[%s1090_s29 + $0xa0] sm:$0xff]  ;;  %v193_v31 = vld [vmem:[%s1090_s29 + $0xb0] sm:$0xff] }
  0x1f   : > { %v236_v30 = vld [vmem:[%s1090_s29 + $0x208] sm:$0xff]  ;;  %v238_v34 = vld [vmem:[%s1090_s29 + $0x218] sm:$0xff]  ;;  %v237_v36 = vld [vmem:[%s1090_s29 + $0x210] sm:$0xff] }
  0x20   : > { %952 = vmatpush1.bf16.msra.mxu0 %v951_v23  ;;  %1002 = vmatpush1.bf16.msra.mxu1 %v951_v23  ;;  %v189_v23 = vld [vmem:[%s1090_s29 + $0x90] sm:$0xff]  ;;  %v196_v33 = vld [vmem:[%s1090_s29 + $0xc8] sm:$0xff]  ;;  %v198_v37 = vld [vmem:[%s1090_s29 + $0xd8] sm:$0xff] }
  0x21   : > { %953 = vmatprep.subr.bf16.mxu0 %v1033_v3  ;;  %987 = vmatprep.subr.bf16.mxu1 %v1033_v3  ;;  %v197_v39 = vld [vmem:[%s1090_s29 + $0xd0] sm:$0xff]  ;;  %v239_v40 = vld [vmem:[%s1090_s29 + $0x220] sm:$0xff]  ;;  %v242_v42 = vld [vmem:[%s1090_s29 + $0x238] sm:$0xff] }
  0x22   : > { %v199_v43 = vld [vmem:[%s1090_s29 + $0xe0] sm:$0xff]  ;;  %v202_v45 = vld [vmem:[%s1090_s29 + $0xf8] sm:$0xff]  ;;  %v244_v46 = vld [vmem:[%s1090_s29 + $0x248] sm:$0xff] }
  0x23   : > { %v243_v48 = vld [vmem:[%s1090_s29 + $0x240] sm:$0xff]  ;;  %v204_v49 = vld [vmem:[%s1090_s29 + $0x108] sm:$0xff] }
  0x24   : > { %955 = vmatpush1.bf16.msra.mxu0 %v954_v26  ;;  %1003 = vmatpush1.bf16.msra.mxu1 %v954_v26  ;;  %v234_v26 = vld [vmem:[%s1090_s29 + $0x1f8] sm:$0xff] }
  0x25   : > { %956 = vmatprep.subr.bf16.mxu0 %v1033_v3  ;;  %988 = vmatprep.subr.bf16.mxu1 %v1033_v3 }
  0x28   : > { %958 = vmatpush1.bf16.msra.mxu0 %v957_v29  ;;  %1004 = vmatpush1.bf16.msra.mxu1 %v957_v29  ;;  %v194_v29 = vld [vmem:[%s1090_s29 + $0xb8] sm:$0xff] }
  0x29   : > { %959 = vmatprep.subr.bf16.mxu0 %v1033_v3  ;;  %989 = vmatprep.subr.bf16.mxu1 %v1033_v3 }
  0x2c   : > { %961 = vmatpush1.bf16.msra.mxu0 %v960_v32  ;;  %1005 = vmatpush1.bf16.msra.mxu1 %v960_v32  ;;  %v235_v32 = vld [vmem:[%s1090_s29 + $0x200] sm:$0xff] }
  0x2d   : > { %962 = vmatprep.subr.bf16.mxu0 %v1033_v3  ;;  %990 = vmatprep.subr.bf16.mxu1 %v1033_v3 }
  0x30   : > { %964 = vmatpush1.bf16.msra.mxu0 %v963_v35  ;;  %1006 = vmatpush1.bf16.msra.mxu1 %v963_v35  ;;  %v195_v35 = vld [vmem:[%s1090_s29 + $0xc0] sm:$0xff] }
  0x31   : > { %965 = vmatprep.subr.bf16.mxu0 %v1033_v3  ;;  %991 = vmatprep.subr.bf16.mxu1 %v1033_v3 }
  0x34   : > { %967 = vmatpush1.bf16.msra.mxu0 %v966_v38  ;;  %1007 = vmatpush1.bf16.msra.mxu1 %v966_v38  ;;  %v240_v38 = vld [vmem:[%s1090_s29 + $0x228] sm:$0xff] }
  0x35   : > { %968 = vmatprep.subr.bf16.mxu0 %v1033_v3  ;;  %992 = vmatprep.subr.bf16.mxu1 %v1033_v3 }
  0x38   : > { %970 = vmatpush1.bf16.msra.mxu0 %v969_v41  ;;  %1008 = vmatpush1.bf16.msra.mxu1 %v969_v41  ;;  %v200_v41 = vld [vmem:[%s1090_s29 + $0xe8] sm:$0xff] }
  0x39   : > { %971 = vmatprep.subr.bf16.mxu0 %v1033_v3  ;;  %993 = vmatprep.subr.bf16.mxu1 %v1033_v3 }
  0x3c   : > { %973 = vmatpush1.bf16.msra.mxu0 %v972_v44  ;;  %1009 = vmatpush1.bf16.msra.mxu1 %v972_v44  ;;  %v241_v44 = vld [vmem:[%s1090_s29 + $0x230] sm:$0xff] }
  0x3d   : > { %974 = vmatprep.subr.bf16.mxu0 %v1033_v3  ;;  %994 = vmatprep.subr.bf16.mxu1 %v1033_v3 }
  0x40   : > { %976 = vmatpush1.bf16.msra.mxu0 %v975_v47  ;;  %1010 = vmatpush1.bf16.msra.mxu1 %v975_v47  ;;  %v201_v47 = vld [vmem:[%s1090_s29 + $0xf0] sm:$0xff] }
  0x41   : > { %977 = vmatprep.subr.bf16.mxu0 %v1033_v3  ;;  %995 = vmatprep.subr.bf16.mxu1 %v1033_v3  ;;  %v179_v3 = vld [vmem:[%s1090_s29 + $0x40] sm:$0xff] }
  0x44   : > { %979 = vmatpush1.bf16.msra.mxu0 %v978_v50  ;;  %1011 = vmatpush1.bf16.msra.mxu1 %v978_v50  ;;  %v246_v50 = vld [vmem:[%s1090_s29 + $0x258] sm:$0xff] }
  0x47   : > { %357 = vmatmul.mubr.f32.vlgmr.msra.gmra.mrb[0].mxu0 %v171_v51  ;;  %462 = vmatmul.mubr.f32.vlgmr.msra.gmra.mrb[0].mxu1 %v213_v52  ;;  %v203_v51 = vld [vmem:[%s1090_s29 + $0x100] sm:$0xff]  ;;  %v245_v52 = vld [vmem:[%s1090_s29 + $0x250] sm:$0xff] }
  0x48   : > { %361 = vmatprep.mubr.f32.mxu0 %v174_v53  ;;  %466 = vmatprep.mubr.f32.mxu1 %v216_v54  ;;  %v206_v53 = vld [vmem:[%s1090_s29 + $0x118] sm:$0xff]  ;;  %v248_v54 = vld [vmem:[%s1090_s29 + $0x268] sm:$0xff] }
  0x4b   : > { %362 = vmatmul.mubr.f32.gmra.mrb[2].mxu0 %v173_v55  ;;  %467 = vmatmul.mubr.f32.gmra.mrb[2].mxu1 %v215_v56  ;;  %v205_v55 = vld [vmem:[%s1090_s29 + $0x110] sm:$0xff]  ;;  %v247_v56 = vld [vmem:[%s1090_s29 + $0x260] sm:$0xff] }
  0x4c   : > { %366 = vmatprep.mubr.f32.mxu0 %v176_v57  ;;  %471 = vmatprep.mubr.f32.mxu1 %v218_v58  ;;  %v208_v57 = vld [vmem:[%s1090_s29 + $0x128] sm:$0xff]  ;;  %v250_v58 = vld [vmem:[%s1090_s29 + $0x278] sm:$0xff] }
  0x4f   : > { %367 = vmatmul.mubr.f32.gmra.mrb[4].mxu0 %v175_v59  ;;  %472 = vmatmul.mubr.f32.gmra.mrb[4].mxu1 %v217_v60  ;;  %v207_v59 = vld [vmem:[%s1090_s29 + $0x120] sm:$0xff]  ;;  %v249_v60 = vld [vmem:[%s1090_s29 + $0x270] sm:$0xff] }
  0x50   : > { %371 = vmatprep.mubr.f32.mxu0 %v178_v61  ;;  %476 = vmatprep.mubr.f32.mxu1 %v220_v62  ;;  %v210_v61 = vld [vmem:[%s1090_s29 + $0x138] sm:$0xff]  ;;  %v252_v62 = vld [vmem:[%s1090_s29 + $0x288] sm:$0xf] }
  0x53   : > { %372 = vmatmul.mubr.f32.gmra.mrb[6].mxu0 %v177_v63  ;;  %477 = vmatmul.mubr.f32.gmra.mrb[6].mxu1 %v219_v0  ;;  %v209_v63 = vld [vmem:[%s1090_s29 + $0x130] sm:$0xff]  ;;  %v251_v0 = vld [vmem:[%s1090_s29 + $0x280] sm:$0xf] }
  0x54   : > { %376 = vmatprep.mubr.f32.mxu0 %v180_v1  ;;  %481 = vmatprep.mubr.f32.mxu1 %v222_v2  ;;  %v212_v1 = vld [vmem:[%s1090_s29 + $0x148] sm:$0xff]  ;;  %v211_v2 = vld [vmem:[%s1090_s29 + $0x140] sm:$0xff] }
  0x57   : > { %377 = vmatmul.mubr.f32.gmra.mrb[8].mxu0 %v179_v3  ;;  %482 = vmatmul.mubr.f32.gmra.mrb[8].mxu1 %v221_v4 }
  0x58   : > { %381 = vmatprep.mubr.f32.mxu0 %v182_v5  ;;  %486 = vmatprep.mubr.f32.mxu1 %v224_v6 }
  0x5b   : > { %382 = vmatmul.mubr.f32.gmra.mrb[10].mxu0 %v181_v7  ;;  %487 = vmatmul.mubr.f32.gmra.mrb[10].mxu1 %v223_v8 }
  0x5c   : > { %386 = vmatprep.mubr.f32.mxu0 %v184_v9  ;;  %491 = vmatprep.mubr.f32.mxu1 %v226_v10 }
  0x5f   : > { %387 = vmatmul.mubr.f32.gmra.mrb[12].mxu0 %v183_v11  ;;  %492 = vmatmul.mubr.f32.gmra.mrb[12].mxu1 %v225_v12 }
  0x60   : > { %391 = vmatprep.mubr.f32.mxu0 %v186_v13  ;;  %496 = vmatprep.mubr.f32.mxu1 %v228_v14 }
  0x63   : > { %392 = vmatmul.mubr.f32.gmra.mrb[14].mxu0 %v185_v15  ;;  %497 = vmatmul.mubr.f32.gmra.mrb[14].mxu1 %v227_v16 }
  0x64   : > { %396 = vmatprep.mubr.f32.mxu0 %v188_v17  ;;  %501 = vmatprep.mubr.f32.mxu1 %v230_v18 }
  0x67   : > { %397 = vmatmul.mubr.f32.gmra.mrb[16].mxu0 %v187_v19  ;;  %502 = vmatmul.mubr.f32.gmra.mrb[16].mxu1 %v229_v20 }
  0x68   : > { %401 = vmatprep.mubr.f32.mxu0 %v190_v21  ;;  %506 = vmatprep.mubr.f32.mxu1 %v232_v22 }
  0x6b   : > { %402 = vmatmul.mubr.f32.gmra.mrb[18].mxu0 %v189_v23  ;;  %507 = vmatmul.mubr.f32.gmra.mrb[18].mxu1 %v231_v24 }
  0x6c   : > { %406 = vmatprep.mubr.f32.mxu0 %v192_v25  ;;  %511 = vmatprep.mubr.f32.mxu1 %v234_v26 }
  0x6f   : > { %407 = vmatmul.mubr.f32.gmra.mrb[20].mxu0 %v191_v27  ;;  %512 = vmatmul.mubr.f32.gmra.mrb[20].mxu1 %v233_v28 }
  0x70   : > { %411 = vmatprep.mubr.f32.mxu0 %v194_v29  ;;  %516 = vmatprep.mubr.f32.mxu1 %v236_v30 }
  0x73   : > { %412 = vmatmul.mubr.f32.gmra.mrb[22].mxu0 %v193_v31  ;;  %517 = vmatmul.mubr.f32.gmra.mrb[22].mxu1 %v235_v32 }
  0x74   : > { %416 = vmatprep.mubr.f32.mxu0 %v196_v33  ;;  %521 = vmatprep.mubr.f32.mxu1 %v238_v34 }
  0x77   : > { %417 = vmatmul.mubr.f32.gmra.mrb[24].mxu0 %v195_v35  ;;  %522 = vmatmul.mubr.f32.gmra.mrb[24].mxu1 %v237_v36 }
  0x78   : > { %421 = vmatprep.mubr.f32.mxu0 %v198_v37  ;;  %526 = vmatprep.mubr.f32.mxu1 %v240_v38 }
  0x7b   : > { %422 = vmatmul.mubr.f32.gmra.mrb[26].mxu0 %v197_v39  ;;  %527 = vmatmul.mubr.f32.gmra.mrb[26].mxu1 %v239_v40 }
  0x7c   : > { %426 = vmatprep.mubr.f32.mxu0 %v200_v41  ;;  %531 = vmatprep.mubr.f32.mxu1 %v242_v42 }
  0x7f   : > { %427 = vmatmul.mubr.f32.gmra.mrb[28].mxu0 %v199_v43  ;;  %532 = vmatmul.mubr.f32.gmra.mrb[28].mxu1 %v241_v44  ;;  %v1303_v43 = vld [vmem:[%s1849_s2] ss:$0 sm:$0xff] }
  0x80   : > { %431 = vmatprep.mubr.f32.mxu0 %v202_v45  ;;  %536 = vmatprep.mubr.f32.mxu1 %v244_v46 }
  0x83   : > { %432 = vmatmul.mubr.f32.gmra.mrb[30].mxu0 %v201_v47  ;;  %537 = vmatmul.mubr.f32.gmra.mrb[30].mxu1 %v243_v48 }
  0x84   : > { %436 = vmatprep.mubr.f32.mxu0 %v204_v49  ;;  %541 = vmatprep.mubr.f32.mxu1 %v246_v50 }
  0x87   : > { %437 = vmatmul.mubr.f32.gmra.mrb[32].mxu0 %v203_v51  ;;  %542 = vmatmul.mubr.f32.gmra.mrb[32].mxu1 %v245_v52 }
  0x88   : > { %441 = vmatprep.mubr.f32.mxu0 %v206_v53  ;;  %546 = vmatprep.mubr.f32.mxu1 %v248_v54 }
  0x8b   : > { %442 = vmatmul.mubr.f32.gmra.mrb[34].mxu0 %v205_v55  ;;  %547 = vmatmul.mubr.f32.gmra.mrb[34].mxu1 %v247_v56 }
  0x8c   : > { %446 = vmatprep.mubr.f32.mxu0 %v208_v57  ;;  %551 = vmatprep.mubr.f32.mxu1 %v250_v58 }
  0x8f   : > { %447 = vmatmul.mubr.f32.gmra.mrb[36].mxu0 %v207_v59  ;;  %552 = vmatmul.mubr.f32.gmra.mrb[36].mxu1 %v249_v60 }
  0x90   : > { %451 = vmatprep.mubr.f32.mxu0 %v210_v61  ;;  %556 = vmatprep.mubr.f32.mxu1 %v252_v62 }
  0x93   : > { %452 = vmatmul.mubr.f32.gmra.mrb[38].mxu0 %v209_v63  ;;  %557 = vmatmul.mubr.f32.gmra.mrb[38].mxu1 %v251_v0 }
  0x94   : > { %456 = vmatprep.mubr.f32.mxu0 %v212_v1 }
  0x97   : > { %457 = vmatmul.mubr.f32.gmra.mrb[40].mxu0 %v211_v2 }
 0x11a   : > { %v358_v3 = vpop.f32.mrb[0].mxu0  ;;  %v1280_v4 = vpop.f32.mrb[0].mxu1 }
 0x11b   : > { %v360_v5 = vpop.f32.mrb[1].mxu0  ;;  %v465_v6 = vpop.f32.mrb[1].mxu1  ;;  %v1311_v49 = vadd.f32 %v1303_v43, %v358_v3 }
 0x11e   : > { %v363_v7 = vpop.f32.mrb[2].mxu0  ;;  %v1282_v8 = vpop.f32.mrb[2].mxu1 }
 0x11f   : > { %v365_v9 = vpop.f32.mrb[3].mxu0  ;;  %v470_v10 = vpop.f32.mrb[3].mxu1  ;;  %v1308_v46 = vadd.f32 %v1303_v43, %v363_v7 }
 0x121   : > { %v562_v53 = vadd.f32 %v1308_v46, %v1311_v49 }
 0x122   : > { %v368_v11 = vpop.f32.mrb[4].mxu0  ;;  %v1284_v12 = vpop.f32.mrb[4].mxu1 }
 0x123   : > { %v370_v13 = vpop.f32.mrb[5].mxu0  ;;  %v475_v14 = vpop.f32.mrb[5].mxu1  ;;  %v1314_v50 = vadd.f32 %v1303_v43, %v368_v11 }
 0x125   : > { %v563_v57 = vadd.f32 %v562_v53, %v1314_v50 }
 0x126   : > { %v373_v15 = vpop.f32.mrb[6].mxu0  ;;  %v1286_v16 = vpop.f32.mrb[6].mxu1 }
 0x127   : > { %v375_v17 = vpop.f32.mrb[7].mxu0  ;;  %v480_v18 = vpop.f32.mrb[7].mxu1  ;;  %v1321_v54 = vadd.f32 %v1303_v43, %v373_v15 }
 0x129   : > { %v564_v61 = vadd.f32 %v563_v57, %v1321_v54 }
 0x12a   : > { %v378_v19 = vpop.f32.mrb[8].mxu0  ;;  %v1288_v20 = vpop.f32.mrb[8].mxu1 }
 0x12b   : > { %v380_v21 = vpop.f32.mrb[9].mxu0  ;;  %v485_v22 = vpop.f32.mrb[9].mxu1  ;;  %v1325_v58 = vadd.f32 %v1303_v43, %v378_v19 }
 0x12d   : > { %v565_v1 = vadd.f32 %v564_v61, %v1325_v58 }
 0x12e   : > { %v383_v23 = vpop.f32.mrb[10].mxu0  ;;  %v1290_v24 = vpop.f32.mrb[10].mxu1 }
 0x12f   : > { %v385_v25 = vpop.f32.mrb[11].mxu0  ;;  %v490_v26 = vpop.f32.mrb[11].mxu1  ;;  %v1331_v62 = vadd.f32 %v1303_v43, %v383_v23 }
 0x131   : > { %v566_v6 = vadd.f32 %v565_v1, %v1331_v62 }
 0x132   : > { %v388_v27 = vpop.f32.mrb[12].mxu0  ;;  %v1292_v28 = vpop.f32.mrb[12].mxu1 }
 0x133   : > { %v390_v29 = vpop.f32.mrb[13].mxu0  ;;  %v495_v30 = vpop.f32.mrb[13].mxu1  ;;  %v1335_v2 = vadd.f32 %v1303_v43, %v388_v27 }
 0x135   : > { %v567_v11 = vadd.f32 %v566_v6, %v1335_v2 }
 0x136   : > { %v393_v31 = vpop.f32.mrb[14].mxu0  ;;  %v1294_v32 = vpop.f32.mrb[14].mxu1 }
 0x137   : > { %v395_v33 = vpop.f32.mrb[15].mxu0  ;;  %v500_v34 = vpop.f32.mrb[15].mxu1  ;;  %v1341_v7 = vadd.f32 %v1303_v43, %v393_v31 }
 0x139   : > { %v568_v17 = vadd.f32 %v567_v11, %v1341_v7 }
 0x13a   : > { %v398_v35 = vpop.f32.mrb[16].mxu0  ;;  %v1296_v36 = vpop.f32.mrb[16].mxu1 }
 0x13b   : > { %v400_v37 = vpop.f32.mrb[17].mxu0  ;;  %v505_v38 = vpop.f32.mrb[17].mxu1  ;;  %v1345_v13 = vadd.f32 %v1303_v43, %v398_v35 }
 0x13d   : > { %v569_v22 = vadd.f32 %v568_v17, %v1345_v13 }
 0x13e   : > { %v403_v39 = vpop.f32.mrb[18].mxu0  ;;  %v1298_v40 = vpop.f32.mrb[18].mxu1 }
 0x13f   : > { %v405_v41 = vpop.f32.mrb[19].mxu0  ;;  %v510_v42 = vpop.f32.mrb[19].mxu1  ;;  %v1351_v18 = vadd.f32 %v1303_v43, %v403_v39 }
 0x141   : > { %v570_v27 = vadd.f32 %v569_v22, %v1351_v18 }
 0x142   : > { %v408_v44 = vpop.f32.mrb[20].mxu0  ;;  %v1305_v45 = vpop.f32.mrb[20].mxu1 }
 0x143   : > { %v410_v47 = vpop.f32.mrb[21].mxu0  ;;  %v515_v48 = vpop.f32.mrb[21].mxu1  ;;  %v1355_v23 = vadd.f32 %v1303_v43, %v408_v44 }
 0x145   : > { %v571_v33 = vadd.f32 %v570_v27, %v1355_v23 }
 0x146   : > { %v413_v51 = vpop.f32.mrb[22].mxu0  ;;  %v1316_v52 = vpop.f32.mrb[22].mxu1 }
 0x147   : > { %v415_v55 = vpop.f32.mrb[23].mxu0  ;;  %v520_v56 = vpop.f32.mrb[23].mxu1  ;;  %v1361_v29 = vadd.f32 %v1303_v43, %v413_v51 }
 0x149   : > { %v572_v38 = vadd.f32 %v571_v33, %v1361_v29 }
 0x14a   : > { %v418_v59 = vpop.f32.mrb[24].mxu0  ;;  %v1327_v60 = vpop.f32.mrb[24].mxu1 }
 0x14b   : > { %v420_v63 = vpop.f32.mrb[25].mxu0  ;;  %v525_v0 = vpop.f32.mrb[25].mxu1  ;;  %v1365_v34 = vadd.f32 %v1303_v43, %v418_v59 }
 0x14d   : > { %v573_v44 = vadd.f32 %v572_v38, %v1365_v34  ;;  %v464_v38 = vadd.f32 %v1303_v43, %v1280_v4  ;;  %v489_v4 = vadd.f32 %v1303_v43, %v1290_v24  ;;  %v514_v24 = vadd.f32 %v1303_v43, %v1305_v45 }
 0x14e   : > { %v423_v3 = vpop.f32.mrb[26].mxu0  ;;  %v1337_v5 = vpop.f32.mrb[26].mxu1 }
 0x14f   : > { %v425_v9 = vpop.f32.mrb[27].mxu0  ;;  %v530_v10 = vpop.f32.mrb[27].mxu1  ;;  %v1371_v39 = vadd.f32 %v1303_v43, %v423_v3 }
 0x151   : > { %v574_v53 = vadd.f32 %v573_v44, %v1371_v39 }
 0x152   : > { %v428_v14 = vpop.f32.mrb[28].mxu0  ;;  %v1347_v15 = vpop.f32.mrb[28].mxu1 }
 0x153   : > { %v430_v19 = vpop.f32.mrb[29].mxu0  ;;  %v535_v21 = vpop.f32.mrb[29].mxu1  ;;  %v1375_v47 = vadd.f32 %v1303_v43, %v428_v14 }
 0x155   : > { %v575_v59 = vadd.f32 %v574_v53, %v1375_v47 }
 0x156   : > { %v433_v25 = vpop.f32.mrb[30].mxu0  ;;  %v1357_v26 = vpop.f32.mrb[30].mxu1 }
 0x157   : > { %v435_v30 = vpop.f32.mrb[31].mxu0  ;;  %v540_v31 = vpop.f32.mrb[31].mxu1  ;;  %v1379_v55 = vadd.f32 %v1303_v43, %v433_v25  ;;  %v539_v45 = vadd.f32 %v1303_v43, %v1357_v26 }
 0x159   : > { %v576_v1 = vadd.f32 %v575_v59, %v1379_v55  ;;  %v484_v59 = vadd.f32 %v1303_v43, %v1288_v20  ;;  %v509_v20 = vadd.f32 %v1303_v43, %v1298_v40  ;;  %v534_v40 = vadd.f32 %v1303_v43, %v1347_v15 }
 0x15a   : > { %v438_v35 = vpop.f32.mrb[32].mxu0  ;;  %v1367_v37 = vpop.f32.mrb[32].mxu1 }
 0x15b   : > { %v440_v41 = vpop.f32.mrb[33].mxu0  ;;  %v545_v42 = vpop.f32.mrb[33].mxu1  ;;  %v1383_v61 = vadd.f32 %v1303_v43, %v438_v35 }
 0x15c   : > { %v469_v42 = vadd.f32 %v1303_v43, %v1282_v8  ;;  %v494_v8 = vadd.f32 %v1303_v43, %v1292_v28  ;;  %v519_v28 = vadd.f32 %v1303_v43, %v1316_v52  ;;  %v544_v52 = vadd.f32 %v1303_v43, %v1367_v37 }
 0x15d   : > { %v577_v10 = vadd.f32 %v576_v1, %v1383_v61 }
 0x15e   : > { %v443_v48 = vpop.f32.mrb[34].mxu0  ;;  %v548_v51 = vpop.f32.mrb[34].mxu1 }
 0x15f   : > { %v445_v56 = vpop.f32.mrb[35].mxu0  ;;  %v550_v57 = vpop.f32.mrb[35].mxu1  ;;  %v1387_v3 = vadd.f32 %v1303_v43, %v443_v48  ;;  %v474_v48 = vadd.f32 %v1303_v43, %v1284_v12  ;;  %v499_v12 = vadd.f32 %v1303_v43, %v1294_v32  ;;  %v524_v32 = vadd.f32 %v1303_v43, %v1327_v60 }
 0x160   : > { %v479_v56 = vadd.f32 %v1303_v43, %v1286_v16  ;;  %v504_v16 = vadd.f32 %v1303_v43, %v1296_v36  ;;  %v529_v36 = vadd.f32 %v1303_v43, %v1337_v5 }
 0x161   : > { %v578_v19 = vadd.f32 %v577_v10, %v1387_v3 }
 0x162   : > { %v448_v63 = vpop.f32.mrb[36].mxu0  ;;  %v553_v0 = vpop.f32.mrb[36].mxu1 }
 0x163   : > { %v450_v6 = vpop.f32.mrb[37].mxu0  ;;  %v555_v9 = vpop.f32.mrb[37].mxu1  ;;  %v1391_v11 = vadd.f32 %v1303_v43, %v448_v63 }
 0x165   : > { %v579_v27 = vadd.f32 %v578_v19, %v1391_v11 }
 0x166   : > { %v453_v14 = vpop.f32.mrb[38].mxu0  ;;  %v558_v17 = vpop.f32.mrb[38].mxu1 }
 0x167   : > { %v454_v21 = vadd.f32 %v1303_v43, %v453_v14  ;;  %v455_v22 = vpop.f32.mrb[39].mxu0  ;;  %v560_v25 = vpop.f32.mrb[39].mxu1 }
 0x169   : > { %v580_v31 = vadd.f32 %v579_v27, %v454_v21 }
 0x16a   : > { %v458_v30 = vpop.f32.mrb[40].mxu0 }
 0x16b   : > { %v459_v33 = vadd.f32 %v1303_v43, %v458_v30  ;;  %v460_v35 = vpop.f32.mrb[41].mxu0 }
 0x16d   : > { %v581_v41 = vadd.f32 %v580_v31, %v459_v33 }
 0x16f   : > { %v582_v44 = vadd.f32 %v581_v41, %v464_v38  ;;  %v1432_v41 = vadd.f32 %v1303_v43, %v558_v17 }
 0x171   : > { %v583_v53 = vadd.f32 %v582_v44, %v469_v42  ;;  %v549_v44 = vadd.f32 %v1303_v43, %v548_v51  ;;  %v602_v15 = vsel %vm601_vm0, %v1432_v41, 0.0 }
 0x173   : > { %v584_v57 = vadd.f32 %v583_v53, %v474_v48  ;;  %v554_v53 = vadd.f32 %v1303_v43, %v553_v0 }
 0x175   : > { %v585_v63 = vadd.f32 %v584_v57, %v479_v56 }
 0x177   : > { %v586_v1 = vadd.f32 %v585_v63, %v484_v59 }
 0x179   : > { %v587_v6 = vadd.f32 %v586_v1, %v489_v4 }
 0x17b   : > { %v588_v9 = vadd.f32 %v587_v6, %v494_v8 }
 0x17d   : > { %v589_v10 = vadd.f32 %v588_v9, %v499_v12 }
 0x17f   : > { %v590_v14 = vadd.f32 %v589_v10, %v504_v16 }
 0x181   : > { %v591_v19 = vadd.f32 %v590_v14, %v509_v20 }
 0x183   : > { %v592_v22 = vadd.f32 %v591_v19, %v514_v24 }
 0x185   : > { %v593_v25 = vadd.f32 %v592_v22, %v519_v28 }
 0x187   : > { %v594_v27 = vadd.f32 %v593_v25, %v524_v32 }
 0x189   : > { %v595_v30 = vadd.f32 %v594_v27, %v529_v36 }
 0x18b   : > { %v596_v31 = vadd.f32 %v595_v30, %v534_v40 }
 0x18d   : > { %v597_v35 = vadd.f32 %v596_v31, %v539_v45 }
 0x18f   : > { %v598_v60 = vadd.f32 %v597_v35, %v544_v52 }
 0x191   : > { %v599_v5 = vadd.f32 %v598_v60, %v549_v44 }
 0x193   : > { %v600_v57 = vadd.f32 %v599_v5, %v554_v53 }
 0x195   : > { %v603_v63 = vadd.f32 %v602_v15, %v600_v57 }
 0x197   : > { %v604_v26 = vrot.slane %v603_v63, 4 }
 0x199   : > { %v605_v1 = vadd.f32 %v604_v26, %v603_v63 }
 0x19b   : > { %v606_v6 = vrot.slane %v605_v1, 2 }
 0x19d   : > { %v607_v9 = vadd.f32 %v606_v6, %v605_v1 }
 0x19f   : > { %v608_v37 = vrot.slane %v607_v9, 1 }
 0x1a1   : > { %v609_v10 = vadd.f32 %v608_v37, %v607_v9 }
 0x1a3   : > { %v1438_v17 = vmul.f32 0.0030864198, %v609_v10 }
 0x1a5   : > { %v1441_v14 = vsub.f32 %v454_v21, %v1438_v17  ;;  %v1444_v51 = vsub.f32 %v459_v33, %v1438_v17  ;;  %v1447_v43 = vsub.f32 %v464_v38, %v1438_v17  ;;  %v1450_v0 = vsub.f32 %v469_v42, %v1438_v17 }
 0x1a6   : > { %v1453_v19 = vsub.f32 %v474_v48, %v1438_v17  ;;  %v1456_v22 = vsub.f32 %v479_v56, %v1438_v17  ;;  %v1459_v25 = vsub.f32 %v484_v59, %v1438_v17  ;;  %v1462_v21 = vsub.f32 %v489_v4, %v1438_v17 }
 0x1a7   : > { %v1465_v33 = vsub.f32 %v494_v8, %v1438_v17  ;;  %v1468_v38 = vsub.f32 %v499_v12, %v1438_v17  ;;  %v1471_v42 = vsub.f32 %v504_v16, %v1438_v17  ;;  %v1474_v48 = vsub.f32 %v509_v20, %v1438_v17 }
 0x1a8   : > { %v1477_v56 = vsub.f32 %v514_v24, %v1438_v17  ;;  %v1480_v59 = vsub.f32 %v519_v28, %v1438_v17  ;;  %v1483_v4 = vsub.f32 %v524_v32, %v1438_v17  ;;  %v1486_v8 = vsub.f32 %v529_v36, %v1438_v17 }
 0x1a9   : > { %v1489_v12 = vsub.f32 %v534_v40, %v1438_v17  ;;  %v1492_v16 = vsub.f32 %v539_v45, %v1438_v17  ;;  %v1495_v20 = vsub.f32 %v544_v52, %v1438_v17  ;;  %v1498_v24 = vsub.f32 %v549_v44, %v1438_v17 }
 0x1aa   : > { %v1501_v28 = vsub.f32 %v554_v53, %v1438_v17  ;;  %v1505_v32 = vsub.f32 %v1311_v49, %v1438_v17  ;;  %v1509_v27 = vsub.f32 %v1308_v46, %v1438_v17  ;;  %v1513_v36 = vsub.f32 %v1314_v50, %v1438_v17 }
 0x1ab   : > { %v1521_v31 = vsub.f32 %v1321_v54, %v1438_v17  ;;  %v1525_v49 = vsub.f32 %v1325_v58, %v1438_v17  ;;  %v1531_v50 = vsub.f32 %v1331_v62, %v1438_v17  ;;  %v1537_v54 = vsub.f32 %v1335_v2, %v1438_v17 }
 0x1ac   : > { %v653_v30 = vmul.f32 %v1505_v32, %v1505_v32  ;;  %v654_v40 = vmul.f32 %v1509_v27, %v1509_v27  ;;  %v655_v46 = vmul.f32 %v1513_v36, %v1513_v36  ;;  %v1543_v44 = vsub.f32 %v1341_v7, %v1438_v17 }
 0x1ad   : > { %v656_v35 = vmul.f32 %v1521_v31, %v1521_v31  ;;  %v657_v58 = vmul.f32 %v1525_v49, %v1525_v49  ;;  %v658_v62 = vmul.f32 %v1531_v50, %v1531_v50  ;;  %v1549_v53 = vsub.f32 %v1345_v13, %v1438_v17 }
 0x1ae   : > { %v694_v45 = vadd.f32 %v654_v40, %v653_v30  ;;  %v659_v2 = vmul.f32 %v1537_v54, %v1537_v54  ;;  %v1555_v57 = vsub.f32 %v1351_v18, %v1438_v17  ;;  %v660_v7 = vmul.f32 %v1543_v44, %v1543_v44 }
 0x1af   : > { %v1561_v26 = vsub.f32 %v1355_v23, %v1438_v17  ;;  %v661_v13 = vmul.f32 %v1549_v53, %v1549_v53  ;;  %v1567_v6 = vsub.f32 %v1361_v29, %v1438_v17  ;;  %v1573_v37 = vsub.f32 %v1365_v34, %v1438_v17 }
 0x1b0   : > { %v695_v52 = vadd.f32 %v694_v45, %v655_v46  ;;  %v662_v18 = vmul.f32 %v1555_v57, %v1555_v57  ;;  %v1579_v30 = vsub.f32 %v1371_v39, %v1438_v17  ;;  %v1585_v46 = vsub.f32 %v1375_v47, %v1438_v17 }
 0x1b1   : > { %v663_v23 = vmul.f32 %v1561_v26, %v1561_v26  ;;  %v664_v29 = vmul.f32 %v1567_v6, %v1567_v6  ;;  %v665_v34 = vmul.f32 %v1573_v37, %v1573_v37 }
 0x1b2   : > { %v696_v60 = vadd.f32 %v695_v52, %v656_v35  ;;  %v1591_v35 = vsub.f32 %v1379_v55, %v1438_v17  ;;  %v666_v39 = vmul.f32 %v1579_v30, %v1579_v30  ;;  %v667_v47 = vmul.f32 %v1585_v46, %v1585_v46 }
 0x1b4   : > { %v697_v5 = vadd.f32 %v696_v60, %v657_v58  ;;  %v1597_v58 = vsub.f32 %v1383_v61, %v1438_v17  ;;  %v668_v55 = vmul.f32 %v1591_v35, %v1591_v35 }
 0x1b6   : > { %v698_v15 = vadd.f32 %v697_v5, %v658_v62  ;;  %v1603_v62 = vsub.f32 %v1387_v3, %v1438_v17  ;;  %v669_v61 = vmul.f32 %v1597_v58, %v1597_v58 }
 0x1b8   : > { %v699_v63 = vadd.f32 %v698_v15, %v659_v2  ;;  %v1609_v2 = vsub.f32 %v1391_v11, %v1438_v17  ;;  %v673_v11 = vmul.f32 %v1444_v51, %v1444_v51 }
 0x1ba   : > { %v700_v1 = vadd.f32 %v699_v63, %v660_v7  ;;  %v670_v7 = vmul.f32 %v1603_v62, %v1603_v62  ;;  %v671_v3 = vmul.f32 %v1609_v2, %v1609_v2 }
 0x1bc   : > { %v701_v9 = vadd.f32 %v700_v1, %v661_v13  ;;  %v672_v1 = vmul.f32 %v1441_v14, %v1441_v14 }
 0x1be   : > { %v702_v10 = vadd.f32 %v701_v9, %v662_v18 }
 0x1c0   : > { %v703_v40 = vadd.f32 %v702_v10, %v663_v23  ;;  %v674_v23 = vmul.f32 %v1447_v43, %v1447_v43 }
 0x1c2   : > { %v704_v45 = vadd.f32 %v703_v40, %v664_v29  ;;  %v675_v29 = vmul.f32 %v1450_v0, %v1450_v0 }
 0x1c4   : > { %v705_v52 = vadd.f32 %v704_v45, %v665_v34  ;;  %v676_v34 = vmul.f32 %v1453_v19, %v1453_v19 }
 0x1c6   : > { %v706_v60 = vadd.f32 %v705_v52, %v666_v39  ;;  %v677_v39 = vmul.f32 %v1456_v22, %v1456_v22 }
 0x1c8   : > { %v707_v5 = vadd.f32 %v706_v60, %v667_v47  ;;  %v678_v47 = vmul.f32 %v1459_v25, %v1459_v25 }
 0x1ca   : > { %v708_v15 = vadd.f32 %v707_v5, %v668_v55  ;;  %v679_v55 = vmul.f32 %v1462_v21, %v1462_v21 }
 0x1cc   : > { %v709_v63 = vadd.f32 %v708_v15, %v669_v61  ;;  %v680_v61 = vmul.f32 %v1465_v33, %v1465_v33 }
 0x1ce   : > { %v710_v13 = vadd.f32 %v709_v63, %v670_v7  ;;  %v681_v7 = vmul.f32 %v1468_v38, %v1468_v38 }
 0x1d0   : > { %v711_v18 = vadd.f32 %v710_v13, %v671_v3  ;;  %v682_v3 = vmul.f32 %v1471_v42, %v1471_v42 }
 0x1d2   : > { %v712_v9 = vadd.f32 %v711_v18, %v672_v1  ;;  %v683_v1 = vmul.f32 %v1474_v48, %v1474_v48 }
 0x1d4   : > { %v713_v10 = vadd.f32 %v712_v9, %v673_v11  ;;  %v684_v11 = vmul.f32 %v1477_v56, %v1477_v56 }
 0x1d6   : > { %v714_v40 = vadd.f32 %v713_v10, %v674_v23  ;;  %v685_v23 = vmul.f32 %v1480_v59, %v1480_v59 }
 0x1d8   : > { %v715_v45 = vadd.f32 %v714_v40, %v675_v29  ;;  %v686_v29 = vmul.f32 %v1483_v4, %v1483_v4 }
 0x1da   : > { %v716_v52 = vadd.f32 %v715_v45, %v676_v34  ;;  %v687_v34 = vmul.f32 %v1486_v8, %v1486_v8 }
 0x1dc   : > { %v717_v60 = vadd.f32 %v716_v52, %v677_v39  ;;  %v688_v39 = vmul.f32 %v1489_v12, %v1489_v12 }
 0x1de   : > { %v718_v5 = vadd.f32 %v717_v60, %v678_v47  ;;  %v689_v47 = vmul.f32 %v1492_v16, %v1492_v16 }
 0x1e0   : > { %v719_v15 = vadd.f32 %v718_v5, %v679_v55  ;;  %v1655_v55 = vsub.f32 %v1432_v41, %v1438_v17  ;;  %v690_v5 = vmul.f32 %v1495_v20, %v1495_v20 }
 0x1e2   : > { %v720_v63 = vadd.f32 %v719_v15, %v680_v61  ;;  %v691_v15 = vmul.f32 %v1498_v24, %v1498_v24 }
 0x1e4   : > { %v721_v13 = vadd.f32 %v720_v63, %v681_v7  ;;  %v693_v63 = vmul.f32 %v1655_v55, %v1655_v55 }
 0x1e6   : > { %v722_v18 = vadd.f32 %v721_v13, %v682_v3  ;;  %v692_v3 = vmul.f32 %v1501_v28, %v1501_v28 }
 0x1e8   : > { %v723_v9 = vadd.f32 %v722_v18, %v683_v1  ;;  %v733_v18 = vsel %vm601_vm0, %v693_v63, 0.0 }
 0x1ea   : > { %v724_v10 = vadd.f32 %v723_v9, %v684_v11 }
 0x1ec   : > { %v725_v40 = vadd.f32 %v724_v10, %v685_v23 }
 0x1ee   : > { %v726_v45 = vadd.f32 %v725_v40, %v686_v29 }
 0x1f0   : > { %v727_v52 = vadd.f32 %v726_v45, %v687_v34 }
 0x1f2   : > { %v728_v60 = vadd.f32 %v727_v52, %v688_v39 }
 0x1f4   : > { %v729_v61 = vadd.f32 %v728_v60, %v689_v47 }
 0x1f6   : > { %v730_v7 = vadd.f32 %v729_v61, %v690_v5 }
 0x1f8   : > { %v731_v13 = vadd.f32 %v730_v7, %v691_v15 }
 0x1fa   : > { %v732_v1 = vadd.f32 %v731_v13, %v692_v3 }
 0x1fc   : > { %v734_v41 = vadd.f32 %v733_v18, %v732_v1 }
 0x1fe   : > { %v735_v17 = vrot.slane %v734_v41, 4 }
 0x200   : > { %v736_v11 = vadd.f32 %v735_v17, %v734_v41 }
 0x202   : > { %v737_v9 = vrot.slane %v736_v11, 2 }
 0x204   : > { %v738_v23 = vadd.f32 %v737_v9, %v736_v11 }
 0x206   : > { %v739_v10 = vrot.slane %v738_v23, 1 }
 0x208   : > { %v740_v29 = vadd.f32 %v739_v10, %v738_v23 }
 0x20a   : > { %v741_v40 = vmul.f32 0.0030864198, %v740_v29 }
 0x20c   : > { %v742_v34 = vadd.f32 1e-05, %v741_v40 }
 0x20e   : > { %1023 = vrsqrt.f32 %v742_v34 }
 0x218   : > { %v1024_v45 = vpop.eup %1023 }
 0x219   : > { %v744_v39 = vmul.f32 %v1024_v45, %v1505_v32  ;;  %v745_v52 = vmul.f32 %v1024_v45, %v1509_v27  ;;  %v746_v47 = vmul.f32 %v1024_v45, %v1513_v36  ;;  %v747_v60 = vmul.f32 %v1024_v45, %v1521_v31 }
 0x21a   : > { %v748_v5 = vmul.f32 %v1024_v45, %v1525_v49  ;;  %v749_v61 = vmul.f32 %v1024_v45, %v1531_v50  ;;  %v750_v15 = vmul.f32 %v1024_v45, %v1537_v54  ;;  %v751_v7 = vmul.f32 %v1024_v45, %v1543_v44 }
 0x21b   : > { %v752_v63 = vmul.f32 %v1024_v45, %v1549_v53  ;;  %v753_v3 = vmul.f32 %v1024_v45, %v1555_v57  ;;  %v754_v32 = vmul.f32 %v1024_v45, %v1561_v26  ;;  %v1678_v27 = vmul.f32 %v1024_v45, %v1567_v6 }
 0x21c   : > { %v1681_v36 = vmul.f32 %v1024_v45, %v1573_v37  ;;  %v1684_v31 = vmul.f32 %v1024_v45, %v1579_v30  ;;  %v1687_v49 = vmul.f32 %v1024_v45, %v1585_v46  ;;  %v1690_v50 = vmul.f32 %v1024_v45, %v1591_v35 }
 0x21d   : > { %v1693_v54 = vmul.f32 %v1024_v45, %v1597_v58  ;;  %v1696_v44 = vmul.f32 %v1024_v45, %v1603_v62  ;;  %v1699_v53 = vmul.f32 %v1024_v45, %v1609_v2  ;;  %v1702_v57 = vmul.f32 %v1024_v45, %v1441_v14 }
 0x21e   : > { %v1706_v26 = vmul.f32 %v1024_v45, %v1444_v51  ;;  %v1709_v6 = vmul.f32 %v1024_v45, %v1447_v43  ;;  %v1712_v37 = vmul.f32 %v1024_v45, %v1450_v0  ;;  %v1715_v30 = vmul.f32 %v1024_v45, %v1453_v19 }
 0x21f   : > { %v1718_v46 = vmul.f32 %v1024_v45, %v1456_v22  ;;  %v1721_v35 = vmul.f32 %v1024_v45, %v1459_v25  ;;  %v1724_v14 = vmul.f32 %v1024_v45, %v1462_v21  ;;  %v1727_v51 = vmul.f32 %v1024_v45, %v1465_v33 }
 0x220   : > { %v1730_v43 = vmul.f32 %v1024_v45, %v1468_v38  ;;  %v1733_v0 = vmul.f32 %v1024_v45, %v1471_v42  ;;  %v1736_v19 = vmul.f32 %v1024_v45, %v1474_v48  ;;  %v1739_v22 = vmul.f32 %v1024_v45, %v1477_v56 }
 0x221   : > { %v1742_v25 = vmul.f32 %v1024_v45, %v1480_v59  ;;  %v1745_v21 = vmul.f32 %v1024_v45, %v1483_v4  ;;  %v1748_v33 = vmul.f32 %v1024_v45, %v1486_v8  ;;  %v1751_v38 = vmul.f32 %v1024_v45, %v1489_v12 }
 0x222   : > { %v1759_v42 = vmul.f32 %v1024_v45, %v1492_v16  ;;  %v1762_v48 = vmul.f32 %v1024_v45, %v1495_v20  ;;  %v1765_v56 = vmul.f32 %v1024_v45, %v1498_v24  ;;  %v1768_v59 = vmul.f32 %v1024_v45, %v1501_v28 }
 0x223   : > { %v1771_v4 = vmul.f32 %v1024_v45, %v1655_v55  ;;  %v785_v8 = vmax.f32 %v744_v39, 0.0  ;;  %v786_v12 = vmax.f32 %v745_v52, 0.0  ;;  %v787_v58 = vmax.f32 %v746_v47, 0.0 }
 0x224   : > { %v788_v16 = vmax.f32 %v747_v60, 0.0  ;;  %v789_v62 = vmax.f32 %v748_v5, 0.0  ;;  %v790_v20 = vmax.f32 %v749_v61, 0.0  ;;  %v791_v2 = vmax.f32 %v750_v15, 0.0 }
 0x225   : > { %v792_v24 = vmax.f32 %v751_v7, 0.0  ;;  %v793_v13 = vmax.f32 %v752_v63, 0.0  ;;  %v794_v1 = vmax.f32 %v753_v3, 0.0  ;;  %v795_v18 = vmax.f32 %v754_v32, 0.0  ;;  %826 = vst [vmem:[%s1756_s10] sm:$0xff] %v785_v8  ;;  %827 = vst [vmem:[%s1756_s10 + $0x8] sm:$0xff] %v786_v12 }
 0x226   : > { %828 = vst [vmem:[%s1756_s10 + $0x10] sm:$0xff] %v787_v58  ;;  %v796_v28 = vmax.f32 %v1678_v27, 0.0  ;;  %v797_v55 = vmax.f32 %v1681_v36, 0.0  ;;  %v798_v41 = vmax.f32 %v1684_v31, 0.0  ;;  %v799_v17 = vmax.f32 %v1687_v49, 0.0  ;;  %829 = vst [vmem:[%s1756_s10 + $0x18] sm:$0xff] %v788_v16 }
 0x227   : > { %830 = vst [vmem:[%s1756_s10 + $0x20] sm:$0xff] %v789_v62  ;;  %831 = vst [vmem:[%s1756_s10 + $0x28] sm:$0xff] %v790_v20  ;;  %v800_v11 = vmax.f32 %v1690_v50, 0.0  ;;  %v801_v9 = vmax.f32 %v1693_v54, 0.0  ;;  %v802_v23 = vmax.f32 %v1696_v44, 0.0  ;;  %v803_v10 = vmax.f32 %v1699_v53, 0.0 }
 0x228   : > { %832 = vst [vmem:[%s1756_s10 + $0x30] sm:$0xff] %v791_v2  ;;  %833 = vst [vmem:[%s1756_s10 + $0x38] sm:$0xff] %v792_v24  ;;  %v804_v29 = vmax.f32 %v1702_v57, 0.0  ;;  %v805_v40 = vmax.f32 %v1706_v26, 0.0  ;;  %v806_v34 = vmax.f32 %v1709_v6, 0.0  ;;  %v807_v45 = vmax.f32 %v1712_v37, 0.0 }
 0x229   : > { %834 = vst [vmem:[%s1756_s10 + $0x40] sm:$0xff] %v793_v13  ;;  %835 = vst [vmem:[%s1756_s10 + $0x48] sm:$0xff] %v794_v1  ;;  %v808_v39 = vmax.f32 %v1715_v30, 0.0  ;;  %v809_v52 = vmax.f32 %v1718_v46, 0.0  ;;  %v810_v47 = vmax.f32 %v1721_v35, 0.0  ;;  %v811_v60 = vmax.f32 %v1724_v14, 0.0 }
 0x22a   : > { %836 = vst [vmem:[%s1756_s10 + $0x50] sm:$0xff] %v795_v18  ;;  %837 = vst [vmem:[%s1756_s10 + $0x58] sm:$0xff] %v796_v28  ;;  %v812_v5 = vmax.f32 %v1727_v51, 0.0  ;;  %v813_v61 = vmax.f32 %v1730_v43, 0.0  ;;  %v814_v15 = vmax.f32 %v1733_v0, 0.0  ;;  %v815_v7 = vmax.f32 %v1736_v19, 0.0 }
 0x22b   : > { %838 = vst [vmem:[%s1756_s10 + $0x60] sm:$0xff] %v797_v55  ;;  %839 = vst [vmem:[%s1756_s10 + $0x68] sm:$0xff] %v798_v41  ;;  %v816_v63 = vmax.f32 %v1739_v22, 0.0  ;;  %v817_v3 = vmax.f32 %v1742_v25, 0.0  ;;  %v818_v32 = vmax.f32 %v1745_v21, 0.0  ;;  %v819_v27 = vmax.f32 %v1748_v33, 0.0 }
 0x22c   : > { %840 = vst [vmem:[%s1756_s10 + $0x70] sm:$0xff] %v799_v17  ;;  %841 = vst [vmem:[%s1756_s10 + $0x78] sm:$0xff] %v800_v11  ;;  %v820_v36 = vmax.f32 %v1751_v38, 0.0  ;;  %v821_v31 = vmax.f32 %v1759_v42, 0.0  ;;  %v822_v49 = vmax.f32 %v1762_v48, 0.0  ;;  %v823_v50 = vmax.f32 %v1765_v56, 0.0 }
 0x22d   : > { %842 = vst [vmem:[%s1756_s10 + $0x80] sm:$0xff] %v801_v9  ;;  %843 = vst [vmem:[%s1756_s10 + $0x88] sm:$0xff] %v802_v23  ;;  %v824_v54 = vmax.f32 %v1768_v59, 0.0  ;;  %v825_v44 = vmax.f32 %v1771_v4, 0.0 }
 0x22e   : > { %844 = vst [vmem:[%s1756_s10 + $0x90] sm:$0xff] %v803_v10  ;;  %845 = vst [vmem:[%s1756_s10 + $0x98] sm:$0xff] %v804_v29 }
 0x22f   : > { %846 = vst [vmem:[%s1756_s10 + $0xa0] sm:$0xff] %v805_v40  ;;  %847 = vst [vmem:[%s1756_s10 + $0xa8] sm:$0xff] %v806_v34 }
 0x230   : > { %848 = vst [vmem:[%s1756_s10 + $0xb0] sm:$0xff] %v807_v45  ;;  %849 = vst [vmem:[%s1756_s10 + $0xb8] sm:$0xff] %v808_v39 }
 0x231   : > { %850 = vst [vmem:[%s1756_s10 + $0xc0] sm:$0xff] %v809_v52  ;;  %851 = vst [vmem:[%s1756_s10 + $0xc8] sm:$0xff] %v810_v47 }
 0x232   : > { %852 = vst [vmem:[%s1756_s10 + $0xd0] sm:$0xff] %v811_v60  ;;  %853 = vst [vmem:[%s1756_s10 + $0xd8] sm:$0xff] %v812_v5 }
 0x233   : > { %854 = vst [vmem:[%s1756_s10 + $0xe0] sm:$0xff] %v813_v61  ;;  %855 = vst [vmem:[%s1756_s10 + $0xe8] sm:$0xff] %v814_v15 }
 0x234   : > { %856 = vst [vmem:[%s1756_s10 + $0xf0] sm:$0xff] %v815_v7  ;;  %857 = vst [vmem:[%s1756_s10 + $0xf8] sm:$0xff] %v816_v63 }
 0x235   : > { %858 = vst [vmem:[%s1756_s10 + $0x100] sm:$0xff] %v817_v3  ;;  %859 = vst [vmem:[%s1756_s10 + $0x108] sm:$0xff] %v818_v32 }
 0x236   : > { %860 = vst [vmem:[%s1756_s10 + $0x110] sm:$0xff] %v819_v27  ;;  %861 = vst [vmem:[%s1756_s10 + $0x118] sm:$0xff] %v820_v36 }
 0x237   : > { %862 = vst [vmem:[%s1756_s10 + $0x120] sm:$0xff] %v821_v31  ;;  %863 = vst [vmem:[%s1756_s10 + $0x128] sm:$0xff] %v822_v49 }
 0x238   : > { %864 = vst [vmem:[%s1756_s10 + $0x130] sm:$0xff] %v823_v50  ;;  %865 = vst [vmem:[%s1756_s10 + $0x138] sm:$0xff] %v824_v54 }
 0x239   : > { %866 = vst [vmem:[%s1756_s10 + $0x140] sm:$0xf] %v825_v44 }
 0x23a PF: > { %s13_s12 = sadd.s32 1, %s1031_s12  }
 0x23b   : > { %p10_p4 = scmp.ge.s32.totalorder %s13_s12, 4  }
 0x23d   :  { %12 = sbr.rel (!%p10_p4) target bundleno = 1 (0x1), region = 62 }

// kernel: generator_forward.13
= control target key start
LH: loop header
LB: loop body
LE: loop exit
PB: predicated region body
PF: predicated region fallthrough
CT: control target
= control target key end

     0   :  { %s3550_s12 = smov 0   ;;  %s6735_s0 = inlined_call_operand.vmem [shape: f32[2,1296,32], index: 0, kind: input, shape index: {}]   ;;  %s6736_s1 = inlined_call_operand.vmem [shape: f32[32,128], index: 1, kind: input, shape index: {}]   ;;  %s6737_s2 = inlined_call_operand.vmem [shape: f32[1,128], index: 2, kind: input, shape index: {}]   ;;  %s6738_s3 = inlined_call_operand.vmem [shape: f32[2,1296,128], index: 3, kind: output, shape index: {}]  }
   0x1 LB: > { %s2910_s13 = sadd.s32 4294967295, %s3528_s12   ;;  %p2914_p0 = scmp.ge.s32.totalorder %s3528_s12, 1  ;;  %s3528_s12 = sphi %s3550_s12, %s13_s12  }
   0x2   : > { %p137_p1 = scmp.lt.s32.totalorder %s3528_s12, 3 }
   0x4   : > { %p138_p2 = pnand %p2914_p0, %p137_p1 }
   0x6   : > { %141 = sbr.rel (%p138_p2) target bundleno = 1081 (0x439), region = 32 }
   0xd   : > { %v333_v0 = vld [vmem:[%s6736_s1] sm:$0xff]  ;;  %v334_v1 = vld [vmem:[%s6736_s1 + $0x8] sm:$0xff]  ;;  %v335_v2 = vld [vmem:[%s6736_s1 + $0x10] sm:$0xff]  ;;  %p161_p3 = scmp.lt.s32.totalorder %s2910_s13, 1  ;;  %vm344_vm0 = vcmask 261120  }
   0xe   : > { %v3499_v3 = vpack.c.bf16 %v334_v1, %v333_v0  ;;  %v336_v4 = vld [vmem:[%s6736_s1 + $0x18] sm:$0xff] }
   0xf   : > { %v3503_v5 = vpack.c.bf16 %v336_v4, %v335_v2  ;;  %s7689_s13 = smov (!%p161_p3, %s2910_s13), 1 }
  0x10   : > { %3500 = vmatprep.subr.bf16.mxu0 %v3499_v3  ;;  %3507 = vmatprep.subr.bf16.mxu1 %v3499_v3  ;;  %s3511_s22 = smul.u32 1296, %s7689_s13 }
  0x11   : > { %3502 = vmatpush3.bf16.msra.mxu0 %v3499_v3  ;;  %3509 = vmatpush3.bf16.msra.mxu1 %v3499_v3 }
  0x12   : > { %3504 = vmatprep.subr.bf16.mxu0 %v3503_v5  ;;  %3508 = vmatprep.subr.bf16.mxu1 %v3503_v5  ;;  %s3578_s25 = scalar_lea.vmem %s6735_s0, %s3511_s22  ;;  %s6382_s30 = scalar_lea.vmem %s6738_s3, %s3511_s22 }
  0x13   : > { %v171_v6 = vld [vmem:[%s3578_s25] sm:$0xff]  ;;  %v172_v7 = vld [vmem:[%s3578_s25 + $0x8] sm:$0xff]  ;;  %v173_v8 = vld [vmem:[%s3578_s25 + $0x10] sm:$0xff] }
  0x14   : > { %3256 = vmatprep.mubr.msk.f32.mxu0 %vm344_vm0, %v171_v6  ;;  %v174_v9 = vld [vmem:[%s3578_s25 + $0x18] sm:$0xff]  ;;  %v175_v10 = vld [vmem:[%s3578_s25 + $0x20] sm:$0xff]  ;;  %v176_v11 = vld [vmem:[%s3578_s25 + $0x28] sm:$0xff] }
  0x15   : > { %3506 = vmatpush3.bf16.msra.mxu0 %v3503_v5  ;;  %3510 = vmatpush3.bf16.msra.mxu1 %v3503_v5  ;;  %v177_v12 = vld [vmem:[%s3578_s25 + $0x30] sm:$0xff]  ;;  %v178_v13 = vld [vmem:[%s3578_s25 + $0x38] sm:$0xff]  ;;  %v179_v14 = vld [vmem:[%s3578_s25 + $0x40] sm:$0xff] }
  0x16   : > { %v180_v15 = vld [vmem:[%s3578_s25 + $0x48] sm:$0xff]  ;;  %v181_v16 = vld [vmem:[%s3578_s25 + $0x50] sm:$0xff]  ;;  %v182_v17 = vld [vmem:[%s3578_s25 + $0x58] sm:$0xff] }
  0x17   : > { %v183_v18 = vld [vmem:[%s3578_s25 + $0x60] sm:$0xff]  ;;  %v184_v19 = vld [vmem:[%s3578_s25 + $0x68] sm:$0xff]  ;;  %v185_v20 = vld [vmem:[%s3578_s25 + $0x70] sm:$0xff] }
  0x18   : > { %3257 = vmatmul.mubr.msk.f32.vlgmr.msra.gmra.mrb[0].mxu0 %vm344_vm0, %v172_v7  ;;  %v186_v21 = vld [vmem:[%s3578_s25 + $0x78] sm:$0xff]  ;;  %v187_v22 = vld [vmem:[%s3578_s25 + $0x80] sm:$0xff]  ;;  %v188_v23 = vld [vmem:[%s3578_s25 + $0x88] sm:$0xff] }
  0x19   : > { %3259 = vmatprep.mubr.msk.f32.mxu0 %vm344_vm0, %v173_v8  ;;  %v189_v24 = vld [vmem:[%s3578_s25 + $0x90] sm:$0xff]  ;;  %v254_v26 = vld [vmem:[%s3578_s25 + $0x298] sm:$0xff]  ;;  %v255_v27 = vld [vmem:[%s3578_s25 + $0x2a0] sm:$0xff] }
  0x1a   : > { %v253_v25 = vld [vmem:[%s3578_s25 + $0x290] sm:$0xff]  ;;  %v190_v28 = vld [vmem:[%s3578_s25 + $0x98] sm:$0xff]  ;;  %v191_v29 = vld [vmem:[%s3578_s25 + $0xa0] sm:$0xff] }
  0x1b   : > { %3379 = vmatprep.mubr.msk.f32.mxu1 %vm344_vm0, %v253_v25  ;;  %v256_v30 = vld [vmem:[%s3578_s25 + $0x2a8] sm:$0xff]  ;;  %v257_v31 = vld [vmem:[%s3578_s25 + $0x2b0] sm:$0xff]  ;;  %v258_v34 = vld [vmem:[%s3578_s25 + $0x2b8] sm:$0xff] }
  0x1c   : > { %3260 = vmatmul.mubr.msk.f32.gmra.mrb[2].mxu0 %vm344_vm0, %v174_v9  ;;  %3380 = vmatmul.mubr.msk.f32.vlgmr.msra.gmra.mrb[0].mxu1 %vm344_vm0, %v254_v26  ;;  %v192_v32 = vld [vmem:[%s3578_s25 + $0xa8] sm:$0xff]  ;;  %v193_v33 = vld [vmem:[%s3578_s25 + $0xb0] sm:$0xff]  ;;  %v259_v35 = vld [vmem:[%s3578_s25 + $0x2c0] sm:$0xff] }
  0x1d   : > { %3262 = vmatprep.mubr.msk.f32.mxu0 %vm344_vm0, %v175_v10  ;;  %3382 = vmatprep.mubr.msk.f32.mxu1 %vm344_vm0, %v255_v27  ;;  %v194_v36 = vld [vmem:[%s3578_s25 + $0xb8] sm:$0xff]  ;;  %v195_v37 = vld [vmem:[%s3578_s25 + $0xc0] sm:$0xff]  ;;  %v260_v38 = vld [vmem:[%s3578_s25 + $0x2c8] sm:$0xff] }
  0x1e   : > { %v261_v39 = vld [vmem:[%s3578_s25 + $0x2d0] sm:$0xff]  ;;  %v196_v40 = vld [vmem:[%s3578_s25 + $0xc8] sm:$0xff]  ;;  %v262_v42 = vld [vmem:[%s3578_s25 + $0x2d8] sm:$0xff] }
  0x1f   : > { %v197_v41 = vld [vmem:[%s3578_s25 + $0xd0] sm:$0xff]  ;;  %v263_v43 = vld [vmem:[%s3578_s25 + $0x2e0] sm:$0xff]  ;;  %v198_v44 = vld [vmem:[%s3578_s25 + $0xd8] sm:$0xff] }
  0x20   : > { %3263 = vmatmul.mubr.msk.f32.gmra.mrb[4].mxu0 %vm344_vm0, %v176_v11  ;;  %3383 = vmatmul.mubr.msk.f32.gmra.mrb[2].mxu1 %vm344_vm0, %v256_v30  ;;  %v199_v45 = vld [vmem:[%s3578_s25 + $0xe0] sm:$0xff]  ;;  %v264_v46 = vld [vmem:[%s3578_s25 + $0x2e8] sm:$0xff]  ;;  %v265_v47 = vld [vmem:[%s3578_s25 + $0x2f0] sm:$0xff] }
  0x21   : > { %3265 = vmatprep.mubr.msk.f32.mxu0 %vm344_vm0, %v177_v12  ;;  %3385 = vmatprep.mubr.msk.f32.mxu1 %vm344_vm0, %v257_v31  ;;  %v200_v48 = vld [vmem:[%s3578_s25 + $0xe8] sm:$0xff]  ;;  %v201_v49 = vld [vmem:[%s3578_s25 + $0xf0] sm:$0xff]  ;;  %v266_v50 = vld [vmem:[%s3578_s25 + $0x2f8] sm:$0xff] }
  0x22   : > { %v267_v51 = vld [vmem:[%s3578_s25 + $0x300] sm:$0xff]  ;;  %v202_v52 = vld [vmem:[%s3578_s25 + $0xf8] sm:$0xff]  ;;  %v268_v54 = vld [vmem:[%s3578_s25 + $0x308] sm:$0xff] }
  0x23   : > { %v203_v53 = vld [vmem:[%s3578_s25 + $0x100] sm:$0xff]  ;;  %v269_v55 = vld [vmem:[%s3578_s25 + $0x310] sm:$0xff]  ;;  %v204_v56 = vld [vmem:[%s3578_s25 + $0x108] sm:$0xff] }
  0x24   : > { %3266 = vmatmul.mubr.msk.f32.gmra.mrb[6].mxu0 %vm344_vm0, %v178_v13  ;;  %3386 = vmatmul.mubr.msk.f32.gmra.mrb[4].mxu1 %vm344_vm0, %v258_v34  ;;  %v205_v57 = vld [vmem:[%s3578_s25 + $0x110] sm:$0xff]  ;;  %v270_v58 = vld [vmem:[%s3578_s25 + $0x318] sm:$0xff]  ;;  %v271_v59 = vld [vmem:[%s3578_s25 + $0x320] sm:$0xff] }
  0x25   : > { %3268 = vmatprep.mubr.msk.f32.mxu0 %vm344_vm0, %v179_v14  ;;  %3388 = vmatprep.mubr.msk.f32.mxu1 %vm344_vm0, %v259_v35  ;;  %v206_v60 = vld [vmem:[%s3578_s25 + $0x118] sm:$0xff]  ;;  %v207_v61 = vld [vmem:[%s3578_s25 + $0x120] sm:$0xff]  ;;  %v272_v62 = vld [vmem:[%s3578_s25 + $0x328] sm:$0xff] }
  0x26   : > { %v273_v63 = vld [vmem:[%s3578_s25 + $0x330] sm:$0xff]  ;;  %v208_v0 = vld [vmem:[%s3578_s25 + $0x128] sm:$0xff]  ;;  %v274_v2 = vld [vmem:[%s3578_s25 + $0x338] sm:$0xff] }
  0x27   : > { %v209_v1 = vld [vmem:[%s3578_s25 + $0x130] sm:$0xff]  ;;  %v275_v3 = vld [vmem:[%s3578_s25 + $0x340] sm:$0xff]  ;;  %v210_v4 = vld [vmem:[%s3578_s25 + $0x138] sm:$0xff] }
  0x28   : > { %3269 = vmatmul.mubr.msk.f32.gmra.mrb[8].mxu0 %vm344_vm0, %v180_v15  ;;  %3389 = vmatmul.mubr.msk.f32.gmra.mrb[6].mxu1 %vm344_vm0, %v260_v38  ;;  %v211_v5 = vld [vmem:[%s3578_s25 + $0x140] sm:$0xff]  ;;  %v276_v6 = vld [vmem:[%s3578_s25 + $0x348] sm:$0xff]  ;;  %v277_v7 = vld [vmem:[%s3578_s25 + $0x350] sm:$0xff] }
  0x29   : > { %3271 = vmatprep.mubr.msk.f32.mxu0 %vm344_vm0, %v181_v16  ;;  %3391 = vmatprep.mubr.msk.f32.mxu1 %vm344_vm0, %v261_v39  ;;  %v212_v8 = vld [vmem:[%s3578_s25 + $0x148] sm:$0xff]  ;;  %v213_v9 = vld [vmem:[%s3578_s25 + $0x150] sm:$0xff]  ;;  %v214_v10 = vld [vmem:[%s3578_s25 + $0x158] sm:$0xff] }
  0x2a   : > { %v215_v11 = vld [vmem:[%s3578_s25 + $0x160] sm:$0xff]  ;;  %v278_v12 = vld [vmem:[%s3578_s25 + $0x358] sm:$0xff]  ;;  %v216_v13 = vld [vmem:[%s3578_s25 + $0x168] sm:$0xff] }
  0x2b   : > { %v279_v14 = vld [vmem:[%s3578_s25 + $0x360] sm:$0xff]  ;;  %v217_v15 = vld [vmem:[%s3578_s25 + $0x170] sm:$0xff]  ;;  %v280_v16 = vld [vmem:[%s3578_s25 + $0x368] sm:$0xff] }
  0x2c   : > { %3272 = vmatmul.mubr.msk.f32.gmra.mrb[10].mxu0 %vm344_vm0, %v182_v17  ;;  %3392 = vmatmul.mubr.msk.f32.gmra.mrb[8].mxu1 %vm344_vm0, %v262_v42  ;;  %v218_v17 = vld [vmem:[%s3578_s25 + $0x178] sm:$0xff]  ;;  %v285_v26 = vld [vmem:[%s3578_s25 + $0x390] sm:$0xff]  ;;  %v223_v27 = vld [vmem:[%s3578_s25 + $0x1a0] sm:$0xff] }
  0x2d   : > { %3274 = vmatprep.mubr.msk.f32.mxu0 %vm344_vm0, %v183_v18  ;;  %3394 = vmatprep.mubr.msk.f32.mxu1 %vm344_vm0, %v263_v43  ;;  %v281_v18 = vld [vmem:[%s3578_s25 + $0x370] sm:$0xff]  ;;  %v222_v25 = vld [vmem:[%s3578_s25 + $0x198] sm:$0xff]  ;;  %v287_v30 = vld [vmem:[%s3578_s25 + $0x3a0] sm:$0xff] }
  0x2e   : > { %v225_v31 = vld [vmem:[%s3578_s25 + $0x1b0] sm:$0xff]  ;;  %v227_v35 = vld [vmem:[%s3578_s25 + $0x1c0] sm:$0xff] }
  0x2f   : > { %v289_v34 = vld [vmem:[%s3578_s25 + $0x3b0] sm:$0xff]  ;;  %v291_v38 = vld [vmem:[%s3578_s25 + $0x3c0] sm:$0xff] }
  0x30   : > { %3275 = vmatmul.mubr.msk.f32.gmra.mrb[12].mxu0 %vm344_vm0, %v184_v19  ;;  %3395 = vmatmul.mubr.msk.f32.gmra.mrb[10].mxu1 %vm344_vm0, %v264_v46  ;;  %v219_v19 = vld [vmem:[%s3578_s25 + $0x180] sm:$0xff]  ;;  %v229_v39 = vld [vmem:[%s3578_s25 + $0x1d0] sm:$0xff] }
  0x31   : > { %3277 = vmatprep.mubr.msk.f32.mxu0 %vm344_vm0, %v185_v20  ;;  %3397 = vmatprep.mubr.msk.f32.mxu1 %vm344_vm0, %v265_v47  ;;  %v282_v20 = vld [vmem:[%s3578_s25 + $0x378] sm:$0xff]  ;;  %v293_v42 = vld [vmem:[%s3578_s25 + $0x3d0] sm:$0xff]  ;;  %v231_v43 = vld [vmem:[%s3578_s25 + $0x1e0] sm:$0xff] }
  0x32   : > { %v295_v46 = vld [vmem:[%s3578_s25 + $0x3e0] sm:$0xff]  ;;  %v233_v47 = vld [vmem:[%s3578_s25 + $0x1f0] sm:$0xff] }
  0x34   : > { %3278 = vmatmul.mubr.msk.f32.gmra.mrb[14].mxu0 %vm344_vm0, %v186_v21  ;;  %3398 = vmatmul.mubr.msk.f32.gmra.mrb[12].mxu1 %vm344_vm0, %v266_v50  ;;  %v220_v21 = vld [vmem:[%s3578_s25 + $0x188] sm:$0xff]  ;;  %v297_v50 = vld [vmem:[%s3578_s25 + $0x3f0] sm:$0xff] }
  0x35   : > { %3280 = vmatprep.mubr.msk.f32.mxu0 %vm344_vm0, %v187_v22  ;;  %3400 = vmatprep.mubr.msk.f32.mxu1 %vm344_vm0, %v267_v51  ;;  %v283_v22 = vld [vmem:[%s3578_s25 + $0x380] sm:$0xff] }
  0x36   : > { %v235_v51 = vld [vmem:[%s3578_s25 + $0x200] sm:$0xff] }
  0x38   : > { %3281 = vmatmul.mubr.msk.f32.gmra.mrb[16].mxu0 %vm344_vm0, %v188_v23  ;;  %3401 = vmatmul.mubr.msk.f32.gmra.mrb[14].mxu1 %vm344_vm0, %v268_v54  ;;  %v221_v23 = vld [vmem:[%s3578_s25 + $0x190] sm:$0xff]  ;;  %v299_v54 = vld [vmem:[%s3578_s25 + $0x400] sm:$0xff] }
  0x39   : > { %3283 = vmatprep.mubr.msk.f32.mxu0 %vm344_vm0, %v189_v24  ;;  %3403 = vmatprep.mubr.msk.f32.mxu1 %vm344_vm0, %v269_v55  ;;  %v284_v24 = vld [vmem:[%s3578_s25 + $0x388] sm:$0xff]  ;;  %v237_v55 = vld [vmem:[%s3578_s25 + $0x210] sm:$0xff] }
  0x3c   : > { %3284 = vmatmul.mubr.msk.f32.gmra.mrb[18].mxu0 %vm344_vm0, %v190_v28  ;;  %3404 = vmatmul.mubr.msk.f32.gmra.mrb[16].mxu1 %vm344_vm0, %v270_v58  ;;  %v286_v28 = vld [vmem:[%s3578_s25 + $0x398] sm:$0xff]  ;;  %v301_v58 = vld [vmem:[%s3578_s25 + $0x410] sm:$0xff] }
  0x3d   : > { %3286 = vmatprep.mubr.msk.f32.mxu0 %vm344_vm0, %v191_v29  ;;  %3406 = vmatprep.mubr.msk.f32.mxu1 %vm344_vm0, %v271_v59  ;;  %v224_v29 = vld [vmem:[%s3578_s25 + $0x1a8] sm:$0xff]  ;;  %v239_v59 = vld [vmem:[%s3578_s25 + $0x220] sm:$0xff] }
  0x40   : > { %3287 = vmatmul.mubr.msk.f32.gmra.mrb[20].mxu0 %vm344_vm0, %v192_v32  ;;  %3407 = vmatmul.mubr.msk.f32.gmra.mrb[18].mxu1 %vm344_vm0, %v272_v62  ;;  %v288_v32 = vld [vmem:[%s3578_s25 + $0x3a8] sm:$0xff]  ;;  %v303_v62 = vld [vmem:[%s3578_s25 + $0x420] sm:$0xff] }
  0x41   : > { %3289 = vmatprep.mubr.msk.f32.mxu0 %vm344_vm0, %v193_v33  ;;  %3409 = vmatprep.mubr.msk.f32.mxu1 %vm344_vm0, %v273_v63  ;;  %v226_v33 = vld [vmem:[%s3578_s25 + $0x1b8] sm:$0xff]  ;;  %v241_v63 = vld [vmem:[%s3578_s25 + $0x230] sm:$0xff] }
  0x44   : > { %3290 = vmatmul.mubr.msk.f32.gmra.mrb[22].mxu0 %vm344_vm0, %v194_v36  ;;  %3410 = vmatmul.mubr.msk.f32.gmra.mrb[20].mxu1 %vm344_vm0, %v274_v2  ;;  %v290_v36 = vld [vmem:[%s3578_s25 + $0x3b8] sm:$0xff]  ;;  %v305_v2 = vld [vmem:[%s3578_s25 + $0x430] sm:$0xff] }
  0x45   : > { %3292 = vmatprep.mubr.msk.f32.mxu0 %vm344_vm0, %v195_v37  ;;  %3412 = vmatprep.mubr.msk.f32.mxu1 %vm344_vm0, %v275_v3  ;;  %v228_v37 = vld [vmem:[%s3578_s25 + $0x1c8] sm:$0xff]  ;;  %v243_v3 = vld [vmem:[%s3578_s25 + $0x240] sm:$0xff] }
  0x48   : > { %3293 = vmatmul.mubr.msk.f32.gmra.mrb[24].mxu0 %vm344_vm0, %v196_v40  ;;  %3413 = vmatmul.mubr.msk.f32.gmra.mrb[22].mxu1 %vm344_vm0, %v276_v6  ;;  %v292_v40 = vld [vmem:[%s3578_s25 + $0x3c8] sm:$0xff]  ;;  %v307_v6 = vld [vmem:[%s3578_s25 + $0x440] sm:$0xff] }
  0x49   : > { %3295 = vmatprep.mubr.msk.f32.mxu0 %vm344_vm0, %v197_v41  ;;  %3415 = vmatprep.mubr.msk.f32.mxu1 %vm344_vm0, %v277_v7  ;;  %v230_v41 = vld [vmem:[%s3578_s25 + $0x1d8] sm:$0xff]  ;;  %v245_v7 = vld [vmem:[%s3578_s25 + $0x250] sm:$0xff] }
  0x4c   : > { %3296 = vmatmul.mubr.msk.f32.gmra.mrb[26].mxu0 %vm344_vm0, %v198_v44  ;;  %3416 = vmatmul.mubr.msk.f32.gmra.mrb[24].mxu1 %vm344_vm0, %v278_v12  ;;  %v294_v44 = vld [vmem:[%s3578_s25 + $0x3d8] sm:$0xff] }
  0x4d   : > { %3298 = vmatprep.mubr.msk.f32.mxu0 %vm344_vm0, %v199_v45  ;;  %3418 = vmatprep.mubr.msk.f32.mxu1 %vm344_vm0, %v279_v14  ;;  %v232_v45 = vld [vmem:[%s3578_s25 + $0x1e8] sm:$0xff]  ;;  %v310_v12 = vld [vmem:[%s3578_s25 + $0x458] sm:$0xff]  ;;  %v311_v14 = vld [vmem:[%s3578_s25 + $0x460] sm:$0xff] }
  0x50   : > { %3299 = vmatmul.mubr.msk.f32.gmra.mrb[28].mxu0 %vm344_vm0, %v200_v48  ;;  %3419 = vmatmul.mubr.msk.f32.gmra.mrb[26].mxu1 %vm344_vm0, %v280_v16  ;;  %v296_v48 = vld [vmem:[%s3578_s25 + $0x3e8] sm:$0xff] }
  0x51   : > { %3301 = vmatprep.mubr.msk.f32.mxu0 %vm344_vm0, %v201_v49  ;;  %3421 = vmatprep.mubr.msk.f32.mxu1 %vm344_vm0, %v281_v18  ;;  %v234_v49 = vld [vmem:[%s3578_s25 + $0x1f8] sm:$0xff]  ;;  %v312_v16 = vld [vmem:[%s3578_s25 + $0x468] sm:$0xff]  ;;  %v313_v18 = vld [vmem:[%s3578_s25 + $0x470] sm:$0xff] }
  0x54   : > { %3302 = vmatmul.mubr.msk.f32.gmra.mrb[30].mxu0 %vm344_vm0, %v202_v52  ;;  %3422 = vmatmul.mubr.msk.f32.gmra.mrb[28].mxu1 %vm344_vm0, %v282_v20  ;;  %v298_v52 = vld [vmem:[%s3578_s25 + $0x3f8] sm:$0xff] }
  0x55   : > { %3304 = vmatprep.mubr.msk.f32.mxu0 %vm344_vm0, %v203_v53  ;;  %3424 = vmatprep.mubr.msk.f32.mxu1 %vm344_vm0, %v283_v22  ;;  %v236_v53 = vld [vmem:[%s3578_s25 + $0x208] sm:$0xff]  ;;  %v314_v20 = vld [vmem:[%s3578_s25 + $0x478] sm:$0xff]  ;;  %v315_v22 = vld [vmem:[%s3578_s25 + $0x480] sm:$0xff] }
  0x58   : > { %3305 = vmatmul.mubr.msk.f32.gmra.mrb[32].mxu0 %vm344_vm0, %v204_v56  ;;  %3425 = vmatmul.mubr.msk.f32.gmra.mrb[30].mxu1 %vm344_vm0, %v284_v24  ;;  %v300_v56 = vld [vmem:[%s3578_s25 + $0x408] sm:$0xff]  ;;  %v317_v24 = vld [vmem:[%s3578_s25 + $0x490] sm:$0xff] }
  0x59   : > { %3307 = vmatprep.mubr.msk.f32.mxu0 %vm344_vm0, %v205_v57  ;;  %3427 = vmatprep.mubr.msk.f32.mxu1 %vm344_vm0, %v285_v26  ;;  %v238_v57 = vld [vmem:[%s3578_s25 + $0x218] sm:$0xff]  ;;  %v319_v26 = vld [vmem:[%s3578_s25 + $0x4a0] sm:$0xff] }
  0x5c   : > { %3308 = vmatmul.mubr.msk.f32.gmra.mrb[34].mxu0 %vm344_vm0, %v206_v60  ;;  %3428 = vmatmul.mubr.msk.f32.gmra.mrb[32].mxu1 %vm344_vm0, %v286_v28  ;;  %v302_v60 = vld [vmem:[%s3578_s25 + $0x418] sm:$0xff]  ;;  %v321_v28 = vld [vmem:[%s3578_s25 + $0x4b0] sm:$0xff] }
  0x5d   : > { %3310 = vmatprep.mubr.msk.f32.mxu0 %vm344_vm0, %v207_v61  ;;  %3430 = vmatprep.mubr.msk.f32.mxu1 %vm344_vm0, %v287_v30  ;;  %v240_v61 = vld [vmem:[%s3578_s25 + $0x228] sm:$0xff]  ;;  %v323_v30 = vld [vmem:[%s3578_s25 + $0x4c0] sm:$0xff] }
  0x60   : > { %3311 = vmatmul.mubr.msk.f32.gmra.mrb[36].mxu0 %vm344_vm0, %v208_v0  ;;  %3431 = vmatmul.mubr.msk.f32.gmra.mrb[34].mxu1 %vm344_vm0, %v288_v32  ;;  %v304_v0 = vld [vmem:[%s3578_s25 + $0x428] sm:$0xff]  ;;  %v325_v32 = vld [vmem:[%s3578_s25 + $0x4d0] sm:$0xff] }
  0x61   : > { %3313 = vmatprep.mubr.msk.f32.mxu0 %vm344_vm0, %v209_v1  ;;  %3433 = vmatprep.mubr.msk.f32.mxu1 %vm344_vm0, %v289_v34  ;;  %v242_v1 = vld [vmem:[%s3578_s25 + $0x238] sm:$0xff]  ;;  %v327_v34 = vld [vmem:[%s3578_s25 + $0x4e0] sm:$0xff] }
  0x64   : > { %3314 = vmatmul.mubr.msk.f32.gmra.mrb[38].mxu0 %vm344_vm0, %v210_v4  ;;  %3434 = vmatmul.mubr.msk.f32.gmra.mrb[36].mxu1 %vm344_vm0, %v290_v36  ;;  %v306_v4 = vld [vmem:[%s3578_s25 + $0x438] sm:$0xff]  ;;  %v329_v36 = vld [vmem:[%s3578_s25 + $0x4f0] sm:$0xff] }
  0x65   : > { %3316 = vmatprep.mubr.msk.f32.mxu0 %vm344_vm0, %v211_v5  ;;  %3436 = vmatprep.mubr.msk.f32.mxu1 %vm344_vm0, %v291_v38  ;;  %v244_v5 = vld [vmem:[%s3578_s25 + $0x248] sm:$0xff]  ;;  %v331_v38 = vld [vmem:[%s3578_s25 + $0x500] sm:$0xff] }
  0x68   : > { %3317 = vmatmul.mubr.msk.f32.gmra.mrb[40].mxu0 %vm344_vm0, %v212_v8  ;;  %3437 = vmatmul.mubr.msk.f32.gmra.mrb[38].mxu1 %vm344_vm0, %v292_v40  ;;  %v308_v8 = vld [vmem:[%s3578_s25 + $0x448] sm:$0xff]  ;;  %v3907_v40 = vld [vmem:[%s6737_s2] ss:$0 sm:$0xff] }
  0x69   : > { %3319 = vmatprep.mubr.msk.f32.mxu0 %vm344_vm0, %v213_v9  ;;  %3439 = vmatprep.mubr.msk.f32.mxu1 %vm344_vm0, %v293_v42  ;;  %v246_v9 = vld [vmem:[%s3578_s25 + $0x258] sm:$0xff] }
  0x6c   : > { %3320 = vmatmul.mubr.msk.f32.gmra.mrb[42].mxu0 %vm344_vm0, %v214_v10  ;;  %3440 = vmatmul.mubr.msk.f32.gmra.mrb[40].mxu1 %vm344_vm0, %v294_v44  ;;  %v309_v10 = vld [vmem:[%s3578_s25 + $0x450] sm:$0xff] }
  0x6d   : > { %3322 = vmatprep.mubr.msk.f32.mxu0 %vm344_vm0, %v215_v11  ;;  %3442 = vmatprep.mubr.msk.f32.mxu1 %vm344_vm0, %v295_v46  ;;  %v247_v11 = vld [vmem:[%s3578_s25 + $0x260] sm:$0xff] }
  0x70   : > { %3323 = vmatmul.mubr.msk.f32.gmra.mrb[44].mxu0 %vm344_vm0, %v216_v13  ;;  %3443 = vmatmul.mubr.msk.f32.gmra.mrb[42].mxu1 %vm344_vm0, %v296_v48  ;;  %v248_v13 = vld [vmem:[%s3578_s25 + $0x268] sm:$0xff] }
  0x71   : > { %3325 = vmatprep.mubr.msk.f32.mxu0 %vm344_vm0, %v217_v15  ;;  %3445 = vmatprep.mubr.msk.f32.mxu1 %vm344_vm0, %v297_v50  ;;  %v249_v15 = vld [vmem:[%s3578_s25 + $0x270] sm:$0xff] }
  0x74   : > { %3326 = vmatmul.mubr.msk.f32.gmra.mrb[46].mxu0 %vm344_vm0, %v218_v17  ;;  %3446 = vmatmul.mubr.msk.f32.gmra.mrb[44].mxu1 %vm344_vm0, %v298_v52  ;;  %v250_v17 = vld [vmem:[%s3578_s25 + $0x278] sm:$0xff] }
  0x75   : > { %3328 = vmatprep.mubr.msk.f32.mxu0 %vm344_vm0, %v219_v19  ;;  %3448 = vmatprep.mubr.msk.f32.mxu1 %vm344_vm0, %v299_v54  ;;  %v251_v19 = vld [vmem:[%s3578_s25 + $0x280] sm:$0xff] }
  0x78   : > { %3329 = vmatmul.mubr.msk.f32.gmra.mrb[48].mxu0 %vm344_vm0, %v220_v21  ;;  %3449 = vmatmul.mubr.msk.f32.gmra.mrb[46].mxu1 %vm344_vm0, %v300_v56  ;;  %v252_v21 = vld [vmem:[%s3578_s25 + $0x288] sm:$0xff] }
  0x79   : > { %3331 = vmatprep.mubr.msk.f32.mxu0 %vm344_vm0, %v221_v23  ;;  %3451 = vmatprep.mubr.msk.f32.mxu1 %vm344_vm0, %v301_v58  ;;  %v316_v23 = vld [vmem:[%s3578_s25 + $0x488] sm:$0xff] }
  0x7c   : > { %3332 = vmatmul.mubr.msk.f32.gmra.mrb[50].mxu0 %vm344_vm0, %v222_v25  ;;  %3452 = vmatmul.mubr.msk.f32.gmra.mrb[48].mxu1 %vm344_vm0, %v302_v60  ;;  %v318_v25 = vld [vmem:[%s3578_s25 + $0x498] sm:$0xff] }
  0x7d   : > { %3334 = vmatprep.mubr.msk.f32.mxu0 %vm344_vm0, %v223_v27  ;;  %3454 = vmatprep.mubr.msk.f32.mxu1 %vm344_vm0, %v303_v62  ;;  %v320_v27 = vld [vmem:[%s3578_s25 + $0x4a8] sm:$0xff] }
  0x80   : > { %3335 = vmatmul.mubr.msk.f32.gmra.mrb[52].mxu0 %vm344_vm0, %v224_v29  ;;  %3455 = vmatmul.mubr.msk.f32.gmra.mrb[50].mxu1 %vm344_vm0, %v304_v0  ;;  %v322_v29 = vld [vmem:[%s3578_s25 + $0x4b8] sm:$0xff] }
  0x81   : > { %3337 = vmatprep.mubr.msk.f32.mxu0 %vm344_vm0, %v225_v31  ;;  %3457 = vmatprep.mubr.msk.f32.mxu1 %vm344_vm0, %v305_v2  ;;  %v324_v31 = vld [vmem:[%s3578_s25 + $0x4c8] sm:$0xff] }
  0x84   : > { %3338 = vmatmul.mubr.msk.f32.gmra.mrb[54].mxu0 %vm344_vm0, %v226_v33  ;;  %3458 = vmatmul.mubr.msk.f32.gmra.mrb[52].mxu1 %vm344_vm0, %v306_v4  ;;  %v326_v33 = vld [vmem:[%s3578_s25 + $0x4d8] sm:$0xff] }
  0x85   : > { %3340 = vmatprep.mubr.msk.f32.mxu0 %vm344_vm0, %v227_v35  ;;  %3460 = vmatprep.mubr.msk.f32.mxu1 %vm344_vm0, %v307_v6  ;;  %v328_v35 = vld [vmem:[%s3578_s25 + $0x4e8] sm:$0xff] }
  0x88   : > { %3341 = vmatmul.mubr.msk.f32.gmra.mrb[56].mxu0 %vm344_vm0, %v228_v37  ;;  %3461 = vmatmul.mubr.msk.f32.gmra.mrb[54].mxu1 %vm344_vm0, %v308_v8  ;;  %v330_v37 = vld [vmem:[%s3578_s25 + $0x4f8] sm:$0xff] }
  0x89   : > { %3343 = vmatprep.mubr.msk.f32.mxu0 %vm344_vm0, %v229_v39  ;;  %3463 = vmatprep.mubr.msk.f32.mxu1 %vm344_vm0, %v309_v10  ;;  %v332_v39 = vld [vmem:[%s3578_s25 + $0x508] sm:$0xff] }
  0x8c   : > { %3344 = vmatmul.mubr.msk.f32.gmra.mrb[58].mxu0 %vm344_vm0, %v230_v41  ;;  %3464 = vmatmul.mubr.msk.f32.gmra.mrb[56].mxu1 %vm344_vm0, %v310_v12 }
  0x8d   : > { %3346 = vmatprep.mubr.msk.f32.mxu0 %vm344_vm0, %v231_v43  ;;  %3466 = vmatprep.mubr.msk.f32.mxu1 %vm344_vm0, %v311_v14 }
  0x90   : > { %3347 = vmatmul.mubr.msk.f32.gmra.mrb[60].mxu0 %vm344_vm0, %v232_v45  ;;  %3467 = vmatmul.mubr.msk.f32.gmra.mrb[58].mxu1 %vm344_vm0, %v312_v16 }
  0x91   : > { %3349 = vmatprep.mubr.msk.f32.mxu0 %vm344_vm0, %v233_v47  ;;  %3469 = vmatprep.mubr.msk.f32.mxu1 %vm344_vm0, %v313_v18 }
  0x94   : > { %3350 = vmatmul.mubr.msk.f32.gmra.mrb[62].mxu0 %vm344_vm0, %v234_v49  ;;  %3470 = vmatmul.mubr.msk.f32.gmra.mrb[60].mxu1 %vm344_vm0, %v314_v20 }
  0x95   : > { %3352 = vmatprep.mubr.msk.f32.mxu0 %vm344_vm0, %v235_v51  ;;  %3472 = vmatprep.mubr.msk.f32.mxu1 %vm344_vm0, %v315_v22 }
  0x98   : > { %3353 = vmatmul.mubr.msk.f32.gmra.mrb[64].mxu0 %vm344_vm0, %v236_v53  ;;  %3473 = vmatmul.mubr.msk.f32.gmra.mrb[62].mxu1 %vm344_vm0, %v316_v23 }
  0x99   : > { %3355 = vmatprep.mubr.msk.f32.mxu0 %vm344_vm0, %v237_v55  ;;  %3475 = vmatprep.mubr.msk.f32.mxu1 %vm344_vm0, %v317_v24 }
  0x9c   : > { %3356 = vmatmul.mubr.msk.f32.gmra.mrb[66].mxu0 %vm344_vm0, %v238_v57  ;;  %3476 = vmatmul.mubr.msk.f32.gmra.mrb[64].mxu1 %vm344_vm0, %v318_v25 }
  0x9d   : > { %3358 = vmatprep.mubr.msk.f32.mxu0 %vm344_vm0, %v239_v59  ;;  %3478 = vmatprep.mubr.msk.f32.mxu1 %vm344_vm0, %v319_v26 }
  0xa0   : > { %3359 = vmatmul.mubr.msk.f32.gmra.mrb[68].mxu0 %vm344_vm0, %v240_v61  ;;  %3479 = vmatmul.mubr.msk.f32.gmra.mrb[66].mxu1 %vm344_vm0, %v320_v27 }
  0xa1   : > { %3361 = vmatprep.mubr.msk.f32.mxu0 %vm344_vm0, %v241_v63  ;;  %3481 = vmatprep.mubr.msk.f32.mxu1 %vm344_vm0, %v321_v28 }
  0xa4   : > { %3362 = vmatmul.mubr.msk.f32.gmra.mrb[70].mxu0 %vm344_vm0, %v242_v1  ;;  %3482 = vmatmul.mubr.msk.f32.gmra.mrb[68].mxu1 %vm344_vm0, %v322_v29 }
  0xa5   : > { %3364 = vmatprep.mubr.msk.f32.mxu0 %vm344_vm0, %v243_v3  ;;  %3484 = vmatprep.mubr.msk.f32.mxu1 %vm344_vm0, %v323_v30 }
  0xa8   : > { %3365 = vmatmul.mubr.msk.f32.gmra.mrb[72].mxu0 %vm344_vm0, %v244_v5  ;;  %3485 = vmatmul.mubr.msk.f32.gmra.mrb[70].mxu1 %vm344_vm0, %v324_v31 }
  0xa9   : > { %3367 = vmatprep.mubr.msk.f32.mxu0 %vm344_vm0, %v245_v7  ;;  %3487 = vmatprep.mubr.msk.f32.mxu1 %vm344_vm0, %v325_v32 }
  0xac   : > { %3368 = vmatmul.mubr.msk.f32.gmra.mrb[74].mxu0 %vm344_vm0, %v246_v9  ;;  %3488 = vmatmul.mubr.msk.f32.gmra.mrb[72].mxu1 %vm344_vm0, %v326_v33 }
  0xad   : > { %3370 = vmatprep.mubr.msk.f32.mxu0 %vm344_vm0, %v247_v11  ;;  %3490 = vmatprep.mubr.msk.f32.mxu1 %vm344_vm0, %v327_v34 }
  0xb0   : > { %3371 = vmatmul.mubr.msk.f32.gmra.mrb[76].mxu0 %vm344_vm0, %v248_v13  ;;  %3491 = vmatmul.mubr.msk.f32.gmra.mrb[74].mxu1 %vm344_vm0, %v328_v35 }
  0xb1   : > { %3373 = vmatprep.mubr.msk.f32.mxu0 %vm344_vm0, %v249_v15  ;;  %3493 = vmatprep.mubr.msk.f32.mxu1 %vm344_vm0, %v329_v36 }
  0xb4   : > { %3374 = vmatmul.mubr.msk.f32.gmra.mrb[78].mxu0 %vm344_vm0, %v250_v17  ;;  %3494 = vmatmul.mubr.msk.f32.gmra.mrb[76].mxu1 %vm344_vm0, %v330_v37 }
  0xb5   : > { %3376 = vmatprep.mubr.msk.f32.mxu0 %vm344_vm0, %v251_v19  ;;  %3496 = vmatprep.mubr.msk.f32.mxu1 %vm344_vm0, %v331_v38 }
  0xb8   : > { %3377 = vmatmul.mubr.msk.f32.gmra.mrb[80].mxu0 %vm344_vm0, %v252_v21  ;;  %3497 = vmatmul.mubr.msk.f32.gmra.mrb[78].mxu1 %vm344_vm0, %v332_v39 }
  0xeb   : > { %v3258_v41 = vpop.f32.mrb[0].mxu0 }
  0xec   : > { %v897_v42 = vpop.f32.mrb[1].mxu0  ;;  %v3910_v43 = vadd.f32 %v3258_v41, %v3907_v40 }
  0xed   : > { %v3913_v44 = vadd.f32 %v3907_v40, %v897_v42 }
  0xee   : > { %6970 = vst [vmem:[#allocation2_spill] sm:$0xff] %v3910_v43 }
  0xef   : > { %6971 = vst [vmem:[#allocation3_spill] sm:$0xff] %v3913_v44  ;;  %v3261_v45 = vpop.f32.mrb[2].mxu0  ;;  %v1706_v47 = vadd.f32 %v3910_v43, %v3913_v44  ;;  %v3976_v27 = vpop.f32.mrb[0].mxu1 }
  0xf0   : > { %v907_v46 = vpop.f32.mrb[3].mxu0  ;;  %v3921_v49 = vadd.f32 %v3261_v45, %v3907_v40  ;;  %v3982_v31 = vpop.f32.mrb[1].mxu1 }
  0xf1   : > { %v3918_v48 = vadd.f32 %v3907_v40, %v907_v46 }
  0xf2   : > { %6973 = vst [vmem:[#allocation5_spill] sm:$0xff] %v3921_v49 }
  0xf3   : > { %6972 = vst [vmem:[#allocation4_spill] sm:$0xff] %v3918_v48  ;;  %v1707_v50 = vadd.f32 %v1706_v47, %v3918_v48  ;;  %v3264_v51 = vpop.f32.mrb[4].mxu0  ;;  %v3988_v35 = vpop.f32.mrb[2].mxu1 }
  0xf4   : > { %v917_v52 = vpop.f32.mrb[5].mxu0  ;;  %v3929_v55 = vadd.f32 %v3264_v51, %v3907_v40  ;;  %v3994_v39 = vpop.f32.mrb[3].mxu1 }
  0xf5   : > { %v1708_v53 = vadd.f32 %v1707_v50, %v3921_v49  ;;  %v3926_v54 = vadd.f32 %v3907_v40, %v917_v52 }
  0xf6   : > { %6975 = vst [vmem:[#allocation7_spill] sm:$0xff] %v3929_v55 }
  0xf7   : > { %6974 = vst [vmem:[#allocation6_spill] sm:$0xff] %v3926_v54  ;;  %v1709_v56 = vadd.f32 %v1708_v53, %v3926_v54  ;;  %v3267_v57 = vpop.f32.mrb[6].mxu0  ;;  %v4000_v46 = vpop.f32.mrb[4].mxu1 }
  0xf8   : > { %v927_v58 = vpop.f32.mrb[7].mxu0  ;;  %v3937_v61 = vadd.f32 %v3267_v57, %v3907_v40  ;;  %v4006_v52 = vpop.f32.mrb[5].mxu1 }
  0xf9   : > { %v1710_v59 = vadd.f32 %v1709_v56, %v3929_v55  ;;  %v3934_v60 = vadd.f32 %v3907_v40, %v927_v58 }
  0xfa   : > { %6977 = vst [vmem:[#allocation9_spill] sm:$0xff] %v3937_v61 }
  0xfb   : > { %6976 = vst [vmem:[#allocation8_spill] sm:$0xff] %v3934_v60  ;;  %v1711_v62 = vadd.f32 %v1710_v59, %v3934_v60  ;;  %v3270_v63 = vpop.f32.mrb[8].mxu0  ;;  %v4012_v58 = vpop.f32.mrb[6].mxu1 }
  0xfc   : > { %v937_v0 = vpop.f32.mrb[9].mxu0  ;;  %v3945_v3 = vadd.f32 %v3270_v63, %v3907_v40 }
  0xfd   : > { %v1712_v1 = vadd.f32 %v1711_v62, %v3937_v61  ;;  %v3942_v2 = vadd.f32 %v3907_v40, %v937_v0  ;;  %v4018_v0 = vpop.f32.mrb[7].mxu1 }
  0xfe   : > { %6979 = vst [vmem:[#allocation11_spill] sm:$0xff] %v3945_v3 }
  0xff   : > { %6978 = vst [vmem:[#allocation10_spill] sm:$0xff] %v3942_v2  ;;  %v1713_v4 = vadd.f32 %v1712_v1, %v3942_v2  ;;  %v3273_v5 = vpop.f32.mrb[10].mxu0 }
 0x100   : > { %v947_v6 = vpop.f32.mrb[11].mxu0  ;;  %v3953_v9 = vadd.f32 %v3273_v5, %v3907_v40 }
 0x101   : > { %v1714_v7 = vadd.f32 %v1713_v4, %v3945_v3  ;;  %v3950_v8 = vadd.f32 %v3907_v40, %v947_v6  ;;  %v4024_v6 = vpop.f32.mrb[8].mxu1 }
 0x102   : > { %6981 = vst [vmem:[#allocation13_spill] sm:$0xff] %v3953_v9 }
 0x103   : > { %6980 = vst [vmem:[#allocation12_spill] sm:$0xff] %v3950_v8  ;;  %v1715_v10 = vadd.f32 %v1714_v7, %v3950_v8  ;;  %v3276_v11 = vpop.f32.mrb[12].mxu0 }
 0x104   : > { %v957_v12 = vpop.f32.mrb[13].mxu0  ;;  %v3961_v15 = vadd.f32 %v3276_v11, %v3907_v40 }
 0x105   : > { %v1716_v13 = vadd.f32 %v1715_v10, %v3953_v9  ;;  %v3958_v14 = vadd.f32 %v3907_v40, %v957_v12  ;;  %v4030_v12 = vpop.f32.mrb[9].mxu1 }
 0x106   : > { %6983 = vst [vmem:[#allocation15_spill] sm:$0xff] %v3961_v15 }
 0x107   : > { %6982 = vst [vmem:[#allocation14_spill] sm:$0xff] %v3958_v14  ;;  %v1717_v16 = vadd.f32 %v1716_v13, %v3958_v14  ;;  %v3279_v17 = vpop.f32.mrb[14].mxu0 }
 0x108   : > { %v967_v18 = vpop.f32.mrb[15].mxu0  ;;  %v3969_v21 = vadd.f32 %v3279_v17, %v3907_v40 }
 0x109   : > { %v1718_v19 = vadd.f32 %v1717_v16, %v3961_v15  ;;  %v3966_v20 = vadd.f32 %v3907_v40, %v967_v18  ;;  %v4036_v18 = vpop.f32.mrb[10].mxu1 }
 0x10a   : > { %6985 = vst [vmem:[#allocation17_spill] sm:$0xff] %v3969_v21 }
 0x10b   : > { %6984 = vst [vmem:[#allocation16_spill] sm:$0xff] %v3966_v20  ;;  %v1719_v22 = vadd.f32 %v1718_v19, %v3966_v20  ;;  %v3282_v23 = vpop.f32.mrb[16].mxu0 }
 0x10c   : > { %v977_v24 = vpop.f32.mrb[17].mxu0  ;;  %v3979_v28 = vadd.f32 %v3282_v23, %v3907_v40 }
 0x10d   : > { %v1720_v25 = vadd.f32 %v1719_v22, %v3969_v21  ;;  %v3974_v26 = vadd.f32 %v3907_v40, %v977_v24  ;;  %v4042_v24 = vpop.f32.mrb[11].mxu1 }
 0x10e   : > { %6987 = vst [vmem:[#allocation19_spill] sm:$0xff] %v3979_v28 }
 0x10f   : > { %6986 = vst [vmem:[#allocation18_spill] sm:$0xff] %v3974_v26  ;;  %v1721_v29 = vadd.f32 %v1720_v25, %v3974_v26  ;;  %v3285_v30 = vpop.f32.mrb[18].mxu0 }
 0x110   : > { %v987_v32 = vpop.f32.mrb[19].mxu0  ;;  %v3991_v36 = vadd.f32 %v3285_v30, %v3907_v40 }
 0x111   : > { %v1722_v33 = vadd.f32 %v1721_v29, %v3979_v28  ;;  %v3986_v34 = vadd.f32 %v3907_v40, %v987_v32  ;;  %v4048_v32 = vpop.f32.mrb[12].mxu1 }
 0x112   : > { %6989 = vst [vmem:[#allocation21_spill] sm:$0xff] %v3991_v36 }
 0x113   : > { %6988 = vst [vmem:[#allocation20_spill] sm:$0xff] %v3986_v34  ;;  %v1723_v37 = vadd.f32 %v1722_v33, %v3986_v34  ;;  %v3288_v38 = vpop.f32.mrb[20].mxu0 }
 0x114   : > { %v997_v41 = vpop.f32.mrb[21].mxu0  ;;  %v4003_v47 = vadd.f32 %v3288_v38, %v3907_v40 }
 0x115   : > { %v1724_v42 = vadd.f32 %v1723_v37, %v3991_v36  ;;  %v3998_v45 = vadd.f32 %v3907_v40, %v997_v41  ;;  %v4054_v41 = vpop.f32.mrb[13].mxu1 }
 0x116   : > { %6991 = vst [vmem:[#allocation23_spill] sm:$0xff] %v4003_v47 }
 0x117   : > { %6990 = vst [vmem:[#allocation22_spill] sm:$0xff] %v3998_v45  ;;  %v1725_v50 = vadd.f32 %v1724_v42, %v3998_v45  ;;  %v3291_v51 = vpop.f32.mrb[22].mxu0 }
 0x118   : > { %v1007_v53 = vpop.f32.mrb[23].mxu0  ;;  %v4015_v59 = vadd.f32 %v3291_v51, %v3907_v40 }
 0x119   : > { %v1726_v56 = vadd.f32 %v1725_v50, %v4003_v47  ;;  %v4010_v57 = vadd.f32 %v3907_v40, %v1007_v53  ;;  %v4060_v53 = vpop.f32.mrb[14].mxu1 }
 0x11a   : > { %6993 = vst [vmem:[#allocation25_spill] sm:$0xff] %v4015_v59 }
 0x11b   : > { %6992 = vst [vmem:[#allocation24_spill] sm:$0xff] %v4010_v57  ;;  %v1727_v62 = vadd.f32 %v1726_v56, %v4010_v57  ;;  %v3294_v63 = vpop.f32.mrb[24].mxu0 }
 0x11c   : > { %v1017_v1 = vpop.f32.mrb[25].mxu0  ;;  %v4027_v7 = vadd.f32 %v3294_v63, %v3907_v40 }
 0x11d   : > { %v1728_v4 = vadd.f32 %v1727_v62, %v4015_v59  ;;  %v4022_v5 = vadd.f32 %v3907_v40, %v1017_v1  ;;  %v4066_v1 = vpop.f32.mrb[15].mxu1 }
 0x11e   : > { %6995 = vst [vmem:[#allocation27_spill] sm:$0xff] %v4027_v7 }
 0x11f   : > { %6994 = vst [vmem:[#allocation26_spill] sm:$0xff] %v4022_v5  ;;  %v1729_v10 = vadd.f32 %v1728_v4, %v4022_v5  ;;  %v3297_v11 = vpop.f32.mrb[26].mxu0 }
 0x120   : > { %v1027_v13 = vpop.f32.mrb[27].mxu0  ;;  %v4039_v19 = vadd.f32 %v3297_v11, %v3907_v40 }
 0x121   : > { %v1730_v16 = vadd.f32 %v1729_v10, %v4027_v7  ;;  %v4034_v17 = vadd.f32 %v3907_v40, %v1027_v13  ;;  %v4072_v13 = vpop.f32.mrb[16].mxu1 }
 0x122   : > { %6997 = vst [vmem:[#allocation29_spill] sm:$0xff] %v4039_v19 }
 0x123   : > { %6996 = vst [vmem:[#allocation28_spill] sm:$0xff] %v4034_v17  ;;  %v1731_v22 = vadd.f32 %v1730_v16, %v4034_v17  ;;  %v3300_v23 = vpop.f32.mrb[28].mxu0 }
 0x124   : > { %v1037_v25 = vpop.f32.mrb[29].mxu0  ;;  %v4051_v33 = vadd.f32 %v3300_v23, %v3907_v40 }
 0x125   : > { %v1732_v29 = vadd.f32 %v1731_v22, %v4039_v19  ;;  %v4046_v30 = vadd.f32 %v3907_v40, %v1037_v25  ;;  %v4078_v25 = vpop.f32.mrb[17].mxu1 }
 0x126   : > { %6999 = vst [vmem:[#allocation31_spill] sm:$0xff] %v4051_v33 }
 0x127   : > { %6998 = vst [vmem:[#allocation30_spill] sm:$0xff] %v4046_v30  ;;  %v1733_v37 = vadd.f32 %v1732_v29, %v4046_v30  ;;  %v3303_v38 = vpop.f32.mrb[30].mxu0 }
 0x128   : > { %v1047_v42 = vpop.f32.mrb[31].mxu0  ;;  %v4063_v56 = vadd.f32 %v3303_v38, %v3907_v40 }
 0x129   : > { %v1734_v50 = vadd.f32 %v1733_v37, %v4051_v33  ;;  %v4058_v51 = vadd.f32 %v3907_v40, %v1047_v42  ;;  %v4084_v42 = vpop.f32.mrb[18].mxu1 }
 0x12a   : > { %7001 = vst [vmem:[#allocation33_spill] sm:$0xff] %v4063_v56 }
 0x12b   : > { %7000 = vst [vmem:[#allocation32_spill] sm:$0xff] %v4058_v51  ;;  %v1735_v62 = vadd.f32 %v1734_v50, %v4058_v51  ;;  %v3306_v63 = vpop.f32.mrb[32].mxu0 }
 0x12c   : > { %v1057_v4 = vpop.f32.mrb[33].mxu0  ;;  %v4075_v16 = vadd.f32 %v3306_v63, %v3907_v40 }
 0x12d   : > { %v1736_v10 = vadd.f32 %v1735_v62, %v4063_v56  ;;  %v4070_v11 = vadd.f32 %v3907_v40, %v1057_v4  ;;  %v4090_v4 = vpop.f32.mrb[19].mxu1 }
 0x12e   : > { %7003 = vst [vmem:[#allocation35_spill] sm:$0xff] %v4075_v16 }
 0x12f   : > { %7002 = vst [vmem:[#allocation34_spill] sm:$0xff] %v4070_v11  ;;  %v1737_v22 = vadd.f32 %v1736_v10, %v4070_v11  ;;  %v3309_v23 = vpop.f32.mrb[34].mxu0 }
 0x130   : > { %v1067_v29 = vpop.f32.mrb[35].mxu0  ;;  %v4087_v50 = vadd.f32 %v3309_v23, %v3907_v40 }
 0x131   : > { %v1738_v37 = vadd.f32 %v1737_v22, %v4075_v16  ;;  %v4082_v38 = vadd.f32 %v3907_v40, %v1067_v29  ;;  %v4096_v22 = vpop.f32.mrb[20].mxu1 }
 0x132   : > { %7005 = vst [vmem:[#allocation37_spill] sm:$0xff] %v4087_v50  ;;  %v4102_v51 = vpop.f32.mrb[21].mxu1 }
 0x133   : > { %7004 = vst [vmem:[#allocation36_spill] sm:$0xff] %v4082_v38  ;;  %v1739_v62 = vadd.f32 %v1738_v37, %v4082_v38  ;;  %v3312_v63 = vpop.f32.mrb[36].mxu0 }
 0x134   : > { %v1077_v10 = vpop.f32.mrb[37].mxu0  ;;  %v4099_v29 = vadd.f32 %v3312_v63, %v3907_v40 }
 0x135   : > { %v1740_v11 = vadd.f32 %v1739_v62, %v4087_v50  ;;  %v4094_v56 = vadd.f32 %v3907_v40, %v1077_v10  ;;  %v4108_v62 = vpop.f32.mrb[22].mxu1 }
 0x136   : > { %7007 = vst [vmem:[#allocation39_spill] sm:$0xff] %v4099_v29  ;;  %v4114_v30 = vpop.f32.mrb[23].mxu1 }
 0x137   : > { %7006 = vst [vmem:[#allocation38_spill] sm:$0xff] %v4094_v56  ;;  %v1741_v16 = vadd.f32 %v1740_v11, %v4094_v56  ;;  %v3315_v23 = vpop.f32.mrb[38].mxu0 }
 0x138   : > { %v1087_v37 = vpop.f32.mrb[39].mxu0  ;;  %v4111_v10 = vadd.f32 %v3315_v23, %v3907_v40 }
 0x139   : > { %v1742_v38 = vadd.f32 %v1741_v16, %v4099_v29  ;;  %v4106_v33 = vadd.f32 %v3907_v40, %v1087_v37  ;;  %v4120_v16 = vpop.f32.mrb[24].mxu1 }
 0x13a   : > { %7009 = vst [vmem:[#allocation41_spill] sm:$0xff] %v4111_v10  ;;  %v4126_v17 = vpop.f32.mrb[25].mxu1 }
 0x13b   : > { %7008 = vst [vmem:[#allocation40_spill] sm:$0xff] %v4106_v33  ;;  %v1743_v50 = vadd.f32 %v1742_v38, %v4106_v33  ;;  %v3318_v63 = vpop.f32.mrb[40].mxu0 }
 0x13c   : > { %v1097_v11 = vpop.f32.mrb[41].mxu0  ;;  %v4123_v37 = vadd.f32 %v3318_v63, %v3907_v40 }
 0x13d   : > { %v1744_v56 = vadd.f32 %v1743_v50, %v4111_v10  ;;  %v4118_v19 = vadd.f32 %v3907_v40, %v1097_v11  ;;  %v4132_v50 = vpop.f32.mrb[26].mxu1 }
 0x13e   : > { %7011 = vst [vmem:[#allocation43_spill] sm:$0xff] %v4123_v37  ;;  %v4138_v5 = vpop.f32.mrb[27].mxu1 }
 0x13f   : > { %7010 = vst [vmem:[#allocation42_spill] sm:$0xff] %v4118_v19  ;;  %v1745_v29 = vadd.f32 %v1744_v56, %v4118_v19  ;;  %v3321_v23 = vpop.f32.mrb[42].mxu0 }
 0x140   : > { %v1107_v38 = vpop.f32.mrb[43].mxu0  ;;  %v4135_v11 = vadd.f32 %v3321_v23, %v3907_v40 }
 0x141   : > { %v1746_v33 = vadd.f32 %v1745_v29, %v4123_v37  ;;  %v4130_v7 = vadd.f32 %v3907_v40, %v1107_v38  ;;  %v4144_v29 = vpop.f32.mrb[28].mxu1 }
 0x142   : > { %7013 = vst [vmem:[#allocation45_spill] sm:$0xff] %v4135_v11  ;;  %v4150_v57 = vpop.f32.mrb[29].mxu1 }
 0x143   : > { %7012 = vst [vmem:[#allocation44_spill] sm:$0xff] %v4130_v7  ;;  %v1747_v10 = vadd.f32 %v1746_v33, %v4130_v7  ;;  %v3324_v63 = vpop.f32.mrb[44].mxu0 }
 0x144   : > { %v1117_v56 = vpop.f32.mrb[45].mxu0  ;;  %v4147_v38 = vadd.f32 %v3324_v63, %v3907_v40 }
 0x145   : > { %v1748_v19 = vadd.f32 %v1747_v10, %v4135_v11  ;;  %v4142_v59 = vadd.f32 %v3907_v40, %v1117_v56  ;;  %v4156_v10 = vpop.f32.mrb[30].mxu1 }
 0x146   : > { %7015 = vst [vmem:[#allocation47_spill] sm:$0xff] %v4147_v38  ;;  %v4162_v45 = vpop.f32.mrb[31].mxu1 }
 0x147   : > { %7014 = vst [vmem:[#allocation46_spill] sm:$0xff] %v4142_v59  ;;  %v1749_v37 = vadd.f32 %v1748_v19, %v4142_v59  ;;  %v3327_v23 = vpop.f32.mrb[46].mxu0 }
 0x148   : > { %v1127_v33 = vpop.f32.mrb[47].mxu0  ;;  %v4159_v56 = vadd.f32 %v3327_v23, %v3907_v40 }
 0x149   : > { %v1750_v7 = vadd.f32 %v1749_v37, %v4147_v38  ;;  %v4154_v47 = vadd.f32 %v3907_v40, %v1127_v33  ;;  %v4168_v37 = vpop.f32.mrb[32].mxu1 }
 0x14a   : > { %7017 = vst [vmem:[#allocation49_spill] sm:$0xff] %v4159_v56  ;;  %v4174_v34 = vpop.f32.mrb[33].mxu1 }
 0x14b   : > { %7016 = vst [vmem:[#allocation48_spill] sm:$0xff] %v4154_v47  ;;  %v1751_v11 = vadd.f32 %v1750_v7, %v4154_v47  ;;  %v3330_v63 = vpop.f32.mrb[48].mxu0 }
 0x14c   : > { %v1137_v19 = vpop.f32.mrb[49].mxu0  ;;  %v4171_v33 = vadd.f32 %v3330_v63, %v3907_v40 }
 0x14d   : > { %v1752_v59 = vadd.f32 %v1751_v11, %v4159_v56  ;;  %v4166_v36 = vadd.f32 %v3907_v40, %v1137_v19  ;;  %v4180_v11 = vpop.f32.mrb[34].mxu1 }
 0x14e   : > { %7019 = vst [vmem:[#allocation51_spill] sm:$0xff] %v4171_v33  ;;  %v4186_v26 = vpop.f32.mrb[35].mxu1 }
 0x14f   : > { %7018 = vst [vmem:[#allocation50_spill] sm:$0xff] %v4166_v36  ;;  %v1753_v38 = vadd.f32 %v1752_v59, %v4166_v36  ;;  %v3333_v23 = vpop.f32.mrb[50].mxu0 }
 0x150   : > { %v1147_v7 = vpop.f32.mrb[51].mxu0  ;;  %v4183_v19 = vadd.f32 %v3333_v23, %v3907_v40 }
 0x151   : > { %v1754_v47 = vadd.f32 %v1753_v38, %v4171_v33  ;;  %v4178_v28 = vadd.f32 %v3907_v40, %v1147_v7  ;;  %v4192_v38 = vpop.f32.mrb[36].mxu1 }
 0x152   : > { %7021 = vst [vmem:[#allocation53_spill] sm:$0xff] %v4183_v19  ;;  %v4198_v20 = vpop.f32.mrb[37].mxu1 }
 0x153   : > { %7020 = vst [vmem:[#allocation52_spill] sm:$0xff] %v4178_v28  ;;  %v1755_v56 = vadd.f32 %v1754_v47, %v4178_v28  ;;  %v3336_v63 = vpop.f32.mrb[52].mxu0 }
 0x154   : > { %v1157_v59 = vpop.f32.mrb[53].mxu0  ;;  %v4195_v7 = vadd.f32 %v3336_v63, %v3907_v40 }
 0x155   : > { %v1756_v36 = vadd.f32 %v1755_v56, %v4183_v19  ;;  %v4190_v21 = vadd.f32 %v3907_v40, %v1157_v59  ;;  %v4204_v56 = vpop.f32.mrb[38].mxu1 }
 0x156   : > { %7023 = vst [vmem:[#allocation55_spill] sm:$0xff] %v4195_v7  ;;  %v4210_v14 = vpop.f32.mrb[39].mxu1 }
 0x157   : > { %7022 = vst [vmem:[#allocation54_spill] sm:$0xff] %v4190_v21  ;;  %v1757_v33 = vadd.f32 %v1756_v36, %v4190_v21  ;;  %v3339_v23 = vpop.f32.mrb[54].mxu0 }
 0x158   : > { %v1167_v47 = vpop.f32.mrb[55].mxu0  ;;  %v4207_v59 = vadd.f32 %v3339_v23, %v3907_v40 }
 0x159   : > { %v1758_v28 = vadd.f32 %v1757_v33, %v4195_v7  ;;  %v4202_v15 = vadd.f32 %v3907_v40, %v1167_v47  ;;  %v4216_v33 = vpop.f32.mrb[40].mxu1 }
 0x15a   : > { %7025 = vst [vmem:[#allocation57_spill] sm:$0xff] %v4207_v59  ;;  %v4222_v8 = vpop.f32.mrb[41].mxu1 }
 0x15b   : > { %7024 = vst [vmem:[#allocation56_spill] sm:$0xff] %v4202_v15  ;;  %v1759_v19 = vadd.f32 %v1758_v28, %v4202_v15  ;;  %v3342_v63 = vpop.f32.mrb[56].mxu0 }
 0x15c   : > { %v1177_v36 = vpop.f32.mrb[57].mxu0  ;;  %v4219_v47 = vadd.f32 %v3342_v63, %v3907_v40 }
 0x15d   : > { %v1760_v21 = vadd.f32 %v1759_v19, %v4207_v59  ;;  %v4214_v9 = vadd.f32 %v3907_v40, %v1177_v36  ;;  %v4228_v19 = vpop.f32.mrb[42].mxu1 }
 0x15e   : > { %7027 = vst [vmem:[#allocation59_spill] sm:$0xff] %v4219_v47  ;;  %v4234_v2 = vpop.f32.mrb[43].mxu1 }
 0x15f   : > { %7026 = vst [vmem:[#allocation58_spill] sm:$0xff] %v4214_v9  ;;  %v1761_v7 = vadd.f32 %v1760_v21, %v4214_v9  ;;  %v3345_v23 = vpop.f32.mrb[58].mxu0 }
 0x160   : > { %v1187_v28 = vpop.f32.mrb[59].mxu0  ;;  %v4231_v36 = vadd.f32 %v3345_v23, %v3907_v40 }
 0x161   : > { %v1762_v15 = vadd.f32 %v1761_v7, %v4219_v47  ;;  %v4226_v3 = vadd.f32 %v3907_v40, %v1187_v28  ;;  %v4240_v7 = vpop.f32.mrb[44].mxu1 }
 0x162   : > { %7029 = vst [vmem:[#allocation61_spill] sm:$0xff] %v4231_v36  ;;  %v4246_v60 = vpop.f32.mrb[45].mxu1 }
 0x163   : > { %7028 = vst [vmem:[#allocation60_spill] sm:$0xff] %v4226_v3  ;;  %v1763_v59 = vadd.f32 %v1762_v15, %v4226_v3  ;;  %v3348_v63 = vpop.f32.mrb[60].mxu0 }
 0x164   : > { %v1197_v21 = vpop.f32.mrb[61].mxu0  ;;  %v4243_v28 = vadd.f32 %v3348_v63, %v3907_v40 }
 0x165   : > { %v1764_v9 = vadd.f32 %v1763_v59, %v4231_v36  ;;  %v4238_v61 = vadd.f32 %v3907_v40, %v1197_v21  ;;  %v4252_v59 = vpop.f32.mrb[46].mxu1 }
 0x166   : > { %7031 = vst [vmem:[#allocation63_spill] sm:$0xff] %v4243_v28  ;;  %v4258_v54 = vpop.f32.mrb[47].mxu1 }
 0x167   : > { %7030 = vst [vmem:[#allocation62_spill] sm:$0xff] %v4238_v61  ;;  %v1765_v47 = vadd.f32 %v1764_v9, %v4238_v61  ;;  %v3351_v23 = vpop.f32.mrb[62].mxu0 }
 0x168   : > { %v1207_v15 = vpop.f32.mrb[63].mxu0  ;;  %v4255_v21 = vadd.f32 %v3351_v23, %v3907_v40 }
 0x169   : > { %v1766_v3 = vadd.f32 %v1765_v47, %v4243_v28  ;;  %v4250_v55 = vadd.f32 %v3907_v40, %v1207_v15  ;;  %v4264_v47 = vpop.f32.mrb[48].mxu1 }
 0x16a   : > { %7033 = vst [vmem:[#allocation65_spill] sm:$0xff] %v4255_v21  ;;  %7035 = vst [vmem:[#allocation67_spill] sm:$0xff] %v4264_v47  ;;  %v4270_v48 = vpop.f32.mrb[49].mxu1 }
 0x16b   : > { %7032 = vst [vmem:[#allocation64_spill] sm:$0xff] %v4250_v55  ;;  %v1767_v36 = vadd.f32 %v1766_v3, %v4250_v55  ;;  %v3354_v63 = vpop.f32.mrb[64].mxu0 }
 0x16c   : > { %v1217_v9 = vpop.f32.mrb[65].mxu0  ;;  %v4267_v15 = vadd.f32 %v3354_v63, %v3907_v40 }
 0x16d   : > { %v1768_v61 = vadd.f32 %v1767_v36, %v4255_v21  ;;  %v4262_v49 = vadd.f32 %v3907_v40, %v1217_v9  ;;  %v4276_v36 = vpop.f32.mrb[50].mxu1 }
 0x16e   : > { %7036 = vst [vmem:[#allocation68_spill] sm:$0xff] %v4267_v15  ;;  %7038 = vst [vmem:[#allocation70_spill] sm:$0xff] %v4276_v36  ;;  %v4282_v44 = vpop.f32.mrb[51].mxu1 }
 0x16f   : > { %7034 = vst [vmem:[#allocation66_spill] sm:$0xff] %v4262_v49  ;;  %v1769_v28 = vadd.f32 %v1768_v61, %v4262_v49  ;;  %v3357_v23 = vpop.f32.mrb[66].mxu0  ;;  %7040 = vst [vmem:[#allocation72_spill] sm:$0xff] %v4282_v44 }
 0x170   : > { %v1227_v3 = vpop.f32.mrb[67].mxu0  ;;  %v4279_v9 = vadd.f32 %v3357_v23, %v3907_v40 }
 0x171   : > { %v1770_v55 = vadd.f32 %v1769_v28, %v4267_v15  ;;  %v4274_v43 = vadd.f32 %v3907_v40, %v1227_v3  ;;  %v4288_v28 = vpop.f32.mrb[52].mxu1 }
 0x172   : > { %7039 = vst [vmem:[#allocation71_spill] sm:$0xff] %v4279_v9  ;;  %7042 = vst [vmem:[#allocation74_spill] sm:$0xff] %v4288_v28  ;;  %v4294_v36 = vpop.f32.mrb[53].mxu1 }
 0x173   : > { %7037 = vst [vmem:[#allocation69_spill] sm:$0xff] %v4274_v43  ;;  %v1771_v21 = vadd.f32 %v1770_v55, %v4274_v43  ;;  %v3360_v63 = vpop.f32.mrb[68].mxu0  ;;  %7044 = vst [vmem:[#allocation76_spill] sm:$0xff] %v4294_v36 }
 0x174   : > { %v1237_v61 = vpop.f32.mrb[69].mxu0  ;;  %v4291_v3 = vadd.f32 %v3360_v63, %v3907_v40 }
 0x175   : > { %v1772_v49 = vadd.f32 %v1771_v21, %v4279_v9  ;;  %v4286_v47 = vadd.f32 %v3907_v40, %v1237_v61  ;;  %v4300_v21 = vpop.f32.mrb[54].mxu1 }
 0x176   : > { %7043 = vst [vmem:[#allocation75_spill] sm:$0xff] %v4291_v3  ;;  %7046 = vst [vmem:[#allocation78_spill] sm:$0xff] %v4300_v21  ;;  %v4306_v28 = vpop.f32.mrb[55].mxu1 }
 0x177   : > { %7041 = vst [vmem:[#allocation73_spill] sm:$0xff] %v4286_v47  ;;  %v1773_v15 = vadd.f32 %v1772_v49, %v4286_v47  ;;  %v3363_v23 = vpop.f32.mrb[70].mxu0  ;;  %7048 = vst [vmem:[#allocation80_spill] sm:$0xff] %v4306_v28 }
 0x178   : > { %v1247_v55 = vpop.f32.mrb[71].mxu0  ;;  %v4303_v61 = vadd.f32 %v3363_v23, %v3907_v40 }
 0x179   : > { %v1774_v43 = vadd.f32 %v1773_v15, %v4291_v3  ;;  %v4298_v44 = vadd.f32 %v3907_v40, %v1247_v55  ;;  %v4312_v15 = vpop.f32.mrb[56].mxu1 }
 0x17a   : > { %7047 = vst [vmem:[#allocation79_spill] sm:$0xff] %v4303_v61  ;;  %7050 = vst [vmem:[#allocation82_spill] sm:$0xff] %v4312_v15  ;;  %v4318_v21 = vpop.f32.mrb[57].mxu1 }
 0x17b   : > { %7045 = vst [vmem:[#allocation77_spill] sm:$0xff] %v4298_v44  ;;  %v1775_v9 = vadd.f32 %v1774_v43, %v4298_v44  ;;  %v3366_v63 = vpop.f32.mrb[72].mxu0  ;;  %7052 = vst [vmem:[#allocation84_spill] sm:$0xff] %v4318_v21 }
 0x17c   : > { %v1257_v49 = vpop.f32.mrb[73].mxu0  ;;  %v4315_v55 = vadd.f32 %v3366_v63, %v3907_v40 }
 0x17d   : > { %v1776_v47 = vadd.f32 %v1775_v9, %v4303_v61  ;;  %v4310_v36 = vadd.f32 %v3907_v40, %v1257_v49  ;;  %v4324_v9 = vpop.f32.mrb[58].mxu1 }
 0x17e   : > { %7051 = vst [vmem:[#allocation83_spill] sm:$0xff] %v4315_v55  ;;  %7054 = vst [vmem:[#allocation86_spill] sm:$0xff] %v4324_v9  ;;  %v4330_v15 = vpop.f32.mrb[59].mxu1 }
 0x17f   : > { %7049 = vst [vmem:[#allocation81_spill] sm:$0xff] %v4310_v36  ;;  %v1777_v3 = vadd.f32 %v1776_v47, %v4310_v36  ;;  %v3369_v23 = vpop.f32.mrb[74].mxu0  ;;  %7056 = vst [vmem:[#allocation88_spill] sm:$0xff] %v4330_v15 }
 0x180   : > { %v1267_v43 = vpop.f32.mrb[75].mxu0  ;;  %v4327_v49 = vadd.f32 %v3369_v23, %v3907_v40 }
 0x181   : > { %v1778_v44 = vadd.f32 %v1777_v3, %v4315_v55  ;;  %v4322_v28 = vadd.f32 %v3907_v40, %v1267_v43  ;;  %v4336_v3 = vpop.f32.mrb[60].mxu1 }
 0x182   : > { %7055 = vst [vmem:[#allocation87_spill] sm:$0xff] %v4327_v49  ;;  %7058 = vst [vmem:[#allocation90_spill] sm:$0xff] %v4336_v3  ;;  %v4342_v9 = vpop.f32.mrb[61].mxu1 }
 0x183   : > { %7053 = vst [vmem:[#allocation85_spill] sm:$0xff] %v4322_v28  ;;  %v1779_v61 = vadd.f32 %v1778_v44, %v4322_v28  ;;  %v3372_v63 = vpop.f32.mrb[76].mxu0  ;;  %7060 = vst [vmem:[#allocation92_spill] sm:$0xff] %v4342_v9 }
 0x184   : > { %v1277_v47 = vpop.f32.mrb[77].mxu0  ;;  %v4339_v43 = vadd.f32 %v3372_v63, %v3907_v40 }
 0x185   : > { %v1780_v36 = vadd.f32 %v1779_v61, %v4327_v49  ;;  %v4334_v21 = vadd.f32 %v3907_v40, %v1277_v47  ;;  %v4348_v61 = vpop.f32.mrb[62].mxu1 }
 0x186   : > { %7059 = vst [vmem:[#allocation91_spill] sm:$0xff] %v4339_v43  ;;  %7062 = vst [vmem:[#allocation94_spill] sm:$0xff] %v4348_v61  ;;  %v4354_v3 = vpop.f32.mrb[63].mxu1 }
 0x187   : > { %7057 = vst [vmem:[#allocation89_spill] sm:$0xff] %v4334_v21  ;;  %v1781_v55 = vadd.f32 %v1780_v36, %v4334_v21  ;;  %v3375_v23 = vpop.f32.mrb[78].mxu0 }
 0x188   : > { %v1287_v44 = vpop.f32.mrb[79].mxu0  ;;  %v4351_v47 = vadd.f32 %v3375_v23, %v3907_v40  ;;  %v4368_v23 = vadd.f32 %v3907_v40, %v3982_v31 }
 0x189   : > { %v1782_v28 = vadd.f32 %v1781_v55, %v4339_v43  ;;  %v4346_v15 = vadd.f32 %v3907_v40, %v1287_v44  ;;  %v4360_v55 = vpop.f32.mrb[64].mxu1 }
 0x18a   : > { %7065 = vst [vmem:[#allocation97_spill] sm:$0xff] %v4368_v23 }
 0x18b   : > { %7061 = vst [vmem:[#allocation93_spill] sm:$0xff] %v4346_v15  ;;  %v1783_v49 = vadd.f32 %v1782_v28, %v4346_v15  ;;  %v3378_v63 = vpop.f32.mrb[80].mxu0  ;;  %v4370_v28 = vpop.f32.mrb[65].mxu1 }
 0x18c   : > { %v1297_v36 = vpop.f32.mrb[81].mxu0  ;;  %v4363_v44 = vadd.f32 %v3378_v63, %v3907_v40  ;;  %v4373_v61 = vpop.f32.mrb[66].mxu1  ;;  %v4382_v63 = vadd.f32 %v3907_v40, %v3994_v39 }
 0x18d   : > { %v1784_v21 = vadd.f32 %v1783_v49, %v4351_v47  ;;  %v4358_v9 = vadd.f32 %v3907_v40, %v1297_v36  ;;  %v4377_v49 = vadd.f32 %v3976_v27, %v3907_v40  ;;  %v4396_v27 = vadd.f32 %v3907_v40, %v4006_v52 }
 0x18e   : > { %7064 = vst [vmem:[#allocation96_spill] sm:$0xff] %v4363_v44  ;;  %7067 = vst [vmem:[#allocation99_spill] sm:$0xff] %v4382_v63 }
 0x18f   : > { %7063 = vst [vmem:[#allocation95_spill] sm:$0xff] %v4358_v9  ;;  %v1785_v43 = vadd.f32 %v1784_v21, %v4358_v9  ;;  %7066 = vst [vmem:[#allocation98_spill] sm:$0xff] %v4377_v49  ;;  %v4384_v21 = vpop.f32.mrb[67].mxu1 }
 0x190   : > { %v4387_v9 = vpop.f32.mrb[68].mxu1  ;;  %7069 = vst [vmem:[#allocation101_spill] sm:$0xff] %v4396_v27 }
 0x191   : > { %v1786_v15 = vadd.f32 %v1785_v43, %v4363_v44  ;;  %v4391_v43 = vadd.f32 %v3988_v35, %v3907_v40  ;;  %v4410_v35 = vadd.f32 %v3907_v40, %v4018_v0 }
 0x193   : > { %v1787_v36 = vadd.f32 %v1786_v15, %v4368_v23  ;;  %7068 = vst [vmem:[#allocation100_spill] sm:$0xff] %v4391_v43  ;;  %v4398_v15 = vpop.f32.mrb[69].mxu1  ;;  %7071 = vst [vmem:[#allocation103_spill] sm:$0xff] %v4410_v35 }
 0x194   : > { %v4401_v23 = vpop.f32.mrb[70].mxu1 }
 0x195   : > { %v1788_v31 = vadd.f32 %v1787_v36, %v4377_v49  ;;  %v4405_v36 = vadd.f32 %v4000_v46, %v3907_v40  ;;  %v4424_v46 = vadd.f32 %v3907_v40, %v4030_v12 }
 0x197   : > { %v1789_v44 = vadd.f32 %v1788_v31, %v4382_v63  ;;  %7070 = vst [vmem:[#allocation102_spill] sm:$0xff] %v4405_v36  ;;  %v4412_v31 = vpop.f32.mrb[71].mxu1  ;;  %7073 = vst [vmem:[#allocation105_spill] sm:$0xff] %v4424_v46 }
 0x198   : > { %v4415_v63 = vpop.f32.mrb[72].mxu1 }
 0x199   : > { %v1790_v39 = vadd.f32 %v1789_v44, %v4391_v43  ;;  %v4419_v44 = vadd.f32 %v4012_v58, %v3907_v40  ;;  %v4438_v58 = vadd.f32 %v3907_v40, %v4042_v24 }
 0x19b   : > { %v1791_v49 = vadd.f32 %v1790_v39, %v4396_v27  ;;  %7072 = vst [vmem:[#allocation104_spill] sm:$0xff] %v4419_v44  ;;  %v4426_v39 = vpop.f32.mrb[73].mxu1  ;;  %7075 = vst [vmem:[#allocation107_spill] sm:$0xff] %v4438_v58 }
 0x19c   : > { %v4429_v27 = vpop.f32.mrb[74].mxu1 }
 0x19d   : > { %v1792_v52 = vadd.f32 %v1791_v49, %v4405_v36  ;;  %v4433_v49 = vadd.f32 %v4024_v6, %v3907_v40  ;;  %v4452_v6 = vadd.f32 %v3907_v40, %v4054_v41 }
 0x19f   : > { %v1793_v43 = vadd.f32 %v1792_v52, %v4410_v35  ;;  %7074 = vst [vmem:[#allocation106_spill] sm:$0xff] %v4433_v49  ;;  %v4440_v52 = vpop.f32.mrb[75].mxu1  ;;  %7076 = vst [vmem:[#allocation108_spill] sm:$0xff] %v4452_v6 }
 0x1a0   : > { %v4443_v35 = vpop.f32.mrb[76].mxu1 }
 0x1a1   : > { %v1794_v0 = vadd.f32 %v1793_v43, %v4419_v44  ;;  %v4447_v43 = vadd.f32 %v4036_v18, %v3907_v40  ;;  %v4466_v18 = vadd.f32 %v3907_v40, %v4066_v1  ;;  %v4483_v1 = vadd.f32 %v4072_v13, %v3907_v40 }
 0x1a3   : > { %v1795_v36 = vadd.f32 %v1794_v0, %v4424_v46  ;;  %v4454_v0 = vpop.f32.mrb[77].mxu1 }
 0x1a4   : > { %v4457_v46 = vpop.f32.mrb[78].mxu1 }
 0x1a5   : > { %v1796_v12 = vadd.f32 %v1795_v36, %v4433_v49  ;;  %v4461_v36 = vadd.f32 %v4048_v32, %v3907_v40  ;;  %v4478_v32 = vadd.f32 %v3907_v40, %v4078_v25 }
 0x1a7   : > { %v1797_v44 = vadd.f32 %v1796_v12, %v4438_v58  ;;  %v4468_v12 = vpop.f32.mrb[79].mxu1  ;;  %v4473_v58 = vadd.f32 %v4060_v53, %v3907_v40 }
 0x1a9   : > { %v1798_v24 = vadd.f32 %v1797_v44, %v4447_v43 }
 0x1ab   : > { %v1799_v49 = vadd.f32 %v1798_v24, %v4452_v6 }
 0x1ad   : > { %v1800_v41 = vadd.f32 %v1799_v49, %v4461_v36  ;;  %v4488_v49 = vadd.f32 %v3907_v40, %v4090_v4 }
 0x1af   : > { %v1801_v44 = vadd.f32 %v1800_v41, %v4466_v18  ;;  %v4493_v41 = vadd.f32 %v4084_v42, %v3907_v40 }
 0x1b1   : > { %v1802_v24 = vadd.f32 %v1801_v44, %v4473_v58  ;;  %v4498_v44 = vadd.f32 %v3907_v40, %v4102_v51 }
 0x1b3   : > { %v1803_v6 = vadd.f32 %v1802_v24, %v4478_v32  ;;  %v4503_v24 = vadd.f32 %v4096_v22, %v3907_v40 }
 0x1b5   : > { %v1804_v53 = vadd.f32 %v1803_v6, %v4483_v1  ;;  %v4508_v6 = vadd.f32 %v3907_v40, %v4114_v30 }
 0x1b7   : > { %v1805_v25 = vadd.f32 %v1804_v53, %v4488_v49  ;;  %v4513_v53 = vadd.f32 %v4108_v62, %v3907_v40 }
 0x1b9   : > { %v1806_v13 = vadd.f32 %v1805_v25, %v4493_v41  ;;  %v4518_v25 = vadd.f32 %v3907_v40, %v4126_v17 }
 0x1bb   : > { %v1807_v4 = vadd.f32 %v1806_v13, %v4498_v44  ;;  %v4523_v13 = vadd.f32 %v4120_v16, %v3907_v40 }
 0x1bd   : > { %v1808_v42 = vadd.f32 %v1807_v4, %v4503_v24  ;;  %v4528_v4 = vadd.f32 %v3907_v40, %v4138_v5 }
 0x1bf   : > { %v1809_v51 = vadd.f32 %v1808_v42, %v4508_v6  ;;  %v4533_v42 = vadd.f32 %v4132_v50, %v3907_v40 }
 0x1c1   : > { %v1810_v22 = vadd.f32 %v1809_v51, %v4513_v53  ;;  %v4538_v51 = vadd.f32 %v3907_v40, %v4150_v57 }
 0x1c3   : > { %v1811_v30 = vadd.f32 %v1810_v22, %v4518_v25  ;;  %v4543_v22 = vadd.f32 %v4144_v29, %v3907_v40 }
 0x1c5   : > { %v1812_v62 = vadd.f32 %v1811_v30, %v4523_v13  ;;  %v4548_v30 = vadd.f32 %v3907_v40, %v4162_v45 }
 0x1c7   : > { %v1813_v17 = vadd.f32 %v1812_v62, %v4528_v4  ;;  %v4553_v62 = vadd.f32 %v4156_v10, %v3907_v40 }
 0x1c9   : > { %v1814_v16 = vadd.f32 %v1813_v17, %v4533_v42  ;;  %v4558_v17 = vadd.f32 %v3907_v40, %v4174_v34 }
 0x1cb   : > { %v1815_v5 = vadd.f32 %v1814_v16, %v4538_v51  ;;  %v4563_v16 = vadd.f32 %v4168_v37, %v3907_v40 }
 0x1cd   : > { %v1816_v50 = vadd.f32 %v1815_v5, %v4543_v22  ;;  %v4568_v5 = vadd.f32 %v3907_v40, %v4186_v26 }
 0x1cf   : > { %v1817_v57 = vadd.f32 %v1816_v50, %v4548_v30  ;;  %v4573_v50 = vadd.f32 %v4180_v11, %v3907_v40 }
 0x1d1   : > { %v1818_v29 = vadd.f32 %v1817_v57, %v4553_v62  ;;  %v4578_v57 = vadd.f32 %v3907_v40, %v4198_v20 }
 0x1d3   : > { %v1819_v45 = vadd.f32 %v1818_v29, %v4558_v17  ;;  %v4583_v29 = vadd.f32 %v4192_v38, %v3907_v40 }
 0x1d5   : > { %v1820_v10 = vadd.f32 %v1819_v45, %v4563_v16  ;;  %v4588_v45 = vadd.f32 %v3907_v40, %v4210_v14 }
 0x1d7   : > { %v1821_v34 = vadd.f32 %v1820_v10, %v4568_v5  ;;  %v4593_v10 = vadd.f32 %v4204_v56, %v3907_v40 }
 0x1d9   : > { %v1822_v37 = vadd.f32 %v1821_v34, %v4573_v50  ;;  %v4598_v34 = vadd.f32 %v3907_v40, %v4222_v8 }
 0x1db   : > { %v1823_v26 = vadd.f32 %v1822_v37, %v4578_v57  ;;  %v4603_v37 = vadd.f32 %v4216_v33, %v3907_v40 }
 0x1dd   : > { %v1824_v11 = vadd.f32 %v1823_v26, %v4583_v29  ;;  %v4608_v26 = vadd.f32 %v3907_v40, %v4234_v2 }
 0x1df   : > { %v1825_v20 = vadd.f32 %v1824_v11, %v4588_v45  ;;  %v4613_v11 = vadd.f32 %v4228_v19, %v3907_v40 }
 0x1e1   : > { %v1826_v38 = vadd.f32 %v1825_v20, %v4593_v10  ;;  %7077 = vst [vmem:[#allocation109_spill] sm:$0xff] %v4613_v11  ;;  %v4618_v20 = vadd.f32 %v3907_v40, %v4246_v60 }
 0x1e3   : > { %v1827_v14 = vadd.f32 %v1826_v38, %v4598_v34  ;;  %7078 = vst [vmem:[#allocation110_spill] sm:$0xff] %v4618_v20  ;;  %v4623_v38 = vadd.f32 %v4240_v7, %v3907_v40 }
 0x1e5   : > { %v1828_v56 = vadd.f32 %v1827_v14, %v4603_v37  ;;  %7079 = vst [vmem:[#allocation111_spill] sm:$0xff] %v4623_v38  ;;  %v4628_v14 = vadd.f32 %v3907_v40, %v4258_v54 }
 0x1e7   : > { %v1829_v8 = vadd.f32 %v1828_v56, %v4608_v26  ;;  %7080 = vst [vmem:[#allocation112_spill] sm:$0xff] %v4628_v14  ;;  %v4633_v56 = vadd.f32 %v4252_v59, %v3907_v40 }
 0x1e9   : > { %v1830_v33 = vadd.f32 %v1829_v8, %v4613_v11  ;;  %7081 = vst [vmem:[#allocation113_spill] sm:$0xff] %v4633_v56  ;;  %v4638_v8 = vadd.f32 %v3907_v40, %v4270_v48  ;;  %v7085_v11 = vld [vmem:[#allocation72_spill] sm:$0xff] }
 0x1eb   : > { %v1831_v2 = vadd.f32 %v1830_v33, %v4618_v20  ;;  %7082 = vst [vmem:[#allocation114_spill] sm:$0xff] %v4638_v8  ;;  %v7083_v33 = vld [vmem:[#allocation67_spill] sm:$0xff] }
 0x1ec   : > { %v4643_v20 = vadd.f32 %v7083_v33, %v3907_v40 }
 0x1ed   : > { %v1832_v19 = vadd.f32 %v1831_v2, %v4623_v38  ;;  %v4648_v2 = vadd.f32 %v3907_v40, %v7085_v11  ;;  %v7089_v38 = vld [vmem:[#allocation76_spill] sm:$0xff] }
 0x1ee   : > { %7084 = vst [vmem:[#allocation67_spill] sm:$0xff] %v4643_v20 }
 0x1ef   : > { %v1833_v60 = vadd.f32 %v1832_v19, %v4628_v14  ;;  %7086 = vst [vmem:[#allocation72_spill] sm:$0xff] %v4648_v2  ;;  %v7087_v19 = vld [vmem:[#allocation70_spill] sm:$0xff] }
 0x1f0   : > { %v4653_v14 = vadd.f32 %v7087_v19, %v3907_v40 }
 0x1f1   : > { %v1834_v7 = vadd.f32 %v1833_v60, %v4633_v56  ;;  %v4658_v60 = vadd.f32 %v3907_v40, %v7089_v38  ;;  %v7093_v56 = vld [vmem:[#allocation80_spill] sm:$0xff] }
 0x1f2   : > { %7088 = vst [vmem:[#allocation70_spill] sm:$0xff] %v4653_v14 }
 0x1f3   : > { %v1835_v54 = vadd.f32 %v1834_v7, %v4638_v8  ;;  %7090 = vst [vmem:[#allocation76_spill] sm:$0xff] %v4658_v60  ;;  %v7091_v7 = vld [vmem:[#allocation74_spill] sm:$0xff] }
 0x1f4   : > { %v4663_v8 = vadd.f32 %v7091_v7, %v3907_v40 }
 0x1f5   : > { %v1836_v59 = vadd.f32 %v1835_v54, %v4643_v20  ;;  %v4668_v54 = vadd.f32 %v3907_v40, %v7093_v56  ;;  %v7096_v20 = vld [vmem:[#allocation84_spill] sm:$0xff] }
 0x1f6   : > { %7092 = vst [vmem:[#allocation74_spill] sm:$0xff] %v4663_v8 }
 0x1f7   : > { %v1837_v48 = vadd.f32 %v1836_v59, %v4648_v2  ;;  %7094 = vst [vmem:[#allocation80_spill] sm:$0xff] %v4668_v54  ;;  %v7095_v59 = vld [vmem:[#allocation78_spill] sm:$0xff] }
 0x1f8   : > { %v4673_v2 = vadd.f32 %v7095_v59, %v3907_v40 }
 0x1f9   : > { %v1838_v33 = vadd.f32 %v1837_v48, %v4653_v14  ;;  %v4678_v48 = vadd.f32 %v3907_v40, %v7096_v20  ;;  %v7099_v14 = vld [vmem:[#allocation88_spill] sm:$0xff] }
 0x1fb   : > { %v1839_v11 = vadd.f32 %v1838_v33, %v4658_v60  ;;  %7097 = vst [vmem:[#allocation78_spill] sm:$0xff] %v4678_v48  ;;  %v7098_v33 = vld [vmem:[#allocation82_spill] sm:$0xff] }
 0x1fc   : > { %v4683_v60 = vadd.f32 %v7098_v33, %v3907_v40 }
 0x1fd   : > { %v1840_v19 = vadd.f32 %v1839_v11, %v4663_v8  ;;  %v4688_v11 = vadd.f32 %v3907_v40, %v7099_v14  ;;  %v7102_v8 = vld [vmem:[#allocation92_spill] sm:$0xff] }
 0x1ff   : > { %v1841_v38 = vadd.f32 %v1840_v19, %v4668_v54  ;;  %7100 = vst [vmem:[#allocation84_spill] sm:$0xff] %v4688_v11  ;;  %v7101_v19 = vld [vmem:[#allocation86_spill] sm:$0xff] }
 0x200   : > { %v4693_v54 = vadd.f32 %v7101_v19, %v3907_v40 }
 0x201   : > { %v1842_v7 = vadd.f32 %v1841_v38, %v4673_v2  ;;  %v4698_v38 = vadd.f32 %v3907_v40, %v7102_v8 }
 0x203   : > { %v1843_v56 = vadd.f32 %v1842_v7, %v4678_v48  ;;  %v7103_v7 = vld [vmem:[#allocation90_spill] sm:$0xff] }
 0x204   : > { %v4703_v48 = vadd.f32 %v7103_v7, %v3907_v40 }
 0x205   : > { %v1844_v59 = vadd.f32 %v1843_v56, %v4683_v60  ;;  %v4708_v56 = vadd.f32 %v3907_v40, %v4354_v3 }
 0x207   : > { %v1845_v20 = vadd.f32 %v1844_v59, %v4688_v11  ;;  %v7104_v59 = vld [vmem:[#allocation94_spill] sm:$0xff] }
 0x208   : > { %v4713_v11 = vadd.f32 %v7104_v59, %v3907_v40 }
 0x209   : > { %v1846_v33 = vadd.f32 %v1845_v20, %v4693_v54  ;;  %v4718_v20 = vadd.f32 %v3907_v40, %v4370_v28 }
 0x20b   : > { %v1847_v14 = vadd.f32 %v1846_v33, %v4698_v38  ;;  %v4723_v33 = vadd.f32 %v4360_v55, %v3907_v40 }
 0x20d   : > { %v1848_v19 = vadd.f32 %v1847_v14, %v4703_v48  ;;  %v4728_v14 = vadd.f32 %v3907_v40, %v4384_v21 }
 0x20f   : > { %v1849_v8 = vadd.f32 %v1848_v19, %v4708_v56  ;;  %v4733_v19 = vadd.f32 %v4373_v61, %v3907_v40 }
 0x211   : > { %v1850_v7 = vadd.f32 %v1849_v8, %v4713_v11  ;;  %v4738_v8 = vadd.f32 %v3907_v40, %v4398_v15 }
 0x213   : > { %v1851_v3 = vadd.f32 %v1850_v7, %v4718_v20  ;;  %7105 = vst [vmem:[#allocation82_spill] sm:$0xff] %v4738_v8  ;;  %v4743_v7 = vadd.f32 %v4387_v9, %v3907_v40 }
 0x215   : > { %v1852_v59 = vadd.f32 %v1851_v3, %v4723_v33  ;;  %7106 = vst [vmem:[#allocation88_spill] sm:$0xff] %v4743_v7  ;;  %v4748_v3 = vadd.f32 %v3907_v40, %v4412_v31 }
 0x217   : > { %v1853_v28 = vadd.f32 %v1852_v59, %v4728_v14  ;;  %7107 = vst [vmem:[#allocation86_spill] sm:$0xff] %v4748_v3  ;;  %v4753_v59 = vadd.f32 %v4401_v23, %v3907_v40 }
 0x219   : > { %v1854_v55 = vadd.f32 %v1853_v28, %v4733_v19  ;;  %7108 = vst [vmem:[#allocation92_spill] sm:$0xff] %v4753_v59  ;;  %v4758_v28 = vadd.f32 %v3907_v40, %v4426_v39 }
 0x21b   : > { %v1855_v21 = vadd.f32 %v1854_v55, %v4738_v8  ;;  %7109 = vst [vmem:[#allocation90_spill] sm:$0xff] %v4758_v28  ;;  %v4763_v55 = vadd.f32 %v4415_v63, %v3907_v40  ;;  %v1693_v63 = vadd.f32 %v4443_v35, %v3907_v40 }
 0x21d   : > { %v1856_v61 = vadd.f32 %v1855_v21, %v4743_v7  ;;  %7110 = vst [vmem:[#allocation94_spill] sm:$0xff] %v4763_v55  ;;  %v4768_v21 = vadd.f32 %v3907_v40, %v4440_v52 }
 0x21f   : > { %v1857_v15 = vadd.f32 %v1856_v61, %v4748_v3  ;;  %7111 = vst [vmem:[#allocation115_spill] sm:$0xff] %v4768_v21  ;;  %v1683_v61 = vadd.f32 %v4429_v27, %v3907_v40 }
 0x221   : > { %v1858_v9 = vadd.f32 %v1857_v15, %v4753_v59  ;;  %v1688_v15 = vadd.f32 %v3907_v40, %v4454_v0 }
 0x223   : > { %v1859_v31 = vadd.f32 %v1858_v9, %v4758_v28  ;;  %v1698_v9 = vadd.f32 %v3907_v40, %v4468_v12 }
 0x225   : > { %v1860_v23 = vadd.f32 %v1859_v31, %v4763_v55  ;;  %v1703_v31 = vadd.f32 %v4457_v46, %v3907_v40 }
 0x227   : > { %v1861_v39 = vadd.f32 %v1860_v23, %v4768_v21 }
 0x229   : > { %v1862_v59 = vadd.f32 %v1861_v39, %v1683_v61 }
 0x22b   : > { %v1863_v3 = vadd.f32 %v1862_v59, %v1688_v15 }
 0x22d   : > { %v1864_v52 = vadd.f32 %v1863_v3, %v1693_v63  ;;  %v7118_v3 = vld [vmem:[#allocation2_spill] sm:$0xff] }
 0x22f   : > { %v1865_v55 = vadd.f32 %v1864_v52, %v1698_v9  ;;  %v7124_v52 = vld [vmem:[#allocation6_spill] sm:$0xff] }
 0x231   : > { %v1866_v28 = vadd.f32 %v1865_v55, %v1703_v31  ;;  %v7120_v55 = vld [vmem:[#allocation4_spill] sm:$0xff] }
 0x233   : > { %v1867_v27 = vrot.slane %v1866_v28, 4 }
 0x235   : > { %v1868_v7 = vadd.f32 %v1867_v27, %v1866_v28 }
 0x237   : > { %v1869_v23 = vrot.slane %v1868_v7, 2 }
 0x239   : > { %v1870_v21 = vadd.f32 %v1869_v23, %v1868_v7  ;;  %v7116_v7 = vld [vmem:[#allocation3_spill] sm:$0xff] }
 0x23b   : > { %v1871_v8 = vrot.slane %v1870_v21, 1 }
 0x23d   : > { %v1872_v0 = vadd.f32 %v1871_v8, %v1870_v21 }
 0x23f   : > { %v4782_v39 = vmul.f32 0.00077160494, %v1872_v0  ;;  %v7126_v0 = vld [vmem:[#allocation7_spill] sm:$0xff] }
 0x241   : > { %v4785_v35 = vsub.f32 %v1683_v61, %v4782_v39  ;;  %v4788_v59 = vsub.f32 %v1688_v15, %v4782_v39  ;;  %v4791_v12 = vsub.f32 %v1693_v63, %v4782_v39  ;;  %v4794_v40 = vsub.f32 %v1698_v9, %v4782_v39  ;;  %v7122_v63 = vld [vmem:[#allocation5_spill] sm:$0xff] }
 0x242   : > { %v4797_v46 = vsub.f32 %v1703_v31, %v4782_v39  ;;  %v4801_v8 = vsub.f32 %v7116_v7, %v4782_v39  ;;  %v4805_v28 = vsub.f32 %v7118_v3, %v4782_v39  ;;  %v4809_v21 = vsub.f32 %v7120_v55, %v4782_v39 }
 0x243   : > { %7112 = vst [vmem:[#allocation116_spill] sm:$0xff] %v4785_v35  ;;  %7113 = vst [vmem:[#allocation117_spill] sm:$0xff] %v4788_v59  ;;  %v4817_v9 = vsub.f32 %v7122_v63, %v4782_v39  ;;  %v4821_v31 = vsub.f32 %v7124_v52, %v4782_v39  ;;  %v4827_v7 = vsub.f32 %v7126_v0, %v4782_v39  ;;  %v7132_v0 = vld [vmem:[#allocation10_spill] sm:$0xff] }
 0x244   : > { %7114 = vst [vmem:[#allocation118_spill] sm:$0xff] %v4791_v12  ;;  %7115 = vst [vmem:[#allocation119_spill] sm:$0xff] %v4797_v46  ;;  %v2037_v61 = vmul.f32 %v4801_v8, %v4801_v8  ;;  %v2038_v15 = vmul.f32 %v4805_v28, %v4805_v28  ;;  %v2039_v27 = vmul.f32 %v4809_v21, %v4809_v21  ;;  %v7130_v46 = vld [vmem:[#allocation9_spill] sm:$0xff] }
 0x245   : > { %7117 = vst [vmem:[#allocation3_spill] sm:$0xff] %v4801_v8  ;;  %7119 = vst [vmem:[#allocation2_spill] sm:$0xff] %v4805_v28  ;;  %v2040_v3 = vmul.f32 %v4817_v9, %v4817_v9  ;;  %v7128_v28 = vld [vmem:[#allocation8_spill] sm:$0xff]  ;;  %v2041_v52 = vmul.f32 %v4821_v31, %v4821_v31 }
 0x246   : > { %7121 = vst [vmem:[#allocation4_spill] sm:$0xff] %v4809_v21  ;;  %7123 = vst [vmem:[#allocation5_spill] sm:$0xff] %v4817_v9  ;;  %v2199_v23 = vadd.f32 %v2038_v15, %v2037_v61  ;;  %v4833_v63 = vsub.f32 %v7128_v28, %v4782_v39  ;;  %v4839_v21 = vsub.f32 %v7130_v46, %v4782_v39 }
 0x247   : > { %7125 = vst [vmem:[#allocation6_spill] sm:$0xff] %v4821_v31  ;;  %7127 = vst [vmem:[#allocation7_spill] sm:$0xff] %v4827_v7  ;;  %v2042_v61 = vmul.f32 %v4827_v7, %v4827_v7  ;;  %v4845_v9 = vsub.f32 %v7132_v0, %v4782_v39  ;;  %v7138_v0 = vld [vmem:[#allocation13_spill] sm:$0xff] }
 0x248   : > { %v2200_v55 = vadd.f32 %v2199_v23, %v2039_v27  ;;  %7129 = vst [vmem:[#allocation8_spill] sm:$0xff] %v4833_v63  ;;  %7131 = vst [vmem:[#allocation9_spill] sm:$0xff] %v4839_v21  ;;  %v2043_v28 = vmul.f32 %v4833_v63, %v4833_v63  ;;  %v7134_v23 = vld [vmem:[#allocation11_spill] sm:$0xff]  ;;  %v2044_v46 = vmul.f32 %v4839_v21, %v4839_v21 }
 0x249   : > { %7133 = vst [vmem:[#allocation10_spill] sm:$0xff] %v4845_v9  ;;  %v4851_v31 = vsub.f32 %v7134_v23, %v4782_v39  ;;  %v4863_v63 = vsub.f32 %v7138_v0, %v4782_v39  ;;  %v7140_v23 = vld [vmem:[#allocation14_spill] sm:$0xff]  ;;  %v7144_v0 = vld [vmem:[#allocation16_spill] sm:$0xff] }
 0x24a   : > { %v2201_v8 = vadd.f32 %v2200_v55, %v2040_v3  ;;  %v7136_v55 = vld [vmem:[#allocation12_spill] sm:$0xff]  ;;  %v4869_v21 = vsub.f32 %v7140_v23, %v4782_v39  ;;  %v7146_v23 = vld [vmem:[#allocation17_spill] sm:$0xff] }
 0x24b   : > { %7135 = vst [vmem:[#allocation11_spill] sm:$0xff] %v4851_v31  ;;  %v4857_v7 = vsub.f32 %v7136_v55, %v4782_v39  ;;  %7139 = vst [vmem:[#allocation13_spill] sm:$0xff] %v4863_v63  ;;  %v7142_v55 = vld [vmem:[#allocation15_spill] sm:$0xff] }
 0x24c   : > { %v2202_v15 = vadd.f32 %v2201_v8, %v2041_v52  ;;  %v2045_v8 = vmul.f32 %v4845_v9, %v4845_v9  ;;  %7141 = vst [vmem:[#allocation14_spill] sm:$0xff] %v4869_v21  ;;  %v4875_v9 = vsub.f32 %v7142_v55, %v4782_v39  ;;  %v7148_v55 = vld [vmem:[#allocation18_spill] sm:$0xff] }
 0x24d   : > { %7137 = vst [vmem:[#allocation12_spill] sm:$0xff] %v4857_v7 }
 0x24e   : > { %v2203_v27 = vadd.f32 %v2202_v15, %v2042_v61  ;;  %v2046_v61 = vmul.f32 %v4851_v31, %v4851_v31  ;;  %7143 = vst [vmem:[#allocation15_spill] sm:$0xff] %v4875_v9  ;;  %v4881_v31 = vsub.f32 %v7144_v0, %v4782_v39  ;;  %v7150_v0 = vld [vmem:[#allocation19_spill] sm:$0xff] }
 0x250   : > { %v2204_v3 = vadd.f32 %v2203_v27, %v2043_v28  ;;  %v2047_v28 = vmul.f32 %v4857_v7, %v4857_v7  ;;  %7145 = vst [vmem:[#allocation16_spill] sm:$0xff] %v4881_v31  ;;  %v4887_v7 = vsub.f32 %v7146_v23, %v4782_v39  ;;  %v7152_v23 = vld [vmem:[#allocation20_spill] sm:$0xff] }
 0x252   : > { %v2205_v52 = vadd.f32 %v2204_v3, %v2044_v46  ;;  %v2048_v46 = vmul.f32 %v4863_v63, %v4863_v63  ;;  %7147 = vst [vmem:[#allocation17_spill] sm:$0xff] %v4887_v7  ;;  %v4893_v63 = vsub.f32 %v7148_v55, %v4782_v39  ;;  %v7154_v55 = vld [vmem:[#allocation21_spill] sm:$0xff] }
 0x254   : > { %v2206_v15 = vadd.f32 %v2205_v52, %v2045_v8  ;;  %v2049_v8 = vmul.f32 %v4869_v21, %v4869_v21  ;;  %7149 = vst [vmem:[#allocation18_spill] sm:$0xff] %v4893_v63  ;;  %v4899_v21 = vsub.f32 %v7150_v0, %v4782_v39  ;;  %v7156_v0 = vld [vmem:[#allocation22_spill] sm:$0xff] }
 0x256   : > { %v2207_v27 = vadd.f32 %v2206_v15, %v2046_v61  ;;  %v2050_v61 = vmul.f32 %v4875_v9, %v4875_v9  ;;  %7151 = vst [vmem:[#allocation19_spill] sm:$0xff] %v4899_v21  ;;  %v4905_v9 = vsub.f32 %v7152_v23, %v4782_v39  ;;  %v7158_v23 = vld [vmem:[#allocation23_spill] sm:$0xff] }
 0x258   : > { %v2208_v3 = vadd.f32 %v2207_v27, %v2047_v28  ;;  %v2051_v28 = vmul.f32 %v4881_v31, %v4881_v31  ;;  %7153 = vst [vmem:[#allocation20_spill] sm:$0xff] %v4905_v9  ;;  %v4911_v31 = vsub.f32 %v7154_v55, %v4782_v39  ;;  %v7160_v55 = vld [vmem:[#allocation24_spill] sm:$0xff] }
 0x25a   : > { %v2209_v52 = vadd.f32 %v2208_v3, %v2048_v46  ;;  %v2052_v46 = vmul.f32 %v4887_v7, %v4887_v7  ;;  %7155 = vst [vmem:[#allocation21_spill] sm:$0xff] %v4911_v31  ;;  %v4917_v7 = vsub.f32 %v7156_v0, %v4782_v39  ;;  %v7162_v0 = vld [vmem:[#allocation25_spill] sm:$0xff] }
 0x25c   : > { %v2210_v15 = vadd.f32 %v2209_v52, %v2049_v8  ;;  %v2053_v8 = vmul.f32 %v4893_v63, %v4893_v63  ;;  %7157 = vst [vmem:[#allocation22_spill] sm:$0xff] %v4917_v7  ;;  %v4923_v63 = vsub.f32 %v7158_v23, %v4782_v39  ;;  %v7164_v23 = vld [vmem:[#allocation26_spill] sm:$0xff] }
 0x25e   : > { %v2211_v27 = vadd.f32 %v2210_v15, %v2050_v61  ;;  %v2054_v61 = vmul.f32 %v4899_v21, %v4899_v21  ;;  %7159 = vst [vmem:[#allocation23_spill] sm:$0xff] %v4923_v63  ;;  %v4929_v21 = vsub.f32 %v7160_v55, %v4782_v39  ;;  %v7166_v55 = vld [vmem:[#allocation27_spill] sm:$0xff] }
 0x260   : > { %v2212_v3 = vadd.f32 %v2211_v27, %v2051_v28  ;;  %v2055_v28 = vmul.f32 %v4905_v9, %v4905_v9  ;;  %7161 = vst [vmem:[#allocation24_spill] sm:$0xff] %v4929_v21  ;;  %v4935_v9 = vsub.f32 %v7162_v0, %v4782_v39  ;;  %v7168_v0 = vld [vmem:[#allocation28_spill] sm:$0xff] }
 0x262   : > { %v2213_v52 = vadd.f32 %v2212_v3, %v2052_v46  ;;  %v2056_v46 = vmul.f32 %v4911_v31, %v4911_v31  ;;  %7163 = vst [vmem:[#allocation25_spill] sm:$0xff] %v4935_v9  ;;  %v4941_v31 = vsub.f32 %v7164_v23, %v4782_v39  ;;  %v7170_v23 = vld [vmem:[#allocation29_spill] sm:$0xff] }
 0x264   : > { %v2214_v15 = vadd.f32 %v2213_v52, %v2053_v8  ;;  %v2057_v8 = vmul.f32 %v4917_v7, %v4917_v7  ;;  %7165 = vst [vmem:[#allocation26_spill] sm:$0xff] %v4941_v31  ;;  %v4947_v7 = vsub.f32 %v7166_v55, %v4782_v39  ;;  %v7172_v55 = vld [vmem:[#allocation30_spill] sm:$0xff] }
 0x266   : > { %v2215_v27 = vadd.f32 %v2214_v15, %v2054_v61  ;;  %v2058_v61 = vmul.f32 %v4923_v63, %v4923_v63  ;;  %7167 = vst [vmem:[#allocation27_spill] sm:$0xff] %v4947_v7  ;;  %v4953_v63 = vsub.f32 %v7168_v0, %v4782_v39  ;;  %v7174_v0 = vld [vmem:[#allocation31_spill] sm:$0xff] }
 0x268   : > { %v2216_v3 = vadd.f32 %v2215_v27, %v2055_v28  ;;  %v2059_v28 = vmul.f32 %v4929_v21, %v4929_v21  ;;  %7169 = vst [vmem:[#allocation28_spill] sm:$0xff] %v4953_v63  ;;  %v4959_v21 = vsub.f32 %v7170_v23, %v4782_v39  ;;  %v7176_v23 = vld [vmem:[#allocation32_spill] sm:$0xff] }
 0x26a   : > { %v2217_v52 = vadd.f32 %v2216_v3, %v2056_v46  ;;  %v2060_v46 = vmul.f32 %v4935_v9, %v4935_v9  ;;  %7171 = vst [vmem:[#allocation29_spill] sm:$0xff] %v4959_v21  ;;  %v4965_v9 = vsub.f32 %v7172_v55, %v4782_v39  ;;  %v7178_v55 = vld [vmem:[#allocation33_spill] sm:$0xff] }
 0x26c   : > { %v2218_v15 = vadd.f32 %v2217_v52, %v2057_v8  ;;  %v2061_v8 = vmul.f32 %v4941_v31, %v4941_v31  ;;  %7173 = vst [vmem:[#allocation30_spill] sm:$0xff] %v4965_v9  ;;  %v4971_v31 = vsub.f32 %v7174_v0, %v4782_v39  ;;  %v7180_v0 = vld [vmem:[#allocation34_spill] sm:$0xff] }
 0x26e   : > { %v2219_v27 = vadd.f32 %v2218_v15, %v2058_v61  ;;  %v2062_v61 = vmul.f32 %v4947_v7, %v4947_v7  ;;  %7175 = vst [vmem:[#allocation31_spill] sm:$0xff] %v4971_v31  ;;  %v4977_v7 = vsub.f32 %v7176_v23, %v4782_v39  ;;  %v7182_v23 = vld [vmem:[#allocation35_spill] sm:$0xff] }
 0x270   : > { %v2220_v3 = vadd.f32 %v2219_v27, %v2059_v28  ;;  %v2063_v28 = vmul.f32 %v4953_v63, %v4953_v63  ;;  %7177 = vst [vmem:[#allocation32_spill] sm:$0xff] %v4977_v7  ;;  %v4983_v63 = vsub.f32 %v7178_v55, %v4782_v39  ;;  %v7184_v55 = vld [vmem:[#allocation36_spill] sm:$0xff] }
 0x272   : > { %v2221_v52 = vadd.f32 %v2220_v3, %v2060_v46  ;;  %v2064_v46 = vmul.f32 %v4959_v21, %v4959_v21  ;;  %7179 = vst [vmem:[#allocation33_spill] sm:$0xff] %v4983_v63  ;;  %v4989_v21 = vsub.f32 %v7180_v0, %v4782_v39  ;;  %v7186_v0 = vld [vmem:[#allocation37_spill] sm:$0xff] }
 0x274   : > { %v2222_v15 = vadd.f32 %v2221_v52, %v2061_v8  ;;  %v2065_v8 = vmul.f32 %v4965_v9, %v4965_v9  ;;  %7181 = vst [vmem:[#allocation34_spill] sm:$0xff] %v4989_v21  ;;  %v4995_v9 = vsub.f32 %v7182_v23, %v4782_v39  ;;  %v7188_v23 = vld [vmem:[#allocation38_spill] sm:$0xff] }
 0x276   : > { %v2223_v27 = vadd.f32 %v2222_v15, %v2062_v61  ;;  %v2066_v61 = vmul.f32 %v4971_v31, %v4971_v31  ;;  %7183 = vst [vmem:[#allocation35_spill] sm:$0xff] %v4995_v9  ;;  %v5001_v31 = vsub.f32 %v7184_v55, %v4782_v39  ;;  %v7190_v55 = vld [vmem:[#allocation39_spill] sm:$0xff] }
 0x278   : > { %v2224_v3 = vadd.f32 %v2223_v27, %v2063_v28  ;;  %v2067_v28 = vmul.f32 %v4977_v7, %v4977_v7  ;;  %7185 = vst [vmem:[#allocation36_spill] sm:$0xff] %v5001_v31  ;;  %v5007_v7 = vsub.f32 %v7186_v0, %v4782_v39  ;;  %v7192_v0 = vld [vmem:[#allocation40_spill] sm:$0xff] }
 0x27a   : > { %v2225_v52 = vadd.f32 %v2224_v3, %v2064_v46  ;;  %v2068_v46 = vmul.f32 %v4983_v63, %v4983_v63  ;;  %7187 = vst [vmem:[#allocation37_spill] sm:$0xff] %v5007_v7  ;;  %v5013_v63 = vsub.f32 %v7188_v23, %v4782_v39  ;;  %v7194_v23 = vld [vmem:[#allocation41_spill] sm:$0xff] }
 0x27c   : > { %v2226_v15 = vadd.f32 %v2225_v52, %v2065_v8  ;;  %v2069_v8 = vmul.f32 %v4989_v21, %v4989_v21  ;;  %7189 = vst [vmem:[#allocation38_spill] sm:$0xff] %v5013_v63  ;;  %v5019_v21 = vsub.f32 %v7190_v55, %v4782_v39  ;;  %v7196_v55 = vld [vmem:[#allocation42_spill] sm:$0xff] }
 0x27e   : > { %v2227_v27 = vadd.f32 %v2226_v15, %v2066_v61  ;;  %v2070_v61 = vmul.f32 %v4995_v9, %v4995_v9  ;;  %7191 = vst [vmem:[#allocation39_spill] sm:$0xff] %v5019_v21  ;;  %v5025_v9 = vsub.f32 %v7192_v0, %v4782_v39  ;;  %v7198_v0 = vld [vmem:[#allocation43_spill] sm:$0xff] }
 0x280   : > { %v2228_v3 = vadd.f32 %v2227_v27, %v2067_v28  ;;  %v2071_v28 = vmul.f32 %v5001_v31, %v5001_v31  ;;  %7193 = vst [vmem:[#allocation40_spill] sm:$0xff] %v5025_v9  ;;  %v5031_v31 = vsub.f32 %v7194_v23, %v4782_v39  ;;  %v7200_v23 = vld [vmem:[#allocation44_spill] sm:$0xff] }
 0x282   : > { %v2229_v52 = vadd.f32 %v2228_v3, %v2068_v46  ;;  %v2072_v46 = vmul.f32 %v5007_v7, %v5007_v7  ;;  %7195 = vst [vmem:[#allocation41_spill] sm:$0xff] %v5031_v31  ;;  %v5037_v7 = vsub.f32 %v7196_v55, %v4782_v39  ;;  %v7202_v55 = vld [vmem:[#allocation45_spill] sm:$0xff] }
 0x284   : > { %v2230_v15 = vadd.f32 %v2229_v52, %v2069_v8  ;;  %v2073_v8 = vmul.f32 %v5013_v63, %v5013_v63  ;;  %7197 = vst [vmem:[#allocation42_spill] sm:$0xff] %v5037_v7  ;;  %v5043_v63 = vsub.f32 %v7198_v0, %v4782_v39  ;;  %v7204_v0 = vld [vmem:[#allocation46_spill] sm:$0xff] }
 0x286   : > { %v2231_v27 = vadd.f32 %v2230_v15, %v2070_v61  ;;  %v2074_v61 = vmul.f32 %v5019_v21, %v5019_v21  ;;  %7199 = vst [vmem:[#allocation43_spill] sm:$0xff] %v5043_v63  ;;  %v5049_v21 = vsub.f32 %v7200_v23, %v4782_v39  ;;  %v7206_v23 = vld [vmem:[#allocation47_spill] sm:$0xff] }
 0x288   : > { %v2232_v3 = vadd.f32 %v2231_v27, %v2071_v28  ;;  %v2075_v28 = vmul.f32 %v5025_v9, %v5025_v9  ;;  %7201 = vst [vmem:[#allocation44_spill] sm:$0xff] %v5049_v21  ;;  %v5055_v9 = vsub.f32 %v7202_v55, %v4782_v39  ;;  %v7208_v55 = vld [vmem:[#allocation48_spill] sm:$0xff] }
 0x28a   : > { %v2233_v52 = vadd.f32 %v2232_v3, %v2072_v46  ;;  %v2076_v46 = vmul.f32 %v5031_v31, %v5031_v31  ;;  %7203 = vst [vmem:[#allocation45_spill] sm:$0xff] %v5055_v9  ;;  %v5061_v31 = vsub.f32 %v7204_v0, %v4782_v39  ;;  %v7210_v0 = vld [vmem:[#allocation49_spill] sm:$0xff] }
 0x28c   : > { %v2234_v15 = vadd.f32 %v2233_v52, %v2073_v8  ;;  %v2077_v8 = vmul.f32 %v5037_v7, %v5037_v7  ;;  %7205 = vst [vmem:[#allocation46_spill] sm:$0xff] %v5061_v31  ;;  %v5067_v7 = vsub.f32 %v7206_v23, %v4782_v39  ;;  %v7212_v23 = vld [vmem:[#allocation50_spill] sm:$0xff] }
 0x28e   : > { %v2235_v27 = vadd.f32 %v2234_v15, %v2074_v61  ;;  %v2078_v61 = vmul.f32 %v5043_v63, %v5043_v63  ;;  %7207 = vst [vmem:[#allocation47_spill] sm:$0xff] %v5067_v7  ;;  %v5073_v63 = vsub.f32 %v7208_v55, %v4782_v39  ;;  %v7214_v55 = vld [vmem:[#allocation51_spill] sm:$0xff] }
 0x290   : > { %v2236_v3 = vadd.f32 %v2235_v27, %v2075_v28  ;;  %v2079_v28 = vmul.f32 %v5049_v21, %v5049_v21  ;;  %7209 = vst [vmem:[#allocation48_spill] sm:$0xff] %v5073_v63  ;;  %v5079_v21 = vsub.f32 %v7210_v0, %v4782_v39  ;;  %v7216_v0 = vld [vmem:[#allocation52_spill] sm:$0xff] }
 0x292   : > { %v2237_v52 = vadd.f32 %v2236_v3, %v2076_v46  ;;  %v2080_v46 = vmul.f32 %v5055_v9, %v5055_v9  ;;  %7211 = vst [vmem:[#allocation49_spill] sm:$0xff] %v5079_v21  ;;  %v5085_v9 = vsub.f32 %v7212_v23, %v4782_v39  ;;  %v7218_v23 = vld [vmem:[#allocation53_spill] sm:$0xff] }
 0x294   : > { %v2238_v15 = vadd.f32 %v2237_v52, %v2077_v8  ;;  %v2081_v8 = vmul.f32 %v5061_v31, %v5061_v31  ;;  %7213 = vst [vmem:[#allocation50_spill] sm:$0xff] %v5085_v9  ;;  %v5091_v31 = vsub.f32 %v7214_v55, %v4782_v39  ;;  %v7220_v55 = vld [vmem:[#allocation54_spill] sm:$0xff] }
 0x296   : > { %v2239_v27 = vadd.f32 %v2238_v15, %v2078_v61  ;;  %v2082_v61 = vmul.f32 %v5067_v7, %v5067_v7  ;;  %7215 = vst [vmem:[#allocation51_spill] sm:$0xff] %v5091_v31  ;;  %v5097_v7 = vsub.f32 %v7216_v0, %v4782_v39  ;;  %v7222_v0 = vld [vmem:[#allocation55_spill] sm:$0xff] }
 0x298   : > { %v2240_v3 = vadd.f32 %v2239_v27, %v2079_v28  ;;  %v2083_v28 = vmul.f32 %v5073_v63, %v5073_v63  ;;  %7217 = vst [vmem:[#allocation52_spill] sm:$0xff] %v5097_v7  ;;  %v5103_v63 = vsub.f32 %v7218_v23, %v4782_v39  ;;  %v7224_v23 = vld [vmem:[#allocation56_spill] sm:$0xff] }
 0x29a   : > { %v2241_v52 = vadd.f32 %v2240_v3, %v2080_v46  ;;  %v2084_v46 = vmul.f32 %v5079_v21, %v5079_v21  ;;  %7219 = vst [vmem:[#allocation53_spill] sm:$0xff] %v5103_v63  ;;  %v5109_v21 = vsub.f32 %v7220_v55, %v4782_v39  ;;  %v7226_v55 = vld [vmem:[#allocation57_spill] sm:$0xff] }
 0x29c   : > { %v2242_v15 = vadd.f32 %v2241_v52, %v2081_v8  ;;  %v2085_v8 = vmul.f32 %v5085_v9, %v5085_v9  ;;  %7221 = vst [vmem:[#allocation54_spill] sm:$0xff] %v5109_v21  ;;  %v5115_v9 = vsub.f32 %v7222_v0, %v4782_v39  ;;  %v7228_v0 = vld [vmem:[#allocation58_spill] sm:$0xff] }
 0x29e   : > { %v2243_v27 = vadd.f32 %v2242_v15, %v2082_v61  ;;  %v2086_v61 = vmul.f32 %v5091_v31, %v5091_v31  ;;  %7223 = vst [vmem:[#allocation55_spill] sm:$0xff] %v5115_v9  ;;  %v5121_v31 = vsub.f32 %v7224_v23, %v4782_v39  ;;  %v7230_v23 = vld [vmem:[#allocation59_spill] sm:$0xff] }
 0x2a0   : > { %v2244_v3 = vadd.f32 %v2243_v27, %v2083_v28  ;;  %v2087_v28 = vmul.f32 %v5097_v7, %v5097_v7  ;;  %7225 = vst [vmem:[#allocation56_spill] sm:$0xff] %v5121_v31  ;;  %v5127_v7 = vsub.f32 %v7226_v55, %v4782_v39  ;;  %v7232_v55 = vld [vmem:[#allocation60_spill] sm:$0xff] }
 0x2a2   : > { %v2245_v52 = vadd.f32 %v2244_v3, %v2084_v46  ;;  %v2088_v46 = vmul.f32 %v5103_v63, %v5103_v63  ;;  %7227 = vst [vmem:[#allocation57_spill] sm:$0xff] %v5127_v7  ;;  %v5133_v63 = vsub.f32 %v7228_v0, %v4782_v39  ;;  %v7234_v0 = vld [vmem:[#allocation61_spill] sm:$0xff] }
 0x2a4   : > { %v2246_v15 = vadd.f32 %v2245_v52, %v2085_v8  ;;  %v2089_v8 = vmul.f32 %v5109_v21, %v5109_v21  ;;  %7229 = vst [vmem:[#allocation58_spill] sm:$0xff] %v5133_v63  ;;  %v5139_v21 = vsub.f32 %v7230_v23, %v4782_v39  ;;  %v7236_v23 = vld [vmem:[#allocation62_spill] sm:$0xff] }
 0x2a6   : > { %v2247_v27 = vadd.f32 %v2246_v15, %v2086_v61  ;;  %v2090_v61 = vmul.f32 %v5115_v9, %v5115_v9  ;;  %7231 = vst [vmem:[#allocation59_spill] sm:$0xff] %v5139_v21  ;;  %v5145_v9 = vsub.f32 %v7232_v55, %v4782_v39  ;;  %v7238_v55 = vld [vmem:[#allocation63_spill] sm:$0xff] }
 0x2a8   : > { %v2248_v3 = vadd.f32 %v2247_v27, %v2087_v28  ;;  %v2091_v28 = vmul.f32 %v5121_v31, %v5121_v31  ;;  %7233 = vst [vmem:[#allocation60_spill] sm:$0xff] %v5145_v9  ;;  %v5151_v31 = vsub.f32 %v7234_v0, %v4782_v39  ;;  %v7240_v0 = vld [vmem:[#allocation64_spill] sm:$0xff] }
 0x2aa   : > { %v2249_v52 = vadd.f32 %v2248_v3, %v2088_v46  ;;  %v2092_v46 = vmul.f32 %v5127_v7, %v5127_v7  ;;  %7235 = vst [vmem:[#allocation61_spill] sm:$0xff] %v5151_v31  ;;  %v5157_v7 = vsub.f32 %v7236_v23, %v4782_v39  ;;  %v7242_v23 = vld [vmem:[#allocation65_spill] sm:$0xff] }
 0x2ac   : > { %v2250_v15 = vadd.f32 %v2249_v52, %v2089_v8  ;;  %v2093_v8 = vmul.f32 %v5133_v63, %v5133_v63  ;;  %7237 = vst [vmem:[#allocation62_spill] sm:$0xff] %v5157_v7  ;;  %v5163_v63 = vsub.f32 %v7238_v55, %v4782_v39  ;;  %v7244_v55 = vld [vmem:[#allocation66_spill] sm:$0xff] }
 0x2ae   : > { %v2251_v27 = vadd.f32 %v2250_v15, %v2090_v61  ;;  %v2094_v61 = vmul.f32 %v5139_v21, %v5139_v21  ;;  %7239 = vst [vmem:[#allocation63_spill] sm:$0xff] %v5163_v63  ;;  %v5169_v21 = vsub.f32 %v7240_v0, %v4782_v39  ;;  %v7246_v0 = vld [vmem:[#allocation68_spill] sm:$0xff] }
 0x2b0   : > { %v2252_v3 = vadd.f32 %v2251_v27, %v2091_v28  ;;  %v2095_v28 = vmul.f32 %v5145_v9, %v5145_v9  ;;  %7241 = vst [vmem:[#allocation64_spill] sm:$0xff] %v5169_v21  ;;  %v5175_v9 = vsub.f32 %v7242_v23, %v4782_v39  ;;  %v7248_v23 = vld [vmem:[#allocation69_spill] sm:$0xff] }
 0x2b2   : > { %v2253_v52 = vadd.f32 %v2252_v3, %v2092_v46  ;;  %v2096_v46 = vmul.f32 %v5151_v31, %v5151_v31  ;;  %7243 = vst [vmem:[#allocation65_spill] sm:$0xff] %v5175_v9  ;;  %v5181_v31 = vsub.f32 %v7244_v55, %v4782_v39  ;;  %v7250_v55 = vld [vmem:[#allocation71_spill] sm:$0xff] }
 0x2b4   : > { %v2254_v15 = vadd.f32 %v2253_v52, %v2093_v8  ;;  %v2097_v8 = vmul.f32 %v5157_v7, %v5157_v7  ;;  %7245 = vst [vmem:[#allocation66_spill] sm:$0xff] %v5181_v31  ;;  %v5187_v7 = vsub.f32 %v7246_v0, %v4782_v39  ;;  %v7252_v0 = vld [vmem:[#allocation73_spill] sm:$0xff] }
 0x2b6   : > { %v2255_v27 = vadd.f32 %v2254_v15, %v2094_v61  ;;  %v2098_v61 = vmul.f32 %v5163_v63, %v5163_v63  ;;  %7247 = vst [vmem:[#allocation68_spill] sm:$0xff] %v5187_v7  ;;  %v5193_v63 = vsub.f32 %v7248_v23, %v4782_v39  ;;  %v7254_v23 = vld [vmem:[#allocation75_spill] sm:$0xff] }
 0x2b8   : > { %v2256_v3 = vadd.f32 %v2255_v27, %v2095_v28  ;;  %v2099_v28 = vmul.f32 %v5169_v21, %v5169_v21  ;;  %7249 = vst [vmem:[#allocation69_spill] sm:$0xff] %v5193_v63  ;;  %v5199_v21 = vsub.f32 %v7250_v55, %v4782_v39  ;;  %v7256_v55 = vld [vmem:[#allocation77_spill] sm:$0xff] }
 0x2ba   : > { %v2257_v52 = vadd.f32 %v2256_v3, %v2096_v46  ;;  %v2100_v46 = vmul.f32 %v5175_v9, %v5175_v9  ;;  %7251 = vst [vmem:[#allocation71_spill] sm:$0xff] %v5199_v21  ;;  %v5205_v9 = vsub.f32 %v7252_v0, %v4782_v39  ;;  %v7258_v0 = vld [vmem:[#allocation79_spill] sm:$0xff] }
 0x2bc   : > { %v2258_v15 = vadd.f32 %v2257_v52, %v2097_v8  ;;  %v2101_v8 = vmul.f32 %v5181_v31, %v5181_v31  ;;  %7253 = vst [vmem:[#allocation73_spill] sm:$0xff] %v5205_v9  ;;  %v5211_v31 = vsub.f32 %v7254_v23, %v4782_v39  ;;  %v7260_v23 = vld [vmem:[#allocation81_spill] sm:$0xff] }
 0x2be   : > { %v2259_v27 = vadd.f32 %v2258_v15, %v2098_v61  ;;  %v2102_v61 = vmul.f32 %v5187_v7, %v5187_v7  ;;  %7255 = vst [vmem:[#allocation75_spill] sm:$0xff] %v5211_v31  ;;  %v5217_v7 = vsub.f32 %v7256_v55, %v4782_v39  ;;  %v7262_v55 = vld [vmem:[#allocation83_spill] sm:$0xff] }
 0x2c0   : > { %v2260_v3 = vadd.f32 %v2259_v27, %v2099_v28  ;;  %v2103_v28 = vmul.f32 %v5193_v63, %v5193_v63  ;;  %7257 = vst [vmem:[#allocation77_spill] sm:$0xff] %v5217_v7  ;;  %v5223_v63 = vsub.f32 %v7258_v0, %v4782_v39  ;;  %v7264_v0 = vld [vmem:[#allocation85_spill] sm:$0xff] }
 0x2c2   : > { %v2261_v52 = vadd.f32 %v2260_v3, %v2100_v46  ;;  %v2104_v46 = vmul.f32 %v5199_v21, %v5199_v21  ;;  %7259 = vst [vmem:[#allocation79_spill] sm:$0xff] %v5223_v63  ;;  %v5229_v21 = vsub.f32 %v7260_v23, %v4782_v39  ;;  %v7265_v23 = vld [vmem:[#allocation87_spill] sm:$0xff] }
 0x2c4   : > { %v2262_v15 = vadd.f32 %v2261_v52, %v2101_v8  ;;  %v2105_v8 = vmul.f32 %v5205_v9, %v5205_v9  ;;  %7261 = vst [vmem:[#allocation81_spill] sm:$0xff] %v5229_v21  ;;  %v5235_v9 = vsub.f32 %v7262_v55, %v4782_v39  ;;  %v7267_v55 = vld [vmem:[#allocation89_spill] sm:$0xff] }
 0x2c6   : > { %v2263_v27 = vadd.f32 %v2262_v15, %v2102_v61  ;;  %v2106_v61 = vmul.f32 %v5211_v31, %v5211_v31  ;;  %7263 = vst [vmem:[#allocation83_spill] sm:$0xff] %v5235_v9  ;;  %v5241_v31 = vsub.f32 %v7264_v0, %v4782_v39  ;;  %v7269_v0 = vld [vmem:[#allocation91_spill] sm:$0xff] }
 0x2c8   : > { %v2264_v3 = vadd.f32 %v2263_v27, %v2103_v28  ;;  %v2107_v28 = vmul.f32 %v5217_v7, %v5217_v7  ;;  %v5247_v7 = vsub.f32 %v7265_v23, %v4782_v39  ;;  %v7271_v23 = vld [vmem:[#allocation93_spill] sm:$0xff] }
 0x2ca   : > { %v2265_v52 = vadd.f32 %v2264_v3, %v2104_v46  ;;  %v2108_v46 = vmul.f32 %v5223_v63, %v5223_v63  ;;  %7266 = vst [vmem:[#allocation85_spill] sm:$0xff] %v5247_v7  ;;  %v5253_v63 = vsub.f32 %v7267_v55, %v4782_v39  ;;  %v5271_v55 = vsub.f32 %v4351_v47, %v4782_v39 }
 0x2cc   : > { %v2266_v15 = vadd.f32 %v2265_v52, %v2105_v8  ;;  %v2109_v8 = vmul.f32 %v5229_v21, %v5229_v21  ;;  %7268 = vst [vmem:[#allocation87_spill] sm:$0xff] %v5253_v63  ;;  %v5259_v21 = vsub.f32 %v7269_v0, %v4782_v39  ;;  %7273 = vst [vmem:[#allocation93_spill] sm:$0xff] %v5271_v55  ;;  %v7274_v0 = vld [vmem:[#allocation95_spill] sm:$0xff] }
 0x2cd   : > { %v2116_v47 = vmul.f32 %v5271_v55, %v5271_v55 }
 0x2ce   : > { %v2267_v27 = vadd.f32 %v2266_v15, %v2106_v61  ;;  %v2110_v61 = vmul.f32 %v5235_v9, %v5235_v9  ;;  %7270 = vst [vmem:[#allocation89_spill] sm:$0xff] %v5259_v21  ;;  %v5265_v9 = vsub.f32 %v7271_v23, %v4782_v39  ;;  %v7276_v23 = vld [vmem:[#allocation96_spill] sm:$0xff] }
 0x2d0   : > { %v2268_v3 = vadd.f32 %v2267_v27, %v2107_v28  ;;  %v2111_v28 = vmul.f32 %v5241_v31, %v5241_v31  ;;  %7272 = vst [vmem:[#allocation91_spill] sm:$0xff] %v5265_v9 }
 0x2d2   : > { %v2269_v52 = vadd.f32 %v2268_v3, %v2108_v46  ;;  %v2112_v46 = vmul.f32 %v5247_v7, %v5247_v7  ;;  %v5277_v7 = vsub.f32 %v7274_v0, %v4782_v39  ;;  %v7280_v0 = vld [vmem:[#allocation98_spill] sm:$0xff] }
 0x2d4   : > { %v2270_v15 = vadd.f32 %v2269_v52, %v2109_v8  ;;  %v2113_v8 = vmul.f32 %v5253_v63, %v5253_v63  ;;  %7275 = vst [vmem:[#allocation95_spill] sm:$0xff] %v5277_v7  ;;  %v5283_v63 = vsub.f32 %v7276_v23, %v4782_v39  ;;  %v7282_v23 = vld [vmem:[#allocation99_spill] sm:$0xff] }
 0x2d5   : > { %v5301_v55 = vsub.f32 %v7282_v23, %v4782_v39  ;;  %v7288_v23 = vld [vmem:[#allocation102_spill] sm:$0xff] }
 0x2d6   : > { %v2271_v27 = vadd.f32 %v2270_v15, %v2110_v61  ;;  %v2114_v61 = vmul.f32 %v5259_v21, %v5259_v21  ;;  %7277 = vst [vmem:[#allocation96_spill] sm:$0xff] %v5283_v63 }
 0x2d7   : > { %7283 = vst [vmem:[#allocation99_spill] sm:$0xff] %v5301_v55 }
 0x2d8   : > { %v2272_v3 = vadd.f32 %v2271_v27, %v2111_v28  ;;  %v2115_v28 = vmul.f32 %v5265_v9, %v5265_v9  ;;  %v5295_v9 = vsub.f32 %v7280_v0, %v4782_v39  ;;  %v7286_v0 = vld [vmem:[#allocation101_spill] sm:$0xff] }
 0x2da   : > { %v2273_v52 = vadd.f32 %v2272_v3, %v2112_v46  ;;  %v7278_v3 = vld [vmem:[#allocation97_spill] sm:$0xff]  ;;  %7281 = vst [vmem:[#allocation98_spill] sm:$0xff] %v5295_v9 }
 0x2db   : > { %v5289_v21 = vsub.f32 %v7278_v3, %v4782_v39  ;;  %v7284_v3 = vld [vmem:[#allocation100_spill] sm:$0xff] }
 0x2dc   : > { %v2274_v15 = vadd.f32 %v2273_v52, %v2113_v8  ;;  %v2117_v8 = vmul.f32 %v5277_v7, %v5277_v7  ;;  %v5307_v7 = vsub.f32 %v7284_v3, %v4782_v39  ;;  %v7290_v3 = vld [vmem:[#allocation103_spill] sm:$0xff] }
 0x2dd   : > { %7279 = vst [vmem:[#allocation97_spill] sm:$0xff] %v5289_v21 }
 0x2de   : > { %v2275_v27 = vadd.f32 %v2274_v15, %v2114_v61  ;;  %v2118_v61 = vmul.f32 %v5283_v63, %v5283_v63  ;;  %7285 = vst [vmem:[#allocation100_spill] sm:$0xff] %v5307_v7  ;;  %v5313_v63 = vsub.f32 %v7286_v0, %v4782_v39  ;;  %v7291_v0 = vld [vmem:[#allocation104_spill] sm:$0xff] }
 0x2e0   : > { %v2276_v46 = vadd.f32 %v2275_v27, %v2115_v28  ;;  %v2119_v28 = vmul.f32 %v5289_v21, %v5289_v21  ;;  %7287 = vst [vmem:[#allocation101_spill] sm:$0xff] %v5313_v63  ;;  %v5319_v21 = vsub.f32 %v7288_v23, %v4782_v39  ;;  %v7293_v23 = vld [vmem:[#allocation105_spill] sm:$0xff] }
 0x2e2   : > { %v2277_v52 = vadd.f32 %v2276_v46, %v2116_v47  ;;  %v2120_v47 = vmul.f32 %v5295_v9, %v5295_v9  ;;  %7289 = vst [vmem:[#allocation102_spill] sm:$0xff] %v5319_v21  ;;  %v5325_v9 = vsub.f32 %v7290_v3, %v4782_v39  ;;  %v7294_v3 = vld [vmem:[#allocation106_spill] sm:$0xff] }
 0x2e4   : > { %v2278_v15 = vadd.f32 %v2277_v52, %v2117_v8  ;;  %v2121_v8 = vmul.f32 %v5301_v55, %v5301_v55  ;;  %v5331_v55 = vsub.f32 %v7291_v0, %v4782_v39  ;;  %v7295_v0 = vld [vmem:[#allocation107_spill] sm:$0xff] }
 0x2e6   : > { %v2279_v27 = vadd.f32 %v2278_v15, %v2118_v61  ;;  %v2122_v61 = vmul.f32 %v5307_v7, %v5307_v7  ;;  %7292 = vst [vmem:[#allocation103_spill] sm:$0xff] %v5331_v55  ;;  %v5337_v7 = vsub.f32 %v7293_v23, %v4782_v39  ;;  %v5355_v23 = vsub.f32 %v4447_v43, %v4782_v39 }
 0x2e8   : > { %v2280_v46 = vadd.f32 %v2279_v27, %v2119_v28  ;;  %v2123_v28 = vmul.f32 %v5313_v63, %v5313_v63  ;;  %v5343_v63 = vsub.f32 %v7294_v3, %v4782_v39  ;;  %v7296_v3 = vld [vmem:[#allocation108_spill] sm:$0xff]  ;;  %v2130_v43 = vmul.f32 %v5355_v23, %v5355_v23 }
 0x2ea   : > { %v2281_v52 = vadd.f32 %v2280_v46, %v2120_v47  ;;  %v2124_v47 = vmul.f32 %v5319_v21, %v5319_v21  ;;  %v5349_v21 = vsub.f32 %v7295_v0, %v4782_v39  ;;  %v5367_v0 = vsub.f32 %v4461_v36, %v4782_v39 }
 0x2ec   : > { %v2282_v15 = vadd.f32 %v2281_v52, %v2121_v8  ;;  %v2125_v8 = vmul.f32 %v5325_v9, %v5325_v9  ;;  %v2132_v36 = vmul.f32 %v5367_v0, %v5367_v0 }
 0x2ee   : > { %v2283_v27 = vadd.f32 %v2282_v15, %v2122_v61  ;;  %v2126_v61 = vmul.f32 %v5331_v55, %v5331_v55  ;;  %v5361_v55 = vsub.f32 %v7296_v3, %v4782_v39  ;;  %v5379_v3 = vsub.f32 %v4473_v58, %v4782_v39 }
 0x2f0   : > { %v2284_v46 = vadd.f32 %v2283_v27, %v2123_v28  ;;  %v2127_v28 = vmul.f32 %v5337_v7, %v5337_v7  ;;  %v2134_v58 = vmul.f32 %v5379_v3, %v5379_v3 }
 0x2f2   : > { %v2285_v52 = vadd.f32 %v2284_v46, %v2124_v47  ;;  %v2128_v47 = vmul.f32 %v5343_v63, %v5343_v63 }
 0x2f4   : > { %v2286_v15 = vadd.f32 %v2285_v52, %v2125_v8  ;;  %v2129_v8 = vmul.f32 %v5349_v21, %v5349_v21 }
 0x2f6   : > { %v2287_v27 = vadd.f32 %v2286_v15, %v2126_v61  ;;  %v5373_v15 = vsub.f32 %v4466_v18, %v4782_v39 }
 0x2f8   : > { %v2288_v46 = vadd.f32 %v2287_v27, %v2127_v28  ;;  %v2131_v28 = vmul.f32 %v5361_v55, %v5361_v55  ;;  %v2133_v18 = vmul.f32 %v5373_v15, %v5373_v15 }
 0x2fa   : > { %v2289_v52 = vadd.f32 %v2288_v46, %v2128_v47  ;;  %v5385_v46 = vsub.f32 %v4478_v32, %v4782_v39 }
 0x2fc   : > { %v2290_v61 = vadd.f32 %v2289_v52, %v2129_v8  ;;  %v5391_v52 = vsub.f32 %v4483_v1, %v4782_v39  ;;  %v2135_v32 = vmul.f32 %v5385_v46, %v5385_v46 }
 0x2fe   : > { %v2291_v27 = vadd.f32 %v2290_v61, %v2130_v43  ;;  %v5397_v61 = vsub.f32 %v4488_v49, %v4782_v39  ;;  %v2136_v1 = vmul.f32 %v5391_v52, %v5391_v52 }
 0x300   : > { %v2292_v47 = vadd.f32 %v2291_v27, %v2131_v28  ;;  %v5403_v27 = vsub.f32 %v4493_v41, %v4782_v39  ;;  %v2137_v49 = vmul.f32 %v5397_v61, %v5397_v61 }
 0x302   : > { %v2293_v8 = vadd.f32 %v2292_v47, %v2132_v36  ;;  %v5409_v47 = vsub.f32 %v4498_v44, %v4782_v39  ;;  %v2138_v41 = vmul.f32 %v5403_v27, %v5403_v27 }
 0x304   : > { %v2294_v43 = vadd.f32 %v2293_v8, %v2133_v18  ;;  %v5415_v8 = vsub.f32 %v4503_v24, %v4782_v39  ;;  %v2139_v44 = vmul.f32 %v5409_v47, %v5409_v47 }
 0x306   : > { %v2295_v28 = vadd.f32 %v2294_v43, %v2134_v58  ;;  %v5421_v43 = vsub.f32 %v4508_v6, %v4782_v39  ;;  %v2140_v24 = vmul.f32 %v5415_v8, %v5415_v8 }
 0x308   : > { %v2296_v36 = vadd.f32 %v2295_v28, %v2135_v32  ;;  %v5427_v28 = vsub.f32 %v4513_v53, %v4782_v39  ;;  %v2141_v6 = vmul.f32 %v5421_v43, %v5421_v43 }
 0x30a   : > { %v2297_v18 = vadd.f32 %v2296_v36, %v2136_v1  ;;  %v5433_v36 = vsub.f32 %v4518_v25, %v4782_v39  ;;  %v2142_v53 = vmul.f32 %v5427_v28, %v5427_v28 }
 0x30c   : > { %v2298_v58 = vadd.f32 %v2297_v18, %v2137_v49  ;;  %v5439_v18 = vsub.f32 %v4523_v13, %v4782_v39  ;;  %v2143_v25 = vmul.f32 %v5433_v36, %v5433_v36 }
 0x30e   : > { %v2299_v32 = vadd.f32 %v2298_v58, %v2138_v41  ;;  %v5445_v58 = vsub.f32 %v4528_v4, %v4782_v39  ;;  %v2144_v13 = vmul.f32 %v5439_v18, %v5439_v18 }
 0x310   : > { %v2300_v1 = vadd.f32 %v2299_v32, %v2139_v44  ;;  %v5451_v32 = vsub.f32 %v4533_v42, %v4782_v39  ;;  %v2145_v4 = vmul.f32 %v5445_v58, %v5445_v58 }
 0x312   : > { %v2301_v49 = vadd.f32 %v2300_v1, %v2140_v24  ;;  %v5457_v1 = vsub.f32 %v4538_v51, %v4782_v39  ;;  %v2146_v42 = vmul.f32 %v5451_v32, %v5451_v32 }
 0x314   : > { %v2302_v41 = vadd.f32 %v2301_v49, %v2141_v6  ;;  %v5463_v49 = vsub.f32 %v4543_v22, %v4782_v39  ;;  %v2147_v51 = vmul.f32 %v5457_v1, %v5457_v1 }
 0x316   : > { %v2303_v44 = vadd.f32 %v2302_v41, %v2142_v53  ;;  %v5469_v41 = vsub.f32 %v4548_v30, %v4782_v39  ;;  %v2148_v22 = vmul.f32 %v5463_v49, %v5463_v49 }
 0x318   : > { %v2304_v24 = vadd.f32 %v2303_v44, %v2143_v25  ;;  %v5475_v44 = vsub.f32 %v4553_v62, %v4782_v39  ;;  %v2149_v30 = vmul.f32 %v5469_v41, %v5469_v41 }
 0x31a   : > { %v2305_v6 = vadd.f32 %v2304_v24, %v2144_v13  ;;  %v5481_v24 = vsub.f32 %v4558_v17, %v4782_v39  ;;  %v2150_v62 = vmul.f32 %v5475_v44, %v5475_v44 }
 0x31c   : > { %v2306_v53 = vadd.f32 %v2305_v6, %v2145_v4  ;;  %v5487_v6 = vsub.f32 %v4563_v16, %v4782_v39  ;;  %v2151_v17 = vmul.f32 %v5481_v24, %v5481_v24 }
 0x31e   : > { %v2307_v25 = vadd.f32 %v2306_v53, %v2146_v42  ;;  %v5493_v53 = vsub.f32 %v4568_v5, %v4782_v39  ;;  %v2152_v16 = vmul.f32 %v5487_v6, %v5487_v6 }
 0x320   : > { %v2308_v13 = vadd.f32 %v2307_v25, %v2147_v51  ;;  %v5499_v25 = vsub.f32 %v4573_v50, %v4782_v39  ;;  %v2153_v5 = vmul.f32 %v5493_v53, %v5493_v53 }
 0x322   : > { %v2309_v4 = vadd.f32 %v2308_v13, %v2148_v22  ;;  %v5505_v13 = vsub.f32 %v4578_v57, %v4782_v39  ;;  %v2154_v50 = vmul.f32 %v5499_v25, %v5499_v25 }
 0x324   : > { %v2310_v42 = vadd.f32 %v2309_v4, %v2149_v30  ;;  %v5511_v4 = vsub.f32 %v4583_v29, %v4782_v39  ;;  %v2155_v57 = vmul.f32 %v5505_v13, %v5505_v13 }
 0x326   : > { %v2311_v51 = vadd.f32 %v2310_v42, %v2150_v62  ;;  %v5517_v42 = vsub.f32 %v4588_v45, %v4782_v39  ;;  %v2156_v29 = vmul.f32 %v5511_v4, %v5511_v4 }
 0x328   : > { %v2312_v22 = vadd.f32 %v2311_v51, %v2151_v17  ;;  %7297 = vst [vmem:[#allocation104_spill] sm:$0xff] %v5517_v42  ;;  %v5523_v51 = vsub.f32 %v4593_v10, %v4782_v39  ;;  %v2157_v45 = vmul.f32 %v5517_v42, %v5517_v42 }
 0x32a   : > { %v2313_v30 = vadd.f32 %v2312_v22, %v2152_v16  ;;  %7298 = vst [vmem:[#allocation105_spill] sm:$0xff] %v5523_v51  ;;  %v5529_v22 = vsub.f32 %v4598_v34, %v4782_v39  ;;  %v2158_v10 = vmul.f32 %v5523_v51, %v5523_v51 }
 0x32c   : > { %v2314_v62 = vadd.f32 %v2313_v30, %v2153_v5  ;;  %7299 = vst [vmem:[#allocation106_spill] sm:$0xff] %v5529_v22  ;;  %v5535_v30 = vsub.f32 %v4603_v37, %v4782_v39  ;;  %v2159_v34 = vmul.f32 %v5529_v22, %v5529_v22 }
 0x32e   : > { %v2315_v17 = vadd.f32 %v2314_v62, %v2154_v50  ;;  %7300 = vst [vmem:[#allocation107_spill] sm:$0xff] %v5535_v30  ;;  %v5541_v62 = vsub.f32 %v4608_v26, %v4782_v39  ;;  %v2160_v37 = vmul.f32 %v5535_v30, %v5535_v30 }
 0x330   : > { %v2316_v16 = vadd.f32 %v2315_v17, %v2155_v57  ;;  %7301 = vst [vmem:[#allocation108_spill] sm:$0xff] %v5541_v62  ;;  %v7302_v17 = vld [vmem:[#allocation109_spill] sm:$0xff]  ;;  %v2161_v26 = vmul.f32 %v5541_v62, %v5541_v62 }
 0x331   : > { %v5547_v42 = vsub.f32 %v7302_v17, %v4782_v39  ;;  %v7308_v17 = vld [vmem:[#allocation112_spill] sm:$0xff] }
 0x332   : > { %v2317_v5 = vadd.f32 %v2316_v16, %v2156_v29  ;;  %v7304_v16 = vld [vmem:[#allocation110_spill] sm:$0xff]  ;;  %v5565_v30 = vsub.f32 %v7308_v17, %v4782_v39  ;;  %v7314_v17 = vld [vmem:[#allocation67_spill] sm:$0xff] }
 0x333   : > { %7303 = vst [vmem:[#allocation109_spill] sm:$0xff] %v5547_v42  ;;  %v5553_v51 = vsub.f32 %v7304_v16, %v4782_v39  ;;  %v7310_v16 = vld [vmem:[#allocation113_spill] sm:$0xff] }
 0x334   : > { %v2318_v50 = vadd.f32 %v2317_v5, %v2157_v45  ;;  %v7306_v5 = vld [vmem:[#allocation111_spill] sm:$0xff]  ;;  %7309 = vst [vmem:[#allocation112_spill] sm:$0xff] %v5565_v30  ;;  %v5571_v62 = vsub.f32 %v7310_v16, %v4782_v39  ;;  %v7316_v16 = vld [vmem:[#allocation72_spill] sm:$0xff] }
 0x335   : > { %7305 = vst [vmem:[#allocation110_spill] sm:$0xff] %v5553_v51  ;;  %v5559_v22 = vsub.f32 %v7306_v5, %v4782_v39  ;;  %v7312_v5 = vld [vmem:[#allocation114_spill] sm:$0xff] }
 0x336   : > { %v2319_v57 = vadd.f32 %v2318_v50, %v2158_v10  ;;  %v2162_v10 = vmul.f32 %v5547_v42, %v5547_v42  ;;  %7311 = vst [vmem:[#allocation113_spill] sm:$0xff] %v5571_v62  ;;  %v5577_v42 = vsub.f32 %v7312_v5, %v4782_v39  ;;  %v7317_v5 = vld [vmem:[#allocation70_spill] sm:$0xff] }
 0x337   : > { %7307 = vst [vmem:[#allocation111_spill] sm:$0xff] %v5559_v22 }
 0x338   : > { %v2320_v29 = vadd.f32 %v2319_v57, %v2159_v34  ;;  %v2163_v34 = vmul.f32 %v5553_v51, %v5553_v51  ;;  %7313 = vst [vmem:[#allocation114_spill] sm:$0xff] %v5577_v42  ;;  %v5583_v51 = vsub.f32 %v7314_v17, %v4782_v39  ;;  %v7319_v17 = vld [vmem:[#allocation76_spill] sm:$0xff] }
 0x33a   : > { %v2321_v45 = vadd.f32 %v2320_v29, %v2160_v37  ;;  %v2164_v37 = vmul.f32 %v5559_v22, %v5559_v22  ;;  %7315 = vst [vmem:[#allocation67_spill] sm:$0xff] %v5583_v51  ;;  %v5589_v22 = vsub.f32 %v7316_v16, %v4782_v39  ;;  %v7320_v16 = vld [vmem:[#allocation74_spill] sm:$0xff] }
 0x33c   : > { %v2322_v50 = vadd.f32 %v2321_v45, %v2161_v26  ;;  %v2165_v26 = vmul.f32 %v5565_v30, %v5565_v30  ;;  %v5595_v30 = vsub.f32 %v7317_v5, %v4782_v39  ;;  %v7322_v5 = vld [vmem:[#allocation80_spill] sm:$0xff] }
 0x33e   : > { %v2323_v57 = vadd.f32 %v2322_v50, %v2162_v10  ;;  %v2166_v10 = vmul.f32 %v5571_v62, %v5571_v62  ;;  %7318 = vst [vmem:[#allocation72_spill] sm:$0xff] %v5595_v30  ;;  %v5601_v62 = vsub.f32 %v7319_v17, %v4782_v39  ;;  %v5619_v17 = vsub.f32 %v4673_v2, %v4782_v39 }
 0x340   : > { %v2324_v29 = vadd.f32 %v2323_v57, %v2163_v34  ;;  %v2167_v34 = vmul.f32 %v5577_v42, %v5577_v42  ;;  %v5607_v42 = vsub.f32 %v7320_v16, %v4782_v39  ;;  %v7323_v16 = vld [vmem:[#allocation78_spill] sm:$0xff]  ;;  %v2174_v2 = vmul.f32 %v5619_v17, %v5619_v17 }
 0x342   : > { %v2325_v45 = vadd.f32 %v2324_v29, %v2164_v37  ;;  %v2168_v37 = vmul.f32 %v5583_v51, %v5583_v51  ;;  %7321 = vst [vmem:[#allocation70_spill] sm:$0xff] %v5607_v42  ;;  %v5613_v51 = vsub.f32 %v7322_v5, %v4782_v39  ;;  %v5631_v5 = vsub.f32 %v4683_v60, %v4782_v39 }
 0x344   : > { %v2326_v50 = vadd.f32 %v2325_v45, %v2165_v26  ;;  %v2169_v26 = vmul.f32 %v5589_v22, %v5589_v22  ;;  %v2176_v60 = vmul.f32 %v5631_v5, %v5631_v5 }
 0x346   : > { %v2327_v57 = vadd.f32 %v2326_v50, %v2166_v10  ;;  %v2170_v10 = vmul.f32 %v5595_v30, %v5595_v30  ;;  %v5625_v30 = vsub.f32 %v7323_v16, %v4782_v39  ;;  %v5643_v16 = vsub.f32 %v4693_v54, %v4782_v39 }
 0x348   : > { %v2328_v29 = vadd.f32 %v2327_v57, %v2167_v34  ;;  %v2171_v34 = vmul.f32 %v5601_v62, %v5601_v62  ;;  %v2178_v54 = vmul.f32 %v5643_v16, %v5643_v16 }
 0x34a   : > { %v2329_v45 = vadd.f32 %v2328_v29, %v2168_v37  ;;  %v2172_v37 = vmul.f32 %v5607_v42, %v5607_v42 }
 0x34c   : > { %v2330_v50 = vadd.f32 %v2329_v45, %v2169_v26  ;;  %v2173_v26 = vmul.f32 %v5613_v51, %v5613_v51 }
 0x34e   : > { %v2331_v57 = vadd.f32 %v2330_v50, %v2170_v10  ;;  %v7324_v50 = vld [vmem:[#allocation84_spill] sm:$0xff] }
 0x34f   : > { %v5637_v42 = vsub.f32 %v7324_v50, %v4782_v39  ;;  %v5655_v50 = vsub.f32 %v4703_v48, %v4782_v39 }
 0x350   : > { %v2332_v29 = vadd.f32 %v2331_v57, %v2171_v34  ;;  %v2175_v34 = vmul.f32 %v5625_v30, %v5625_v30 }
 0x351   : > { %v2180_v48 = vmul.f32 %v5655_v50, %v5655_v50 }
 0x352   : > { %v2333_v45 = vadd.f32 %v2332_v29, %v2172_v37  ;;  %v5649_v29 = vsub.f32 %v4698_v38, %v4782_v39 }
 0x354   : > { %v2334_v10 = vadd.f32 %v2333_v45, %v2173_v26  ;;  %v2177_v26 = vmul.f32 %v5637_v42, %v5637_v42  ;;  %v2179_v38 = vmul.f32 %v5649_v29, %v5649_v29 }
 0x356   : > { %v2335_v57 = vadd.f32 %v2334_v10, %v2174_v2  ;;  %v5661_v10 = vsub.f32 %v4708_v56, %v4782_v39 }
 0x358   : > { %v2336_v37 = vadd.f32 %v2335_v57, %v2175_v34  ;;  %v5667_v57 = vsub.f32 %v4713_v11, %v4782_v39  ;;  %v2181_v56 = vmul.f32 %v5661_v10, %v5661_v10 }
 0x35a   : > { %v2337_v45 = vadd.f32 %v2336_v37, %v2176_v60  ;;  %7325 = vst [vmem:[#allocation76_spill] sm:$0xff] %v5667_v57  ;;  %v5673_v37 = vsub.f32 %v4718_v20, %v4782_v39  ;;  %v2182_v11 = vmul.f32 %v5667_v57, %v5667_v57 }
 0x35c   : > { %v2338_v2 = vadd.f32 %v2337_v45, %v2177_v26  ;;  %7326 = vst [vmem:[#allocation74_spill] sm:$0xff] %v5673_v37  ;;  %v5679_v45 = vsub.f32 %v4723_v33, %v4782_v39  ;;  %v2183_v20 = vmul.f32 %v5673_v37, %v5673_v37 }
 0x35e   : > { %v2339_v34 = vadd.f32 %v2338_v2, %v2178_v54  ;;  %7327 = vst [vmem:[#allocation80_spill] sm:$0xff] %v5679_v45  ;;  %v5685_v2 = vsub.f32 %v4728_v14, %v4782_v39  ;;  %v2184_v33 = vmul.f32 %v5679_v45, %v5679_v45 }
 0x360   : > { %v2340_v60 = vadd.f32 %v2339_v34, %v2179_v38  ;;  %7328 = vst [vmem:[#allocation78_spill] sm:$0xff] %v5685_v2  ;;  %v5691_v34 = vsub.f32 %v4733_v19, %v4782_v39  ;;  %v2185_v14 = vmul.f32 %v5685_v2, %v5685_v2 }
 0x362   : > { %v2341_v26 = vadd.f32 %v2340_v60, %v2180_v48  ;;  %7329 = vst [vmem:[#allocation84_spill] sm:$0xff] %v5691_v34  ;;  %v7330_v60 = vld [vmem:[#allocation82_spill] sm:$0xff]  ;;  %v2186_v19 = vmul.f32 %v5691_v34, %v5691_v34 }
 0x363   : > { %v5697_v57 = vsub.f32 %v7330_v60, %v4782_v39  ;;  %v7335_v60 = vld [vmem:[#allocation92_spill] sm:$0xff] }
 0x364   : > { %v2342_v54 = vadd.f32 %v2341_v26, %v2181_v56  ;;  %v7332_v26 = vld [vmem:[#allocation88_spill] sm:$0xff]  ;;  %v5715_v2 = vsub.f32 %v7335_v60, %v4782_v39  ;;  %v7341_v60 = vld [vmem:[#allocation115_spill] sm:$0xff] }
 0x365   : > { %7331 = vst [vmem:[#allocation82_spill] sm:$0xff] %v5697_v57  ;;  %v5703_v37 = vsub.f32 %v7332_v26, %v4782_v39  ;;  %v7337_v26 = vld [vmem:[#allocation90_spill] sm:$0xff] }
 0x366   : > { %v2343_v38 = vadd.f32 %v2342_v54, %v2182_v11  ;;  %v7334_v54 = vld [vmem:[#allocation86_spill] sm:$0xff]  ;;  %v5721_v34 = vsub.f32 %v7337_v26, %v4782_v39 }
 0x367   : > { %7333 = vst [vmem:[#allocation88_spill] sm:$0xff] %v5703_v37  ;;  %v5709_v45 = vsub.f32 %v7334_v54, %v4782_v39  ;;  %7336 = vst [vmem:[#allocation86_spill] sm:$0xff] %v5715_v2  ;;  %v7339_v54 = vld [vmem:[#allocation94_spill] sm:$0xff] }
 0x368   : > { %v2344_v48 = vadd.f32 %v2343_v38, %v2183_v20  ;;  %v2187_v20 = vmul.f32 %v5697_v57, %v5697_v57  ;;  %7338 = vst [vmem:[#allocation92_spill] sm:$0xff] %v5721_v34  ;;  %v5727_v57 = vsub.f32 %v7339_v54, %v4782_v39 }
 0x36a   : > { %v2345_v56 = vadd.f32 %v2344_v48, %v2184_v33  ;;  %v2188_v33 = vmul.f32 %v5703_v37, %v5703_v37  ;;  %7340 = vst [vmem:[#allocation90_spill] sm:$0xff] %v5727_v57  ;;  %v5733_v37 = vsub.f32 %v7341_v60, %v4782_v39  ;;  %v2192_v26 = vmul.f32 %v5727_v57, %v5727_v57 }
 0x36b   : > { %v2195_v39 = vmul.f32 %v4788_v59, %v4788_v59  ;;  %v2196_v60 = vmul.f32 %v4791_v12, %v4791_v12 }
 0x36c   : > { %v2346_v11 = vadd.f32 %v2345_v56, %v2185_v14  ;;  %v2189_v14 = vmul.f32 %v5709_v45, %v5709_v45  ;;  %7342 = vst [vmem:[#allocation94_spill] sm:$0xff] %v5733_v37 }
 0x36e   : > { %v2347_v38 = vadd.f32 %v2346_v11, %v2186_v19  ;;  %v2190_v19 = vmul.f32 %v5715_v2, %v5715_v2  ;;  %v2194_v2 = vmul.f32 %v4785_v35, %v4785_v35 }
 0x370   : > { %v2348_v48 = vadd.f32 %v2347_v38, %v2187_v20  ;;  %v2191_v20 = vmul.f32 %v5721_v34, %v5721_v34 }
 0x372   : > { %v2349_v56 = vadd.f32 %v2348_v48, %v2188_v33  ;;  %v2193_v48 = vmul.f32 %v5733_v37, %v5733_v37 }
 0x374   : > { %v2350_v11 = vadd.f32 %v2349_v56, %v2189_v14 }
 0x376   : > { %v2351_v38 = vadd.f32 %v2350_v11, %v2190_v19  ;;  %v2197_v11 = vmul.f32 %v4794_v40, %v4794_v40 }
 0x378   : > { %v2352_v33 = vadd.f32 %v2351_v38, %v2191_v20  ;;  %v7343_v38 = vld [vmem:[#allocation119_spill] sm:$0xff] }
 0x379   : > { %v2198_v37 = vmul.f32 %v7343_v38, %v7343_v38 }
 0x37a   : > { %v2353_v54 = vadd.f32 %v2352_v33, %v2192_v26 }
 0x37c   : > { %v2354_v14 = vadd.f32 %v2353_v54, %v2193_v48 }
 0x37e   : > { %v2355_v56 = vadd.f32 %v2354_v14, %v2194_v2 }
 0x380   : > { %v2356_v19 = vadd.f32 %v2355_v56, %v2195_v39  ;;  %v7344_v39 = vld [vmem:[#allocation3_spill] sm:$0xff] }
 0x382   : > { %v2357_v20 = vadd.f32 %v2356_v19, %v2196_v60  ;;  %v7345_v60 = vld [vmem:[#allocation2_spill] sm:$0xff] }
 0x384   : > { %v2358_v26 = vadd.f32 %v2357_v20, %v2197_v11  ;;  %v7349_v20 = vld [vmem:[#allocation7_spill] sm:$0xff] }
 0x386   : > { %v2359_v33 = vadd.f32 %v2358_v26, %v2198_v37  ;;  %v7346_v37 = vld [vmem:[#allocation4_spill] sm:$0xff] }
 0x388   : > { %v2360_v57 = vrot.slane %v2359_v33, 4 }
 0x38a   : > { %v2361_v35 = vadd.f32 %v2360_v57, %v2359_v33  ;;  %v7350_v33 = vld [vmem:[#allocation8_spill] sm:$0xff] }
 0x38c   : > { %v2362_v48 = vrot.slane %v2361_v35, 2 }
 0x38e   : > { %v2363_v54 = vadd.f32 %v2362_v48, %v2361_v35  ;;  %v7347_v35 = vld [vmem:[#allocation5_spill] sm:$0xff] }
 0x390   : > { %v2364_v34 = vrot.slane %v2363_v54, 1 }
 0x392   : > { %v2365_v59 = vadd.f32 %v2364_v34, %v2363_v54  ;;  %v7352_v54 = vld [vmem:[#allocation9_spill] sm:$0xff] }
 0x394   : > { %v2366_v2 = vmul.f32 0.00077160494, %v2365_v59  ;;  %v7348_v59 = vld [vmem:[#allocation6_spill] sm:$0xff] }
 0x396   : > { %v2367_v14 = vadd.f32 1e-05, %v2366_v2 }
 0x398   : > { %3520 = vrsqrt.f32 %v2367_v14  ;;  %v7354_v14 = vld [vmem:[#allocation10_spill] sm:$0xff] }
 0x3a2   : > { %v5751_v12 = vpop.eup %3520 }
 0x3a3   : > { %v5755_v56 = vmul.f32 %v5751_v12, %v7344_v39  ;;  %v5759_v19 = vmul.f32 %v5751_v12, %v7345_v60  ;;  %v5763_v57 = vmul.f32 %v5751_v12, %v7346_v37  ;;  %v5767_v34 = vmul.f32 %v5751_v12, %v7347_v35  ;;  %v7356_v60 = vld [vmem:[#allocation11_spill] sm:$0xff]  ;;  %v7358_v35 = vld [vmem:[#allocation12_spill] sm:$0xff] }
 0x3a4   : > { %v5771_v11 = vmul.f32 %v5751_v12, %v7348_v59  ;;  %v5775_v26 = vmul.f32 %v5751_v12, %v7349_v20  ;;  %v5779_v48 = vmul.f32 %v5751_v12, %v7350_v33  ;;  %v5783_v2 = vmul.f32 %v5751_v12, %v7352_v54  ;;  %v7360_v20 = vld [vmem:[#allocation13_spill] sm:$0xff] }
 0x3a5   : > { %v5787_v39 = vmul.f32 %v5751_v12, %v7354_v14  ;;  %v5791_v37 = vmul.f32 %v5751_v12, %v7356_v60  ;;  %v5795_v59 = vmul.f32 %v5751_v12, %v7358_v35  ;;  %v5799_v33 = vmul.f32 %v5751_v12, %v7360_v20 }
 0x3a6   : > { %7351 = vst [vmem:[#allocation115_spill] sm:$0xff] %v5779_v48  ;;  %7353 = vst [vmem:[#allocation119_spill] sm:$0xff] %v5783_v2  ;;  %v7362_v48 = vld [vmem:[#allocation14_spill] sm:$0xff]  ;;  %v7364_v2 = vld [vmem:[#allocation15_spill] sm:$0xff] }
 0x3a7   : > { %7355 = vst [vmem:[#allocation3_spill] sm:$0xff] %v5787_v39  ;;  %7357 = vst [vmem:[#allocation2_spill] sm:$0xff] %v5791_v37  ;;  %v5803_v54 = vmul.f32 %v5751_v12, %v7362_v48  ;;  %v5807_v14 = vmul.f32 %v5751_v12, %v7364_v2  ;;  %v7366_v39 = vld [vmem:[#allocation16_spill] sm:$0xff]  ;;  %v7368_v37 = vld [vmem:[#allocation17_spill] sm:$0xff] }
 0x3a8   : > { %7359 = vst [vmem:[#allocation4_spill] sm:$0xff] %v5795_v59  ;;  %7361 = vst [vmem:[#allocation5_spill] sm:$0xff] %v5799_v33  ;;  %v5811_v60 = vmul.f32 %v5751_v12, %v7366_v39  ;;  %v5815_v35 = vmul.f32 %v5751_v12, %v7368_v37  ;;  %v7370_v59 = vld [vmem:[#allocation18_spill] sm:$0xff]  ;;  %v7372_v33 = vld [vmem:[#allocation19_spill] sm:$0xff] }
 0x3a9   : > { %7363 = vst [vmem:[#allocation6_spill] sm:$0xff] %v5803_v54  ;;  %7365 = vst [vmem:[#allocation7_spill] sm:$0xff] %v5807_v14  ;;  %v5819_v20 = vmul.f32 %v5751_v12, %v7370_v59  ;;  %v5823_v48 = vmul.f32 %v5751_v12, %v7372_v33  ;;  %v7374_v54 = vld [vmem:[#allocation20_spill] sm:$0xff]  ;;  %v7376_v14 = vld [vmem:[#allocation21_spill] sm:$0xff] }
 0x3aa   : > { %7367 = vst [vmem:[#allocation8_spill] sm:$0xff] %v5811_v60  ;;  %7369 = vst [vmem:[#allocation9_spill] sm:$0xff] %v5815_v35  ;;  %v5827_v2 = vmul.f32 %v5751_v12, %v7374_v54  ;;  %v5831_v39 = vmul.f32 %v5751_v12, %v7376_v14  ;;  %v7378_v60 = vld [vmem:[#allocation22_spill] sm:$0xff]  ;;  %v7380_v35 = vld [vmem:[#allocation23_spill] sm:$0xff] }
 0x3ab   : > { %7371 = vst [vmem:[#allocation10_spill] sm:$0xff] %v5819_v20  ;;  %7373 = vst [vmem:[#allocation11_spill] sm:$0xff] %v5823_v48  ;;  %v5835_v37 = vmul.f32 %v5751_v12, %v7378_v60  ;;  %v5839_v59 = vmul.f32 %v5751_v12, %v7380_v35  ;;  %v7382_v20 = vld [vmem:[#allocation24_spill] sm:$0xff]  ;;  %v7384_v48 = vld [vmem:[#allocation25_spill] sm:$0xff] }
 0x3ac   : > { %7375 = vst [vmem:[#allocation12_spill] sm:$0xff] %v5827_v2  ;;  %7377 = vst [vmem:[#allocation13_spill] sm:$0xff] %v5831_v39  ;;  %v5843_v33 = vmul.f32 %v5751_v12, %v7382_v20  ;;  %v5847_v54 = vmul.f32 %v5751_v12, %v7384_v48  ;;  %v7386_v2 = vld [vmem:[#allocation26_spill] sm:$0xff]  ;;  %v7388_v39 = vld [vmem:[#allocation27_spill] sm:$0xff] }
 0x3ad   : > { %7379 = vst [vmem:[#allocation14_spill] sm:$0xff] %v5835_v37  ;;  %7381 = vst [vmem:[#allocation15_spill] sm:$0xff] %v5839_v59  ;;  %v5851_v14 = vmul.f32 %v5751_v12, %v7386_v2  ;;  %v5855_v60 = vmul.f32 %v5751_v12, %v7388_v39  ;;  %v7390_v37 = vld [vmem:[#allocation28_spill] sm:$0xff]  ;;  %v7392_v59 = vld [vmem:[#allocation29_spill] sm:$0xff] }
 0x3ae   : > { %7383 = vst [vmem:[#allocation16_spill] sm:$0xff] %v5843_v33  ;;  %7385 = vst [vmem:[#allocation17_spill] sm:$0xff] %v5847_v54  ;;  %v5859_v35 = vmul.f32 %v5751_v12, %v7390_v37  ;;  %v5863_v20 = vmul.f32 %v5751_v12, %v7392_v59  ;;  %v7394_v33 = vld [vmem:[#allocation30_spill] sm:$0xff]  ;;  %v7396_v54 = vld [vmem:[#allocation31_spill] sm:$0xff] }
 0x3af   : > { %7387 = vst [vmem:[#allocation18_spill] sm:$0xff] %v5851_v14  ;;  %7389 = vst [vmem:[#allocation19_spill] sm:$0xff] %v5855_v60  ;;  %v5867_v48 = vmul.f32 %v5751_v12, %v7394_v33  ;;  %v5871_v2 = vmul.f32 %v5751_v12, %v7396_v54  ;;  %v7398_v14 = vld [vmem:[#allocation32_spill] sm:$0xff]  ;;  %v7400_v60 = vld [vmem:[#allocation33_spill] sm:$0xff] }
 0x3b0   : > { %7391 = vst [vmem:[#allocation20_spill] sm:$0xff] %v5859_v35  ;;  %7393 = vst [vmem:[#allocation21_spill] sm:$0xff] %v5863_v20  ;;  %v5875_v39 = vmul.f32 %v5751_v12, %v7398_v14  ;;  %v5879_v37 = vmul.f32 %v5751_v12, %v7400_v60  ;;  %v7402_v35 = vld [vmem:[#allocation34_spill] sm:$0xff]  ;;  %v7404_v20 = vld [vmem:[#allocation35_spill] sm:$0xff] }
 0x3b1   : > { %7395 = vst [vmem:[#allocation22_spill] sm:$0xff] %v5867_v48  ;;  %7397 = vst [vmem:[#allocation23_spill] sm:$0xff] %v5871_v2  ;;  %v5883_v59 = vmul.f32 %v5751_v12, %v7402_v35  ;;  %v5887_v33 = vmul.f32 %v5751_v12, %v7404_v20  ;;  %v7406_v48 = vld [vmem:[#allocation36_spill] sm:$0xff]  ;;  %v7408_v2 = vld [vmem:[#allocation37_spill] sm:$0xff] }
 0x3b2   : > { %7399 = vst [vmem:[#allocation24_spill] sm:$0xff] %v5875_v39  ;;  %7401 = vst [vmem:[#allocation25_spill] sm:$0xff] %v5879_v37  ;;  %v5891_v54 = vmul.f32 %v5751_v12, %v7406_v48  ;;  %v5895_v14 = vmul.f32 %v5751_v12, %v7408_v2  ;;  %v7410_v39 = vld [vmem:[#allocation38_spill] sm:$0xff]  ;;  %v7412_v37 = vld [vmem:[#allocation39_spill] sm:$0xff] }
 0x3b3   : > { %7403 = vst [vmem:[#allocation26_spill] sm:$0xff] %v5883_v59  ;;  %7405 = vst [vmem:[#allocation27_spill] sm:$0xff] %v5887_v33  ;;  %v5899_v60 = vmul.f32 %v5751_v12, %v7410_v39  ;;  %v5903_v35 = vmul.f32 %v5751_v12, %v7412_v37  ;;  %v7414_v59 = vld [vmem:[#allocation40_spill] sm:$0xff]  ;;  %v7416_v33 = vld [vmem:[#allocation41_spill] sm:$0xff] }
 0x3b4   : > { %7407 = vst [vmem:[#allocation28_spill] sm:$0xff] %v5891_v54  ;;  %7409 = vst [vmem:[#allocation29_spill] sm:$0xff] %v5895_v14  ;;  %v5907_v20 = vmul.f32 %v5751_v12, %v7414_v59  ;;  %v5911_v48 = vmul.f32 %v5751_v12, %v7416_v33  ;;  %v7418_v54 = vld [vmem:[#allocation42_spill] sm:$0xff]  ;;  %v7420_v14 = vld [vmem:[#allocation43_spill] sm:$0xff] }
 0x3b5   : > { %7411 = vst [vmem:[#allocation30_spill] sm:$0xff] %v5899_v60  ;;  %7413 = vst [vmem:[#allocation31_spill] sm:$0xff] %v5903_v35  ;;  %v5915_v2 = vmul.f32 %v5751_v12, %v7418_v54  ;;  %v5919_v39 = vmul.f32 %v5751_v12, %v7420_v14  ;;  %v7422_v60 = vld [vmem:[#allocation44_spill] sm:$0xff]  ;;  %v7424_v35 = vld [vmem:[#allocation45_spill] sm:$0xff] }
 0x3b6   : > { %7415 = vst [vmem:[#allocation32_spill] sm:$0xff] %v5907_v20  ;;  %7417 = vst [vmem:[#allocation33_spill] sm:$0xff] %v5911_v48  ;;  %v5923_v37 = vmul.f32 %v5751_v12, %v7422_v60  ;;  %v5927_v59 = vmul.f32 %v5751_v12, %v7424_v35  ;;  %v7426_v20 = vld [vmem:[#allocation46_spill] sm:$0xff]  ;;  %v7428_v48 = vld [vmem:[#allocation47_spill] sm:$0xff] }
 0x3b7   : > { %7419 = vst [vmem:[#allocation34_spill] sm:$0xff] %v5915_v2  ;;  %7421 = vst [vmem:[#allocation35_spill] sm:$0xff] %v5919_v39  ;;  %v5931_v33 = vmul.f32 %v5751_v12, %v7426_v20  ;;  %v5935_v54 = vmul.f32 %v5751_v12, %v7428_v48  ;;  %v7430_v2 = vld [vmem:[#allocation48_spill] sm:$0xff]  ;;  %v7432_v39 = vld [vmem:[#allocation49_spill] sm:$0xff] }
 0x3b8   : > { %7423 = vst [vmem:[#allocation36_spill] sm:$0xff] %v5923_v37  ;;  %7425 = vst [vmem:[#allocation37_spill] sm:$0xff] %v5927_v59  ;;  %v5939_v14 = vmul.f32 %v5751_v12, %v7430_v2  ;;  %v5943_v60 = vmul.f32 %v5751_v12, %v7432_v39  ;;  %v7434_v37 = vld [vmem:[#allocation50_spill] sm:$0xff]  ;;  %v7436_v59 = vld [vmem:[#allocation51_spill] sm:$0xff] }
 0x3b9   : > { %7427 = vst [vmem:[#allocation38_spill] sm:$0xff] %v5931_v33  ;;  %7429 = vst [vmem:[#allocation39_spill] sm:$0xff] %v5935_v54  ;;  %v5947_v35 = vmul.f32 %v5751_v12, %v7434_v37  ;;  %v5951_v20 = vmul.f32 %v5751_v12, %v7436_v59  ;;  %v7438_v33 = vld [vmem:[#allocation52_spill] sm:$0xff]  ;;  %v7440_v54 = vld [vmem:[#allocation53_spill] sm:$0xff] }
 0x3ba   : > { %7431 = vst [vmem:[#allocation40_spill] sm:$0xff] %v5939_v14  ;;  %7433 = vst [vmem:[#allocation41_spill] sm:$0xff] %v5943_v60  ;;  %v5955_v48 = vmul.f32 %v5751_v12, %v7438_v33  ;;  %v5959_v2 = vmul.f32 %v5751_v12, %v7440_v54  ;;  %v7442_v14 = vld [vmem:[#allocation54_spill] sm:$0xff]  ;;  %v7444_v60 = vld [vmem:[#allocation55_spill] sm:$0xff] }
 0x3bb   : > { %7435 = vst [vmem:[#allocation42_spill] sm:$0xff] %v5947_v35  ;;  %7437 = vst [vmem:[#allocation43_spill] sm:$0xff] %v5951_v20  ;;  %v5963_v39 = vmul.f32 %v5751_v12, %v7442_v14  ;;  %v5967_v37 = vmul.f32 %v5751_v12, %v7444_v60  ;;  %v7446_v35 = vld [vmem:[#allocation56_spill] sm:$0xff]  ;;  %v7448_v20 = vld [vmem:[#allocation57_spill] sm:$0xff] }
 0x3bc   : > { %7439 = vst [vmem:[#allocation44_spill] sm:$0xff] %v5955_v48  ;;  %7441 = vst [vmem:[#allocation45_spill] sm:$0xff] %v5959_v2  ;;  %v5971_v59 = vmul.f32 %v5751_v12, %v7446_v35  ;;  %v5975_v33 = vmul.f32 %v5751_v12, %v7448_v20  ;;  %v7450_v48 = vld [vmem:[#allocation58_spill] sm:$0xff]  ;;  %v7452_v2 = vld [vmem:[#allocation59_spill] sm:$0xff] }
 0x3bd   : > { %7443 = vst [vmem:[#allocation46_spill] sm:$0xff] %v5963_v39  ;;  %7445 = vst [vmem:[#allocation47_spill] sm:$0xff] %v5967_v37  ;;  %v5979_v54 = vmul.f32 %v5751_v12, %v7450_v48  ;;  %v5983_v14 = vmul.f32 %v5751_v12, %v7452_v2  ;;  %v7454_v39 = vld [vmem:[#allocation60_spill] sm:$0xff]  ;;  %v7456_v37 = vld [vmem:[#allocation61_spill] sm:$0xff] }
 0x3be   : > { %7447 = vst [vmem:[#allocation48_spill] sm:$0xff] %v5971_v59  ;;  %7449 = vst [vmem:[#allocation49_spill] sm:$0xff] %v5975_v33  ;;  %v5987_v60 = vmul.f32 %v5751_v12, %v7454_v39  ;;  %v5991_v35 = vmul.f32 %v5751_v12, %v7456_v37  ;;  %v7458_v59 = vld [vmem:[#allocation62_spill] sm:$0xff]  ;;  %v7460_v33 = vld [vmem:[#allocation63_spill] sm:$0xff] }
 0x3bf   : > { %7451 = vst [vmem:[#allocation50_spill] sm:$0xff] %v5979_v54  ;;  %7453 = vst [vmem:[#allocation51_spill] sm:$0xff] %v5983_v14  ;;  %v5995_v20 = vmul.f32 %v5751_v12, %v7458_v59  ;;  %v5999_v48 = vmul.f32 %v5751_v12, %v7460_v33  ;;  %v7462_v54 = vld [vmem:[#allocation64_spill] sm:$0xff]  ;;  %v7464_v14 = vld [vmem:[#allocation65_spill] sm:$0xff] }
 0x3c0   : > { %7455 = vst [vmem:[#allocation52_spill] sm:$0xff] %v5987_v60  ;;  %7457 = vst [vmem:[#allocation53_spill] sm:$0xff] %v5991_v35  ;;  %v6003_v2 = vmul.f32 %v5751_v12, %v7462_v54  ;;  %v6007_v39 = vmul.f32 %v5751_v12, %v7464_v14  ;;  %v7466_v60 = vld [vmem:[#allocation66_spill] sm:$0xff]  ;;  %v7468_v35 = vld [vmem:[#allocation68_spill] sm:$0xff] }
 0x3c1   : > { %7459 = vst [vmem:[#allocation54_spill] sm:$0xff] %v5995_v20  ;;  %7461 = vst [vmem:[#allocation55_spill] sm:$0xff] %v5999_v48  ;;  %v6011_v37 = vmul.f32 %v5751_v12, %v7466_v60  ;;  %v6015_v59 = vmul.f32 %v5751_v12, %v7468_v35  ;;  %v7470_v20 = vld [vmem:[#allocation69_spill] sm:$0xff]  ;;  %v7472_v48 = vld [vmem:[#allocation71_spill] sm:$0xff] }
 0x3c2   : > { %7463 = vst [vmem:[#allocation56_spill] sm:$0xff] %v6003_v2  ;;  %7465 = vst [vmem:[#allocation57_spill] sm:$0xff] %v6007_v39  ;;  %v6019_v33 = vmul.f32 %v5751_v12, %v7470_v20  ;;  %v6023_v54 = vmul.f32 %v5751_v12, %v7472_v48  ;;  %v7474_v2 = vld [vmem:[#allocation73_spill] sm:$0xff]  ;;  %v7475_v39 = vld [vmem:[#allocation75_spill] sm:$0xff] }
 0x3c3   : > { %7467 = vst [vmem:[#allocation58_spill] sm:$0xff] %v6011_v37  ;;  %7469 = vst [vmem:[#allocation59_spill] sm:$0xff] %v6015_v59  ;;  %v6027_v14 = vmul.f32 %v5751_v12, %v7474_v2  ;;  %v6031_v60 = vmul.f32 %v5751_v12, %v7475_v39  ;;  %v7477_v37 = vld [vmem:[#allocation77_spill] sm:$0xff]  ;;  %v7479_v59 = vld [vmem:[#allocation79_spill] sm:$0xff]  ;;  %v6051_v39 = vmul.f32 %v5751_v12, %v5241_v31 }
 0x3c4   : > { %7471 = vst [vmem:[#allocation60_spill] sm:$0xff] %v6019_v33  ;;  %7473 = vst [vmem:[#allocation61_spill] sm:$0xff] %v6023_v54  ;;  %v6035_v35 = vmul.f32 %v5751_v12, %v7477_v37  ;;  %v6039_v20 = vmul.f32 %v5751_v12, %v7479_v59  ;;  %v7481_v33 = vld [vmem:[#allocation81_spill] sm:$0xff]  ;;  %v7483_v54 = vld [vmem:[#allocation83_spill] sm:$0xff] }
 0x3c5   : > { %7476 = vst [vmem:[#allocation62_spill] sm:$0xff] %v6031_v60  ;;  %v6043_v48 = vmul.f32 %v5751_v12, %v7481_v33  ;;  %v6047_v2 = vmul.f32 %v5751_v12, %v7483_v54  ;;  %7485 = vst [vmem:[#allocation68_spill] sm:$0xff] %v6051_v39  ;;  %v7486_v60 = vld [vmem:[#allocation85_spill] sm:$0xff]  ;;  %v7496_v39 = vld [vmem:[#allocation95_spill] sm:$0xff] }
 0x3c6   : > { %7478 = vst [vmem:[#allocation63_spill] sm:$0xff] %v6035_v35  ;;  %7480 = vst [vmem:[#allocation64_spill] sm:$0xff] %v6039_v20  ;;  %v6055_v37 = vmul.f32 %v5751_v12, %v7486_v60  ;;  %v7488_v35 = vld [vmem:[#allocation87_spill] sm:$0xff]  ;;  %v7490_v20 = vld [vmem:[#allocation89_spill] sm:$0xff]  ;;  %v6075_v60 = vmul.f32 %v5751_v12, %v7496_v39 }
 0x3c7   : > { %7482 = vst [vmem:[#allocation65_spill] sm:$0xff] %v6043_v48  ;;  %7484 = vst [vmem:[#allocation66_spill] sm:$0xff] %v6047_v2  ;;  %v6059_v59 = vmul.f32 %v5751_v12, %v7488_v35  ;;  %v6063_v33 = vmul.f32 %v5751_v12, %v7490_v20  ;;  %v7492_v48 = vld [vmem:[#allocation91_spill] sm:$0xff]  ;;  %v7494_v2 = vld [vmem:[#allocation93_spill] sm:$0xff] }
 0x3c8   : > { %7487 = vst [vmem:[#allocation69_spill] sm:$0xff] %v6055_v37  ;;  %v6067_v54 = vmul.f32 %v5751_v12, %v7492_v48  ;;  %v6071_v31 = vmul.f32 %v5751_v12, %v7494_v2  ;;  %7497 = vst [vmem:[#allocation79_spill] sm:$0xff] %v6075_v60  ;;  %v7498_v37 = vld [vmem:[#allocation96_spill] sm:$0xff]  ;;  %v7505_v60 = vld [vmem:[#allocation101_spill] sm:$0xff] }
 0x3c9   : > { %7489 = vst [vmem:[#allocation71_spill] sm:$0xff] %v6059_v59  ;;  %7491 = vst [vmem:[#allocation73_spill] sm:$0xff] %v6063_v33  ;;  %v6079_v35 = vmul.f32 %v5751_v12, %v7498_v37  ;;  %v7500_v59 = vld [vmem:[#allocation97_spill] sm:$0xff]  ;;  %v7501_v33 = vld [vmem:[#allocation98_spill] sm:$0xff]  ;;  %v6099_v37 = vmul.f32 %v5751_v12, %v7505_v60  ;;  %v6119_v60 = vmul.f32 %v5751_v12, %v5343_v63 }
 0x3ca   : > { %7493 = vst [vmem:[#allocation75_spill] sm:$0xff] %v6067_v54  ;;  %7495 = vst [vmem:[#allocation77_spill] sm:$0xff] %v6071_v31  ;;  %v6083_v20 = vmul.f32 %v5751_v12, %v7500_v59  ;;  %v6087_v48 = vmul.f32 %v5751_v12, %v7501_v33  ;;  %v7503_v54 = vld [vmem:[#allocation99_spill] sm:$0xff]  ;;  %v7504_v31 = vld [vmem:[#allocation100_spill] sm:$0xff]  ;;  %v6107_v33 = vmul.f32 %v5751_v12, %v5325_v9 }
 0x3cb   : > { %7499 = vst [vmem:[#allocation81_spill] sm:$0xff] %v6079_v35  ;;  %v6091_v2 = vmul.f32 %v5751_v12, %v7503_v54  ;;  %v6095_v39 = vmul.f32 %v5751_v12, %v7504_v31  ;;  %v7506_v35 = vld [vmem:[#allocation102_spill] sm:$0xff]  ;;  %v6115_v31 = vmul.f32 %v5751_v12, %v5337_v7  ;;  %v6127_v9 = vmul.f32 %v5751_v12, %v5355_v23 }
 0x3cc   : > { %7502 = vst [vmem:[#allocation83_spill] sm:$0xff] %v6087_v48  ;;  %v6103_v59 = vmul.f32 %v5751_v12, %v7506_v35  ;;  %v7507_v48 = vld [vmem:[#allocation103_spill] sm:$0xff]  ;;  %v6123_v35 = vmul.f32 %v5751_v12, %v5349_v21  ;;  %v6135_v7 = vmul.f32 %v5751_v12, %v5367_v0  ;;  %v6139_v63 = vmul.f32 %v5751_v12, %v5373_v15 }
 0x3cd   : > { %v6111_v54 = vmul.f32 %v5751_v12, %v7507_v48  ;;  %v6131_v48 = vmul.f32 %v5751_v12, %v5361_v55  ;;  %v6143_v21 = vmul.f32 %v5751_v12, %v5379_v3  ;;  %v6147_v23 = vmul.f32 %v5751_v12, %v5385_v46 }
 0x3ce   : > { %v6151_v55 = vmul.f32 %v5751_v12, %v5391_v52  ;;  %v6155_v0 = vmul.f32 %v5751_v12, %v5397_v61  ;;  %v6159_v15 = vmul.f32 %v5751_v12, %v5403_v27  ;;  %v6163_v3 = vmul.f32 %v5751_v12, %v5409_v47 }
 0x3cf   : > { %v6167_v46 = vmul.f32 %v5751_v12, %v5415_v8  ;;  %v6171_v52 = vmul.f32 %v5751_v12, %v5421_v43  ;;  %v6175_v61 = vmul.f32 %v5751_v12, %v5427_v28  ;;  %v6179_v27 = vmul.f32 %v5751_v12, %v5433_v36 }
 0x3d0   : > { %v6183_v47 = vmul.f32 %v5751_v12, %v5439_v18  ;;  %v6187_v8 = vmul.f32 %v5751_v12, %v5445_v58  ;;  %v6191_v43 = vmul.f32 %v5751_v12, %v5451_v32  ;;  %v6195_v28 = vmul.f32 %v5751_v12, %v5457_v1 }
 0x3d1   : > { %v6199_v36 = vmul.f32 %v5751_v12, %v5463_v49  ;;  %v6203_v18 = vmul.f32 %v5751_v12, %v5469_v41  ;;  %v6207_v58 = vmul.f32 %v5751_v12, %v5475_v44  ;;  %v6211_v32 = vmul.f32 %v5751_v12, %v5481_v24 }
 0x3d2   : > { %v6215_v1 = vmul.f32 %v5751_v12, %v5487_v6  ;;  %v6219_v49 = vmul.f32 %v5751_v12, %v5493_v53  ;;  %v6223_v41 = vmul.f32 %v5751_v12, %v5499_v25  ;;  %v6227_v44 = vmul.f32 %v5751_v12, %v5505_v13 }
 0x3d3   : > { %7508 = vst [vmem:[#allocation85_spill] sm:$0xff] %v6211_v32  ;;  %v6231_v24 = vmul.f32 %v5751_v12, %v5511_v4  ;;  %v7514_v32 = vld [vmem:[#allocation104_spill] sm:$0xff] }
 0x3d4   : > { %7509 = vst [vmem:[#allocation87_spill] sm:$0xff] %v6215_v1  ;;  %7510 = vst [vmem:[#allocation89_spill] sm:$0xff] %v6219_v49  ;;  %v6235_v6 = vmul.f32 %v5751_v12, %v7514_v32  ;;  %v7516_v1 = vld [vmem:[#allocation105_spill] sm:$0xff]  ;;  %v7518_v49 = vld [vmem:[#allocation106_spill] sm:$0xff] }
 0x3d5   : > { %7511 = vst [vmem:[#allocation91_spill] sm:$0xff] %v6223_v41  ;;  %7512 = vst [vmem:[#allocation93_spill] sm:$0xff] %v6227_v44  ;;  %v6239_v53 = vmul.f32 %v5751_v12, %v7516_v1  ;;  %v6243_v25 = vmul.f32 %v5751_v12, %v7518_v49  ;;  %v7520_v41 = vld [vmem:[#allocation107_spill] sm:$0xff]  ;;  %v7522_v44 = vld [vmem:[#allocation108_spill] sm:$0xff] }
 0x3d6   : > { %7513 = vst [vmem:[#allocation95_spill] sm:$0xff] %v6231_v24  ;;  %7515 = vst [vmem:[#allocation96_spill] sm:$0xff] %v6235_v6  ;;  %v6247_v13 = vmul.f32 %v5751_v12, %v7520_v41  ;;  %v6251_v4 = vmul.f32 %v5751_v12, %v7522_v44  ;;  %v7524_v24 = vld [vmem:[#allocation109_spill] sm:$0xff]  ;;  %v7526_v6 = vld [vmem:[#allocation110_spill] sm:$0xff] }
 0x3d7   : > { %7517 = vst [vmem:[#allocation97_spill] sm:$0xff] %v6239_v53  ;;  %7519 = vst [vmem:[#allocation98_spill] sm:$0xff] %v6243_v25  ;;  %v6255_v32 = vmul.f32 %v5751_v12, %v7524_v24  ;;  %v6259_v1 = vmul.f32 %v5751_v12, %v7526_v6  ;;  %v7527_v53 = vld [vmem:[#allocation111_spill] sm:$0xff]  ;;  %v7529_v25 = vld [vmem:[#allocation112_spill] sm:$0xff] }
 0x3d8   : > { %7521 = vst [vmem:[#allocation99_spill] sm:$0xff] %v6247_v13  ;;  %7523 = vst [vmem:[#allocation100_spill] sm:$0xff] %v6251_v4  ;;  %v6263_v49 = vmul.f32 %v5751_v12, %v7527_v53  ;;  %v6267_v41 = vmul.f32 %v5751_v12, %v7529_v25  ;;  %v7530_v13 = vld [vmem:[#allocation113_spill] sm:$0xff]  ;;  %v7532_v4 = vld [vmem:[#allocation114_spill] sm:$0xff]  ;;  %v6283_v53 = vmul.f32 %v5751_v12, %v5589_v22 }
 0x3d9   : > { %7525 = vst [vmem:[#allocation101_spill] sm:$0xff] %v6255_v32  ;;  %v6271_v44 = vmul.f32 %v5751_v12, %v7530_v13  ;;  %v6275_v24 = vmul.f32 %v5751_v12, %v7532_v4  ;;  %v7533_v32 = vld [vmem:[#allocation67_spill] sm:$0xff]  ;;  %v6291_v13 = vmul.f32 %v5751_v12, %v5601_v62  ;;  %v6303_v22 = vmul.f32 %v5751_v12, %v5619_v17 }
 0x3da   : > { %7528 = vst [vmem:[#allocation102_spill] sm:$0xff] %v6263_v49  ;;  %v6279_v6 = vmul.f32 %v5751_v12, %v7533_v32  ;;  %v7534_v49 = vld [vmem:[#allocation72_spill] sm:$0xff]  ;;  %v6299_v32 = vmul.f32 %v5751_v12, %v5613_v51  ;;  %v6311_v62 = vmul.f32 %v5751_v12, %v5631_v5  ;;  %v6319_v51 = vmul.f32 %v5751_v12, %v5643_v16 }
 0x3db   : > { %7531 = vst [vmem:[#allocation103_spill] sm:$0xff] %v6271_v44  ;;  %v6287_v25 = vmul.f32 %v5751_v12, %v7534_v49  ;;  %v7535_v44 = vld [vmem:[#allocation70_spill] sm:$0xff]  ;;  %v6307_v49 = vmul.f32 %v5751_v12, %v5625_v30  ;;  %v6323_v17 = vmul.f32 %v5751_v12, %v5649_v29  ;;  %v6327_v30 = vmul.f32 %v5751_v12, %v5655_v50 }
 0x3dc   : > { %v6295_v4 = vmul.f32 %v5751_v12, %v7535_v44  ;;  %7537 = vst [vmem:[#allocation105_spill] sm:$0xff] %v6311_v62  ;;  %v6315_v44 = vmul.f32 %v5751_v12, %v5637_v42  ;;  %7539 = vst [vmem:[#allocation107_spill] sm:$0xff] %v6319_v51  ;;  %v6331_v5 = vmul.f32 %v5751_v12, %v5661_v10  ;;  %v7543_v62 = vld [vmem:[#allocation76_spill] sm:$0xff] }
 0x3dd   : > { %7536 = vst [vmem:[#allocation104_spill] sm:$0xff] %v6307_v49  ;;  %7540 = vst [vmem:[#allocation108_spill] sm:$0xff] %v6323_v17  ;;  %v6335_v42 = vmul.f32 %v5751_v12, %v7543_v62  ;;  %v7547_v51 = vld [vmem:[#allocation80_spill] sm:$0xff]  ;;  %v7549_v17 = vld [vmem:[#allocation78_spill] sm:$0xff] }
 0x3de   : > { %7538 = vst [vmem:[#allocation106_spill] sm:$0xff] %v6315_v44  ;;  %7541 = vst [vmem:[#allocation109_spill] sm:$0xff] %v6327_v30  ;;  %v7545_v44 = vld [vmem:[#allocation74_spill] sm:$0xff]  ;;  %v6343_v29 = vmul.f32 %v5751_v12, %v7547_v51  ;;  %v6347_v50 = vmul.f32 %v5751_v12, %v7549_v17  ;;  %v7551_v30 = vld [vmem:[#allocation84_spill] sm:$0xff]  ;;  %v6363_v51 = vmul.f32 %v5751_v12, %v5709_v45 }
 0x3df   : > { %7542 = vst [vmem:[#allocation110_spill] sm:$0xff] %v6331_v5  ;;  %7544 = vst [vmem:[#allocation111_spill] sm:$0xff] %v6335_v42  ;;  %v6339_v16 = vmul.f32 %v5751_v12, %v7545_v44  ;;  %v6351_v10 = vmul.f32 %v5751_v12, %v7551_v30  ;;  %v7553_v5 = vld [vmem:[#allocation82_spill] sm:$0xff]  ;;  %v7555_v42 = vld [vmem:[#allocation88_spill] sm:$0xff] }
 0x3e0   : > { %7548 = vst [vmem:[#allocation113_spill] sm:$0xff] %v6343_v29  ;;  %7550 = vst [vmem:[#allocation114_spill] sm:$0xff] %v6347_v50  ;;  %v6355_v62 = vmul.f32 %v5751_v12, %v7553_v5  ;;  %v6359_v44 = vmul.f32 %v5751_v12, %v7555_v42  ;;  %v7558_v29 = vld [vmem:[#allocation86_spill] sm:$0xff]  ;;  %v7560_v50 = vld [vmem:[#allocation92_spill] sm:$0xff] }
 0x3e1   : > { %7546 = vst [vmem:[#allocation112_spill] sm:$0xff] %v6339_v16  ;;  %7552 = vst [vmem:[#allocation67_spill] sm:$0xff] %v6351_v10  ;;  %v6367_v17 = vmul.f32 %v5751_v12, %v7558_v29  ;;  %v6371_v30 = vmul.f32 %v5751_v12, %v7560_v50  ;;  %v7562_v10 = vld [vmem:[#allocation90_spill] sm:$0xff]  ;;  %v7566_v29 = vld [vmem:[#allocation116_spill] sm:$0xff] }
 0x3e2   : > { %7554 = vst [vmem:[#allocation72_spill] sm:$0xff] %v6355_v62  ;;  %7556 = vst [vmem:[#allocation70_spill] sm:$0xff] %v6359_v44  ;;  %v6375_v5 = vmul.f32 %v5751_v12, %v7562_v10  ;;  %v7564_v45 = vld [vmem:[#allocation94_spill] sm:$0xff]  ;;  %v7568_v50 = vld [vmem:[#allocation117_spill] sm:$0xff] }
 0x3e3   : > { %7557 = vst [vmem:[#allocation76_spill] sm:$0xff] %v6363_v51  ;;  %7559 = vst [vmem:[#allocation74_spill] sm:$0xff] %v6367_v17  ;;  %v6386_v42 = vmul.f32 %v5751_v12, %v7564_v45  ;;  %v6390_v17 = vmul.f32 %v5751_v12, %v7566_v29  ;;  %v6394_v10 = vmul.f32 %v5751_v12, %v7568_v50  ;;  %v2531_v29 = vmax.f32 %v5755_v56, 0.0  ;;  %v7579_v44 = vld [vmem:[#allocation5_spill] sm:$0xff]  ;;  %v7580_v62 = vld [vmem:[#allocation6_spill] sm:$0xff] }
 0x3e4   : > { %7561 = vst [vmem:[#allocation80_spill] sm:$0xff] %v6371_v30  ;;  %7563 = vst [vmem:[#allocation78_spill] sm:$0xff] %v6375_v5  ;;  %v7570_v5 = vld [vmem:[#allocation118_spill] sm:$0xff]  ;;  %v6402_v51 = vmul.f32 %v5751_v12, %v4794_v40  ;;  %v6406_v45 = vmul.f32 %v5751_v12, %v7343_v38  ;;  %v2533_v50 = vmax.f32 %v5763_v57, 0.0  ;;  %v2536_v40 = vmax.f32 %v5775_v26, 0.0  ;;  %v7578_v57 = vld [vmem:[#allocation4_spill] sm:$0xff] }
 0x3e5   : > { %7565 = vst [vmem:[#allocation84_spill] sm:$0xff] %v6386_v42  ;;  %7567 = vst [vmem:[#allocation82_spill] sm:$0xff] %v6390_v17  ;;  %v6398_v30 = vmul.f32 %v5751_v12, %v7570_v5  ;;  %v2532_v17 = vmax.f32 %v5759_v19, 0.0  ;;  %v2534_v5 = vmax.f32 %v5767_v34, 0.0  ;;  %v7575_v12 = vld [vmem:[#allocation119_spill] sm:$0xff]  ;;  %v7577_v42 = vld [vmem:[#allocation2_spill] sm:$0xff] }
 0x3e6   : > { %7569 = vst [vmem:[#allocation88_spill] sm:$0xff] %v6394_v10  ;;  %7572 = vst [vmem:[#allocation92_spill] sm:$0xff] %v6402_v51  ;;  %v7574_v51 = vld [vmem:[#allocation115_spill] sm:$0xff]  ;;  %v2538_v38 = vmax.f32 %v7575_v12, 0.0  ;;  %v2540_v19 = vmax.f32 %v7577_v42, 0.0  ;;  %v2541_v34 = vmax.f32 %v7578_v57, 0.0 }
 0x3e7   : > { %7571 = vst [vmem:[#allocation86_spill] sm:$0xff] %v6398_v30  ;;  %7573 = vst [vmem:[#allocation90_spill] sm:$0xff] %v6406_v45  ;;  %v2535_v30 = vmax.f32 %v5771_v11, 0.0  ;;  %v2537_v10 = vmax.f32 %v7574_v51, 0.0  ;;  %v7576_v45 = vld [vmem:[#allocation3_spill] sm:$0xff]  ;;  %v2542_v11 = vmax.f32 %v7579_v44, 0.0 }
 0x3e8   : > { %v2539_v56 = vmax.f32 %v7576_v45, 0.0  ;;  %2693 = vst [vmem:[%s6382_s30] sm:$0xff] %v2531_v29  ;;  %2694 = vst [vmem:[%s6382_s30 + $0x8] sm:$0xff] %v2532_v17  ;;  %v2543_v26 = vmax.f32 %v7580_v62, 0.0  ;;  %v7581_v16 = vld [vmem:[#allocation7_spill] sm:$0xff]  ;;  %v7582_v42 = vld [vmem:[#allocation8_spill] sm:$0xff] }
 0x3e9   : > { %v2544_v51 = vmax.f32 %v7581_v16, 0.0  ;;  %2695 = vst [vmem:[%s6382_s30 + $0x10] sm:$0xff] %v2533_v50  ;;  %2696 = vst [vmem:[%s6382_s30 + $0x18] sm:$0xff] %v2534_v5  ;;  %v2545_v45 = vmax.f32 %v7582_v42, 0.0  ;;  %v7583_v17 = vld [vmem:[#allocation9_spill] sm:$0xff]  ;;  %v7584_v12 = vld [vmem:[#allocation10_spill] sm:$0xff] }
 0x3ea   : > { %2697 = vst [vmem:[%s6382_s30 + $0x20] sm:$0xff] %v2535_v30  ;;  %2698 = vst [vmem:[%s6382_s30 + $0x28] sm:$0xff] %v2536_v40  ;;  %v2546_v29 = vmax.f32 %v7583_v17, 0.0  ;;  %v2547_v57 = vmax.f32 %v7584_v12, 0.0  ;;  %v7585_v49 = vld [vmem:[#allocation11_spill] sm:$0xff]  ;;  %v7586_v16 = vld [vmem:[#allocation12_spill] sm:$0xff] }
 0x3eb   : > { %v2548_v44 = vmax.f32 %v7585_v49, 0.0  ;;  %2699 = vst [vmem:[%s6382_s30 + $0x30] sm:$0xff] %v2537_v10  ;;  %2700 = vst [vmem:[%s6382_s30 + $0x38] sm:$0xff] %v2538_v38  ;;  %v2549_v62 = vmax.f32 %v7586_v16, 0.0  ;;  %v7587_v30 = vld [vmem:[#allocation13_spill] sm:$0xff]  ;;  %v7588_v5 = vld [vmem:[#allocation14_spill] sm:$0xff] }
 0x3ec   : > { %2701 = vst [vmem:[%s6382_s30 + $0x40] sm:$0xff] %v2539_v56  ;;  %2702 = vst [vmem:[%s6382_s30 + $0x48] sm:$0xff] %v2540_v19  ;;  %v2550_v50 = vmax.f32 %v7587_v30, 0.0  ;;  %v2551_v40 = vmax.f32 %v7588_v5, 0.0  ;;  %v7589_v42 = vld [vmem:[#allocation15_spill] sm:$0xff]  ;;  %v7590_v49 = vld [vmem:[#allocation16_spill] sm:$0xff] }
 0x3ed   : > { %v2552_v17 = vmax.f32 %v7589_v42, 0.0  ;;  %2703 = vst [vmem:[%s6382_s30 + $0x50] sm:$0xff] %v2541_v34  ;;  %2704 = vst [vmem:[%s6382_s30 + $0x58] sm:$0xff] %v2542_v11  ;;  %v2553_v10 = vmax.f32 %v7590_v49, 0.0  ;;  %v7591_v38 = vld [vmem:[#allocation17_spill] sm:$0xff]  ;;  %v7592_v19 = vld [vmem:[#allocation18_spill] sm:$0xff] }
 0x3ee   : > { %2705 = vst [vmem:[%s6382_s30 + $0x60] sm:$0xff] %v2543_v26  ;;  %2706 = vst [vmem:[%s6382_s30 + $0x68] sm:$0xff] %v2544_v51  ;;  %v2554_v56 = vmax.f32 %v7591_v38, 0.0  ;;  %v2555_v12 = vmax.f32 %v7592_v19, 0.0  ;;  %v7593_v16 = vld [vmem:[#allocation19_spill] sm:$0xff]  ;;  %v7594_v34 = vld [vmem:[#allocation20_spill] sm:$0xff] }
 0x3ef   : > { %v2556_v30 = vmax.f32 %v7593_v16, 0.0  ;;  %2707 = vst [vmem:[%s6382_s30 + $0x70] sm:$0xff] %v2545_v45  ;;  %2708 = vst [vmem:[%s6382_s30 + $0x78] sm:$0xff] %v2546_v29  ;;  %v2557_v11 = vmax.f32 %v7594_v34, 0.0  ;;  %v7595_v26 = vld [vmem:[#allocation21_spill] sm:$0xff]  ;;  %v7596_v5 = vld [vmem:[#allocation22_spill] sm:$0xff] }
 0x3f0   : > { %2709 = vst [vmem:[%s6382_s30 + $0x80] sm:$0xff] %v2547_v57  ;;  %2710 = vst [vmem:[%s6382_s30 + $0x88] sm:$0xff] %v2548_v44  ;;  %v2558_v51 = vmax.f32 %v7595_v26, 0.0  ;;  %v2559_v42 = vmax.f32 %v7596_v5, 0.0  ;;  %v7597_v49 = vld [vmem:[#allocation23_spill] sm:$0xff]  ;;  %v7598_v45 = vld [vmem:[#allocation24_spill] sm:$0xff] }
 0x3f1   : > { %v2560_v38 = vmax.f32 %v7597_v49, 0.0  ;;  %2711 = vst [vmem:[%s6382_s30 + $0x90] sm:$0xff] %v2549_v62  ;;  %2712 = vst [vmem:[%s6382_s30 + $0x98] sm:$0xff] %v2550_v50  ;;  %v2561_v29 = vmax.f32 %v7598_v45, 0.0  ;;  %v7599_v57 = vld [vmem:[#allocation25_spill] sm:$0xff]  ;;  %v7600_v19 = vld [vmem:[#allocation26_spill] sm:$0xff] }
 0x3f2   : > { %2713 = vst [vmem:[%s6382_s30 + $0xa0] sm:$0xff] %v2551_v40  ;;  %2714 = vst [vmem:[%s6382_s30 + $0xa8] sm:$0xff] %v2552_v17  ;;  %v2562_v44 = vmax.f32 %v7599_v57, 0.0  ;;  %v2563_v16 = vmax.f32 %v7600_v19, 0.0  ;;  %v7601_v34 = vld [vmem:[#allocation27_spill] sm:$0xff]  ;;  %v7602_v62 = vld [vmem:[#allocation28_spill] sm:$0xff] }
 0x3f3   : > { %v2564_v26 = vmax.f32 %v7601_v34, 0.0  ;;  %2715 = vst [vmem:[%s6382_s30 + $0xb0] sm:$0xff] %v2553_v10  ;;  %2716 = vst [vmem:[%s6382_s30 + $0xb8] sm:$0xff] %v2554_v56  ;;  %v2565_v50 = vmax.f32 %v7602_v62, 0.0  ;;  %v7603_v40 = vld [vmem:[#allocation29_spill] sm:$0xff]  ;;  %v7604_v5 = vld [vmem:[#allocation30_spill] sm:$0xff] }
 0x3f4   : > { %2717 = vst [vmem:[%s6382_s30 + $0xc0] sm:$0xff] %v2555_v12  ;;  %2718 = vst [vmem:[%s6382_s30 + $0xc8] sm:$0xff] %v2556_v30  ;;  %v2566_v17 = vmax.f32 %v7603_v40, 0.0  ;;  %v2567_v49 = vmax.f32 %v7604_v5, 0.0  ;;  %v7605_v45 = vld [vmem:[#allocation31_spill] sm:$0xff]  ;;  %v7606_v10 = vld [vmem:[#allocation32_spill] sm:$0xff] }
 0x3f5   : > { %v2568_v57 = vmax.f32 %v7605_v45, 0.0  ;;  %2719 = vst [vmem:[%s6382_s30 + $0xd0] sm:$0xff] %v2557_v11  ;;  %2720 = vst [vmem:[%s6382_s30 + $0xd8] sm:$0xff] %v2558_v51  ;;  %v2569_v56 = vmax.f32 %v7606_v10, 0.0  ;;  %v7607_v12 = vld [vmem:[#allocation33_spill] sm:$0xff]  ;;  %v7608_v19 = vld [vmem:[#allocation34_spill] sm:$0xff] }
 0x3f6   : > { %2721 = vst [vmem:[%s6382_s30 + $0xe0] sm:$0xff] %v2559_v42  ;;  %2722 = vst [vmem:[%s6382_s30 + $0xe8] sm:$0xff] %v2560_v38  ;;  %v2570_v30 = vmax.f32 %v7607_v12, 0.0  ;;  %v2571_v34 = vmax.f32 %v7608_v19, 0.0  ;;  %v7609_v62 = vld [vmem:[#allocation35_spill] sm:$0xff]  ;;  %v7610_v11 = vld [vmem:[#allocation36_spill] sm:$0xff] }
 0x3f7   : > { %v2572_v40 = vmax.f32 %v7609_v62, 0.0  ;;  %2723 = vst [vmem:[%s6382_s30 + $0xf0] sm:$0xff] %v2561_v29  ;;  %2724 = vst [vmem:[%s6382_s30 + $0xf8] sm:$0xff] %v2562_v44  ;;  %v2573_v51 = vmax.f32 %v7610_v11, 0.0  ;;  %v7611_v42 = vld [vmem:[#allocation37_spill] sm:$0xff]  ;;  %v7612_v5 = vld [vmem:[#allocation38_spill] sm:$0xff] }
 0x3f8   : > { %2725 = vst [vmem:[%s6382_s30 + $0x100] sm:$0xff] %v2563_v16  ;;  %2726 = vst [vmem:[%s6382_s30 + $0x108] sm:$0xff] %v2564_v26  ;;  %v2574_v38 = vmax.f32 %v7611_v42, 0.0  ;;  %v2575_v45 = vmax.f32 %v7612_v5, 0.0  ;;  %v7613_v10 = vld [vmem:[#allocation39_spill] sm:$0xff]  ;;  %v7614_v29 = vld [vmem:[#allocation40_spill] sm:$0xff] }
 0x3f9   : > { %v2576_v12 = vmax.f32 %v7613_v10, 0.0  ;;  %2727 = vst [vmem:[%s6382_s30 + $0x110] sm:$0xff] %v2565_v50  ;;  %2728 = vst [vmem:[%s6382_s30 + $0x118] sm:$0xff] %v2566_v17  ;;  %v2577_v44 = vmax.f32 %v7614_v29, 0.0  ;;  %v7615_v16 = vld [vmem:[#allocation41_spill] sm:$0xff]  ;;  %v7616_v19 = vld [vmem:[#allocation42_spill] sm:$0xff] }
 0x3fa   : > { %2729 = vst [vmem:[%s6382_s30 + $0x120] sm:$0xff] %v2567_v49  ;;  %2730 = vst [vmem:[%s6382_s30 + $0x128] sm:$0xff] %v2568_v57  ;;  %v2578_v26 = vmax.f32 %v7615_v16, 0.0  ;;  %v2579_v62 = vmax.f32 %v7616_v19, 0.0  ;;  %v7617_v11 = vld [vmem:[#allocation43_spill] sm:$0xff]  ;;  %v7618_v50 = vld [vmem:[#allocation44_spill] sm:$0xff] }
 0x3fb   : > { %v2580_v42 = vmax.f32 %v7617_v11, 0.0  ;;  %2731 = vst [vmem:[%s6382_s30 + $0x130] sm:$0xff] %v2569_v56  ;;  %2732 = vst [vmem:[%s6382_s30 + $0x138] sm:$0xff] %v2570_v30  ;;  %v2581_v17 = vmax.f32 %v7618_v50, 0.0  ;;  %v7619_v49 = vld [vmem:[#allocation45_spill] sm:$0xff]  ;;  %v7620_v5 = vld [vmem:[#allocation46_spill] sm:$0xff] }
 0x3fc   : > { %2733 = vst [vmem:[%s6382_s30 + $0x140] sm:$0xff] %v2571_v34  ;;  %2734 = vst [vmem:[%s6382_s30 + $0x148] sm:$0xff] %v2572_v40  ;;  %v2582_v57 = vmax.f32 %v7619_v49, 0.0  ;;  %v2583_v10 = vmax.f32 %v7620_v5, 0.0  ;;  %v7621_v29 = vld [vmem:[#allocation47_spill] sm:$0xff]  ;;  %v7622_v56 = vld [vmem:[#allocation48_spill] sm:$0xff] }
 0x3fd   : > { %v2584_v16 = vmax.f32 %v7621_v29, 0.0  ;;  %2735 = vst [vmem:[%s6382_s30 + $0x150] sm:$0xff] %v2573_v51  ;;  %2736 = vst [vmem:[%s6382_s30 + $0x158] sm:$0xff] %v2574_v38  ;;  %v2585_v30 = vmax.f32 %v7622_v56, 0.0  ;;  %v7623_v34 = vld [vmem:[#allocation49_spill] sm:$0xff]  ;;  %v7624_v19 = vld [vmem:[#allocation50_spill] sm:$0xff] }
 0x3fe   : > { %2737 = vst [vmem:[%s6382_s30 + $0x160] sm:$0xff] %v2575_v45  ;;  %2738 = vst [vmem:[%s6382_s30 + $0x168] sm:$0xff] %v2576_v12  ;;  %v2586_v40 = vmax.f32 %v7623_v34, 0.0  ;;  %v2587_v11 = vmax.f32 %v7624_v19, 0.0  ;;  %v7625_v50 = vld [vmem:[#allocation51_spill] sm:$0xff]  ;;  %v7626_v51 = vld [vmem:[#allocation52_spill] sm:$0xff] }
 0x3ff   : > { %v2588_v49 = vmax.f32 %v7625_v50, 0.0  ;;  %2739 = vst [vmem:[%s6382_s30 + $0x170] sm:$0xff] %v2577_v44  ;;  %2740 = vst [vmem:[%s6382_s30 + $0x178] sm:$0xff] %v2578_v26  ;;  %v2589_v38 = vmax.f32 %v7626_v51, 0.0  ;;  %v7627_v45 = vld [vmem:[#allocation53_spill] sm:$0xff]  ;;  %v7628_v5 = vld [vmem:[#allocation54_spill] sm:$0xff] }
 0x400   : > { %2741 = vst [vmem:[%s6382_s30 + $0x180] sm:$0xff] %v2579_v62  ;;  %2742 = vst [vmem:[%s6382_s30 + $0x188] sm:$0xff] %v2580_v42  ;;  %v2590_v12 = vmax.f32 %v7627_v45, 0.0  ;;  %v2591_v29 = vmax.f32 %v7628_v5, 0.0  ;;  %v7629_v56 = vld [vmem:[#allocation55_spill] sm:$0xff]  ;;  %v7630_v44 = vld [vmem:[#allocation56_spill] sm:$0xff] }
 0x401   : > { %v2592_v34 = vmax.f32 %v7629_v56, 0.0  ;;  %2743 = vst [vmem:[%s6382_s30 + $0x190] sm:$0xff] %v2581_v17  ;;  %2744 = vst [vmem:[%s6382_s30 + $0x198] sm:$0xff] %v2582_v57  ;;  %v2593_v26 = vmax.f32 %v7630_v44, 0.0  ;;  %v7631_v62 = vld [vmem:[#allocation57_spill] sm:$0xff]  ;;  %v7632_v19 = vld [vmem:[#allocation58_spill] sm:$0xff] }
 0x402   : > { %2745 = vst [vmem:[%s6382_s30 + $0x1a0] sm:$0xff] %v2583_v10  ;;  %2746 = vst [vmem:[%s6382_s30 + $0x1a8] sm:$0xff] %v2584_v16  ;;  %v2594_v42 = vmax.f32 %v7631_v62, 0.0  ;;  %v2595_v50 = vmax.f32 %v7632_v19, 0.0  ;;  %v7633_v51 = vld [vmem:[#allocation59_spill] sm:$0xff]  ;;  %v7634_v17 = vld [vmem:[#allocation60_spill] sm:$0xff] }
 0x403   : > { %v2596_v45 = vmax.f32 %v7633_v51, 0.0  ;;  %2747 = vst [vmem:[%s6382_s30 + $0x1b0] sm:$0xff] %v2585_v30  ;;  %2748 = vst [vmem:[%s6382_s30 + $0x1b8] sm:$0xff] %v2586_v40  ;;  %v2597_v57 = vmax.f32 %v7634_v17, 0.0  ;;  %v7635_v10 = vld [vmem:[#allocation61_spill] sm:$0xff]  ;;  %v2599_v5 = vmax.f32 %v6027_v14, 0.0 }
 0x404   : > { %2749 = vst [vmem:[%s6382_s30 + $0x1c0] sm:$0xff] %v2587_v11  ;;  %2750 = vst [vmem:[%s6382_s30 + $0x1c8] sm:$0xff] %v2588_v49  ;;  %v2598_v16 = vmax.f32 %v7635_v10, 0.0  ;;  %v7636_v56 = vld [vmem:[#allocation62_spill] sm:$0xff]  ;;  %v7637_v30 = vld [vmem:[#allocation63_spill] sm:$0xff] }
 0x405   : > { %v2600_v44 = vmax.f32 %v7636_v56, 0.0  ;;  %2751 = vst [vmem:[%s6382_s30 + $0x1d0] sm:$0xff] %v2589_v38  ;;  %2752 = vst [vmem:[%s6382_s30 + $0x1d8] sm:$0xff] %v2590_v12  ;;  %v2601_v40 = vmax.f32 %v7637_v30, 0.0  ;;  %v7638_v11 = vld [vmem:[#allocation64_spill] sm:$0xff]  ;;  %v7639_v62 = vld [vmem:[#allocation65_spill] sm:$0xff] }
 0x406   : > { %2753 = vst [vmem:[%s6382_s30 + $0x1e0] sm:$0xff] %v2591_v29  ;;  %2754 = vst [vmem:[%s6382_s30 + $0x1e8] sm:$0xff] %v2592_v34  ;;  %v2602_v49 = vmax.f32 %v7638_v11, 0.0  ;;  %v2603_v19 = vmax.f32 %v7639_v62, 0.0  ;;  %v7640_v51 = vld [vmem:[#allocation66_spill] sm:$0xff]  ;;  %v7641_v14 = vld [vmem:[#allocation68_spill] sm:$0xff] }
 0x407   : > { %v2604_v17 = vmax.f32 %v7640_v51, 0.0  ;;  %2755 = vst [vmem:[%s6382_s30 + $0x1f0] sm:$0xff] %v2593_v26  ;;  %2756 = vst [vmem:[%s6382_s30 + $0x1f8] sm:$0xff] %v2594_v42  ;;  %v2605_v38 = vmax.f32 %v7641_v14, 0.0  ;;  %v7642_v12 = vld [vmem:[#allocation69_spill] sm:$0xff]  ;;  %v7643_v34 = vld [vmem:[#allocation71_spill] sm:$0xff] }
 0x408   : > { %2757 = vst [vmem:[%s6382_s30 + $0x200] sm:$0xff] %v2595_v50  ;;  %2758 = vst [vmem:[%s6382_s30 + $0x208] sm:$0xff] %v2596_v45  ;;  %v2606_v29 = vmax.f32 %v7642_v12, 0.0  ;;  %v2607_v10 = vmax.f32 %v7643_v34, 0.0  ;;  %v7644_v56 = vld [vmem:[#allocation73_spill] sm:$0xff]  ;;  %v7645_v26 = vld [vmem:[#allocation75_spill] sm:$0xff] }
 0x409   : > { %v2608_v30 = vmax.f32 %v7644_v56, 0.0  ;;  %2759 = vst [vmem:[%s6382_s30 + $0x210] sm:$0xff] %v2597_v57  ;;  %2760 = vst [vmem:[%s6382_s30 + $0x218] sm:$0xff] %v2598_v16  ;;  %v2609_v42 = vmax.f32 %v7645_v26, 0.0  ;;  %v7646_v50 = vld [vmem:[#allocation77_spill] sm:$0xff]  ;;  %v7647_v11 = vld [vmem:[#allocation79_spill] sm:$0xff] }
 0x40a   : > { %2761 = vst [vmem:[%s6382_s30 + $0x220] sm:$0xff] %v2599_v5  ;;  %2762 = vst [vmem:[%s6382_s30 + $0x228] sm:$0xff] %v2600_v44  ;;  %v2610_v45 = vmax.f32 %v7646_v50, 0.0  ;;  %v2611_v62 = vmax.f32 %v7647_v11, 0.0  ;;  %v7648_v51 = vld [vmem:[#allocation81_spill] sm:$0xff]  ;;  %v2613_v57 = vmax.f32 %v6083_v20, 0.0 }
 0x40b   : > { %v2612_v14 = vmax.f32 %v7648_v51, 0.0  ;;  %2763 = vst [vmem:[%s6382_s30 + $0x230] sm:$0xff] %v2601_v40  ;;  %2764 = vst [vmem:[%s6382_s30 + $0x238] sm:$0xff] %v2602_v49  ;;  %v7649_v16 = vld [vmem:[#allocation83_spill] sm:$0xff]  ;;  %v2615_v44 = vmax.f32 %v6091_v2, 0.0  ;;  %v2616_v12 = vmax.f32 %v6095_v39, 0.0 }
 0x40c   : > { %2765 = vst [vmem:[%s6382_s30 + $0x240] sm:$0xff] %v2603_v19  ;;  %2766 = vst [vmem:[%s6382_s30 + $0x248] sm:$0xff] %v2604_v17  ;;  %v2614_v5 = vmax.f32 %v7649_v16, 0.0  ;;  %v2617_v40 = vmax.f32 %v6099_v37, 0.0  ;;  %v2618_v49 = vmax.f32 %v6103_v59, 0.0  ;;  %v2619_v20 = vmax.f32 %v6107_v33, 0.0 }
 0x40d   : > { %2767 = vst [vmem:[%s6382_s30 + $0x250] sm:$0xff] %v2605_v38  ;;  %2768 = vst [vmem:[%s6382_s30 + $0x258] sm:$0xff] %v2606_v29  ;;  %v2620_v19 = vmax.f32 %v6111_v54, 0.0  ;;  %v2621_v2 = vmax.f32 %v6115_v31, 0.0  ;;  %v2622_v39 = vmax.f32 %v6119_v60, 0.0  ;;  %v2623_v37 = vmax.f32 %v6123_v35, 0.0 }
 0x40e   : > { %2769 = vst [vmem:[%s6382_s30 + $0x260] sm:$0xff] %v2607_v10  ;;  %2770 = vst [vmem:[%s6382_s30 + $0x268] sm:$0xff] %v2608_v30  ;;  %v2624_v59 = vmax.f32 %v6127_v9, 0.0  ;;  %v2625_v33 = vmax.f32 %v6131_v48, 0.0  ;;  %v2626_v54 = vmax.f32 %v6135_v7, 0.0  ;;  %v2627_v31 = vmax.f32 %v6139_v63, 0.0 }
 0x40f   : > { %2771 = vst [vmem:[%s6382_s30 + $0x270] sm:$0xff] %v2609_v42  ;;  %2772 = vst [vmem:[%s6382_s30 + $0x278] sm:$0xff] %v2610_v45  ;;  %v2628_v60 = vmax.f32 %v6143_v21, 0.0  ;;  %v2629_v35 = vmax.f32 %v6147_v23, 0.0  ;;  %v2630_v9 = vmax.f32 %v6151_v55, 0.0  ;;  %v2631_v48 = vmax.f32 %v6155_v0, 0.0 }
 0x410   : > { %2773 = vst [vmem:[%s6382_s30 + $0x280] sm:$0xff] %v2611_v62  ;;  %2774 = vst [vmem:[%s6382_s30 + $0x288] sm:$0xff] %v2612_v14  ;;  %v2632_v7 = vmax.f32 %v6159_v15, 0.0  ;;  %v2633_v63 = vmax.f32 %v6163_v3, 0.0  ;;  %v2634_v21 = vmax.f32 %v6167_v46, 0.0  ;;  %v2635_v23 = vmax.f32 %v6171_v52, 0.0 }
 0x411   : > { %2775 = vst [vmem:[%s6382_s30 + $0x290] sm:$0xff] %v2613_v57  ;;  %2776 = vst [vmem:[%s6382_s30 + $0x298] sm:$0xff] %v2614_v5  ;;  %v2636_v55 = vmax.f32 %v6175_v61, 0.0  ;;  %v2637_v0 = vmax.f32 %v6179_v27, 0.0  ;;  %v2638_v15 = vmax.f32 %v6183_v47, 0.0  ;;  %v2639_v3 = vmax.f32 %v6187_v8, 0.0 }
 0x412   : > { %2777 = vst [vmem:[%s6382_s30 + $0x2a0] sm:$0xff] %v2615_v44  ;;  %2778 = vst [vmem:[%s6382_s30 + $0x2a8] sm:$0xff] %v2616_v12  ;;  %v2640_v46 = vmax.f32 %v6191_v43, 0.0  ;;  %v2641_v52 = vmax.f32 %v6195_v28, 0.0  ;;  %v2642_v61 = vmax.f32 %v6199_v36, 0.0  ;;  %v2643_v27 = vmax.f32 %v6203_v18, 0.0 }
 0x413   : > { %2779 = vst [vmem:[%s6382_s30 + $0x2b0] sm:$0xff] %v2617_v40  ;;  %2780 = vst [vmem:[%s6382_s30 + $0x2b8] sm:$0xff] %v2618_v49  ;;  %v2644_v47 = vmax.f32 %v6207_v58, 0.0  ;;  %v7650_v8 = vld [vmem:[#allocation85_spill] sm:$0xff]  ;;  %v7651_v17 = vld [vmem:[#allocation87_spill] sm:$0xff]  ;;  %v2657_v44 = vmax.f32 %v6259_v1, 0.0 }
 0x414   : > { %2781 = vst [vmem:[%s6382_s30 + $0x2c0] sm:$0xff] %v2619_v20  ;;  %2782 = vst [vmem:[%s6382_s30 + $0x2c8] sm:$0xff] %v2620_v19  ;;  %v2645_v43 = vmax.f32 %v7650_v8, 0.0  ;;  %v2646_v38 = vmax.f32 %v7651_v17, 0.0  ;;  %v7652_v29 = vld [vmem:[#allocation89_spill] sm:$0xff]  ;;  %v7653_v34 = vld [vmem:[#allocation91_spill] sm:$0xff] }
 0x415   : > { %2783 = vst [vmem:[%s6382_s30 + $0x2d0] sm:$0xff] %v2621_v2  ;;  %2784 = vst [vmem:[%s6382_s30 + $0x2d8] sm:$0xff] %v2622_v39  ;;  %v2647_v28 = vmax.f32 %v7652_v29, 0.0  ;;  %v2648_v36 = vmax.f32 %v7653_v34, 0.0  ;;  %v7654_v18 = vld [vmem:[#allocation93_spill] sm:$0xff]  ;;  %v7655_v10 = vld [vmem:[#allocation95_spill] sm:$0xff] }
 0x416   : > { %2785 = vst [vmem:[%s6382_s30 + $0x2e0] sm:$0xff] %v2623_v37  ;;  %2786 = vst [vmem:[%s6382_s30 + $0x2e8] sm:$0xff] %v2624_v59  ;;  %v2649_v58 = vmax.f32 %v7654_v18, 0.0  ;;  %v2650_v56 = vmax.f32 %v7655_v10, 0.0  ;;  %v7656_v30 = vld [vmem:[#allocation96_spill] sm:$0xff]  ;;  %v7657_v42 = vld [vmem:[#allocation97_spill] sm:$0xff] }
 0x417   : > { %2787 = vst [vmem:[%s6382_s30 + $0x2f0] sm:$0xff] %v2625_v33  ;;  %2788 = vst [vmem:[%s6382_s30 + $0x2f8] sm:$0xff] %v2626_v54  ;;  %v2651_v26 = vmax.f32 %v7656_v30, 0.0  ;;  %v2652_v50 = vmax.f32 %v7657_v42, 0.0  ;;  %v7658_v45 = vld [vmem:[#allocation98_spill] sm:$0xff]  ;;  %v7659_v62 = vld [vmem:[#allocation99_spill] sm:$0xff] }
 0x418   : > { %2789 = vst [vmem:[%s6382_s30 + $0x300] sm:$0xff] %v2627_v31  ;;  %2790 = vst [vmem:[%s6382_s30 + $0x308] sm:$0xff] %v2628_v60  ;;  %v2653_v11 = vmax.f32 %v7658_v45, 0.0  ;;  %v2654_v51 = vmax.f32 %v7659_v62, 0.0  ;;  %v7660_v14 = vld [vmem:[#allocation100_spill] sm:$0xff]  ;;  %v7661_v16 = vld [vmem:[#allocation101_spill] sm:$0xff] }
 0x419   : > { %2791 = vst [vmem:[%s6382_s30 + $0x310] sm:$0xff] %v2629_v35  ;;  %2792 = vst [vmem:[%s6382_s30 + $0x318] sm:$0xff] %v2630_v9  ;;  %v2655_v57 = vmax.f32 %v7660_v14, 0.0  ;;  %v2656_v5 = vmax.f32 %v7661_v16, 0.0  ;;  %v7662_v12 = vld [vmem:[#allocation102_spill] sm:$0xff]  ;;  %v2659_v49 = vmax.f32 %v6267_v41, 0.0 }
 0x41a   : > { %2793 = vst [vmem:[%s6382_s30 + $0x320] sm:$0xff] %v2631_v48  ;;  %2794 = vst [vmem:[%s6382_s30 + $0x328] sm:$0xff] %v2632_v7  ;;  %v2658_v40 = vmax.f32 %v7662_v12, 0.0  ;;  %v7663_v20 = vld [vmem:[#allocation103_spill] sm:$0xff]  ;;  %v2661_v2 = vmax.f32 %v6275_v24, 0.0  ;;  %v2662_v39 = vmax.f32 %v6279_v6, 0.0 }
 0x41b   : > { %2795 = vst [vmem:[%s6382_s30 + $0x330] sm:$0xff] %v2633_v63  ;;  %2796 = vst [vmem:[%s6382_s30 + $0x338] sm:$0xff] %v2634_v21  ;;  %v2660_v19 = vmax.f32 %v7663_v20, 0.0  ;;  %v2663_v1 = vmax.f32 %v6283_v53, 0.0  ;;  %v2664_v37 = vmax.f32 %v6287_v25, 0.0  ;;  %v2665_v41 = vmax.f32 %v6291_v13, 0.0 }
 0x41c   : > { %2797 = vst [vmem:[%s6382_s30 + $0x340] sm:$0xff] %v2635_v23  ;;  %2798 = vst [vmem:[%s6382_s30 + $0x348] sm:$0xff] %v2636_v55  ;;  %v2666_v59 = vmax.f32 %v6295_v4, 0.0  ;;  %v2667_v24 = vmax.f32 %v6299_v32, 0.0  ;;  %v2668_v6 = vmax.f32 %v6303_v22, 0.0  ;;  %v7664_v53 = vld [vmem:[#allocation104_spill] sm:$0xff] }
 0x41d   : > { %2799 = vst [vmem:[%s6382_s30 + $0x350] sm:$0xff] %v2637_v0  ;;  %2800 = vst [vmem:[%s6382_s30 + $0x358] sm:$0xff] %v2638_v15  ;;  %v2669_v25 = vmax.f32 %v7664_v53, 0.0  ;;  %v7665_v33 = vld [vmem:[#allocation105_spill] sm:$0xff]  ;;  %v7666_v31 = vld [vmem:[#allocation106_spill] sm:$0xff] }
 0x41e   : > { %2801 = vst [vmem:[%s6382_s30 + $0x360] sm:$0xff] %v2639_v3  ;;  %2802 = vst [vmem:[%s6382_s30 + $0x368] sm:$0xff] %v2640_v46  ;;  %v2670_v54 = vmax.f32 %v7665_v33, 0.0  ;;  %v2671_v13 = vmax.f32 %v7666_v31, 0.0  ;;  %v7667_v60 = vld [vmem:[#allocation107_spill] sm:$0xff]  ;;  %v7668_v32 = vld [vmem:[#allocation108_spill] sm:$0xff] }
 0x41f   : > { %2803 = vst [vmem:[%s6382_s30 + $0x370] sm:$0xff] %v2641_v52  ;;  %2804 = vst [vmem:[%s6382_s30 + $0x378] sm:$0xff] %v2642_v61  ;;  %v2672_v4 = vmax.f32 %v7667_v60, 0.0  ;;  %v2673_v22 = vmax.f32 %v7668_v32, 0.0  ;;  %v7669_v35 = vld [vmem:[#allocation109_spill] sm:$0xff]  ;;  %v7670_v48 = vld [vmem:[#allocation110_spill] sm:$0xff] }
 0x420   : > { %2805 = vst [vmem:[%s6382_s30 + $0x380] sm:$0xff] %v2643_v27  ;;  %2806 = vst [vmem:[%s6382_s30 + $0x388] sm:$0xff] %v2644_v47  ;;  %v2674_v9 = vmax.f32 %v7669_v35, 0.0  ;;  %v2675_v7 = vmax.f32 %v7670_v48, 0.0  ;;  %v7671_v63 = vld [vmem:[#allocation111_spill] sm:$0xff]  ;;  %v7672_v23 = vld [vmem:[#allocation112_spill] sm:$0xff] }
 0x421   : > { %2807 = vst [vmem:[%s6382_s30 + $0x390] sm:$0xff] %v2645_v43  ;;  %2808 = vst [vmem:[%s6382_s30 + $0x398] sm:$0xff] %v2646_v38  ;;  %v2676_v21 = vmax.f32 %v7671_v63, 0.0  ;;  %v2677_v55 = vmax.f32 %v7672_v23, 0.0  ;;  %v7673_v0 = vld [vmem:[#allocation113_spill] sm:$0xff]  ;;  %v7674_v3 = vld [vmem:[#allocation114_spill] sm:$0xff] }
 0x422   : > { %2809 = vst [vmem:[%s6382_s30 + $0x3a0] sm:$0xff] %v2647_v28  ;;  %2810 = vst [vmem:[%s6382_s30 + $0x3a8] sm:$0xff] %v2648_v36  ;;  %v2678_v15 = vmax.f32 %v7673_v0, 0.0  ;;  %v2679_v46 = vmax.f32 %v7674_v3, 0.0  ;;  %v7675_v52 = vld [vmem:[#allocation67_spill] sm:$0xff]  ;;  %v7676_v27 = vld [vmem:[#allocation72_spill] sm:$0xff] }
 0x423   : > { %2811 = vst [vmem:[%s6382_s30 + $0x3b0] sm:$0xff] %v2649_v58  ;;  %2812 = vst [vmem:[%s6382_s30 + $0x3b8] sm:$0xff] %v2650_v56  ;;  %v2680_v61 = vmax.f32 %v7675_v52, 0.0  ;;  %v2681_v47 = vmax.f32 %v7676_v27, 0.0  ;;  %v7677_v8 = vld [vmem:[#allocation70_spill] sm:$0xff]  ;;  %v7678_v17 = vld [vmem:[#allocation76_spill] sm:$0xff] }
 0x424   : > { %2813 = vst [vmem:[%s6382_s30 + $0x3c0] sm:$0xff] %v2651_v26  ;;  %2814 = vst [vmem:[%s6382_s30 + $0x3c8] sm:$0xff] %v2652_v50  ;;  %v2682_v43 = vmax.f32 %v7677_v8, 0.0  ;;  %v2683_v38 = vmax.f32 %v7678_v17, 0.0  ;;  %v7679_v29 = vld [vmem:[#allocation74_spill] sm:$0xff]  ;;  %v7680_v34 = vld [vmem:[#allocation80_spill] sm:$0xff] }
 0x425   : > { %2815 = vst [vmem:[%s6382_s30 + $0x3d0] sm:$0xff] %v2653_v11  ;;  %2816 = vst [vmem:[%s6382_s30 + $0x3d8] sm:$0xff] %v2654_v51  ;;  %v2684_v28 = vmax.f32 %v7679_v29, 0.0  ;;  %v2685_v36 = vmax.f32 %v7680_v34, 0.0  ;;  %v7681_v18 = vld [vmem:[#allocation78_spill] sm:$0xff]  ;;  %v7682_v10 = vld [vmem:[#allocation84_spill] sm:$0xff] }
 0x426   : > { %2817 = vst [vmem:[%s6382_s30 + $0x3e0] sm:$0xff] %v2655_v57  ;;  %2818 = vst [vmem:[%s6382_s30 + $0x3e8] sm:$0xff] %v2656_v5  ;;  %v2686_v58 = vmax.f32 %v7681_v18, 0.0  ;;  %v2687_v56 = vmax.f32 %v7682_v10, 0.0  ;;  %v7683_v30 = vld [vmem:[#allocation82_spill] sm:$0xff]  ;;  %v7684_v42 = vld [vmem:[#allocation88_spill] sm:$0xff] }
 0x427   : > { %2819 = vst [vmem:[%s6382_s30 + $0x3f0] sm:$0xff] %v2657_v44  ;;  %2820 = vst [vmem:[%s6382_s30 + $0x3f8] sm:$0xff] %v2658_v40  ;;  %v2688_v26 = vmax.f32 %v7683_v30, 0.0  ;;  %v2689_v50 = vmax.f32 %v7684_v42, 0.0  ;;  %v7685_v45 = vld [vmem:[#allocation86_spill] sm:$0xff]  ;;  %v7686_v62 = vld [vmem:[#allocation92_spill] sm:$0xff] }
 0x428   : > { %2821 = vst [vmem:[%s6382_s30 + $0x400] sm:$0xff] %v2659_v49  ;;  %2822 = vst [vmem:[%s6382_s30 + $0x408] sm:$0xff] %v2660_v19  ;;  %v2690_v11 = vmax.f32 %v7685_v45, 0.0  ;;  %v2691_v51 = vmax.f32 %v7686_v62, 0.0  ;;  %v7687_v14 = vld [vmem:[#allocation90_spill] sm:$0xff] }
 0x429   : > { %2823 = vst [vmem:[%s6382_s30 + $0x410] sm:$0xff] %v2661_v2  ;;  %2824 = vst [vmem:[%s6382_s30 + $0x418] sm:$0xff] %v2662_v39  ;;  %v2692_v57 = vmax.f32 %v7687_v14, 0.0 }
 0x42a   : > { %2825 = vst [vmem:[%s6382_s30 + $0x420] sm:$0xff] %v2663_v1  ;;  %2826 = vst [vmem:[%s6382_s30 + $0x428] sm:$0xff] %v2664_v37 }
 0x42b   : > { %2827 = vst [vmem:[%s6382_s30 + $0x430] sm:$0xff] %v2665_v41  ;;  %2828 = vst [vmem:[%s6382_s30 + $0x438] sm:$0xff] %v2666_v59 }
 0x42c   : > { %2829 = vst [vmem:[%s6382_s30 + $0x440] sm:$0xff] %v2667_v24  ;;  %2830 = vst [vmem:[%s6382_s30 + $0x448] sm:$0xff] %v2668_v6 }
 0x42d   : > { %2831 = vst [vmem:[%s6382_s30 + $0x450] sm:$0xff] %v2669_v25  ;;  %2832 = vst [vmem:[%s6382_s30 + $0x458] sm:$0xff] %v2670_v54 }
 0x42e   : > { %2833 = vst [vmem:[%s6382_s30 + $0x460] sm:$0xff] %v2671_v13  ;;  %2834 = vst [vmem:[%s6382_s30 + $0x468] sm:$0xff] %v2672_v4 }
 0x42f   : > { %2835 = vst [vmem:[%s6382_s30 + $0x470] sm:$0xff] %v2673_v22  ;;  %2836 = vst [vmem:[%s6382_s30 + $0x478] sm:$0xff] %v2674_v9 }
 0x430   : > { %2837 = vst [vmem:[%s6382_s30 + $0x480] sm:$0xff] %v2675_v7  ;;  %2838 = vst [vmem:[%s6382_s30 + $0x488] sm:$0xff] %v2676_v21 }
 0x431   : > { %2839 = vst [vmem:[%s6382_s30 + $0x490] sm:$0xff] %v2677_v55  ;;  %2840 = vst [vmem:[%s6382_s30 + $0x498] sm:$0xff] %v2678_v15 }
 0x432   : > { %2841 = vst [vmem:[%s6382_s30 + $0x4a0] sm:$0xff] %v2679_v46  ;;  %2842 = vst [vmem:[%s6382_s30 + $0x4a8] sm:$0xff] %v2680_v61 }
 0x433   : > { %2843 = vst [vmem:[%s6382_s30 + $0x4b0] sm:$0xff] %v2681_v47  ;;  %2844 = vst [vmem:[%s6382_s30 + $0x4b8] sm:$0xff] %v2682_v43 }
 0x434   : > { %2845 = vst [vmem:[%s6382_s30 + $0x4c0] sm:$0xff] %v2683_v38  ;;  %2846 = vst [vmem:[%s6382_s30 + $0x4c8] sm:$0xff] %v2684_v28 }
 0x435   : > { %2847 = vst [vmem:[%s6382_s30 + $0x4d0] sm:$0xff] %v2685_v36  ;;  %2848 = vst [vmem:[%s6382_s30 + $0x4d8] sm:$0xff] %v2686_v58 }
 0x436   : > { %2849 = vst [vmem:[%s6382_s30 + $0x4e0] sm:$0xff] %v2687_v56  ;;  %2850 = vst [vmem:[%s6382_s30 + $0x4e8] sm:$0xff] %v2688_v26 }
 0x437   : > { %2851 = vst [vmem:[%s6382_s30 + $0x4f0] sm:$0xff] %v2689_v50  ;;  %2852 = vst [vmem:[%s6382_s30 + $0x4f8] sm:$0xff] %v2690_v11 }
 0x438   : > { %2853 = vst [vmem:[%s6382_s30 + $0x500] sm:$0xff] %v2691_v51  ;;  %2854 = vst [vmem:[%s6382_s30 + $0x508] sm:$0xff] %v2692_v57 }
 0x439 PF: > { %s13_s12 = sadd.s32 1, %s3528_s12  }
 0x43a   : > { %p10_p4 = scmp.ge.s32.totalorder %s13_s12, 4  }
 0x43c   :  { %12 = sbr.rel (!%p10_p4) target bundleno = 1 (0x1), region = 62 }

</bundles_post_ra>
